<compile_context>
chip_gen: v5e
topology: v5e:2x2
jax: 0.10.0
libtpu: 0.0.40
codegen_flags: <defaults>
</compile_context>

<pallas_src>
import functools

import jax
import jax.numpy as jnp
from jax.experimental import pallas as pl
from jax.experimental.pallas import tpu as pltpu

# ----------------------- model config (small, synthetic) -----------------------
VOCAB = 64          # text vocab size
T_SEQ = 8           # text sequence length
HIDDEN = 32         # transformer width (text and vision)
HEADS = 4
HEAD_DIM = HIDDEN // HEADS
INTER = 64          # MLP intermediate size
LAYERS = 2          # encoder layers (text and vision)
PROJ = 16           # CLIP projection dim (shared embedding space)
IMG_C, IMG_HW, PATCH = 3, 16, 8
N_PATCH = (IMG_HW // PATCH) ** 2      # 4 patches
V_SEQ = N_PATCH + 1                   # +1 CLS token
EOS_ID = VOCAB - 1                    # EOS token id used by the synthetic tokenizer
NEG_INF = -1e9

_ENC_KEYS = ("ln1_g", "ln1_b", "qkv_w", "qkv_b", "o_w", "o_b",
             "ln2_g", "ln2_b", "fc1_w", "fc1_b", "fc2_w", "fc2_b")
TEXT_W_KEYS = _ENC_KEYS + ("lnf_g", "lnf_b", "proj_w")
VIS_W_KEYS = ("patch_w", "pre_ln_g", "pre_ln_b") + _ENC_KEYS + \
             ("post_ln_g", "post_ln_b", "proj_w")
N_TEXT_IN, N_VIS_IN = 3, 6            # non-weight inputs per tower


# --------------------------- in-kernel building blocks ---------------------------
def _layernorm(x, g, b, eps=1e-5):
    mu = jnp.mean(x, axis=-1, keepdims=True)
    var = jnp.mean((x - mu) ** 2, axis=-1, keepdims=True)
    return (x - mu) * jax.lax.rsqrt(var + eps) * g + b


def _quick_gelu(x):                       # CLIP activation: x * sigmoid(1.702 x)
    return x * jax.nn.sigmoid(1.702 * x)


def _encoder_layer(x, mask, w, l):
    """One pre-LN CLIP encoder layer on the full (B*S, D) slab.

    Stacked per-layer weights are loaded from refs right before use (no hoisting
    across the layer loop -> low vreg pressure; VMEM reloads are free).
    """
    d, hd = HIDDEN, HEAD_DIM
    scale = hd ** -0.5
    # --- attention block -----------------------------------------------------
    h = _layernorm(x, w["ln1_g"][l], w["ln1_b"][l])
    qkv = jnp.dot(h, w["qkv_w"][l], preferred_element_type=jnp.float32) + w["qkv_b"][l]
    ctx = []
    for hh in range(HEADS):
        lo = hh * hd
        q = qkv[:, lo:lo + hd]
        k = qkv[:, d + lo:d + lo + hd]
        v = qkv[:, 2 * d + lo:2 * d + lo + hd]
        s = jax.lax.dot_general(q, k, (((1,), (1,)), ((), ())),
                                preferred_element_type=jnp.float32) * scale
        s = s + mask                                  # block-diag / causal / padding
        s = s - jnp.max(s, axis=-1, keepdims=True)
        p = jnp.exp(s)
        p = p * pl.reciprocal(jnp.sum(p, axis=-1, keepdims=True), approx=True)
        ctx.append(jnp.dot(p, v, preferred_element_type=jnp.float32))
    ctx = jnp.concatenate(ctx, axis=-1)               # heads merged BEFORE O-proj
    x = x + jnp.dot(ctx, w["o_w"][l], preferred_element_type=jnp.float32) + w["o_b"][l]
    # --- MLP block -------------------------------------------------------------
    h = _layernorm(x, w["ln2_g"][l], w["ln2_b"][l])
    h = jnp.dot(h, w["fc1_w"][l], preferred_element_type=jnp.float32) + w["fc1_b"][l]
    h = _quick_gelu(h)
    h = jnp.dot(h, w["fc2_w"][l], preferred_element_type=jnp.float32) + w["fc2_b"][l]
    return x + h


def _text_tower(x_ref, mask_ref, pool_ref, w, *, layers):
    x = x_ref[...]                                    # (Bt*St, D) tok+pos embeddings
    mask = mask_ref[...]                              # (Bt*St, Bt*St) additive mask
    for l in range(layers):
        x = _encoder_layer(x, mask, w, l)
    x = _layernorm(x, w["lnf_g"][...], w["lnf_b"][...])
    # EOS pooling as one M=B selection matmul (no per-row M=1 dots).
    pooled = jnp.dot(pool_ref[...], x, preferred_element_type=jnp.float32)   # (Bt, D)
    return jnp.dot(pooled, w["proj_w"][...], preferred_element_type=jnp.float32)


def _vision_tower(patch_ref, base_ref, tile_ref, scat_ref, mask_ref, pool_ref, w,
                  *, layers):
    # Patch embedding (Conv2d kernel=stride=P, no bias) as one in-kernel matmul.
    pe = jnp.dot(patch_ref[...], w["patch_w"][...],
                 preferred_element_type=jnp.float32)                         # (Bv*NP, D)
    # x[b, 0] = CLS + pos0 ; x[b, j+1] = pos[j+1] + patch_embed[b, j]
    x = (jnp.dot(tile_ref[...], base_ref[...], preferred_element_type=jnp.float32)
         + jnp.dot(scat_ref[...], pe, preferred_element_type=jnp.float32))  # (Bv*V_SEQ, D)
    x = _layernorm(x, w["pre_ln_g"][...], w["pre_ln_b"][...])
    mask = mask_ref[...]                              # block-diagonal over images
    for l in range(layers):
        x = _encoder_layer(x, mask, w, l)
    # CLS pooling (one M=B selection matmul), post-LN, CLIP projection.
    pooled = jnp.dot(pool_ref[...], x, preferred_element_type=jnp.float32)   # (Bv, D)
    pooled = _layernorm(pooled, w["post_ln_g"][...], w["post_ln_b"][...])
    return jnp.dot(pooled, w["proj_w"][...], preferred_element_type=jnp.float32)


def _pad_rows(x, rows):
    if x.shape[0] == rows:
        return x
    pad = jnp.zeros((rows - x.shape[0], x.shape[1]), x.dtype)
    return jnp.concatenate([x, pad], axis=0)


# ------------------------------ fused tower kernels ------------------------------
def _text_only_kernel(*refs, layers):
    t_in = refs[:N_TEXT_IN]
    w = dict(zip(TEXT_W_KEYS, refs[N_TEXT_IN:N_TEXT_IN + len(TEXT_W_KEYS)]))
    out_ref = refs[-1]
    out_ref[...] = _text_tower(*t_in, w, layers=layers)


def _vision_only_kernel(*refs, layers):
    v_in = refs[:N_VIS_IN]
    w = dict(zip(VIS_W_KEYS, refs[N_VIS_IN:N_VIS_IN + len(VIS_W_KEYS)]))
    out_ref = refs[-1]
    out_ref[...] = _vision_tower(*v_in, w, layers=layers)


def _fused_towers_kernel(*refs, max_b, layers):
    """Grid point 0 = text tower, grid point 1 = vision tower.

    With dimension_semantics=("parallel",) each v7x TensorCore runs one tower;
    on single-core v5e/v6e the grid is just a 2-step loop in one launch.
    """
    nt = N_TEXT_IN + len(TEXT_W_KEYS)
    t_in = refs[:N_TEXT_IN]
    t_w = dict(zip(TEXT_W_KEYS, refs[N_TEXT_IN:nt]))
    v_in = refs[nt:nt + N_VIS_IN]
    v_w = dict(zip(VIS_W_KEYS, refs[nt + N_VIS_IN:nt + N_VIS_IN + len(VIS_W_KEYS)]))
    out_ref = refs[-1]                                # (1, max_b, PROJ) block per tower
    tower = pl.program_id(0)

    @pl.when(tower == 0)
    def _():
        out_ref[0, :, :] = _pad_rows(_text_tower(*t_in, t_w, layers=layers), max_b)

    @pl.when(tower == 1)
    def _():
        out_ref[0, :, :] = _pad_rows(_vision_tower(*v_in, v_w, layers=layers), max_b)


# ------------------------------ wrappers (glue + call) ---------------------------
def _full_specs(args):
    return [pl.BlockSpec(tuple(a.shape), (lambda i, _nd=a.ndim: (0,) * _nd))
            for a in args]


def _text_kernel_inputs(params, input_ids, attention_mask):
    tp = params["text"]
    B, S = input_ids.shape
    bs = B * S
    x = tp["tok_emb"][input_ids] + tp["pos_emb"][None, :S]   # embedding gather (XLA glue)
    x2d = x.reshape(bs, HIDDEN).astype(jnp.float32)
    # Single (bs, bs) additive mask: same-sequence AND causal AND key-not-padded.
    pos = jnp.arange(bs)
    bid, pidx = pos // S, pos % S
    keep = ((bid[:, None] == bid[None, :])
            & (pidx[None, :] <= pidx[:, None])
            & (attention_mask.reshape(bs) > 0)[None, :])
    mask = jnp.where(keep, 0.0, NEG_INF).astype(jnp.float32)
    # Pool at the EOS token position (ids == EOS_ID) via one (B, bs) selection mat.
    eos_pos = jnp.argmax((input_ids == EOS_ID).astype(jnp.int32), axis=-1)
    pool = jax.nn.one_hot(eos_pos + jnp.arange(B) * S, bs, dtype=jnp.float32)
    return [x2d, mask, pool], B


def _vision_kernel_inputs(params, pixel_values):
    vp = params["vision"]
    B, C, H, W = pixel_values.shape
    P = PATCH
    hp, wp = H // P, W // P
    npatch = hp * wp
    seq = npatch + 1
    bs = B * seq
    # NCHW -> (B*NP, C*P*P) patch unfold (single XLA reshape/transpose).
    patches = (pixel_values.reshape(B, C, hp, P, wp, P)
               .transpose(0, 2, 4, 1, 3, 5)
               .reshape(B * npatch, C * P * P)).astype(jnp.float32)
    # Row 0 = CLS + pos0, rows 1.. = positional embeddings (weight-only prep).
    base = jnp.concatenate([vp["class_emb"] + vp["pos_emb"][0:1], vp["pos_emb"][1:]],
                           axis=0)                                   # (V_SEQ, D)
    rows = jnp.arange(bs)
    rb, rp = rows // seq, rows % seq
    cols = jnp.arange(B * npatch)
    cb, cp = cols // npatch, cols % npatch
    tile_sel = jax.nn.one_hot(rp, seq, dtype=jnp.float32)            # (bs, V_SEQ)
    scatter = ((rb[:, None] == cb[None, :])
               & (rp[:, None] == cp[None, :] + 1)).astype(jnp.float32)   # (bs, B*NP)
    mask = jnp.where(rb[:, None] == rb[None, :], 0.0, NEG_INF).astype(jnp.float32)
    pool = jax.nn.one_hot(jnp.arange(B) * seq, bs, dtype=jnp.float32)    # (B, bs) CLS rows
    return [patches, base, tile_sel, scatter, mask, pool], B


def get_text_features(params, input_ids, attention_mask):
    t_in, B = _text_kernel_inputs(params, input_ids, attention_mask)
    args = t_in + [params["text"][k] for k in TEXT_W_KEYS]
    kern = functools.partial(_text_only_kernel, layers=LAYERS)
    return pl.pallas_call(
        kern,
        out_shape=jax.ShapeDtypeStruct((B, PROJ), jnp.float32),
        grid=(1,),
        in_specs=_full_specs(args),
        out_specs=pl.BlockSpec((B, PROJ), lambda i: (0, 0)),
        compiler_params=pltpu.CompilerParams(dimension_semantics=("arbitrary",)),
    )(*args)


def get_image_features(params, pixel_values):
    v_in, B = _vision_kernel_inputs(params, pixel_values)
    args = v_in + [params["vision"][k] for k in VIS_W_KEYS]
    kern = functools.partial(_vision_only_kernel, layers=LAYERS)
    return pl.pallas_call(
        kern,
        out_shape=jax.ShapeDtypeStruct((B, PROJ), jnp.float32),
        grid=(1,),
        in_specs=_full_specs(args),
        out_specs=pl.BlockSpec((B, PROJ), lambda i: (0, 0)),
        compiler_params=pltpu.CompilerParams(dimension_semantics=("arbitrary",)),
    )(*args)


def get_text_and_image_features(params, input_ids, attention_mask, pixel_values):
    """Both towers in ONE pallas_call: the tower axis is a 2-point parallel grid."""
    t_in, Bt = _text_kernel_inputs(params, input_ids, attention_mask)
    v_in, Bv = _vision_kernel_inputs(params, pixel_values)
    args = (t_in + [params["text"][k] for k in TEXT_W_KEYS]
            + v_in + [params["vision"][k] for k in VIS_W_KEYS])
    max_b = max(Bt, Bv)
    kern = functools.partial(_fused_towers_kernel, max_b=max_b, layers=LAYERS)
    out = pl.pallas_call(
        kern,
        out_shape=jax.ShapeDtypeStruct((2, max_b, PROJ), jnp.float32),
        grid=(2,),
        in_specs=_full_specs(args),
        out_specs=pl.BlockSpec((1, max_b, PROJ), lambda t: (t, 0, 0)),
        compiler_params=pltpu.CompilerParams(dimension_semantics=("parallel",)),
    )(*args)
    return out[0, :Bt], out[1, :Bv]


def clip_finetuner_forward(params, query_tokens, text_tokens, image_tensor=None):
    """Mirrors CLIPFineTuner.forward semantics."""
    if query_tokens is None:
        img = get_image_features(params, image_tensor)
        return img, img
    # Perf: batch query + product-text passes into one text-tower pass (B = 2+2).
    ids = jnp.concatenate([query_tokens["input_ids"], text_tokens["input_ids"]], axis=0)
    am = jnp.concatenate([query_tokens["attention_mask"],
                          text_tokens["attention_mask"]], axis=0)
    bq = query_tokens["input_ids"].shape[0]
    if image_tensor is not None:
        text_feats, image_embedding = get_text_and_image_features(params, ids, am,
                                                                  image_tensor)
        query_embedding, text_embedding = text_feats[:bq], text_feats[bq:]
        product_embedding = (text_embedding + image_embedding) / 2
    else:
        text_feats = get_text_features(params, ids, am)
        query_embedding, text_embedding = text_feats[:bq], text_feats[bq:]
        product_embedding = text_embedding
    return query_embedding, product_embedding


# ------------------------------ parameter init ----------------------------------
def _encoder_params(key, d, inter, layers):
    ks = jax.random.split(key, 8)
    s = 0.02
    return {
        "ln1_g": jnp.ones((layers, 1, d), jnp.float32),
        "ln1_b": jnp.zeros((layers, 1, d), jnp.float32),
        "qkv_w": s * jax.random.normal(ks[0], (layers, d, 3 * d), jnp.float32),
        "qkv_b": s * jax.random.normal(ks[1], (layers, 1, 3 * d), jnp.float32),
        "o_w": s * jax.random.normal(ks[2], (layers, d, d), jnp.float32),
        "o_b": s * jax.random.normal(ks[3], (layers, 1, d), jnp.float32),
        "ln2_g": jnp.ones((layers, 1, d), jnp.float32),
        "ln2_b": jnp.zeros((layers, 1, d), jnp.float32),
        "fc1_w": s * jax.random.normal(ks[4], (layers, d, inter), jnp.float32),
        "fc1_b": s * jax.random.normal(ks[5], (layers, 1, inter), jnp.float32),
        "fc2_w": s * jax.random.normal(ks[6], (layers, inter, d), jnp.float32),
        "fc2_b": s * jax.random.normal(ks[7], (layers, 1, d), jnp.float32),
    }


def init_params(key):
    k = jax.random.split(key, 9)
    text = {
        "tok_emb": 0.02 * jax.random.normal(k[2], (VOCAB, HIDDEN), jnp.float32),
        "pos_emb": 0.02 * jax.random.normal(k[3], (T_SEQ, HIDDEN), jnp.float32),
        "lnf_g": jnp.ones((1, HIDDEN), jnp.float32),
        "lnf_b": jnp.zeros((1, HIDDEN), jnp.float32),
        "proj_w": 0.02 * jax.random.normal(k[4], (HIDDEN, PROJ), jnp.float32),
    }
    text.update(_encoder_params(k[0], HIDDEN, INTER, LAYERS))
    vision = {
        "patch_w": 0.02 * jax.random.normal(k[5], (IMG_C * PATCH * PATCH, HIDDEN),
                                            jnp.float32),
        "class_emb": 0.02 * jax.random.normal(k[6], (1, HIDDEN), jnp.float32),
        "pos_emb": 0.02 * jax.random.normal(k[7], (V_SEQ, HIDDEN), jnp.float32),
        "pre_ln_g": jnp.ones((1, HIDDEN), jnp.float32),
        "pre_ln_b": jnp.zeros((1, HIDDEN), jnp.float32),
        "post_ln_g": jnp.ones((1, HIDDEN), jnp.float32),
        "post_ln_b": jnp.zeros((1, HIDDEN), jnp.float32),
        "proj_w": 0.02 * jax.random.normal(k[8], (HIDDEN, PROJ), jnp.float32),
    }
    vision.update(_encoder_params(k[1], HIDDEN, INTER, LAYERS))
    return {"text": text, "vision": vision}


# ------------------------------------ main ---------------------------------------
if __name__ == "__main__":
    key = jax.random.PRNGKey(0)
    kp, kq, kt, ki = jax.random.split(key, 4)
    params = init_params(kp)

    B = 2

    def make_tokens(k, lengths):
        ids = jax.random.randint(k, (B, T_SEQ), 1, VOCAB - 1)      # ids in [1, VOCAB-2]
        pos = jnp.arange(T_SEQ)[None, :]
        lens = jnp.asarray(lengths)[:, None]
        mask = (pos < lens).astype(jnp.int32)
        ids = jnp.where(pos == lens - 1, EOS_ID, ids)              # EOS at last valid pos
        ids = jnp.where(mask > 0, ids, 0)                          # pad id 0
        return {"input_ids": ids, "attention_mask": mask}

    query_tokens = make_tokens(kq, [8, 6])
    text_tokens = make_tokens(kt, [7, 8])
    image_tensor = jax.random.normal(ki, (B, IMG_C, IMG_HW, IMG_HW), jnp.float32)  # NCHW

    fwd = jax.jit(clip_finetuner_forward)

    # Main path: text (query + product text, batched) + vision in ONE fused call.
    q_emb, p_emb = fwd(params, query_tokens, text_tokens, image_tensor)
    jax.block_until_ready((q_emb, p_emb))
    assert q_emb.shape == (B, PROJ) and p_emb.shape == (B, PROJ)
    assert bool(jnp.all(jnp.isfinite(q_emb))) and bool(jnp.all(jnp.isfinite(p_emb)))

    # Image-only branch (query_tokens is None).
    i1, i2 = fwd(params, None, None, image_tensor)
    jax.block_until_ready((i1, i2))
    assert i1.shape == (B, PROJ) and bool(jnp.all(jnp.isfinite(i1)))

    # Text-only branch (no image): product embedding falls back to text features.
    q2, p2 = fwd(params, query_tokens, text_tokens, None)
    jax.block_until_ready((q2, p2))
    assert q2.shape == (B, PROJ) and p2.shape == (B, PROJ)
    assert bool(jnp.all(jnp.isfinite(q2))) and bool(jnp.all(jnp.isfinite(p2)))

    print("KERNEL_OK")
</pallas_src>

<mosaic_0001>
module attributes {stable_mosaic.version = 11 : i64} {
  func.func @_fused_towers_kernel(%arg0: i32, %arg1: memref<32x32xf32, #tpu.memory_space<vmem>>, %arg2: memref<32x32xf32, #tpu.memory_space<vmem>>, %arg3: memref<4x32xf32, #tpu.memory_space<vmem>>, %arg4: memref<2x1x32xf32, #tpu.memory_space<vmem>>, %arg5: memref<2x1x32xf32, #tpu.memory_space<vmem>>, %arg6: memref<2x32x96xf32, #tpu.memory_space<vmem>>, %arg7: memref<2x1x96xf32, #tpu.memory_space<vmem>>, %arg8: memref<2x32x32xf32, #tpu.memory_space<vmem>>, %arg9: memref<2x1x32xf32, #tpu.memory_space<vmem>>, %arg10: memref<2x1x32xf32, #tpu.memory_space<vmem>>, %arg11: memref<2x1x32xf32, #tpu.memory_space<vmem>>, %arg12: memref<2x32x64xf32, #tpu.memory_space<vmem>>, %arg13: memref<2x1x64xf32, #tpu.memory_space<vmem>>, %arg14: memref<2x64x32xf32, #tpu.memory_space<vmem>>, %arg15: memref<2x1x32xf32, #tpu.memory_space<vmem>>, %arg16: memref<1x32xf32, #tpu.memory_space<vmem>>, %arg17: memref<1x32xf32, #tpu.memory_space<vmem>>, %arg18: memref<32x16xf32, #tpu.memory_space<vmem>>, %arg19: memref<8x192xf32, #tpu.memory_space<vmem>>, %arg20: memref<5x32xf32, #tpu.memory_space<vmem>>, %arg21: memref<10x5xf32, #tpu.memory_space<vmem>>, %arg22: memref<10x8xf32, #tpu.memory_space<vmem>>, %arg23: memref<10x10xf32, #tpu.memory_space<vmem>>, %arg24: memref<2x10xf32, #tpu.memory_space<vmem>>, %arg25: memref<192x32xf32, #tpu.memory_space<vmem>>, %arg26: memref<1x32xf32, #tpu.memory_space<vmem>>, %arg27: memref<1x32xf32, #tpu.memory_space<vmem>>, %arg28: memref<2x1x32xf32, #tpu.memory_space<vmem>>, %arg29: memref<2x1x32xf32, #tpu.memory_space<vmem>>, %arg30: memref<2x32x96xf32, #tpu.memory_space<vmem>>, %arg31: memref<2x1x96xf32, #tpu.memory_space<vmem>>, %arg32: memref<2x32x32xf32, #tpu.memory_space<vmem>>, %arg33: memref<2x1x32xf32, #tpu.memory_space<vmem>>, %arg34: memref<2x1x32xf32, #tpu.memory_space<vmem>>, %arg35: memref<2x1x32xf32, #tpu.memory_space<vmem>>, %arg36: memref<2x32x64xf32, #tpu.memory_space<vmem>>, %arg37: memref<2x1x64xf32, #tpu.memory_space<vmem>>, %arg38: memref<2x64x32xf32, #tpu.memory_space<vmem>>, %arg39: memref<2x1x32xf32, #tpu.memory_space<vmem>>, %arg40: memref<1x32xf32, #tpu.memory_space<vmem>>, %arg41: memref<1x32xf32, #tpu.memory_space<vmem>>, %arg42: memref<32x16xf32, #tpu.memory_space<vmem>>, %arg43: memref<1x4x16xf32, #tpu.memory_space<vmem>>) attributes {dimension_semantics = [#tpu.dimension_semantics<parallel>], iteration_bounds = array<i64: 2>, scalar_prefetch = 0 : i64, scratch_operands = 0 : i64, tpu.core_type = #tpu.core_type<tc>, window_params = [{pipeline_mode = #tpu.pipeline_mode<synchronous>, transform_indices = @transform_0, window_bounds = array<i64: 32, 32>}, {pipeline_mode = #tpu.pipeline_mode<synchronous>, transform_indices = @transform_1, window_bounds = array<i64: 32, 32>}, {pipeline_mode = #tpu.pipeline_mode<synchronous>, transform_indices = @transform_2, window_bounds = array<i64: 4, 32>}, {pipeline_mode = #tpu.pipeline_mode<synchronous>, transform_indices = @transform_3, window_bounds = array<i64: 2, 1, 32>}, {pipeline_mode = #tpu.pipeline_mode<synchronous>, transform_indices = @transform_4, window_bounds = array<i64: 2, 1, 32>}, {pipeline_mode = #tpu.pipeline_mode<synchronous>, transform_indices = @transform_5, window_bounds = array<i64: 2, 32, 96>}, {pipeline_mode = #tpu.pipeline_mode<synchronous>, transform_indices = @transform_6, window_bounds = array<i64: 2, 1, 96>}, {pipeline_mode = #tpu.pipeline_mode<synchronous>, transform_indices = @transform_7, window_bounds = array<i64: 2, 32, 32>}, {pipeline_mode = #tpu.pipeline_mode<synchronous>, transform_indices = @transform_8, window_bounds = array<i64: 2, 1, 32>}, {pipeline_mode = #tpu.pipeline_mode<synchronous>, transform_indices = @transform_9, window_bounds = array<i64: 2, 1, 32>}, {pipeline_mode = #tpu.pipeline_mode<synchronous>, transform_indices = @transform_10, window_bounds = array<i64: 2, 1, 32>}, {pipeline_mode = #tpu.pipeline_mode<synchronous>, transform_indices = @transform_11, window_bounds = array<i64: 2, 32, 64>}, {pipeline_mode = #tpu.pipeline_mode<synchronous>, transform_indices = @transform_12, window_bounds = array<i64: 2, 1, 64>}, {pipeline_mode = #tpu.pipeline_mode<synchronous>, transform_indices = @transform_13, window_bounds = array<i64: 2, 64, 32>}, {pipeline_mode = #tpu.pipeline_mode<synchronous>, transform_indices = @transform_14, window_bounds = array<i64: 2, 1, 32>}, {pipeline_mode = #tpu.pipeline_mode<synchronous>, transform_indices = @transform_15, window_bounds = array<i64: 1, 32>}, {pipeline_mode = #tpu.pipeline_mode<synchronous>, transform_indices = @transform_16, window_bounds = array<i64: 1, 32>}, {pipeline_mode = #tpu.pipeline_mode<synchronous>, transform_indices = @transform_17, window_bounds = array<i64: 32, 16>}, {pipeline_mode = #tpu.pipeline_mode<synchronous>, transform_indices = @transform_18, window_bounds = array<i64: 8, 192>}, {pipeline_mode = #tpu.pipeline_mode<synchronous>, transform_indices = @transform_19, window_bounds = array<i64: 5, 32>}, {pipeline_mode = #tpu.pipeline_mode<synchronous>, transform_indices = @transform_20, window_bounds = array<i64: 10, 5>}, {pipeline_mode = #tpu.pipeline_mode<synchronous>, transform_indices = @transform_21, window_bounds = array<i64: 10, 8>}, {pipeline_mode = #tpu.pipeline_mode<synchronous>, transform_indices = @transform_22, window_bounds = array<i64: 10, 10>}, {pipeline_mode = #tpu.pipeline_mode<synchronous>, transform_indices = @transform_23, window_bounds = array<i64: 2, 10>}, {pipeline_mode = #tpu.pipeline_mode<synchronous>, transform_indices = @transform_24, window_bounds = array<i64: 192, 32>}, {pipeline_mode = #tpu.pipeline_mode<synchronous>, transform_indices = @transform_25, window_bounds = array<i64: 1, 32>}, {pipeline_mode = #tpu.pipeline_mode<synchronous>, transform_indices = @transform_26, window_bounds = array<i64: 1, 32>}, {pipeline_mode = #tpu.pipeline_mode<synchronous>, transform_indices = @transform_27, window_bounds = array<i64: 2, 1, 32>}, {pipeline_mode = #tpu.pipeline_mode<synchronous>, transform_indices = @transform_28, window_bounds = array<i64: 2, 1, 32>}, {pipeline_mode = #tpu.pipeline_mode<synchronous>, transform_indices = @transform_29, window_bounds = array<i64: 2, 32, 96>}, {pipeline_mode = #tpu.pipeline_mode<synchronous>, transform_indices = @transform_30, window_bounds = array<i64: 2, 1, 96>}, {pipeline_mode = #tpu.pipeline_mode<synchronous>, transform_indices = @transform_31, window_bounds = array<i64: 2, 32, 32>}, {pipeline_mode = #tpu.pipeline_mode<synchronous>, transform_indices = @transform_32, window_bounds = array<i64: 2, 1, 32>}, {pipeline_mode = #tpu.pipeline_mode<synchronous>, transform_indices = @transform_33, window_bounds = array<i64: 2, 1, 32>}, {pipeline_mode = #tpu.pipeline_mode<synchronous>, transform_indices = @transform_34, window_bounds = array<i64: 2, 1, 32>}, {pipeline_mode = #tpu.pipeline_mode<synchronous>, transform_indices = @transform_35, window_bounds = array<i64: 2, 32, 64>}, {pipeline_mode = #tpu.pipeline_mode<synchronous>, transform_indices = @transform_36, window_bounds = array<i64: 2, 1, 64>}, {pipeline_mode = #tpu.pipeline_mode<synchronous>, transform_indices = @transform_37, window_bounds = array<i64: 2, 64, 32>}, {pipeline_mode = #tpu.pipeline_mode<synchronous>, transform_indices = @transform_38, window_bounds = array<i64: 2, 1, 32>}, {pipeline_mode = #tpu.pipeline_mode<synchronous>, transform_indices = @transform_39, window_bounds = array<i64: 1, 32>}, {pipeline_mode = #tpu.pipeline_mode<synchronous>, transform_indices = @transform_40, window_bounds = array<i64: 1, 32>}, {pipeline_mode = #tpu.pipeline_mode<synchronous>, transform_indices = @transform_41, window_bounds = array<i64: 32, 16>}, {transform_indices = @transform_42, window_bounds = array<i64: 1, 4, 16>}]} {
    %c0_i32 = arith.constant 0 : i32
    %0 = arith.cmpi eq, %arg0, %c0_i32 : i32
    %1 = arith.extui %0 : i1 to i32
    %c0_i32_0 = arith.constant 0 : i32
    %2 = arith.cmpi ne, %1, %c0_i32_0 : i32
    scf.if %2 {
      %c0 = arith.constant 0 : index
      %c0_2 = arith.constant 0 : index
      %6 = vector.load %arg1[%c0, %c0_2] : memref<32x32xf32, #tpu.memory_space<vmem>>, vector<32x32xf32>
      %c0_3 = arith.constant 0 : index
      %c0_4 = arith.constant 0 : index
      %7 = vector.load %arg2[%c0_3, %c0_4] : memref<32x32xf32, #tpu.memory_space<vmem>>, vector<32x32xf32>
      %c0_5 = arith.constant 0 : index
      %c0_6 = arith.constant 0 : index
      %c0_7 = arith.constant 0 : index
      %8 = vector.load %arg4[%c0_5, %c0_6, %c0_7] : memref<2x1x32xf32, #tpu.memory_space<vmem>>, vector<1x1x32xf32>
      %9 = vector.shape_cast %8 : vector<1x1x32xf32> to vector<1x32xf32>
      %c0_8 = arith.constant 0 : index
      %c0_9 = arith.constant 0 : index
      %c0_10 = arith.constant 0 : index
      %10 = vector.load %arg5[%c0_8, %c0_9, %c0_10] : memref<2x1x32xf32, #tpu.memory_space<vmem>>, vector<1x1x32xf32>
      %11 = vector.shape_cast %10 : vector<1x1x32xf32> to vector<1x32xf32>
      %cst = arith.constant dense<0.000000e+00> : vector<32xf32>
      %12 = vector.multi_reduction <add>, %6, %cst [1] : vector<32x32xf32> to vector<32xf32>
      %13 = vector.shape_cast %12 : vector<32xf32> to vector<32x1xf32>
      %cst_11 = arith.constant 3.200000e+01 : f32
      %14 = vector.broadcast %cst_11 : f32 to vector<32x1xf32>
      %15 = arith.divf %13, %14 : vector<32x1xf32>
      %16 = vector.broadcast %15 : vector<32x1xf32> to vector<32x32xf32>
      %17 = arith.subf %6, %16 : vector<32x32xf32>
      %18 = arith.mulf %17, %17 : vector<32x32xf32>
      %cst_12 = arith.constant dense<0.000000e+00> : vector<32xf32>
      %19 = vector.multi_reduction <add>, %18, %cst_12 [1] : vector<32x32xf32> to vector<32xf32>
      %20 = vector.shape_cast %19 : vector<32xf32> to vector<32x1xf32>
      %cst_13 = arith.constant 3.200000e+01 : f32
      %21 = vector.broadcast %cst_13 : f32 to vector<32x1xf32>
      %22 = arith.divf %20, %21 : vector<32x1xf32>
      %23 = vector.broadcast %15 : vector<32x1xf32> to vector<32x32xf32>
      %24 = arith.subf %6, %23 : vector<32x32xf32>
      %cst_14 = arith.constant 9.99999974E-6 : f32
      %25 = vector.broadcast %cst_14 : f32 to vector<32x1xf32>
      %26 = arith.addf %22, %25 : vector<32x1xf32>
      %27 = math.rsqrt %26 : vector<32x1xf32>
      %28 = vector.broadcast %27 : vector<32x1xf32> to vector<32x32xf32>
      %29 = arith.mulf %24, %28 : vector<32x32xf32>
      %30 = vector.broadcast %9 : vector<1x32xf32> to vector<32x32xf32>
      %31 = arith.mulf %29, %30 : vector<32x32xf32>
      %32 = vector.broadcast %11 : vector<1x32xf32> to vector<32x32xf32>
      %33 = arith.addf %31, %32 : vector<32x32xf32>
      %c0_15 = arith.constant 0 : index
      %c0_16 = arith.constant 0 : index
      %c0_17 = arith.constant 0 : index
      %34 = vector.load %arg6[%c0_15, %c0_16, %c0_17] : memref<2x32x96xf32, #tpu.memory_space<vmem>>, vector<1x32x96xf32>
      %35 = vector.shape_cast %34 : vector<1x32x96xf32> to vector<32x96xf32>
      %cst_18 = arith.constant dense<0.000000e+00> : vector<32x96xf32>
      %36 = tpu.matmul %33, %35, %cst_18 {dimension_numbers = #tpu.dot_dimension_numbers<[1], [0], [0], [1], [0, 0, 1, 1], [], []>} : vector<32x32xf32>, vector<32x96xf32>, vector<32x96xf32> -> vector<32x96xf32>
      %c0_19 = arith.constant 0 : index
      %c0_20 = arith.constant 0 : index
      %c0_21 = arith.constant 0 : index
      %37 = vector.load %arg7[%c0_19, %c0_20, %c0_21] : memref<2x1x96xf32, #tpu.memory_space<vmem>>, vector<1x1x96xf32>
      %38 = vector.shape_cast %37 : vector<1x1x96xf32> to vector<1x96xf32>
      %39 = vector.broadcast %38 : vector<1x96xf32> to vector<32x96xf32>
      %40 = arith.addf %36, %39 : vector<32x96xf32>
      %41 = vector.extract_strided_slice %40 {offsets = [0, 0], sizes = [32, 8], strides = [1, 1]} : vector<32x96xf32> to vector<32x8xf32>
      %42 = vector.extract_strided_slice %40 {offsets = [0, 32], sizes = [32, 8], strides = [1, 1]} : vector<32x96xf32> to vector<32x8xf32>
      %43 = vector.extract_strided_slice %40 {offsets = [0, 64], sizes = [32, 8], strides = [1, 1]} : vector<32x96xf32> to vector<32x8xf32>
      %cst_22 = arith.constant dense<0.000000e+00> : vector<32x32xf32>
      %44 = tpu.matmul %41, %42, %cst_22 {dimension_numbers = #tpu.dot_dimension_numbers<[1], [1], [0], [0], [0, 0, 1, 0], [], []>} : vector<32x8xf32>, vector<32x8xf32>, vector<32x32xf32> -> vector<32x32xf32>
      %cst_23 = arith.constant 0.353553385 : f32
      %45 = vector.broadcast %cst_23 : f32 to vector<32x32xf32>
      %46 = arith.mulf %44, %45 : vector<32x32xf32>
      %47 = arith.addf %46, %7 : vector<32x32xf32>
      %cst_24 = arith.constant dense<0xFF800000> : vector<32xf32>
      %48 = vector.multi_reduction <maximumf>, %47, %cst_24 [1] : vector<32x32xf32> to vector<32xf32>
      %49 = vector.shape_cast %48 : vector<32xf32> to vector<32x1xf32>
      %50 = vector.broadcast %49 : vector<32x1xf32> to vector<32x32xf32>
      %51 = arith.subf %47, %50 : vector<32x32xf32>
      %52 = math.exp %51 : vector<32x32xf32>
      %cst_25 = arith.constant dense<0.000000e+00> : vector<32xf32>
      %53 = vector.multi_reduction <add>, %52, %cst_25 [1] : vector<32x32xf32> to vector<32xf32>
      %54 = vector.shape_cast %53 : vector<32xf32> to vector<32x1xf32>
      %55 = tpu.reciprocal %54 {approx = true} : vector<32x1xf32> -> vector<32x1xf32>
      %56 = vector.broadcast %55 : vector<32x1xf32> to vector<32x32xf32>
      %57 = arith.mulf %52, %56 : vector<32x32xf32>
      %cst_26 = arith.constant dense<0.000000e+00> : vector<32x8xf32>
      %58 = tpu.matmul %57, %43, %cst_26 {dimension_numbers = #tpu.dot_dimension_numbers<[1], [0], [0], [1], [0, 0, 1, 1], [], []>} : vector<32x32xf32>, vector<32x8xf32>, vector<32x8xf32> -> vector<32x8xf32>
      %59 = vector.extract_strided_slice %40 {offsets = [0, 8], sizes = [32, 8], strides = [1, 1]} : vector<32x96xf32> to vector<32x8xf32>
      %60 = vector.extract_strided_slice %40 {offsets = [0, 40], sizes = [32, 8], strides = [1, 1]} : vector<32x96xf32> to vector<32x8xf32>
      %61 = vector.extract_strided_slice %40 {offsets = [0, 72], sizes = [32, 8], strides = [1, 1]} : vector<32x96xf32> to vector<32x8xf32>
      %cst_27 = arith.constant dense<0.000000e+00> : vector<32x32xf32>
      %62 = tpu.matmul %59, %60, %cst_27 {dimension_numbers = #tpu.dot_dimension_numbers<[1], [1], [0], [0], [0, 0, 1, 0], [], []>} : vector<32x8xf32>, vector<32x8xf32>, vector<32x32xf32> -> vector<32x32xf32>
      %cst_28 = arith.constant 0.353553385 : f32
      %63 = vector.broadcast %cst_28 : f32 to vector<32x32xf32>
      %64 = arith.mulf %62, %63 : vector<32x32xf32>
      %65 = arith.addf %64, %7 : vector<32x32xf32>
      %cst_29 = arith.constant dense<0xFF800000> : vector<32xf32>
      %66 = vector.multi_reduction <maximumf>, %65, %cst_29 [1] : vector<32x32xf32> to vector<32xf32>
      %67 = vector.shape_cast %66 : vector<32xf32> to vector<32x1xf32>
      %68 = vector.broadcast %67 : vector<32x1xf32> to vector<32x32xf32>
      %69 = arith.subf %65, %68 : vector<32x32xf32>
      %70 = math.exp %69 : vector<32x32xf32>
      %cst_30 = arith.constant dense<0.000000e+00> : vector<32xf32>
      %71 = vector.multi_reduction <add>, %70, %cst_30 [1] : vector<32x32xf32> to vector<32xf32>
      %72 = vector.shape_cast %71 : vector<32xf32> to vector<32x1xf32>
      %73 = tpu.reciprocal %72 {approx = true} : vector<32x1xf32> -> vector<32x1xf32>
      %74 = vector.broadcast %73 : vector<32x1xf32> to vector<32x32xf32>
      %75 = arith.mulf %70, %74 : vector<32x32xf32>
      %cst_31 = arith.constant dense<0.000000e+00> : vector<32x8xf32>
      %76 = tpu.matmul %75, %61, %cst_31 {dimension_numbers = #tpu.dot_dimension_numbers<[1], [0], [0], [1], [0, 0, 1, 1], [], []>} : vector<32x32xf32>, vector<32x8xf32>, vector<32x8xf32> -> vector<32x8xf32>
      %77 = vector.extract_strided_slice %40 {offsets = [0, 16], sizes = [32, 8], strides = [1, 1]} : vector<32x96xf32> to vector<32x8xf32>
      %78 = vector.extract_strided_slice %40 {offsets = [0, 48], sizes = [32, 8], strides = [1, 1]} : vector<32x96xf32> to vector<32x8xf32>
      %79 = vector.extract_strided_slice %40 {offsets = [0, 80], sizes = [32, 8], strides = [1, 1]} : vector<32x96xf32> to vector<32x8xf32>
      %cst_32 = arith.constant dense<0.000000e+00> : vector<32x32xf32>
      %80 = tpu.matmul %77, %78, %cst_32 {dimension_numbers = #tpu.dot_dimension_numbers<[1], [1], [0], [0], [0, 0, 1, 0], [], []>} : vector<32x8xf32>, vector<32x8xf32>, vector<32x32xf32> -> vector<32x32xf32>
      %cst_33 = arith.constant 0.353553385 : f32
      %81 = vector.broadcast %cst_33 : f32 to vector<32x32xf32>
      %82 = arith.mulf %80, %81 : vector<32x32xf32>
      %83 = arith.addf %82, %7 : vector<32x32xf32>
      %cst_34 = arith.constant dense<0xFF800000> : vector<32xf32>
      %84 = vector.multi_reduction <maximumf>, %83, %cst_34 [1] : vector<32x32xf32> to vector<32xf32>
      %85 = vector.shape_cast %84 : vector<32xf32> to vector<32x1xf32>
      %86 = vector.broadcast %85 : vector<32x1xf32> to vector<32x32xf32>
      %87 = arith.subf %83, %86 : vector<32x32xf32>
      %88 = math.exp %87 : vector<32x32xf32>
      %cst_35 = arith.constant dense<0.000000e+00> : vector<32xf32>
      %89 = vector.multi_reduction <add>, %88, %cst_35 [1] : vector<32x32xf32> to vector<32xf32>
      %90 = vector.shape_cast %89 : vector<32xf32> to vector<32x1xf32>
      %91 = tpu.reciprocal %90 {approx = true} : vector<32x1xf32> -> vector<32x1xf32>
      %92 = vector.broadcast %91 : vector<32x1xf32> to vector<32x32xf32>
      %93 = arith.mulf %88, %92 : vector<32x32xf32>
      %cst_36 = arith.constant dense<0.000000e+00> : vector<32x8xf32>
      %94 = tpu.matmul %93, %79, %cst_36 {dimension_numbers = #tpu.dot_dimension_numbers<[1], [0], [0], [1], [0, 0, 1, 1], [], []>} : vector<32x32xf32>, vector<32x8xf32>, vector<32x8xf32> -> vector<32x8xf32>
      %95 = vector.extract_strided_slice %40 {offsets = [0, 24], sizes = [32, 8], strides = [1, 1]} : vector<32x96xf32> to vector<32x8xf32>
      %96 = vector.extract_strided_slice %40 {offsets = [0, 56], sizes = [32, 8], strides = [1, 1]} : vector<32x96xf32> to vector<32x8xf32>
      %97 = vector.extract_strided_slice %40 {offsets = [0, 88], sizes = [32, 8], strides = [1, 1]} : vector<32x96xf32> to vector<32x8xf32>
      %cst_37 = arith.constant dense<0.000000e+00> : vector<32x32xf32>
      %98 = tpu.matmul %95, %96, %cst_37 {dimension_numbers = #tpu.dot_dimension_numbers<[1], [1], [0], [0], [0, 0, 1, 0], [], []>} : vector<32x8xf32>, vector<32x8xf32>, vector<32x32xf32> -> vector<32x32xf32>
      %cst_38 = arith.constant 0.353553385 : f32
      %99 = vector.broadcast %cst_38 : f32 to vector<32x32xf32>
      %100 = arith.mulf %98, %99 : vector<32x32xf32>
      %101 = arith.addf %100, %7 : vector<32x32xf32>
      %cst_39 = arith.constant dense<0xFF800000> : vector<32xf32>
      %102 = vector.multi_reduction <maximumf>, %101, %cst_39 [1] : vector<32x32xf32> to vector<32xf32>
      %103 = vector.shape_cast %102 : vector<32xf32> to vector<32x1xf32>
      %104 = vector.broadcast %103 : vector<32x1xf32> to vector<32x32xf32>
      %105 = arith.subf %101, %104 : vector<32x32xf32>
      %106 = math.exp %105 : vector<32x32xf32>
      %cst_40 = arith.constant dense<0.000000e+00> : vector<32xf32>
      %107 = vector.multi_reduction <add>, %106, %cst_40 [1] : vector<32x32xf32> to vector<32xf32>
      %108 = vector.shape_cast %107 : vector<32xf32> to vector<32x1xf32>
      %109 = tpu.reciprocal %108 {approx = true} : vector<32x1xf32> -> vector<32x1xf32>
      %110 = vector.broadcast %109 : vector<32x1xf32> to vector<32x32xf32>
      %111 = arith.mulf %106, %110 : vector<32x32xf32>
      %cst_41 = arith.constant dense<0.000000e+00> : vector<32x8xf32>
      %112 = tpu.matmul %111, %97, %cst_41 {dimension_numbers = #tpu.dot_dimension_numbers<[1], [0], [0], [1], [0, 0, 1, 1], [], []>} : vector<32x32xf32>, vector<32x8xf32>, vector<32x8xf32> -> vector<32x8xf32>
      %113 = tpu.concatenate %58, %76, %94, %112 in 1 : vector<32x8xf32>, vector<32x8xf32>, vector<32x8xf32>, vector<32x8xf32> -> vector<32x32xf32>
      %c0_42 = arith.constant 0 : index
      %c0_43 = arith.constant 0 : index
      %c0_44 = arith.constant 0 : index
      %114 = vector.load %arg8[%c0_42, %c0_43, %c0_44] : memref<2x32x32xf32, #tpu.memory_space<vmem>>, vector<1x32x32xf32>
      %115 = vector.shape_cast %114 : vector<1x32x32xf32> to vector<32x32xf32>
      %cst_45 = arith.constant dense<0.000000e+00> : vector<32x32xf32>
      %116 = tpu.matmul %113, %115, %cst_45 {dimension_numbers = #tpu.dot_dimension_numbers<[1], [0], [0], [1], [0, 0, 1, 1], [], []>} : vector<32x32xf32>, vector<32x32xf32>, vector<32x32xf32> -> vector<32x32xf32>
      %117 = arith.addf %6, %116 : vector<32x32xf32>
      %c0_46 = arith.constant 0 : index
      %c0_47 = arith.constant 0 : index
      %c0_48 = arith.constant 0 : index
      %118 = vector.load %arg9[%c0_46, %c0_47, %c0_48] : memref<2x1x32xf32, #tpu.memory_space<vmem>>, vector<1x1x32xf32>
      %119 = vector.shape_cast %118 : vector<1x1x32xf32> to vector<1x32xf32>
      %120 = vector.broadcast %119 : vector<1x32xf32> to vector<32x32xf32>
      %121 = arith.addf %117, %120 : vector<32x32xf32>
      %c0_49 = arith.constant 0 : index
      %c0_50 = arith.constant 0 : index
      %c0_51 = arith.constant 0 : index
      %122 = vector.load %arg10[%c0_49, %c0_50, %c0_51] : memref<2x1x32xf32, #tpu.memory_space<vmem>>, vector<1x1x32xf32>
      %123 = vector.shape_cast %122 : vector<1x1x32xf32> to vector<1x32xf32>
      %c0_52 = arith.constant 0 : index
      %c0_53 = arith.constant 0 : index
      %c0_54 = arith.constant 0 : index
      %124 = vector.load %arg11[%c0_52, %c0_53, %c0_54] : memref<2x1x32xf32, #tpu.memory_space<vmem>>, vector<1x1x32xf32>
      %125 = vector.shape_cast %124 : vector<1x1x32xf32> to vector<1x32xf32>
      %cst_55 = arith.constant dense<0.000000e+00> : vector<32xf32>
      %126 = vector.multi_reduction <add>, %121, %cst_55 [1] : vector<32x32xf32> to vector<32xf32>
      %127 = vector.shape_cast %126 : vector<32xf32> to vector<32x1xf32>
      %cst_56 = arith.constant 3.200000e+01 : f32
      %128 = vector.broadcast %cst_56 : f32 to vector<32x1xf32>
      %129 = arith.divf %127, %128 : vector<32x1xf32>
      %130 = vector.broadcast %129 : vector<32x1xf32> to vector<32x32xf32>
      %131 = arith.subf %121, %130 : vector<32x32xf32>
      %132 = arith.mulf %131, %131 : vector<32x32xf32>
      %cst_57 = arith.constant dense<0.000000e+00> : vector<32xf32>
      %133 = vector.multi_reduction <add>, %132, %cst_57 [1] : vector<32x32xf32> to vector<32xf32>
      %134 = vector.shape_cast %133 : vector<32xf32> to vector<32x1xf32>
      %cst_58 = arith.constant 3.200000e+01 : f32
      %135 = vector.broadcast %cst_58 : f32 to vector<32x1xf32>
      %136 = arith.divf %134, %135 : vector<32x1xf32>
      %137 = vector.broadcast %129 : vector<32x1xf32> to vector<32x32xf32>
      %138 = arith.subf %121, %137 : vector<32x32xf32>
      %cst_59 = arith.constant 9.99999974E-6 : f32
      %139 = vector.broadcast %cst_59 : f32 to vector<32x1xf32>
      %140 = arith.addf %136, %139 : vector<32x1xf32>
      %141 = math.rsqrt %140 : vector<32x1xf32>
      %142 = vector.broadcast %141 : vector<32x1xf32> to vector<32x32xf32>
      %143 = arith.mulf %138, %142 : vector<32x32xf32>
      %144 = vector.broadcast %123 : vector<1x32xf32> to vector<32x32xf32>
      %145 = arith.mulf %143, %144 : vector<32x32xf32>
      %146 = vector.broadcast %125 : vector<1x32xf32> to vector<32x32xf32>
      %147 = arith.addf %145, %146 : vector<32x32xf32>
      %c0_60 = arith.constant 0 : index
      %c0_61 = arith.constant 0 : index
      %c0_62 = arith.constant 0 : index
      %148 = vector.load %arg12[%c0_60, %c0_61, %c0_62] : memref<2x32x64xf32, #tpu.memory_space<vmem>>, vector<1x32x64xf32>
      %149 = vector.shape_cast %148 : vector<1x32x64xf32> to vector<32x64xf32>
      %cst_63 = arith.constant dense<0.000000e+00> : vector<32x64xf32>
      %150 = tpu.matmul %147, %149, %cst_63 {dimension_numbers = #tpu.dot_dimension_numbers<[1], [0], [0], [1], [0, 0, 1, 1], [], []>} : vector<32x32xf32>, vector<32x64xf32>, vector<32x64xf32> -> vector<32x64xf32>
      %c0_64 = arith.constant 0 : index
      %c0_65 = arith.constant 0 : index
      %c0_66 = arith.constant 0 : index
      %151 = vector.load %arg13[%c0_64, %c0_65, %c0_66] : memref<2x1x64xf32, #tpu.memory_space<vmem>>, vector<1x1x64xf32>
      %152 = vector.shape_cast %151 : vector<1x1x64xf32> to vector<1x64xf32>
      %153 = vector.broadcast %152 : vector<1x64xf32> to vector<32x64xf32>
      %154 = arith.addf %150, %153 : vector<32x64xf32>
      %cst_67 = arith.constant 1.702000e+00 : f32
      %155 = vector.broadcast %cst_67 : f32 to vector<32x64xf32>
      %156 = arith.mulf %155, %154 : vector<32x64xf32>
      %157 = arith.negf %156 : vector<32x64xf32>
      %158 = math.exp %157 : vector<32x64xf32>
      %cst_68 = arith.constant 1.000000e+00 : f32
      %159 = vector.broadcast %cst_68 : f32 to vector<32x64xf32>
      %160 = arith.addf %159, %158 : vector<32x64xf32>
      %161 = arith.divf %159, %160 : vector<32x64xf32>
      %162 = arith.mulf %154, %161 : vector<32x64xf32>
      %c0_69 = arith.constant 0 : index
      %c0_70 = arith.constant 0 : index
      %c0_71 = arith.constant 0 : index
      %163 = vector.load %arg14[%c0_69, %c0_70, %c0_71] : memref<2x64x32xf32, #tpu.memory_space<vmem>>, vector<1x64x32xf32>
      %164 = vector.shape_cast %163 : vector<1x64x32xf32> to vector<64x32xf32>
      %cst_72 = arith.constant dense<0.000000e+00> : vector<32x32xf32>
      %165 = tpu.matmul %162, %164, %cst_72 {dimension_numbers = #tpu.dot_dimension_numbers<[1], [0], [0], [1], [0, 0, 1, 1], [], []>} : vector<32x64xf32>, vector<64x32xf32>, vector<32x32xf32> -> vector<32x32xf32>
      %c0_73 = arith.constant 0 : index
      %c0_74 = arith.constant 0 : index
      %c0_75 = arith.constant 0 : index
      %166 = vector.load %arg15[%c0_73, %c0_74, %c0_75] : memref<2x1x32xf32, #tpu.memory_space<vmem>>, vector<1x1x32xf32>
      %167 = vector.shape_cast %166 : vector<1x1x32xf32> to vector<1x32xf32>
      %168 = vector.broadcast %167 : vector<1x32xf32> to vector<32x32xf32>
      %169 = arith.addf %165, %168 : vector<32x32xf32>
      %170 = arith.addf %121, %169 : vector<32x32xf32>
      %c1 = arith.constant 1 : index
      %c0_76 = arith.constant 0 : index
      %c0_77 = arith.constant 0 : index
      %171 = vector.load %arg4[%c1, %c0_76, %c0_77] : memref<2x1x32xf32, #tpu.memory_space<vmem>>, vector<1x1x32xf32>
      %172 = vector.shape_cast %171 : vector<1x1x32xf32> to vector<1x32xf32>
      %c1_78 = arith.constant 1 : index
      %c0_79 = arith.constant 0 : index
      %c0_80 = arith.constant 0 : index
      %173 = vector.load %arg5[%c1_78, %c0_79, %c0_80] : memref<2x1x32xf32, #tpu.memory_space<vmem>>, vector<1x1x32xf32>
      %174 = vector.shape_cast %173 : vector<1x1x32xf32> to vector<1x32xf32>
      %cst_81 = arith.constant dense<0.000000e+00> : vector<32xf32>
      %175 = vector.multi_reduction <add>, %170, %cst_81 [1] : vector<32x32xf32> to vector<32xf32>
      %176 = vector.shape_cast %175 : vector<32xf32> to vector<32x1xf32>
      %cst_82 = arith.constant 3.200000e+01 : f32
      %177 = vector.broadcast %cst_82 : f32 to vector<32x1xf32>
      %178 = arith.divf %176, %177 : vector<32x1xf32>
      %179 = vector.broadcast %178 : vector<32x1xf32> to vector<32x32xf32>
      %180 = arith.subf %170, %179 : vector<32x32xf32>
      %181 = arith.mulf %180, %180 : vector<32x32xf32>
      %cst_83 = arith.constant dense<0.000000e+00> : vector<32xf32>
      %182 = vector.multi_reduction <add>, %181, %cst_83 [1] : vector<32x32xf32> to vector<32xf32>
      %183 = vector.shape_cast %182 : vector<32xf32> to vector<32x1xf32>
      %cst_84 = arith.constant 3.200000e+01 : f32
      %184 = vector.broadcast %cst_84 : f32 to vector<32x1xf32>
      %185 = arith.divf %183, %184 : vector<32x1xf32>
      %186 = vector.broadcast %178 : vector<32x1xf32> to vector<32x32xf32>
      %187 = arith.subf %170, %186 : vector<32x32xf32>
      %cst_85 = arith.constant 9.99999974E-6 : f32
      %188 = vector.broadcast %cst_85 : f32 to vector<32x1xf32>
      %189 = arith.addf %185, %188 : vector<32x1xf32>
      %190 = math.rsqrt %189 : vector<32x1xf32>
      %191 = vector.broadcast %190 : vector<32x1xf32> to vector<32x32xf32>
      %192 = arith.mulf %187, %191 : vector<32x32xf32>
      %193 = vector.broadcast %172 : vector<1x32xf32> to vector<32x32xf32>
      %194 = arith.mulf %192, %193 : vector<32x32xf32>
      %195 = vector.broadcast %174 : vector<1x32xf32> to vector<32x32xf32>
      %196 = arith.addf %194, %195 : vector<32x32xf32>
      %c1_86 = arith.constant 1 : index
      %c0_87 = arith.constant 0 : index
      %c0_88 = arith.constant 0 : index
      %197 = vector.load %arg6[%c1_86, %c0_87, %c0_88] : memref<2x32x96xf32, #tpu.memory_space<vmem>>, vector<1x32x96xf32>
      %198 = vector.shape_cast %197 : vector<1x32x96xf32> to vector<32x96xf32>
      %cst_89 = arith.constant dense<0.000000e+00> : vector<32x96xf32>
      %199 = tpu.matmul %196, %198, %cst_89 {dimension_numbers = #tpu.dot_dimension_numbers<[1], [0], [0], [1], [0, 0, 1, 1], [], []>} : vector<32x32xf32>, vector<32x96xf32>, vector<32x96xf32> -> vector<32x96xf32>
      %c1_90 = arith.constant 1 : index
      %c0_91 = arith.constant 0 : index
      %c0_92 = arith.constant 0 : index
      %200 = vector.load %arg7[%c1_90, %c0_91, %c0_92] : memref<2x1x96xf32, #tpu.memory_space<vmem>>, vector<1x1x96xf32>
      %201 = vector.shape_cast %200 : vector<1x1x96xf32> to vector<1x96xf32>
      %202 = vector.broadcast %201 : vector<1x96xf32> to vector<32x96xf32>
      %203 = arith.addf %199, %202 : vector<32x96xf32>
      %204 = vector.extract_strided_slice %203 {offsets = [0, 0], sizes = [32, 8], strides = [1, 1]} : vector<32x96xf32> to vector<32x8xf32>
      %205 = vector.extract_strided_slice %203 {offsets = [0, 32], sizes = [32, 8], strides = [1, 1]} : vector<32x96xf32> to vector<32x8xf32>
      %206 = vector.extract_strided_slice %203 {offsets = [0, 64], sizes = [32, 8], strides = [1, 1]} : vector<32x96xf32> to vector<32x8xf32>
      %cst_93 = arith.constant dense<0.000000e+00> : vector<32x32xf32>
      %207 = tpu.matmul %204, %205, %cst_93 {dimension_numbers = #tpu.dot_dimension_numbers<[1], [1], [0], [0], [0, 0, 1, 0], [], []>} : vector<32x8xf32>, vector<32x8xf32>, vector<32x32xf32> -> vector<32x32xf32>
      %cst_94 = arith.constant 0.353553385 : f32
      %208 = vector.broadcast %cst_94 : f32 to vector<32x32xf32>
      %209 = arith.mulf %207, %208 : vector<32x32xf32>
      %210 = arith.addf %209, %7 : vector<32x32xf32>
      %cst_95 = arith.constant dense<0xFF800000> : vector<32xf32>
      %211 = vector.multi_reduction <maximumf>, %210, %cst_95 [1] : vector<32x32xf32> to vector<32xf32>
      %212 = vector.shape_cast %211 : vector<32xf32> to vector<32x1xf32>
      %213 = vector.broadcast %212 : vector<32x1xf32> to vector<32x32xf32>
      %214 = arith.subf %210, %213 : vector<32x32xf32>
      %215 = math.exp %214 : vector<32x32xf32>
      %cst_96 = arith.constant dense<0.000000e+00> : vector<32xf32>
      %216 = vector.multi_reduction <add>, %215, %cst_96 [1] : vector<32x32xf32> to vector<32xf32>
      %217 = vector.shape_cast %216 : vector<32xf32> to vector<32x1xf32>
      %218 = tpu.reciprocal %217 {approx = true} : vector<32x1xf32> -> vector<32x1xf32>
      %219 = vector.broadcast %218 : vector<32x1xf32> to vector<32x32xf32>
      %220 = arith.mulf %215, %219 : vector<32x32xf32>
      %cst_97 = arith.constant dense<0.000000e+00> : vector<32x8xf32>
      %221 = tpu.matmul %220, %206, %cst_97 {dimension_numbers = #tpu.dot_dimension_numbers<[1], [0], [0], [1], [0, 0, 1, 1], [], []>} : vector<32x32xf32>, vector<32x8xf32>, vector<32x8xf32> -> vector<32x8xf32>
      %222 = vector.extract_strided_slice %203 {offsets = [0, 8], sizes = [32, 8], strides = [1, 1]} : vector<32x96xf32> to vector<32x8xf32>
      %223 = vector.extract_strided_slice %203 {offsets = [0, 40], sizes = [32, 8], strides = [1, 1]} : vector<32x96xf32> to vector<32x8xf32>
      %224 = vector.extract_strided_slice %203 {offsets = [0, 72], sizes = [32, 8], strides = [1, 1]} : vector<32x96xf32> to vector<32x8xf32>
      %cst_98 = arith.constant dense<0.000000e+00> : vector<32x32xf32>
      %225 = tpu.matmul %222, %223, %cst_98 {dimension_numbers = #tpu.dot_dimension_numbers<[1], [1], [0], [0], [0, 0, 1, 0], [], []>} : vector<32x8xf32>, vector<32x8xf32>, vector<32x32xf32> -> vector<32x32xf32>
      %cst_99 = arith.constant 0.353553385 : f32
      %226 = vector.broadcast %cst_99 : f32 to vector<32x32xf32>
      %227 = arith.mulf %225, %226 : vector<32x32xf32>
      %228 = arith.addf %227, %7 : vector<32x32xf32>
      %cst_100 = arith.constant dense<0xFF800000> : vector<32xf32>
      %229 = vector.multi_reduction <maximumf>, %228, %cst_100 [1] : vector<32x32xf32> to vector<32xf32>
      %230 = vector.shape_cast %229 : vector<32xf32> to vector<32x1xf32>
      %231 = vector.broadcast %230 : vector<32x1xf32> to vector<32x32xf32>
      %232 = arith.subf %228, %231 : vector<32x32xf32>
      %233 = math.exp %232 : vector<32x32xf32>
      %cst_101 = arith.constant dense<0.000000e+00> : vector<32xf32>
      %234 = vector.multi_reduction <add>, %233, %cst_101 [1] : vector<32x32xf32> to vector<32xf32>
      %235 = vector.shape_cast %234 : vector<32xf32> to vector<32x1xf32>
      %236 = tpu.reciprocal %235 {approx = true} : vector<32x1xf32> -> vector<32x1xf32>
      %237 = vector.broadcast %236 : vector<32x1xf32> to vector<32x32xf32>
      %238 = arith.mulf %233, %237 : vector<32x32xf32>
      %cst_102 = arith.constant dense<0.000000e+00> : vector<32x8xf32>
      %239 = tpu.matmul %238, %224, %cst_102 {dimension_numbers = #tpu.dot_dimension_numbers<[1], [0], [0], [1], [0, 0, 1, 1], [], []>} : vector<32x32xf32>, vector<32x8xf32>, vector<32x8xf32> -> vector<32x8xf32>
      %240 = vector.extract_strided_slice %203 {offsets = [0, 16], sizes = [32, 8], strides = [1, 1]} : vector<32x96xf32> to vector<32x8xf32>
      %241 = vector.extract_strided_slice %203 {offsets = [0, 48], sizes = [32, 8], strides = [1, 1]} : vector<32x96xf32> to vector<32x8xf32>
      %242 = vector.extract_strided_slice %203 {offsets = [0, 80], sizes = [32, 8], strides = [1, 1]} : vector<32x96xf32> to vector<32x8xf32>
      %cst_103 = arith.constant dense<0.000000e+00> : vector<32x32xf32>
      %243 = tpu.matmul %240, %241, %cst_103 {dimension_numbers = #tpu.dot_dimension_numbers<[1], [1], [0], [0], [0, 0, 1, 0], [], []>} : vector<32x8xf32>, vector<32x8xf32>, vector<32x32xf32> -> vector<32x32xf32>
      %cst_104 = arith.constant 0.353553385 : f32
      %244 = vector.broadcast %cst_104 : f32 to vector<32x32xf32>
      %245 = arith.mulf %243, %244 : vector<32x32xf32>
      %246 = arith.addf %245, %7 : vector<32x32xf32>
      %cst_105 = arith.constant dense<0xFF800000> : vector<32xf32>
      %247 = vector.multi_reduction <maximumf>, %246, %cst_105 [1] : vector<32x32xf32> to vector<32xf32>
      %248 = vector.shape_cast %247 : vector<32xf32> to vector<32x1xf32>
      %249 = vector.broadcast %248 : vector<32x1xf32> to vector<32x32xf32>
      %250 = arith.subf %246, %249 : vector<32x32xf32>
      %251 = math.exp %250 : vector<32x32xf32>
      %cst_106 = arith.constant dense<0.000000e+00> : vector<32xf32>
      %252 = vector.multi_reduction <add>, %251, %cst_106 [1] : vector<32x32xf32> to vector<32xf32>
      %253 = vector.shape_cast %252 : vector<32xf32> to vector<32x1xf32>
      %254 = tpu.reciprocal %253 {approx = true} : vector<32x1xf32> -> vector<32x1xf32>
      %255 = vector.broadcast %254 : vector<32x1xf32> to vector<32x32xf32>
      %256 = arith.mulf %251, %255 : vector<32x32xf32>
      %cst_107 = arith.constant dense<0.000000e+00> : vector<32x8xf32>
      %257 = tpu.matmul %256, %242, %cst_107 {dimension_numbers = #tpu.dot_dimension_numbers<[1], [0], [0], [1], [0, 0, 1, 1], [], []>} : vector<32x32xf32>, vector<32x8xf32>, vector<32x8xf32> -> vector<32x8xf32>
      %258 = vector.extract_strided_slice %203 {offsets = [0, 24], sizes = [32, 8], strides = [1, 1]} : vector<32x96xf32> to vector<32x8xf32>
      %259 = vector.extract_strided_slice %203 {offsets = [0, 56], sizes = [32, 8], strides = [1, 1]} : vector<32x96xf32> to vector<32x8xf32>
      %260 = vector.extract_strided_slice %203 {offsets = [0, 88], sizes = [32, 8], strides = [1, 1]} : vector<32x96xf32> to vector<32x8xf32>
      %cst_108 = arith.constant dense<0.000000e+00> : vector<32x32xf32>
      %261 = tpu.matmul %258, %259, %cst_108 {dimension_numbers = #tpu.dot_dimension_numbers<[1], [1], [0], [0], [0, 0, 1, 0], [], []>} : vector<32x8xf32>, vector<32x8xf32>, vector<32x32xf32> -> vector<32x32xf32>
      %cst_109 = arith.constant 0.353553385 : f32
      %262 = vector.broadcast %cst_109 : f32 to vector<32x32xf32>
      %263 = arith.mulf %261, %262 : vector<32x32xf32>
      %264 = arith.addf %263, %7 : vector<32x32xf32>
      %cst_110 = arith.constant dense<0xFF800000> : vector<32xf32>
      %265 = vector.multi_reduction <maximumf>, %264, %cst_110 [1] : vector<32x32xf32> to vector<32xf32>
      %266 = vector.shape_cast %265 : vector<32xf32> to vector<32x1xf32>
      %267 = vector.broadcast %266 : vector<32x1xf32> to vector<32x32xf32>
      %268 = arith.subf %264, %267 : vector<32x32xf32>
      %269 = math.exp %268 : vector<32x32xf32>
      %cst_111 = arith.constant dense<0.000000e+00> : vector<32xf32>
      %270 = vector.multi_reduction <add>, %269, %cst_111 [1] : vector<32x32xf32> to vector<32xf32>
      %271 = vector.shape_cast %270 : vector<32xf32> to vector<32x1xf32>
      %272 = tpu.reciprocal %271 {approx = true} : vector<32x1xf32> -> vector<32x1xf32>
      %273 = vector.broadcast %272 : vector<32x1xf32> to vector<32x32xf32>
      %274 = arith.mulf %269, %273 : vector<32x32xf32>
      %cst_112 = arith.constant dense<0.000000e+00> : vector<32x8xf32>
      %275 = tpu.matmul %274, %260, %cst_112 {dimension_numbers = #tpu.dot_dimension_numbers<[1], [0], [0], [1], [0, 0, 1, 1], [], []>} : vector<32x32xf32>, vector<32x8xf32>, vector<32x8xf32> -> vector<32x8xf32>
      %276 = tpu.concatenate %221, %239, %257, %275 in 1 : vector<32x8xf32>, vector<32x8xf32>, vector<32x8xf32>, vector<32x8xf32> -> vector<32x32xf32>
      %c1_113 = arith.constant 1 : index
      %c0_114 = arith.constant 0 : index
      %c0_115 = arith.constant 0 : index
      %277 = vector.load %arg8[%c1_113, %c0_114, %c0_115] : memref<2x32x32xf32, #tpu.memory_space<vmem>>, vector<1x32x32xf32>
      %278 = vector.shape_cast %277 : vector<1x32x32xf32> to vector<32x32xf32>
      %cst_116 = arith.constant dense<0.000000e+00> : vector<32x32xf32>
      %279 = tpu.matmul %276, %278, %cst_116 {dimension_numbers = #tpu.dot_dimension_numbers<[1], [0], [0], [1], [0, 0, 1, 1], [], []>} : vector<32x32xf32>, vector<32x32xf32>, vector<32x32xf32> -> vector<32x32xf32>
      %280 = arith.addf %170, %279 : vector<32x32xf32>
      %c1_117 = arith.constant 1 : index
      %c0_118 = arith.constant 0 : index
      %c0_119 = arith.constant 0 : index
      %281 = vector.load %arg9[%c1_117, %c0_118, %c0_119] : memref<2x1x32xf32, #tpu.memory_space<vmem>>, vector<1x1x32xf32>
      %282 = vector.shape_cast %281 : vector<1x1x32xf32> to vector<1x32xf32>
      %283 = vector.broadcast %282 : vector<1x32xf32> to vector<32x32xf32>
      %284 = arith.addf %280, %283 : vector<32x32xf32>
      %c1_120 = arith.constant 1 : index
      %c0_121 = arith.constant 0 : index
      %c0_122 = arith.constant 0 : index
      %285 = vector.load %arg10[%c1_120, %c0_121, %c0_122] : memref<2x1x32xf32, #tpu.memory_space<vmem>>, vector<1x1x32xf32>
      %286 = vector.shape_cast %285 : vector<1x1x32xf32> to vector<1x32xf32>
      %c1_123 = arith.constant 1 : index
      %c0_124 = arith.constant 0 : index
      %c0_125 = arith.constant 0 : index
      %287 = vector.load %arg11[%c1_123, %c0_124, %c0_125] : memref<2x1x32xf32, #tpu.memory_space<vmem>>, vector<1x1x32xf32>
      %288 = vector.shape_cast %287 : vector<1x1x32xf32> to vector<1x32xf32>
      %cst_126 = arith.constant dense<0.000000e+00> : vector<32xf32>
      %289 = vector.multi_reduction <add>, %284, %cst_126 [1] : vector<32x32xf32> to vector<32xf32>
      %290 = vector.shape_cast %289 : vector<32xf32> to vector<32x1xf32>
      %cst_127 = arith.constant 3.200000e+01 : f32
      %291 = vector.broadcast %cst_127 : f32 to vector<32x1xf32>
      %292 = arith.divf %290, %291 : vector<32x1xf32>
      %293 = vector.broadcast %292 : vector<32x1xf32> to vector<32x32xf32>
      %294 = arith.subf %284, %293 : vector<32x32xf32>
      %295 = arith.mulf %294, %294 : vector<32x32xf32>
      %cst_128 = arith.constant dense<0.000000e+00> : vector<32xf32>
      %296 = vector.multi_reduction <add>, %295, %cst_128 [1] : vector<32x32xf32> to vector<32xf32>
      %297 = vector.shape_cast %296 : vector<32xf32> to vector<32x1xf32>
      %cst_129 = arith.constant 3.200000e+01 : f32
      %298 = vector.broadcast %cst_129 : f32 to vector<32x1xf32>
      %299 = arith.divf %297, %298 : vector<32x1xf32>
      %300 = vector.broadcast %292 : vector<32x1xf32> to vector<32x32xf32>
      %301 = arith.subf %284, %300 : vector<32x32xf32>
      %cst_130 = arith.constant 9.99999974E-6 : f32
      %302 = vector.broadcast %cst_130 : f32 to vector<32x1xf32>
      %303 = arith.addf %299, %302 : vector<32x1xf32>
      %304 = math.rsqrt %303 : vector<32x1xf32>
      %305 = vector.broadcast %304 : vector<32x1xf32> to vector<32x32xf32>
      %306 = arith.mulf %301, %305 : vector<32x32xf32>
      %307 = vector.broadcast %286 : vector<1x32xf32> to vector<32x32xf32>
      %308 = arith.mulf %306, %307 : vector<32x32xf32>
      %309 = vector.broadcast %288 : vector<1x32xf32> to vector<32x32xf32>
      %310 = arith.addf %308, %309 : vector<32x32xf32>
      %c1_131 = arith.constant 1 : index
      %c0_132 = arith.constant 0 : index
      %c0_133 = arith.constant 0 : index
      %311 = vector.load %arg12[%c1_131, %c0_132, %c0_133] : memref<2x32x64xf32, #tpu.memory_space<vmem>>, vector<1x32x64xf32>
      %312 = vector.shape_cast %311 : vector<1x32x64xf32> to vector<32x64xf32>
      %cst_134 = arith.constant dense<0.000000e+00> : vector<32x64xf32>
      %313 = tpu.matmul %310, %312, %cst_134 {dimension_numbers = #tpu.dot_dimension_numbers<[1], [0], [0], [1], [0, 0, 1, 1], [], []>} : vector<32x32xf32>, vector<32x64xf32>, vector<32x64xf32> -> vector<32x64xf32>
      %c1_135 = arith.constant 1 : index
      %c0_136 = arith.constant 0 : index
      %c0_137 = arith.constant 0 : index
      %314 = vector.load %arg13[%c1_135, %c0_136, %c0_137] : memref<2x1x64xf32, #tpu.memory_space<vmem>>, vector<1x1x64xf32>
      %315 = vector.shape_cast %314 : vector<1x1x64xf32> to vector<1x64xf32>
      %316 = vector.broadcast %315 : vector<1x64xf32> to vector<32x64xf32>
      %317 = arith.addf %313, %316 : vector<32x64xf32>
      %cst_138 = arith.constant 1.702000e+00 : f32
      %318 = vector.broadcast %cst_138 : f32 to vector<32x64xf32>
      %319 = arith.mulf %318, %317 : vector<32x64xf32>
      %320 = arith.negf %319 : vector<32x64xf32>
      %321 = math.exp %320 : vector<32x64xf32>
      %cst_139 = arith.constant 1.000000e+00 : f32
      %322 = vector.broadcast %cst_139 : f32 to vector<32x64xf32>
      %323 = arith.addf %322, %321 : vector<32x64xf32>
      %324 = arith.divf %322, %323 : vector<32x64xf32>
      %325 = arith.mulf %317, %324 : vector<32x64xf32>
      %c1_140 = arith.constant 1 : index
      %c0_141 = arith.constant 0 : index
      %c0_142 = arith.constant 0 : index
      %326 = vector.load %arg14[%c1_140, %c0_141, %c0_142] : memref<2x64x32xf32, #tpu.memory_space<vmem>>, vector<1x64x32xf32>
      %327 = vector.shape_cast %326 : vector<1x64x32xf32> to vector<64x32xf32>
      %cst_143 = arith.constant dense<0.000000e+00> : vector<32x32xf32>
      %328 = tpu.matmul %325, %327, %cst_143 {dimension_numbers = #tpu.dot_dimension_numbers<[1], [0], [0], [1], [0, 0, 1, 1], [], []>} : vector<32x64xf32>, vector<64x32xf32>, vector<32x32xf32> -> vector<32x32xf32>
      %c1_144 = arith.constant 1 : index
      %c0_145 = arith.constant 0 : index
      %c0_146 = arith.constant 0 : index
      %329 = vector.load %arg15[%c1_144, %c0_145, %c0_146] : memref<2x1x32xf32, #tpu.memory_space<vmem>>, vector<1x1x32xf32>
      %330 = vector.shape_cast %329 : vector<1x1x32xf32> to vector<1x32xf32>
      %331 = vector.broadcast %330 : vector<1x32xf32> to vector<32x32xf32>
      %332 = arith.addf %328, %331 : vector<32x32xf32>
      %333 = arith.addf %284, %332 : vector<32x32xf32>
      %c0_147 = arith.constant 0 : index
      %c0_148 = arith.constant 0 : index
      %334 = vector.load %arg16[%c0_147, %c0_148] : memref<1x32xf32, #tpu.memory_space<vmem>>, vector<1x32xf32>
      %c0_149 = arith.constant 0 : index
      %c0_150 = arith.constant 0 : index
      %335 = vector.load %arg17[%c0_149, %c0_150] : memref<1x32xf32, #tpu.memory_space<vmem>>, vector<1x32xf32>
      %cst_151 = arith.constant dense<0.000000e+00> : vector<32xf32>
      %336 = vector.multi_reduction <add>, %333, %cst_151 [1] : vector<32x32xf32> to vector<32xf32>
      %337 = vector.shape_cast %336 : vector<32xf32> to vector<32x1xf32>
      %cst_152 = arith.constant 3.200000e+01 : f32
      %338 = vector.broadcast %cst_152 : f32 to vector<32x1xf32>
      %339 = arith.divf %337, %338 : vector<32x1xf32>
      %340 = vector.broadcast %339 : vector<32x1xf32> to vector<32x32xf32>
      %341 = arith.subf %333, %340 : vector<32x32xf32>
      %342 = arith.mulf %341, %341 : vector<32x32xf32>
      %cst_153 = arith.constant dense<0.000000e+00> : vector<32xf32>
      %343 = vector.multi_reduction <add>, %342, %cst_153 [1] : vector<32x32xf32> to vector<32xf32>
      %344 = vector.shape_cast %343 : vector<32xf32> to vector<32x1xf32>
      %cst_154 = arith.constant 3.200000e+01 : f32
      %345 = vector.broadcast %cst_154 : f32 to vector<32x1xf32>
      %346 = arith.divf %344, %345 : vector<32x1xf32>
      %347 = vector.broadcast %339 : vector<32x1xf32> to vector<32x32xf32>
      %348 = arith.subf %333, %347 : vector<32x32xf32>
      %cst_155 = arith.constant 9.99999974E-6 : f32
      %349 = vector.broadcast %cst_155 : f32 to vector<32x1xf32>
      %350 = arith.addf %346, %349 : vector<32x1xf32>
      %351 = math.rsqrt %350 : vector<32x1xf32>
      %352 = vector.broadcast %351 : vector<32x1xf32> to vector<32x32xf32>
      %353 = arith.mulf %348, %352 : vector<32x32xf32>
      %354 = vector.broadcast %334 : vector<1x32xf32> to vector<32x32xf32>
      %355 = arith.mulf %353, %354 : vector<32x32xf32>
      %356 = vector.broadcast %335 : vector<1x32xf32> to vector<32x32xf32>
      %357 = arith.addf %355, %356 : vector<32x32xf32>
      %c0_156 = arith.constant 0 : index
      %c0_157 = arith.constant 0 : index
      %358 = vector.load %arg3[%c0_156, %c0_157] : memref<4x32xf32, #tpu.memory_space<vmem>>, vector<4x32xf32>
      %cst_158 = arith.constant dense<0.000000e+00> : vector<4x32xf32>
      %359 = tpu.matmul %358, %357, %cst_158 {dimension_numbers = #tpu.dot_dimension_numbers<[1], [0], [0], [1], [0, 0, 1, 1], [], []>} : vector<4x32xf32>, vector<32x32xf32>, vector<4x32xf32> -> vector<4x32xf32>
      %c0_159 = arith.constant 0 : index
      %c0_160 = arith.constant 0 : index
      %360 = vector.load %arg18[%c0_159, %c0_160] : memref<32x16xf32, #tpu.memory_space<vmem>>, vector<32x16xf32>
      %cst_161 = arith.constant dense<0.000000e+00> : vector<4x16xf32>
      %361 = tpu.matmul %359, %360, %cst_161 {dimension_numbers = #tpu.dot_dimension_numbers<[1], [0], [0], [1], [0, 0, 1, 1], [], []>} : vector<4x32xf32>, vector<32x16xf32>, vector<4x16xf32> -> vector<4x16xf32>
      %c0_162 = arith.constant 0 : index
      %c0_163 = arith.constant 0 : index
      %c0_164 = arith.constant 0 : index
      %362 = vector.load %arg43[%c0_162, %c0_163, %c0_164] : memref<1x4x16xf32, #tpu.memory_space<vmem>>, vector<1x4x16xf32>
      %363 = vector.shape_cast %362 : vector<1x4x16xf32> to vector<4x16xf32>
      %364 = vector.shape_cast %361 : vector<4x16xf32> to vector<1x4x16xf32>
      tpu.vector_store %arg43[%c0_162, %c0_163, %c0_164], %364 {strides = array<i32>} : memref<1x4x16xf32, #tpu.memory_space<vmem>>, vector<1x4x16xf32>,
    } else {
    }
    %c1_i32 = arith.constant 1 : i32
    %3 = arith.cmpi eq, %arg0, %c1_i32 : i32
    %4 = arith.extui %3 : i1 to i32
    %c0_i32_1 = arith.constant 0 : i32
    %5 = arith.cmpi ne, %4, %c0_i32_1 : i32
    scf.if %5 {
      %c0 = arith.constant 0 : index
      %c0_2 = arith.constant 0 : index
      %6 = vector.load %arg19[%c0, %c0_2] : memref<8x192xf32, #tpu.memory_space<vmem>>, vector<8x192xf32>
      %c0_3 = arith.constant 0 : index
      %c0_4 = arith.constant 0 : index
      %7 = vector.load %arg25[%c0_3, %c0_4] : memref<192x32xf32, #tpu.memory_space<vmem>>, vector<192x32xf32>
      %cst = arith.constant dense<0.000000e+00> : vector<8x32xf32>
      %8 = tpu.matmul %6, %7, %cst {dimension_numbers = #tpu.dot_dimension_numbers<[1], [0], [0], [1], [0, 0, 1, 1], [], []>} : vector<8x192xf32>, vector<192x32xf32>, vector<8x32xf32> -> vector<8x32xf32>
      %c0_5 = arith.constant 0 : index
      %c0_6 = arith.constant 0 : index
      %9 = vector.load %arg21[%c0_5, %c0_6] : memref<10x5xf32, #tpu.memory_space<vmem>>, vector<10x5xf32>
      %c0_7 = arith.constant 0 : index
      %c0_8 = arith.constant 0 : index
      %10 = vector.load %arg20[%c0_7, %c0_8] : memref<5x32xf32, #tpu.memory_space<vmem>>, vector<5x32xf32>
      %cst_9 = arith.constant dense<0.000000e+00> : vector<10x32xf32>
      %11 = tpu.matmul %9, %10, %cst_9 {dimension_numbers = #tpu.dot_dimension_numbers<[1], [0], [0], [1], [0, 0, 1, 1], [], []>} : vector<10x5xf32>, vector<5x32xf32>, vector<10x32xf32> -> vector<10x32xf32>
      %c0_10 = arith.constant 0 : index
      %c0_11 = arith.constant 0 : index
      %12 = vector.load %arg22[%c0_10, %c0_11] : memref<10x8xf32, #tpu.memory_space<vmem>>, vector<10x8xf32>
      %cst_12 = arith.constant dense<0.000000e+00> : vector<10x32xf32>
      %13 = tpu.matmul %12, %8, %cst_12 {dimension_numbers = #tpu.dot_dimension_numbers<[1], [0], [0], [1], [0, 0, 1, 1], [], []>} : vector<10x8xf32>, vector<8x32xf32>, vector<10x32xf32> -> vector<10x32xf32>
      %14 = arith.addf %11, %13 : vector<10x32xf32>
      %c0_13 = arith.constant 0 : index
      %c0_14 = arith.constant 0 : index
      %15 = vector.load %arg26[%c0_13, %c0_14] : memref<1x32xf32, #tpu.memory_space<vmem>>, vector<1x32xf32>
      %c0_15 = arith.constant 0 : index
      %c0_16 = arith.constant 0 : index
      %16 = vector.load %arg27[%c0_15, %c0_16] : memref<1x32xf32, #tpu.memory_space<vmem>>, vector<1x32xf32>
      %cst_17 = arith.constant dense<0.000000e+00> : vector<10xf32>
      %17 = vector.multi_reduction <add>, %14, %cst_17 [1] : vector<10x32xf32> to vector<10xf32>
      %18 = vector.shape_cast %17 : vector<10xf32> to vector<10x1xf32>
      %cst_18 = arith.constant 3.200000e+01 : f32
      %19 = vector.broadcast %cst_18 : f32 to vector<10x1xf32>
      %20 = arith.divf %18, %19 : vector<10x1xf32>
      %21 = vector.broadcast %20 : vector<10x1xf32> to vector<10x32xf32>
      %22 = arith.subf %14, %21 : vector<10x32xf32>
      %23 = arith.mulf %22, %22 : vector<10x32xf32>
      %cst_19 = arith.constant dense<0.000000e+00> : vector<10xf32>
      %24 = vector.multi_reduction <add>, %23, %cst_19 [1] : vector<10x32xf32> to vector<10xf32>
      %25 = vector.shape_cast %24 : vector<10xf32> to vector<10x1xf32>
      %cst_20 = arith.constant 3.200000e+01 : f32
      %26 = vector.broadcast %cst_20 : f32 to vector<10x1xf32>
      %27 = arith.divf %25, %26 : vector<10x1xf32>
      %28 = vector.broadcast %20 : vector<10x1xf32> to vector<10x32xf32>
      %29 = arith.subf %14, %28 : vector<10x32xf32>
      %cst_21 = arith.constant 9.99999974E-6 : f32
      %30 = vector.broadcast %cst_21 : f32 to vector<10x1xf32>
      %31 = arith.addf %27, %30 : vector<10x1xf32>
      %32 = math.rsqrt %31 : vector<10x1xf32>
      %33 = vector.broadcast %32 : vector<10x1xf32> to vector<10x32xf32>
      %34 = arith.mulf %29, %33 : vector<10x32xf32>
      %35 = vector.broadcast %15 : vector<1x32xf32> to vector<10x32xf32>
      %36 = arith.mulf %34, %35 : vector<10x32xf32>
      %37 = vector.broadcast %16 : vector<1x32xf32> to vector<10x32xf32>
      %38 = arith.addf %36, %37 : vector<10x32xf32>
      %c0_22 = arith.constant 0 : index
      %c0_23 = arith.constant 0 : index
      %39 = vector.load %arg23[%c0_22, %c0_23] : memref<10x10xf32, #tpu.memory_space<vmem>>, vector<10x10xf32>
      %c0_24 = arith.constant 0 : index
      %c0_25 = arith.constant 0 : index
      %c0_26 = arith.constant 0 : index
      %40 = vector.load %arg28[%c0_24, %c0_25, %c0_26] : memref<2x1x32xf32, #tpu.memory_space<vmem>>, vector<1x1x32xf32>
      %41 = vector.shape_cast %40 : vector<1x1x32xf32> to vector<1x32xf32>
      %c0_27 = arith.constant 0 : index
      %c0_28 = arith.constant 0 : index
      %c0_29 = arith.constant 0 : index
      %42 = vector.load %arg29[%c0_27, %c0_28, %c0_29] : memref<2x1x32xf32, #tpu.memory_space<vmem>>, vector<1x1x32xf32>
      %43 = vector.shape_cast %42 : vector<1x1x32xf32> to vector<1x32xf32>
      %cst_30 = arith.constant dense<0.000000e+00> : vector<10xf32>
      %44 = vector.multi_reduction <add>, %38, %cst_30 [1] : vector<10x32xf32> to vector<10xf32>
      %45 = vector.shape_cast %44 : vector<10xf32> to vector<10x1xf32>
      %cst_31 = arith.constant 3.200000e+01 : f32
      %46 = vector.broadcast %cst_31 : f32 to vector<10x1xf32>
      %47 = arith.divf %45, %46 : vector<10x1xf32>
      %48 = vector.broadcast %47 : vector<10x1xf32> to vector<10x32xf32>
      %49 = arith.subf %38, %48 : vector<10x32xf32>
      %50 = arith.mulf %49, %49 : vector<10x32xf32>
      %cst_32 = arith.constant dense<0.000000e+00> : vector<10xf32>
      %51 = vector.multi_reduction <add>, %50, %cst_32 [1] : vector<10x32xf32> to vector<10xf32>
      %52 = vector.shape_cast %51 : vector<10xf32> to vector<10x1xf32>
      %cst_33 = arith.constant 3.200000e+01 : f32
      %53 = vector.broadcast %cst_33 : f32 to vector<10x1xf32>
      %54 = arith.divf %52, %53 : vector<10x1xf32>
      %55 = vector.broadcast %47 : vector<10x1xf32> to vector<10x32xf32>
      %56 = arith.subf %38, %55 : vector<10x32xf32>
      %cst_34 = arith.constant 9.99999974E-6 : f32
      %57 = vector.broadcast %cst_34 : f32 to vector<10x1xf32>
      %58 = arith.addf %54, %57 : vector<10x1xf32>
      %59 = math.rsqrt %58 : vector<10x1xf32>
      %60 = vector.broadcast %59 : vector<10x1xf32> to vector<10x32xf32>
      %61 = arith.mulf %56, %60 : vector<10x32xf32>
      %62 = vector.broadcast %41 : vector<1x32xf32> to vector<10x32xf32>
      %63 = arith.mulf %61, %62 : vector<10x32xf32>
      %64 = vector.broadcast %43 : vector<1x32xf32> to vector<10x32xf32>
      %65 = arith.addf %63, %64 : vector<10x32xf32>
      %c0_35 = arith.constant 0 : index
      %c0_36 = arith.constant 0 : index
      %c0_37 = arith.constant 0 : index
      %66 = vector.load %arg30[%c0_35, %c0_36, %c0_37] : memref<2x32x96xf32, #tpu.memory_space<vmem>>, vector<1x32x96xf32>
      %67 = vector.shape_cast %66 : vector<1x32x96xf32> to vector<32x96xf32>
      %cst_38 = arith.constant dense<0.000000e+00> : vector<10x96xf32>
      %68 = tpu.matmul %65, %67, %cst_38 {dimension_numbers = #tpu.dot_dimension_numbers<[1], [0], [0], [1], [0, 0, 1, 1], [], []>} : vector<10x32xf32>, vector<32x96xf32>, vector<10x96xf32> -> vector<10x96xf32>
      %c0_39 = arith.constant 0 : index
      %c0_40 = arith.constant 0 : index
      %c0_41 = arith.constant 0 : index
      %69 = vector.load %arg31[%c0_39, %c0_40, %c0_41] : memref<2x1x96xf32, #tpu.memory_space<vmem>>, vector<1x1x96xf32>
      %70 = vector.shape_cast %69 : vector<1x1x96xf32> to vector<1x96xf32>
      %71 = vector.broadcast %70 : vector<1x96xf32> to vector<10x96xf32>
      %72 = arith.addf %68, %71 : vector<10x96xf32>
      %73 = vector.extract_strided_slice %72 {offsets = [0, 0], sizes = [10, 8], strides = [1, 1]} : vector<10x96xf32> to vector<10x8xf32>
      %74 = vector.extract_strided_slice %72 {offsets = [0, 32], sizes = [10, 8], strides = [1, 1]} : vector<10x96xf32> to vector<10x8xf32>
      %75 = vector.extract_strided_slice %72 {offsets = [0, 64], sizes = [10, 8], strides = [1, 1]} : vector<10x96xf32> to vector<10x8xf32>
      %cst_42 = arith.constant dense<0.000000e+00> : vector<10x10xf32>
      %76 = tpu.matmul %73, %74, %cst_42 {dimension_numbers = #tpu.dot_dimension_numbers<[1], [1], [0], [0], [0, 0, 1, 0], [], []>} : vector<10x8xf32>, vector<10x8xf32>, vector<10x10xf32> -> vector<10x10xf32>
      %cst_43 = arith.constant 0.353553385 : f32
      %77 = vector.broadcast %cst_43 : f32 to vector<10x10xf32>
      %78 = arith.mulf %76, %77 : vector<10x10xf32>
      %79 = arith.addf %78, %39 : vector<10x10xf32>
      %cst_44 = arith.constant dense<0xFF800000> : vector<10xf32>
      %80 = vector.multi_reduction <maximumf>, %79, %cst_44 [1] : vector<10x10xf32> to vector<10xf32>
      %81 = vector.shape_cast %80 : vector<10xf32> to vector<10x1xf32>
      %82 = vector.broadcast %81 : vector<10x1xf32> to vector<10x10xf32>
      %83 = arith.subf %79, %82 : vector<10x10xf32>
      %84 = math.exp %83 : vector<10x10xf32>
      %cst_45 = arith.constant dense<0.000000e+00> : vector<10xf32>
      %85 = vector.multi_reduction <add>, %84, %cst_45 [1] : vector<10x10xf32> to vector<10xf32>
      %86 = vector.shape_cast %85 : vector<10xf32> to vector<10x1xf32>
      %87 = tpu.reciprocal %86 {approx = true} : vector<10x1xf32> -> vector<10x1xf32>
      %88 = vector.broadcast %87 : vector<10x1xf32> to vector<10x10xf32>
      %89 = arith.mulf %84, %88 : vector<10x10xf32>
      %cst_46 = arith.constant dense<0.000000e+00> : vector<10x8xf32>
      %90 = tpu.matmul %89, %75, %cst_46 {dimension_numbers = #tpu.dot_dimension_numbers<[1], [0], [0], [1], [0, 0, 1, 1], [], []>} : vector<10x10xf32>, vector<10x8xf32>, vector<10x8xf32> -> vector<10x8xf32>
      %91 = vector.extract_strided_slice %72 {offsets = [0, 8], sizes = [10, 8], strides = [1, 1]} : vector<10x96xf32> to vector<10x8xf32>
      %92 = vector.extract_strided_slice %72 {offsets = [0, 40], sizes = [10, 8], strides = [1, 1]} : vector<10x96xf32> to vector<10x8xf32>
      %93 = vector.extract_strided_slice %72 {offsets = [0, 72], sizes = [10, 8], strides = [1, 1]} : vector<10x96xf32> to vector<10x8xf32>
      %cst_47 = arith.constant dense<0.000000e+00> : vector<10x10xf32>
      %94 = tpu.matmul %91, %92, %cst_47 {dimension_numbers = #tpu.dot_dimension_numbers<[1], [1], [0], [0], [0, 0, 1, 0], [], []>} : vector<10x8xf32>, vector<10x8xf32>, vector<10x10xf32> -> vector<10x10xf32>
      %cst_48 = arith.constant 0.353553385 : f32
      %95 = vector.broadcast %cst_48 : f32 to vector<10x10xf32>
      %96 = arith.mulf %94, %95 : vector<10x10xf32>
      %97 = arith.addf %96, %39 : vector<10x10xf32>
      %cst_49 = arith.constant dense<0xFF800000> : vector<10xf32>
      %98 = vector.multi_reduction <maximumf>, %97, %cst_49 [1] : vector<10x10xf32> to vector<10xf32>
      %99 = vector.shape_cast %98 : vector<10xf32> to vector<10x1xf32>
      %100 = vector.broadcast %99 : vector<10x1xf32> to vector<10x10xf32>
      %101 = arith.subf %97, %100 : vector<10x10xf32>
      %102 = math.exp %101 : vector<10x10xf32>
      %cst_50 = arith.constant dense<0.000000e+00> : vector<10xf32>
      %103 = vector.multi_reduction <add>, %102, %cst_50 [1] : vector<10x10xf32> to vector<10xf32>
      %104 = vector.shape_cast %103 : vector<10xf32> to vector<10x1xf32>
      %105 = tpu.reciprocal %104 {approx = true} : vector<10x1xf32> -> vector<10x1xf32>
      %106 = vector.broadcast %105 : vector<10x1xf32> to vector<10x10xf32>
      %107 = arith.mulf %102, %106 : vector<10x10xf32>
      %cst_51 = arith.constant dense<0.000000e+00> : vector<10x8xf32>
      %108 = tpu.matmul %107, %93, %cst_51 {dimension_numbers = #tpu.dot_dimension_numbers<[1], [0], [0], [1], [0, 0, 1, 1], [], []>} : vector<10x10xf32>, vector<10x8xf32>, vector<10x8xf32> -> vector<10x8xf32>
      %109 = vector.extract_strided_slice %72 {offsets = [0, 16], sizes = [10, 8], strides = [1, 1]} : vector<10x96xf32> to vector<10x8xf32>
      %110 = vector.extract_strided_slice %72 {offsets = [0, 48], sizes = [10, 8], strides = [1, 1]} : vector<10x96xf32> to vector<10x8xf32>
      %111 = vector.extract_strided_slice %72 {offsets = [0, 80], sizes = [10, 8], strides = [1, 1]} : vector<10x96xf32> to vector<10x8xf32>
      %cst_52 = arith.constant dense<0.000000e+00> : vector<10x10xf32>
      %112 = tpu.matmul %109, %110, %cst_52 {dimension_numbers = #tpu.dot_dimension_numbers<[1], [1], [0], [0], [0, 0, 1, 0], [], []>} : vector<10x8xf32>, vector<10x8xf32>, vector<10x10xf32> -> vector<10x10xf32>
      %cst_53 = arith.constant 0.353553385 : f32
      %113 = vector.broadcast %cst_53 : f32 to vector<10x10xf32>
      %114 = arith.mulf %112, %113 : vector<10x10xf32>
      %115 = arith.addf %114, %39 : vector<10x10xf32>
      %cst_54 = arith.constant dense<0xFF800000> : vector<10xf32>
      %116 = vector.multi_reduction <maximumf>, %115, %cst_54 [1] : vector<10x10xf32> to vector<10xf32>
      %117 = vector.shape_cast %116 : vector<10xf32> to vector<10x1xf32>
      %118 = vector.broadcast %117 : vector<10x1xf32> to vector<10x10xf32>
      %119 = arith.subf %115, %118 : vector<10x10xf32>
      %120 = math.exp %119 : vector<10x10xf32>
      %cst_55 = arith.constant dense<0.000000e+00> : vector<10xf32>
      %121 = vector.multi_reduction <add>, %120, %cst_55 [1] : vector<10x10xf32> to vector<10xf32>
      %122 = vector.shape_cast %121 : vector<10xf32> to vector<10x1xf32>
      %123 = tpu.reciprocal %122 {approx = true} : vector<10x1xf32> -> vector<10x1xf32>
      %124 = vector.broadcast %123 : vector<10x1xf32> to vector<10x10xf32>
      %125 = arith.mulf %120, %124 : vector<10x10xf32>
      %cst_56 = arith.constant dense<0.000000e+00> : vector<10x8xf32>
      %126 = tpu.matmul %125, %111, %cst_56 {dimension_numbers = #tpu.dot_dimension_numbers<[1], [0], [0], [1], [0, 0, 1, 1], [], []>} : vector<10x10xf32>, vector<10x8xf32>, vector<10x8xf32> -> vector<10x8xf32>
      %127 = vector.extract_strided_slice %72 {offsets = [0, 24], sizes = [10, 8], strides = [1, 1]} : vector<10x96xf32> to vector<10x8xf32>
      %128 = vector.extract_strided_slice %72 {offsets = [0, 56], sizes = [10, 8], strides = [1, 1]} : vector<10x96xf32> to vector<10x8xf32>
      %129 = vector.extract_strided_slice %72 {offsets = [0, 88], sizes = [10, 8], strides = [1, 1]} : vector<10x96xf32> to vector<10x8xf32>
      %cst_57 = arith.constant dense<0.000000e+00> : vector<10x10xf32>
      %130 = tpu.matmul %127, %128, %cst_57 {dimension_numbers = #tpu.dot_dimension_numbers<[1], [1], [0], [0], [0, 0, 1, 0], [], []>} : vector<10x8xf32>, vector<10x8xf32>, vector<10x10xf32> -> vector<10x10xf32>
      %cst_58 = arith.constant 0.353553385 : f32
      %131 = vector.broadcast %cst_58 : f32 to vector<10x10xf32>
      %132 = arith.mulf %130, %131 : vector<10x10xf32>
      %133 = arith.addf %132, %39 : vector<10x10xf32>
      %cst_59 = arith.constant dense<0xFF800000> : vector<10xf32>
      %134 = vector.multi_reduction <maximumf>, %133, %cst_59 [1] : vector<10x10xf32> to vector<10xf32>
      %135 = vector.shape_cast %134 : vector<10xf32> to vector<10x1xf32>
      %136 = vector.broadcast %135 : vector<10x1xf32> to vector<10x10xf32>
      %137 = arith.subf %133, %136 : vector<10x10xf32>
      %138 = math.exp %137 : vector<10x10xf32>
      %cst_60 = arith.constant dense<0.000000e+00> : vector<10xf32>
      %139 = vector.multi_reduction <add>, %138, %cst_60 [1] : vector<10x10xf32> to vector<10xf32>
      %140 = vector.shape_cast %139 : vector<10xf32> to vector<10x1xf32>
      %141 = tpu.reciprocal %140 {approx = true} : vector<10x1xf32> -> vector<10x1xf32>
      %142 = vector.broadcast %141 : vector<10x1xf32> to vector<10x10xf32>
      %143 = arith.mulf %138, %142 : vector<10x10xf32>
      %cst_61 = arith.constant dense<0.000000e+00> : vector<10x8xf32>
      %144 = tpu.matmul %143, %129, %cst_61 {dimension_numbers = #tpu.dot_dimension_numbers<[1], [0], [0], [1], [0, 0, 1, 1], [], []>} : vector<10x10xf32>, vector<10x8xf32>, vector<10x8xf32> -> vector<10x8xf32>
      %145 = tpu.concatenate %90, %108, %126, %144 in 1 : vector<10x8xf32>, vector<10x8xf32>, vector<10x8xf32>, vector<10x8xf32> -> vector<10x32xf32>
      %c0_62 = arith.constant 0 : index
      %c0_63 = arith.constant 0 : index
      %c0_64 = arith.constant 0 : index
      %146 = vector.load %arg32[%c0_62, %c0_63, %c0_64] : memref<2x32x32xf32, #tpu.memory_space<vmem>>, vector<1x32x32xf32>
      %147 = vector.shape_cast %146 : vector<1x32x32xf32> to vector<32x32xf32>
      %cst_65 = arith.constant dense<0.000000e+00> : vector<10x32xf32>
      %148 = tpu.matmul %145, %147, %cst_65 {dimension_numbers = #tpu.dot_dimension_numbers<[1], [0], [0], [1], [0, 0, 1, 1], [], []>} : vector<10x32xf32>, vector<32x32xf32>, vector<10x32xf32> -> vector<10x32xf32>
      %149 = arith.addf %38, %148 : vector<10x32xf32>
      %c0_66 = arith.constant 0 : index
      %c0_67 = arith.constant 0 : index
      %c0_68 = arith.constant 0 : index
      %150 = vector.load %arg33[%c0_66, %c0_67, %c0_68] : memref<2x1x32xf32, #tpu.memory_space<vmem>>, vector<1x1x32xf32>
      %151 = vector.shape_cast %150 : vector<1x1x32xf32> to vector<1x32xf32>
      %152 = vector.broadcast %151 : vector<1x32xf32> to vector<10x32xf32>
      %153 = arith.addf %149, %152 : vector<10x32xf32>
      %c0_69 = arith.constant 0 : index
      %c0_70 = arith.constant 0 : index
      %c0_71 = arith.constant 0 : index
      %154 = vector.load %arg34[%c0_69, %c0_70, %c0_71] : memref<2x1x32xf32, #tpu.memory_space<vmem>>, vector<1x1x32xf32>
      %155 = vector.shape_cast %154 : vector<1x1x32xf32> to vector<1x32xf32>
      %c0_72 = arith.constant 0 : index
      %c0_73 = arith.constant 0 : index
      %c0_74 = arith.constant 0 : index
      %156 = vector.load %arg35[%c0_72, %c0_73, %c0_74] : memref<2x1x32xf32, #tpu.memory_space<vmem>>, vector<1x1x32xf32>
      %157 = vector.shape_cast %156 : vector<1x1x32xf32> to vector<1x32xf32>
      %cst_75 = arith.constant dense<0.000000e+00> : vector<10xf32>
      %158 = vector.multi_reduction <add>, %153, %cst_75 [1] : vector<10x32xf32> to vector<10xf32>
      %159 = vector.shape_cast %158 : vector<10xf32> to vector<10x1xf32>
      %cst_76 = arith.constant 3.200000e+01 : f32
      %160 = vector.broadcast %cst_76 : f32 to vector<10x1xf32>
      %161 = arith.divf %159, %160 : vector<10x1xf32>
      %162 = vector.broadcast %161 : vector<10x1xf32> to vector<10x32xf32>
      %163 = arith.subf %153, %162 : vector<10x32xf32>
      %164 = arith.mulf %163, %163 : vector<10x32xf32>
      %cst_77 = arith.constant dense<0.000000e+00> : vector<10xf32>
      %165 = vector.multi_reduction <add>, %164, %cst_77 [1] : vector<10x32xf32> to vector<10xf32>
      %166 = vector.shape_cast %165 : vector<10xf32> to vector<10x1xf32>
      %cst_78 = arith.constant 3.200000e+01 : f32
      %167 = vector.broadcast %cst_78 : f32 to vector<10x1xf32>
      %168 = arith.divf %166, %167 : vector<10x1xf32>
      %169 = vector.broadcast %161 : vector<10x1xf32> to vector<10x32xf32>
      %170 = arith.subf %153, %169 : vector<10x32xf32>
      %cst_79 = arith.constant 9.99999974E-6 : f32
      %171 = vector.broadcast %cst_79 : f32 to vector<10x1xf32>
      %172 = arith.addf %168, %171 : vector<10x1xf32>
      %173 = math.rsqrt %172 : vector<10x1xf32>
      %174 = vector.broadcast %173 : vector<10x1xf32> to vector<10x32xf32>
      %175 = arith.mulf %170, %174 : vector<10x32xf32>
      %176 = vector.broadcast %155 : vector<1x32xf32> to vector<10x32xf32>
      %177 = arith.mulf %175, %176 : vector<10x32xf32>
      %178 = vector.broadcast %157 : vector<1x32xf32> to vector<10x32xf32>
      %179 = arith.addf %177, %178 : vector<10x32xf32>
      %c0_80 = arith.constant 0 : index
      %c0_81 = arith.constant 0 : index
      %c0_82 = arith.constant 0 : index
      %180 = vector.load %arg36[%c0_80, %c0_81, %c0_82] : memref<2x32x64xf32, #tpu.memory_space<vmem>>, vector<1x32x64xf32>
      %181 = vector.shape_cast %180 : vector<1x32x64xf32> to vector<32x64xf32>
      %cst_83 = arith.constant dense<0.000000e+00> : vector<10x64xf32>
      %182 = tpu.matmul %179, %181, %cst_83 {dimension_numbers = #tpu.dot_dimension_numbers<[1], [0], [0], [1], [0, 0, 1, 1], [], []>} : vector<10x32xf32>, vector<32x64xf32>, vector<10x64xf32> -> vector<10x64xf32>
      %c0_84 = arith.constant 0 : index
      %c0_85 = arith.constant 0 : index
      %c0_86 = arith.constant 0 : index
      %183 = vector.load %arg37[%c0_84, %c0_85, %c0_86] : memref<2x1x64xf32, #tpu.memory_space<vmem>>, vector<1x1x64xf32>
      %184 = vector.shape_cast %183 : vector<1x1x64xf32> to vector<1x64xf32>
      %185 = vector.broadcast %184 : vector<1x64xf32> to vector<10x64xf32>
      %186 = arith.addf %182, %185 : vector<10x64xf32>
      %cst_87 = arith.constant 1.702000e+00 : f32
      %187 = vector.broadcast %cst_87 : f32 to vector<10x64xf32>
      %188 = arith.mulf %187, %186 : vector<10x64xf32>
      %189 = arith.negf %188 : vector<10x64xf32>
      %190 = math.exp %189 : vector<10x64xf32>
      %cst_88 = arith.constant 1.000000e+00 : f32
      %191 = vector.broadcast %cst_88 : f32 to vector<10x64xf32>
      %192 = arith.addf %191, %190 : vector<10x64xf32>
      %193 = arith.divf %191, %192 : vector<10x64xf32>
      %194 = arith.mulf %186, %193 : vector<10x64xf32>
      %c0_89 = arith.constant 0 : index
      %c0_90 = arith.constant 0 : index
      %c0_91 = arith.constant 0 : index
      %195 = vector.load %arg38[%c0_89, %c0_90, %c0_91] : memref<2x64x32xf32, #tpu.memory_space<vmem>>, vector<1x64x32xf32>
      %196 = vector.shape_cast %195 : vector<1x64x32xf32> to vector<64x32xf32>
      %cst_92 = arith.constant dense<0.000000e+00> : vector<10x32xf32>
      %197 = tpu.matmul %194, %196, %cst_92 {dimension_numbers = #tpu.dot_dimension_numbers<[1], [0], [0], [1], [0, 0, 1, 1], [], []>} : vector<10x64xf32>, vector<64x32xf32>, vector<10x32xf32> -> vector<10x32xf32>
      %c0_93 = arith.constant 0 : index
      %c0_94 = arith.constant 0 : index
      %c0_95 = arith.constant 0 : index
      %198 = vector.load %arg39[%c0_93, %c0_94, %c0_95] : memref<2x1x32xf32, #tpu.memory_space<vmem>>, vector<1x1x32xf32>
      %199 = vector.shape_cast %198 : vector<1x1x32xf32> to vector<1x32xf32>
      %200 = vector.broadcast %199 : vector<1x32xf32> to vector<10x32xf32>
      %201 = arith.addf %197, %200 : vector<10x32xf32>
      %202 = arith.addf %153, %201 : vector<10x32xf32>
      %c1 = arith.constant 1 : index
      %c0_96 = arith.constant 0 : index
      %c0_97 = arith.constant 0 : index
      %203 = vector.load %arg28[%c1, %c0_96, %c0_97] : memref<2x1x32xf32, #tpu.memory_space<vmem>>, vector<1x1x32xf32>
      %204 = vector.shape_cast %203 : vector<1x1x32xf32> to vector<1x32xf32>
      %c1_98 = arith.constant 1 : index
      %c0_99 = arith.constant 0 : index
      %c0_100 = arith.constant 0 : index
      %205 = vector.load %arg29[%c1_98, %c0_99, %c0_100] : memref<2x1x32xf32, #tpu.memory_space<vmem>>, vector<1x1x32xf32>
      %206 = vector.shape_cast %205 : vector<1x1x32xf32> to vector<1x32xf32>
      %cst_101 = arith.constant dense<0.000000e+00> : vector<10xf32>
      %207 = vector.multi_reduction <add>, %202, %cst_101 [1] : vector<10x32xf32> to vector<10xf32>
      %208 = vector.shape_cast %207 : vector<10xf32> to vector<10x1xf32>
      %cst_102 = arith.constant 3.200000e+01 : f32
      %209 = vector.broadcast %cst_102 : f32 to vector<10x1xf32>
      %210 = arith.divf %208, %209 : vector<10x1xf32>
      %211 = vector.broadcast %210 : vector<10x1xf32> to vector<10x32xf32>
      %212 = arith.subf %202, %211 : vector<10x32xf32>
      %213 = arith.mulf %212, %212 : vector<10x32xf32>
      %cst_103 = arith.constant dense<0.000000e+00> : vector<10xf32>
      %214 = vector.multi_reduction <add>, %213, %cst_103 [1] : vector<10x32xf32> to vector<10xf32>
      %215 = vector.shape_cast %214 : vector<10xf32> to vector<10x1xf32>
      %cst_104 = arith.constant 3.200000e+01 : f32
      %216 = vector.broadcast %cst_104 : f32 to vector<10x1xf32>
      %217 = arith.divf %215, %216 : vector<10x1xf32>
      %218 = vector.broadcast %210 : vector<10x1xf32> to vector<10x32xf32>
      %219 = arith.subf %202, %218 : vector<10x32xf32>
      %cst_105 = arith.constant 9.99999974E-6 : f32
      %220 = vector.broadcast %cst_105 : f32 to vector<10x1xf32>
      %221 = arith.addf %217, %220 : vector<10x1xf32>
      %222 = math.rsqrt %221 : vector<10x1xf32>
      %223 = vector.broadcast %222 : vector<10x1xf32> to vector<10x32xf32>
      %224 = arith.mulf %219, %223 : vector<10x32xf32>
      %225 = vector.broadcast %204 : vector<1x32xf32> to vector<10x32xf32>
      %226 = arith.mulf %224, %225 : vector<10x32xf32>
      %227 = vector.broadcast %206 : vector<1x32xf32> to vector<10x32xf32>
      %228 = arith.addf %226, %227 : vector<10x32xf32>
      %c1_106 = arith.constant 1 : index
      %c0_107 = arith.constant 0 : index
      %c0_108 = arith.constant 0 : index
      %229 = vector.load %arg30[%c1_106, %c0_107, %c0_108] : memref<2x32x96xf32, #tpu.memory_space<vmem>>, vector<1x32x96xf32>
      %230 = vector.shape_cast %229 : vector<1x32x96xf32> to vector<32x96xf32>
      %cst_109 = arith.constant dense<0.000000e+00> : vector<10x96xf32>
      %231 = tpu.matmul %228, %230, %cst_109 {dimension_numbers = #tpu.dot_dimension_numbers<[1], [0], [0], [1], [0, 0, 1, 1], [], []>} : vector<10x32xf32>, vector<32x96xf32>, vector<10x96xf32> -> vector<10x96xf32>
      %c1_110 = arith.constant 1 : index
      %c0_111 = arith.constant 0 : index
      %c0_112 = arith.constant 0 : index
      %232 = vector.load %arg31[%c1_110, %c0_111, %c0_112] : memref<2x1x96xf32, #tpu.memory_space<vmem>>, vector<1x1x96xf32>
      %233 = vector.shape_cast %232 : vector<1x1x96xf32> to vector<1x96xf32>
      %234 = vector.broadcast %233 : vector<1x96xf32> to vector<10x96xf32>
      %235 = arith.addf %231, %234 : vector<10x96xf32>
      %236 = vector.extract_strided_slice %235 {offsets = [0, 0], sizes = [10, 8], strides = [1, 1]} : vector<10x96xf32> to vector<10x8xf32>
      %237 = vector.extract_strided_slice %235 {offsets = [0, 32], sizes = [10, 8], strides = [1, 1]} : vector<10x96xf32> to vector<10x8xf32>
      %238 = vector.extract_strided_slice %235 {offsets = [0, 64], sizes = [10, 8], strides = [1, 1]} : vector<10x96xf32> to vector<10x8xf32>
      %cst_113 = arith.constant dense<0.000000e+00> : vector<10x10xf32>
      %239 = tpu.matmul %236, %237, %cst_113 {dimension_numbers = #tpu.dot_dimension_numbers<[1], [1], [0], [0], [0, 0, 1, 0], [], []>} : vector<10x8xf32>, vector<10x8xf32>, vector<10x10xf32> -> vector<10x10xf32>
      %cst_114 = arith.constant 0.353553385 : f32
      %240 = vector.broadcast %cst_114 : f32 to vector<10x10xf32>
      %241 = arith.mulf %239, %240 : vector<10x10xf32>
      %242 = arith.addf %241, %39 : vector<10x10xf32>
      %cst_115 = arith.constant dense<0xFF800000> : vector<10xf32>
      %243 = vector.multi_reduction <maximumf>, %242, %cst_115 [1] : vector<10x10xf32> to vector<10xf32>
      %244 = vector.shape_cast %243 : vector<10xf32> to vector<10x1xf32>
      %245 = vector.broadcast %244 : vector<10x1xf32> to vector<10x10xf32>
      %246 = arith.subf %242, %245 : vector<10x10xf32>
      %247 = math.exp %246 : vector<10x10xf32>
      %cst_116 = arith.constant dense<0.000000e+00> : vector<10xf32>
      %248 = vector.multi_reduction <add>, %247, %cst_116 [1] : vector<10x10xf32> to vector<10xf32>
      %249 = vector.shape_cast %248 : vector<10xf32> to vector<10x1xf32>
      %250 = tpu.reciprocal %249 {approx = true} : vector<10x1xf32> -> vector<10x1xf32>
      %251 = vector.broadcast %250 : vector<10x1xf32> to vector<10x10xf32>
      %252 = arith.mulf %247, %251 : vector<10x10xf32>
      %cst_117 = arith.constant dense<0.000000e+00> : vector<10x8xf32>
      %253 = tpu.matmul %252, %238, %cst_117 {dimension_numbers = #tpu.dot_dimension_numbers<[1], [0], [0], [1], [0, 0, 1, 1], [], []>} : vector<10x10xf32>, vector<10x8xf32>, vector<10x8xf32> -> vector<10x8xf32>
      %254 = vector.extract_strided_slice %235 {offsets = [0, 8], sizes = [10, 8], strides = [1, 1]} : vector<10x96xf32> to vector<10x8xf32>
      %255 = vector.extract_strided_slice %235 {offsets = [0, 40], sizes = [10, 8], strides = [1, 1]} : vector<10x96xf32> to vector<10x8xf32>
      %256 = vector.extract_strided_slice %235 {offsets = [0, 72], sizes = [10, 8], strides = [1, 1]} : vector<10x96xf32> to vector<10x8xf32>
      %cst_118 = arith.constant dense<0.000000e+00> : vector<10x10xf32>
      %257 = tpu.matmul %254, %255, %cst_118 {dimension_numbers = #tpu.dot_dimension_numbers<[1], [1], [0], [0], [0, 0, 1, 0], [], []>} : vector<10x8xf32>, vector<10x8xf32>, vector<10x10xf32> -> vector<10x10xf32>
      %cst_119 = arith.constant 0.353553385 : f32
      %258 = vector.broadcast %cst_119 : f32 to vector<10x10xf32>
      %259 = arith.mulf %257, %258 : vector<10x10xf32>
      %260 = arith.addf %259, %39 : vector<10x10xf32>
      %cst_120 = arith.constant dense<0xFF800000> : vector<10xf32>
      %261 = vector.multi_reduction <maximumf>, %260, %cst_120 [1] : vector<10x10xf32> to vector<10xf32>
      %262 = vector.shape_cast %261 : vector<10xf32> to vector<10x1xf32>
      %263 = vector.broadcast %262 : vector<10x1xf32> to vector<10x10xf32>
      %264 = arith.subf %260, %263 : vector<10x10xf32>
      %265 = math.exp %264 : vector<10x10xf32>
      %cst_121 = arith.constant dense<0.000000e+00> : vector<10xf32>
      %266 = vector.multi_reduction <add>, %265, %cst_121 [1] : vector<10x10xf32> to vector<10xf32>
      %267 = vector.shape_cast %266 : vector<10xf32> to vector<10x1xf32>
      %268 = tpu.reciprocal %267 {approx = true} : vector<10x1xf32> -> vector<10x1xf32>
      %269 = vector.broadcast %268 : vector<10x1xf32> to vector<10x10xf32>
      %270 = arith.mulf %265, %269 : vector<10x10xf32>
      %cst_122 = arith.constant dense<0.000000e+00> : vector<10x8xf32>
      %271 = tpu.matmul %270, %256, %cst_122 {dimension_numbers = #tpu.dot_dimension_numbers<[1], [0], [0], [1], [0, 0, 1, 1], [], []>} : vector<10x10xf32>, vector<10x8xf32>, vector<10x8xf32> -> vector<10x8xf32>
      %272 = vector.extract_strided_slice %235 {offsets = [0, 16], sizes = [10, 8], strides = [1, 1]} : vector<10x96xf32> to vector<10x8xf32>
      %273 = vector.extract_strided_slice %235 {offsets = [0, 48], sizes = [10, 8], strides = [1, 1]} : vector<10x96xf32> to vector<10x8xf32>
      %274 = vector.extract_strided_slice %235 {offsets = [0, 80], sizes = [10, 8], strides = [1, 1]} : vector<10x96xf32> to vector<10x8xf32>
      %cst_123 = arith.constant dense<0.000000e+00> : vector<10x10xf32>
      %275 = tpu.matmul %272, %273, %cst_123 {dimension_numbers = #tpu.dot_dimension_numbers<[1], [1], [0], [0], [0, 0, 1, 0], [], []>} : vector<10x8xf32>, vector<10x8xf32>, vector<10x10xf32> -> vector<10x10xf32>
      %cst_124 = arith.constant 0.353553385 : f32
      %276 = vector.broadcast %cst_124 : f32 to vector<10x10xf32>
      %277 = arith.mulf %275, %276 : vector<10x10xf32>
      %278 = arith.addf %277, %39 : vector<10x10xf32>
      %cst_125 = arith.constant dense<0xFF800000> : vector<10xf32>
      %279 = vector.multi_reduction <maximumf>, %278, %cst_125 [1] : vector<10x10xf32> to vector<10xf32>
      %280 = vector.shape_cast %279 : vector<10xf32> to vector<10x1xf32>
      %281 = vector.broadcast %280 : vector<10x1xf32> to vector<10x10xf32>
      %282 = arith.subf %278, %281 : vector<10x10xf32>
      %283 = math.exp %282 : vector<10x10xf32>
      %cst_126 = arith.constant dense<0.000000e+00> : vector<10xf32>
      %284 = vector.multi_reduction <add>, %283, %cst_126 [1] : vector<10x10xf32> to vector<10xf32>
      %285 = vector.shape_cast %284 : vector<10xf32> to vector<10x1xf32>
      %286 = tpu.reciprocal %285 {approx = true} : vector<10x1xf32> -> vector<10x1xf32>
      %287 = vector.broadcast %286 : vector<10x1xf32> to vector<10x10xf32>
      %288 = arith.mulf %283, %287 : vector<10x10xf32>
      %cst_127 = arith.constant dense<0.000000e+00> : vector<10x8xf32>
      %289 = tpu.matmul %288, %274, %cst_127 {dimension_numbers = #tpu.dot_dimension_numbers<[1], [0], [0], [1], [0, 0, 1, 1], [], []>} : vector<10x10xf32>, vector<10x8xf32>, vector<10x8xf32> -> vector<10x8xf32>
      %290 = vector.extract_strided_slice %235 {offsets = [0, 24], sizes = [10, 8], strides = [1, 1]} : vector<10x96xf32> to vector<10x8xf32>
      %291 = vector.extract_strided_slice %235 {offsets = [0, 56], sizes = [10, 8], strides = [1, 1]} : vector<10x96xf32> to vector<10x8xf32>
      %292 = vector.extract_strided_slice %235 {offsets = [0, 88], sizes = [10, 8], strides = [1, 1]} : vector<10x96xf32> to vector<10x8xf32>
      %cst_128 = arith.constant dense<0.000000e+00> : vector<10x10xf32>
      %293 = tpu.matmul %290, %291, %cst_128 {dimension_numbers = #tpu.dot_dimension_numbers<[1], [1], [0], [0], [0, 0, 1, 0], [], []>} : vector<10x8xf32>, vector<10x8xf32>, vector<10x10xf32> -> vector<10x10xf32>
      %cst_129 = arith.constant 0.353553385 : f32
      %294 = vector.broadcast %cst_129 : f32 to vector<10x10xf32>
      %295 = arith.mulf %293, %294 : vector<10x10xf32>
      %296 = arith.addf %295, %39 : vector<10x10xf32>
      %cst_130 = arith.constant dense<0xFF800000> : vector<10xf32>
      %297 = vector.multi_reduction <maximumf>, %296, %cst_130 [1] : vector<10x10xf32> to vector<10xf32>
      %298 = vector.shape_cast %297 : vector<10xf32> to vector<10x1xf32>
      %299 = vector.broadcast %298 : vector<10x1xf32> to vector<10x10xf32>
      %300 = arith.subf %296, %299 : vector<10x10xf32>
      %301 = math.exp %300 : vector<10x10xf32>
      %cst_131 = arith.constant dense<0.000000e+00> : vector<10xf32>
      %302 = vector.multi_reduction <add>, %301, %cst_131 [1] : vector<10x10xf32> to vector<10xf32>
      %303 = vector.shape_cast %302 : vector<10xf32> to vector<10x1xf32>
      %304 = tpu.reciprocal %303 {approx = true} : vector<10x1xf32> -> vector<10x1xf32>
      %305 = vector.broadcast %304 : vector<10x1xf32> to vector<10x10xf32>
      %306 = arith.mulf %301, %305 : vector<10x10xf32>
      %cst_132 = arith.constant dense<0.000000e+00> : vector<10x8xf32>
      %307 = tpu.matmul %306, %292, %cst_132 {dimension_numbers = #tpu.dot_dimension_numbers<[1], [0], [0], [1], [0, 0, 1, 1], [], []>} : vector<10x10xf32>, vector<10x8xf32>, vector<10x8xf32> -> vector<10x8xf32>
      %308 = tpu.concatenate %253, %271, %289, %307 in 1 : vector<10x8xf32>, vector<10x8xf32>, vector<10x8xf32>, vector<10x8xf32> -> vector<10x32xf32>
      %c1_133 = arith.constant 1 : index
      %c0_134 = arith.constant 0 : index
      %c0_135 = arith.constant 0 : index
      %309 = vector.load %arg32[%c1_133, %c0_134, %c0_135] : memref<2x32x32xf32, #tpu.memory_space<vmem>>, vector<1x32x32xf32>
      %310 = vector.shape_cast %309 : vector<1x32x32xf32> to vector<32x32xf32>
      %cst_136 = arith.constant dense<0.000000e+00> : vector<10x32xf32>
      %311 = tpu.matmul %308, %310, %cst_136 {dimension_numbers = #tpu.dot_dimension_numbers<[1], [0], [0], [1], [0, 0, 1, 1], [], []>} : vector<10x32xf32>, vector<32x32xf32>, vector<10x32xf32> -> vector<10x32xf32>
      %312 = arith.addf %202, %311 : vector<10x32xf32>
      %c1_137 = arith.constant 1 : index
      %c0_138 = arith.constant 0 : index
      %c0_139 = arith.constant 0 : index
      %313 = vector.load %arg33[%c1_137, %c0_138, %c0_139] : memref<2x1x32xf32, #tpu.memory_space<vmem>>, vector<1x1x32xf32>
      %314 = vector.shape_cast %313 : vector<1x1x32xf32> to vector<1x32xf32>
      %315 = vector.broadcast %314 : vector<1x32xf32> to vector<10x32xf32>
      %316 = arith.addf %312, %315 : vector<10x32xf32>
      %c1_140 = arith.constant 1 : index
      %c0_141 = arith.constant 0 : index
      %c0_142 = arith.constant 0 : index
      %317 = vector.load %arg34[%c1_140, %c0_141, %c0_142] : memref<2x1x32xf32, #tpu.memory_space<vmem>>, vector<1x1x32xf32>
      %318 = vector.shape_cast %317 : vector<1x1x32xf32> to vector<1x32xf32>
      %c1_143 = arith.constant 1 : index
      %c0_144 = arith.constant 0 : index
      %c0_145 = arith.constant 0 : index
      %319 = vector.load %arg35[%c1_143, %c0_144, %c0_145] : memref<2x1x32xf32, #tpu.memory_space<vmem>>, vector<1x1x32xf32>
      %320 = vector.shape_cast %319 : vector<1x1x32xf32> to vector<1x32xf32>
      %cst_146 = arith.constant dense<0.000000e+00> : vector<10xf32>
      %321 = vector.multi_reduction <add>, %316, %cst_146 [1] : vector<10x32xf32> to vector<10xf32>
      %322 = vector.shape_cast %321 : vector<10xf32> to vector<10x1xf32>
      %cst_147 = arith.constant 3.200000e+01 : f32
      %323 = vector.broadcast %cst_147 : f32 to vector<10x1xf32>
      %324 = arith.divf %322, %323 : vector<10x1xf32>
      %325 = vector.broadcast %324 : vector<10x1xf32> to vector<10x32xf32>
      %326 = arith.subf %316, %325 : vector<10x32xf32>
      %327 = arith.mulf %326, %326 : vector<10x32xf32>
      %cst_148 = arith.constant dense<0.000000e+00> : vector<10xf32>
      %328 = vector.multi_reduction <add>, %327, %cst_148 [1] : vector<10x32xf32> to vector<10xf32>
      %329 = vector.shape_cast %328 : vector<10xf32> to vector<10x1xf32>
      %cst_149 = arith.constant 3.200000e+01 : f32
      %330 = vector.broadcast %cst_149 : f32 to vector<10x1xf32>
      %331 = arith.divf %329, %330 : vector<10x1xf32>
      %332 = vector.broadcast %324 : vector<10x1xf32> to vector<10x32xf32>
      %333 = arith.subf %316, %332 : vector<10x32xf32>
      %cst_150 = arith.constant 9.99999974E-6 : f32
      %334 = vector.broadcast %cst_150 : f32 to vector<10x1xf32>
      %335 = arith.addf %331, %334 : vector<10x1xf32>
      %336 = math.rsqrt %335 : vector<10x1xf32>
      %337 = vector.broadcast %336 : vector<10x1xf32> to vector<10x32xf32>
      %338 = arith.mulf %333, %337 : vector<10x32xf32>
      %339 = vector.broadcast %318 : vector<1x32xf32> to vector<10x32xf32>
      %340 = arith.mulf %338, %339 : vector<10x32xf32>
      %341 = vector.broadcast %320 : vector<1x32xf32> to vector<10x32xf32>
      %342 = arith.addf %340, %341 : vector<10x32xf32>
      %c1_151 = arith.constant 1 : index
      %c0_152 = arith.constant 0 : index
      %c0_153 = arith.constant 0 : index
      %343 = vector.load %arg36[%c1_151, %c0_152, %c0_153] : memref<2x32x64xf32, #tpu.memory_space<vmem>>, vector<1x32x64xf32>
      %344 = vector.shape_cast %343 : vector<1x32x64xf32> to vector<32x64xf32>
      %cst_154 = arith.constant dense<0.000000e+00> : vector<10x64xf32>
      %345 = tpu.matmul %342, %344, %cst_154 {dimension_numbers = #tpu.dot_dimension_numbers<[1], [0], [0], [1], [0, 0, 1, 1], [], []>} : vector<10x32xf32>, vector<32x64xf32>, vector<10x64xf32> -> vector<10x64xf32>
      %c1_155 = arith.constant 1 : index
      %c0_156 = arith.constant 0 : index
      %c0_157 = arith.constant 0 : index
      %346 = vector.load %arg37[%c1_155, %c0_156, %c0_157] : memref<2x1x64xf32, #tpu.memory_space<vmem>>, vector<1x1x64xf32>
      %347 = vector.shape_cast %346 : vector<1x1x64xf32> to vector<1x64xf32>
      %348 = vector.broadcast %347 : vector<1x64xf32> to vector<10x64xf32>
      %349 = arith.addf %345, %348 : vector<10x64xf32>
      %cst_158 = arith.constant 1.702000e+00 : f32
      %350 = vector.broadcast %cst_158 : f32 to vector<10x64xf32>
      %351 = arith.mulf %350, %349 : vector<10x64xf32>
      %352 = arith.negf %351 : vector<10x64xf32>
      %353 = math.exp %352 : vector<10x64xf32>
      %cst_159 = arith.constant 1.000000e+00 : f32
      %354 = vector.broadcast %cst_159 : f32 to vector<10x64xf32>
      %355 = arith.addf %354, %353 : vector<10x64xf32>
      %356 = arith.divf %354, %355 : vector<10x64xf32>
      %357 = arith.mulf %349, %356 : vector<10x64xf32>
      %c1_160 = arith.constant 1 : index
      %c0_161 = arith.constant 0 : index
      %c0_162 = arith.constant 0 : index
      %358 = vector.load %arg38[%c1_160, %c0_161, %c0_162] : memref<2x64x32xf32, #tpu.memory_space<vmem>>, vector<1x64x32xf32>
      %359 = vector.shape_cast %358 : vector<1x64x32xf32> to vector<64x32xf32>
      %cst_163 = arith.constant dense<0.000000e+00> : vector<10x32xf32>
      %360 = tpu.matmul %357, %359, %cst_163 {dimension_numbers = #tpu.dot_dimension_numbers<[1], [0], [0], [1], [0, 0, 1, 1], [], []>} : vector<10x64xf32>, vector<64x32xf32>, vector<10x32xf32> -> vector<10x32xf32>
      %c1_164 = arith.constant 1 : index
      %c0_165 = arith.constant 0 : index
      %c0_166 = arith.constant 0 : index
      %361 = vector.load %arg39[%c1_164, %c0_165, %c0_166] : memref<2x1x32xf32, #tpu.memory_space<vmem>>, vector<1x1x32xf32>
      %362 = vector.shape_cast %361 : vector<1x1x32xf32> to vector<1x32xf32>
      %363 = vector.broadcast %362 : vector<1x32xf32> to vector<10x32xf32>
      %364 = arith.addf %360, %363 : vector<10x32xf32>
      %365 = arith.addf %316, %364 : vector<10x32xf32>
      %c0_167 = arith.constant 0 : index
      %c0_168 = arith.constant 0 : index
      %366 = vector.load %arg24[%c0_167, %c0_168] : memref<2x10xf32, #tpu.memory_space<vmem>>, vector<2x10xf32>
      %cst_169 = arith.constant dense<0.000000e+00> : vector<2x32xf32>
      %367 = tpu.matmul %366, %365, %cst_169 {dimension_numbers = #tpu.dot_dimension_numbers<[1], [0], [0], [1], [0, 0, 1, 1], [], []>} : vector<2x10xf32>, vector<10x32xf32>, vector<2x32xf32> -> vector<2x32xf32>
      %c0_170 = arith.constant 0 : index
      %c0_171 = arith.constant 0 : index
      %368 = vector.load %arg40[%c0_170, %c0_171] : memref<1x32xf32, #tpu.memory_space<vmem>>, vector<1x32xf32>
      %c0_172 = arith.constant 0 : index
      %c0_173 = arith.constant 0 : index
      %369 = vector.load %arg41[%c0_172, %c0_173] : memref<1x32xf32, #tpu.memory_space<vmem>>, vector<1x32xf32>
      %cst_174 = arith.constant dense<0.000000e+00> : vector<2xf32>
      %370 = vector.multi_reduction <add>, %367, %cst_174 [1] : vector<2x32xf32> to vector<2xf32>
      %371 = vector.shape_cast %370 : vector<2xf32> to vector<2x1xf32>
      %cst_175 = arith.constant 3.200000e+01 : f32
      %372 = vector.broadcast %cst_175 : f32 to vector<2x1xf32>
      %373 = arith.divf %371, %372 : vector<2x1xf32>
      %374 = vector.broadcast %373 : vector<2x1xf32> to vector<2x32xf32>
      %375 = arith.subf %367, %374 : vector<2x32xf32>
      %376 = arith.mulf %375, %375 : vector<2x32xf32>
      %cst_176 = arith.constant dense<0.000000e+00> : vector<2xf32>
      %377 = vector.multi_reduction <add>, %376, %cst_176 [1] : vector<2x32xf32> to vector<2xf32>
      %378 = vector.shape_cast %377 : vector<2xf32> to vector<2x1xf32>
      %cst_177 = arith.constant 3.200000e+01 : f32
      %379 = vector.broadcast %cst_177 : f32 to vector<2x1xf32>
      %380 = arith.divf %378, %379 : vector<2x1xf32>
      %381 = vector.broadcast %373 : vector<2x1xf32> to vector<2x32xf32>
      %382 = arith.subf %367, %381 : vector<2x32xf32>
      %cst_178 = arith.constant 9.99999974E-6 : f32
      %383 = vector.broadcast %cst_178 : f32 to vector<2x1xf32>
      %384 = arith.addf %380, %383 : vector<2x1xf32>
      %385 = math.rsqrt %384 : vector<2x1xf32>
      %386 = vector.broadcast %385 : vector<2x1xf32> to vector<2x32xf32>
      %387 = arith.mulf %382, %386 : vector<2x32xf32>
      %388 = vector.broadcast %368 : vector<1x32xf32> to vector<2x32xf32>
      %389 = arith.mulf %387, %388 : vector<2x32xf32>
      %390 = vector.broadcast %369 : vector<1x32xf32> to vector<2x32xf32>
      %391 = arith.addf %389, %390 : vector<2x32xf32>
      %c0_179 = arith.constant 0 : index
      %c0_180 = arith.constant 0 : index
      %392 = vector.load %arg42[%c0_179, %c0_180] : memref<32x16xf32, #tpu.memory_space<vmem>>, vector<32x16xf32>
      %cst_181 = arith.constant dense<0.000000e+00> : vector<2x16xf32>
      %393 = tpu.matmul %391, %392, %cst_181 {dimension_numbers = #tpu.dot_dimension_numbers<[1], [0], [0], [1], [0, 0, 1, 1], [], []>} : vector<2x32xf32>, vector<32x16xf32>, vector<2x16xf32> -> vector<2x16xf32>
      %cst_182 = arith.constant 0.000000e+00 : f32
      %394 = vector.broadcast %cst_182 : f32 to vector<2x16xf32>
      %395 = tpu.concatenate %393, %394 in 0 : vector<2x16xf32>, vector<2x16xf32> -> vector<4x16xf32>
      %c0_183 = arith.constant 0 : index
      %c0_184 = arith.constant 0 : index
      %c0_185 = arith.constant 0 : index
      %396 = vector.load %arg43[%c0_183, %c0_184, %c0_185] : memref<1x4x16xf32, #tpu.memory_space<vmem>>, vector<1x4x16xf32>
      %397 = vector.shape_cast %396 : vector<1x4x16xf32> to vector<4x16xf32>
      %398 = vector.shape_cast %395 : vector<4x16xf32> to vector<1x4x16xf32>
      tpu.vector_store %arg43[%c0_183, %c0_184, %c0_185], %398 {strides = array<i32>} : memref<1x4x16xf32, #tpu.memory_space<vmem>>, vector<1x4x16xf32>,
    } else {
    }
    return
  }
  func.func @transform_0(%arg0: i32) -> (i32, i32) {
    %c0_i32 = arith.constant 0 : i32
    %c0_i32_0 = arith.constant 0 : i32
    %c0_i32_1 = arith.constant 0 : i32
    return %c0_i32, %c0_i32_0 : i32, i32
  }
  func.func @transform_1(%arg0: i32) -> (i32, i32) {
    %c0_i32 = arith.constant 0 : i32
    %c0_i32_0 = arith.constant 0 : i32
    %c0_i32_1 = arith.constant 0 : i32
    return %c0_i32, %c0_i32_0 : i32, i32
  }
  func.func @transform_2(%arg0: i32) -> (i32, i32) {
    %c0_i32 = arith.constant 0 : i32
    %c0_i32_0 = arith.constant 0 : i32
    %c0_i32_1 = arith.constant 0 : i32
    return %c0_i32, %c0_i32_0 : i32, i32
  }
  func.func @transform_3(%arg0: i32) -> (i32, i32, i32) {
    %c0_i32 = arith.constant 0 : i32
    %c0_i32_0 = arith.constant 0 : i32
    %c0_i32_1 = arith.constant 0 : i32
    %c0_i32_2 = arith.constant 0 : i32
    return %c0_i32, %c0_i32_0, %c0_i32_1 : i32, i32, i32
  }
  func.func @transform_4(%arg0: i32) -> (i32, i32, i32) {
    %c0_i32 = arith.constant 0 : i32
    %c0_i32_0 = arith.constant 0 : i32
    %c0_i32_1 = arith.constant 0 : i32
    %c0_i32_2 = arith.constant 0 : i32
    return %c0_i32, %c0_i32_0, %c0_i32_1 : i32, i32, i32
  }
  func.func @transform_5(%arg0: i32) -> (i32, i32, i32) {
    %c0_i32 = arith.constant 0 : i32
    %c0_i32_0 = arith.constant 0 : i32
    %c0_i32_1 = arith.constant 0 : i32
    %c0_i32_2 = arith.constant 0 : i32
    return %c0_i32, %c0_i32_0, %c0_i32_1 : i32, i32, i32
  }
  func.func @transform_6(%arg0: i32) -> (i32, i32, i32) {
    %c0_i32 = arith.constant 0 : i32
    %c0_i32_0 = arith.constant 0 : i32
    %c0_i32_1 = arith.constant 0 : i32
    %c0_i32_2 = arith.constant 0 : i32
    return %c0_i32, %c0_i32_0, %c0_i32_1 : i32, i32, i32
  }
  func.func @transform_7(%arg0: i32) -> (i32, i32, i32) {
    %c0_i32 = arith.constant 0 : i32
    %c0_i32_0 = arith.constant 0 : i32
    %c0_i32_1 = arith.constant 0 : i32
    %c0_i32_2 = arith.constant 0 : i32
    return %c0_i32, %c0_i32_0, %c0_i32_1 : i32, i32, i32
  }
  func.func @transform_8(%arg0: i32) -> (i32, i32, i32) {
    %c0_i32 = arith.constant 0 : i32
    %c0_i32_0 = arith.constant 0 : i32
    %c0_i32_1 = arith.constant 0 : i32
    %c0_i32_2 = arith.constant 0 : i32
    return %c0_i32, %c0_i32_0, %c0_i32_1 : i32, i32, i32
  }
  func.func @transform_9(%arg0: i32) -> (i32, i32, i32) {
    %c0_i32 = arith.constant 0 : i32
    %c0_i32_0 = arith.constant 0 : i32
    %c0_i32_1 = arith.constant 0 : i32
    %c0_i32_2 = arith.constant 0 : i32
    return %c0_i32, %c0_i32_0, %c0_i32_1 : i32, i32, i32
  }
  func.func @transform_10(%arg0: i32) -> (i32, i32, i32) {
    %c0_i32 = arith.constant 0 : i32
    %c0_i32_0 = arith.constant 0 : i32
    %c0_i32_1 = arith.constant 0 : i32
    %c0_i32_2 = arith.constant 0 : i32
    return %c0_i32, %c0_i32_0, %c0_i32_1 : i32, i32, i32
  }
  func.func @transform_11(%arg0: i32) -> (i32, i32, i32) {
    %c0_i32 = arith.constant 0 : i32
    %c0_i32_0 = arith.constant 0 : i32
    %c0_i32_1 = arith.constant 0 : i32
    %c0_i32_2 = arith.constant 0 : i32
    return %c0_i32, %c0_i32_0, %c0_i32_1 : i32, i32, i32
  }
  func.func @transform_12(%arg0: i32) -> (i32, i32, i32) {
    %c0_i32 = arith.constant 0 : i32
    %c0_i32_0 = arith.constant 0 : i32
    %c0_i32_1 = arith.constant 0 : i32
    %c0_i32_2 = arith.constant 0 : i32
    return %c0_i32, %c0_i32_0, %c0_i32_1 : i32, i32, i32
  }
  func.func @transform_13(%arg0: i32) -> (i32, i32, i32) {
    %c0_i32 = arith.constant 0 : i32
    %c0_i32_0 = arith.constant 0 : i32
    %c0_i32_1 = arith.constant 0 : i32
    %c0_i32_2 = arith.constant 0 : i32
    return %c0_i32, %c0_i32_0, %c0_i32_1 : i32, i32, i32
  }
  func.func @transform_14(%arg0: i32) -> (i32, i32, i32) {
    %c0_i32 = arith.constant 0 : i32
    %c0_i32_0 = arith.constant 0 : i32
    %c0_i32_1 = arith.constant 0 : i32
    %c0_i32_2 = arith.constant 0 : i32
    return %c0_i32, %c0_i32_0, %c0_i32_1 : i32, i32, i32
  }
  func.func @transform_15(%arg0: i32) -> (i32, i32) {
    %c0_i32 = arith.constant 0 : i32
    %c0_i32_0 = arith.constant 0 : i32
    %c0_i32_1 = arith.constant 0 : i32
    return %c0_i32, %c0_i32_0 : i32, i32
  }
  func.func @transform_16(%arg0: i32) -> (i32, i32) {
    %c0_i32 = arith.constant 0 : i32
    %c0_i32_0 = arith.constant 0 : i32
    %c0_i32_1 = arith.constant 0 : i32
    return %c0_i32, %c0_i32_0 : i32, i32
  }
  func.func @transform_17(%arg0: i32) -> (i32, i32) {
    %c0_i32 = arith.constant 0 : i32
    %c0_i32_0 = arith.constant 0 : i32
    %c0_i32_1 = arith.constant 0 : i32
    return %c0_i32, %c0_i32_0 : i32, i32
  }
  func.func @transform_18(%arg0: i32) -> (i32, i32) {
    %c0_i32 = arith.constant 0 : i32
    %c0_i32_0 = arith.constant 0 : i32
    %c0_i32_1 = arith.constant 0 : i32
    return %c0_i32, %c0_i32_0 : i32, i32
  }
  func.func @transform_19(%arg0: i32) -> (i32, i32) {
    %c0_i32 = arith.constant 0 : i32
    %c0_i32_0 = arith.constant 0 : i32
    %c0_i32_1 = arith.constant 0 : i32
    return %c0_i32, %c0_i32_0 : i32, i32
  }
  func.func @transform_20(%arg0: i32) -> (i32, i32) {
    %c0_i32 = arith.constant 0 : i32
    %c0_i32_0 = arith.constant 0 : i32
    %c0_i32_1 = arith.constant 0 : i32
    return %c0_i32, %c0_i32_0 : i32, i32
  }
  func.func @transform_21(%arg0: i32) -> (i32, i32) {
    %c0_i32 = arith.constant 0 : i32
    %c0_i32_0 = arith.constant 0 : i32
    %c0_i32_1 = arith.constant 0 : i32
    return %c0_i32, %c0_i32_0 : i32, i32
  }
  func.func @transform_22(%arg0: i32) -> (i32, i32) {
    %c0_i32 = arith.constant 0 : i32
    %c0_i32_0 = arith.constant 0 : i32
    %c0_i32_1 = arith.constant 0 : i32
    return %c0_i32, %c0_i32_0 : i32, i32
  }
  func.func @transform_23(%arg0: i32) -> (i32, i32) {
    %c0_i32 = arith.constant 0 : i32
    %c0_i32_0 = arith.constant 0 : i32
    %c0_i32_1 = arith.constant 0 : i32
    return %c0_i32, %c0_i32_0 : i32, i32
  }
  func.func @transform_24(%arg0: i32) -> (i32, i32) {
    %c0_i32 = arith.constant 0 : i32
    %c0_i32_0 = arith.constant 0 : i32
    %c0_i32_1 = arith.constant 0 : i32
    return %c0_i32, %c0_i32_0 : i32, i32
  }
  func.func @transform_25(%arg0: i32) -> (i32, i32) {
    %c0_i32 = arith.constant 0 : i32
    %c0_i32_0 = arith.constant 0 : i32
    %c0_i32_1 = arith.constant 0 : i32
    return %c0_i32, %c0_i32_0 : i32, i32
  }
  func.func @transform_26(%arg0: i32) -> (i32, i32) {
    %c0_i32 = arith.constant 0 : i32
    %c0_i32_0 = arith.constant 0 : i32
    %c0_i32_1 = arith.constant 0 : i32
    return %c0_i32, %c0_i32_0 : i32, i32
  }
  func.func @transform_27(%arg0: i32) -> (i32, i32, i32) {
    %c0_i32 = arith.constant 0 : i32
    %c0_i32_0 = arith.constant 0 : i32
    %c0_i32_1 = arith.constant 0 : i32
    %c0_i32_2 = arith.constant 0 : i32
    return %c0_i32, %c0_i32_0, %c0_i32_1 : i32, i32, i32
  }
  func.func @transform_28(%arg0: i32) -> (i32, i32, i32) {
    %c0_i32 = arith.constant 0 : i32
    %c0_i32_0 = arith.constant 0 : i32
    %c0_i32_1 = arith.constant 0 : i32
    %c0_i32_2 = arith.constant 0 : i32
    return %c0_i32, %c0_i32_0, %c0_i32_1 : i32, i32, i32
  }
  func.func @transform_29(%arg0: i32) -> (i32, i32, i32) {
    %c0_i32 = arith.constant 0 : i32
    %c0_i32_0 = arith.constant 0 : i32
    %c0_i32_1 = arith.constant 0 : i32
    %c0_i32_2 = arith.constant 0 : i32
    return %c0_i32, %c0_i32_0, %c0_i32_1 : i32, i32, i32
  }
  func.func @transform_30(%arg0: i32) -> (i32, i32, i32) {
    %c0_i32 = arith.constant 0 : i32
    %c0_i32_0 = arith.constant 0 : i32
    %c0_i32_1 = arith.constant 0 : i32
    %c0_i32_2 = arith.constant 0 : i32
    return %c0_i32, %c0_i32_0, %c0_i32_1 : i32, i32, i32
  }
  func.func @transform_31(%arg0: i32) -> (i32, i32, i32) {
    %c0_i32 = arith.constant 0 : i32
    %c0_i32_0 = arith.constant 0 : i32
    %c0_i32_1 = arith.constant 0 : i32
    %c0_i32_2 = arith.constant 0 : i32
    return %c0_i32, %c0_i32_0, %c0_i32_1 : i32, i32, i32
  }
  func.func @transform_32(%arg0: i32) -> (i32, i32, i32) {
    %c0_i32 = arith.constant 0 : i32
    %c0_i32_0 = arith.constant 0 : i32
    %c0_i32_1 = arith.constant 0 : i32
    %c0_i32_2 = arith.constant 0 : i32
    return %c0_i32, %c0_i32_0, %c0_i32_1 : i32, i32, i32
  }
  func.func @transform_33(%arg0: i32) -> (i32, i32, i32) {
    %c0_i32 = arith.constant 0 : i32
    %c0_i32_0 = arith.constant 0 : i32
    %c0_i32_1 = arith.constant 0 : i32
    %c0_i32_2 = arith.constant 0 : i32
    return %c0_i32, %c0_i32_0, %c0_i32_1 : i32, i32, i32
  }
  func.func @transform_34(%arg0: i32) -> (i32, i32, i32) {
    %c0_i32 = arith.constant 0 : i32
    %c0_i32_0 = arith.constant 0 : i32
    %c0_i32_1 = arith.constant 0 : i32
    %c0_i32_2 = arith.constant 0 : i32
    return %c0_i32, %c0_i32_0, %c0_i32_1 : i32, i32, i32
  }
  func.func @transform_35(%arg0: i32) -> (i32, i32, i32) {
    %c0_i32 = arith.constant 0 : i32
    %c0_i32_0 = arith.constant 0 : i32
    %c0_i32_1 = arith.constant 0 : i32
    %c0_i32_2 = arith.constant 0 : i32
    return %c0_i32, %c0_i32_0, %c0_i32_1 : i32, i32, i32
  }
  func.func @transform_36(%arg0: i32) -> (i32, i32, i32) {
    %c0_i32 = arith.constant 0 : i32
    %c0_i32_0 = arith.constant 0 : i32
    %c0_i32_1 = arith.constant 0 : i32
    %c0_i32_2 = arith.constant 0 : i32
    return %c0_i32, %c0_i32_0, %c0_i32_1 : i32, i32, i32
  }
  func.func @transform_37(%arg0: i32) -> (i32, i32, i32) {
    %c0_i32 = arith.constant 0 : i32
    %c0_i32_0 = arith.constant 0 : i32
    %c0_i32_1 = arith.constant 0 : i32
    %c0_i32_2 = arith.constant 0 : i32
    return %c0_i32, %c0_i32_0, %c0_i32_1 : i32, i32, i32
  }
  func.func @transform_38(%arg0: i32) -> (i32, i32, i32) {
    %c0_i32 = arith.constant 0 : i32
    %c0_i32_0 = arith.constant 0 : i32
    %c0_i32_1 = arith.constant 0 : i32
    %c0_i32_2 = arith.constant 0 : i32
    return %c0_i32, %c0_i32_0, %c0_i32_1 : i32, i32, i32
  }
  func.func @transform_39(%arg0: i32) -> (i32, i32) {
    %c0_i32 = arith.constant 0 : i32
    %c0_i32_0 = arith.constant 0 : i32
    %c0_i32_1 = arith.constant 0 : i32
    return %c0_i32, %c0_i32_0 : i32, i32
  }
  func.func @transform_40(%arg0: i32) -> (i32, i32) {
    %c0_i32 = arith.constant 0 : i32
    %c0_i32_0 = arith.constant 0 : i32
    %c0_i32_1 = arith.constant 0 : i32
    return %c0_i32, %c0_i32_0 : i32, i32
  }
  func.func @transform_41(%arg0: i32) -> (i32, i32) {
    %c0_i32 = arith.constant 0 : i32
    %c0_i32_0 = arith.constant 0 : i32
    %c0_i32_1 = arith.constant 0 : i32
    return %c0_i32, %c0_i32_0 : i32, i32
  }
  func.func @transform_42(%arg0: i32) -> (i32, i32, i32) {
    %c0_i32 = arith.constant 0 : i32
    %c0_i32_0 = arith.constant 0 : i32
    %c0_i32_1 = arith.constant 0 : i32
    return %arg0, %c0_i32, %c0_i32_0 : i32, i32, i32
  }
}

</mosaic_0001>

<bundles_post_ra>
// kernel: clip_finetuner_forward.1
= control target key start
LH: loop header
LB: loop body
LE: loop exit
PB: predicated region body
PF: predicated region fallthrough
CT: control target
= control target key end

     0   :  { %s6582_s6 = smov 1   ;;  %s6583_s10 = smov 2   ;;  %s8297_s0 = inlined_call_operand.smem [shape: u32[43], index: -1, kind: input, shape index: {}] }
   0x1   :  { %s6662_s5 = sld [smem:[%s8297_s0]]   ;;  %s6584_s14 = smov 3  }
   0x2   :  { %s6667_s9 = sld [smem:[%s8297_s0 + %s6582_s6]]   ;;  %s6585_s18 = smov 4  }
   0x3   :  { %s6672_s13 = sld [smem:[%s8297_s0 + %s6583_s10]]   ;;  %s6586_s22 = smov 5  }
   0x4   :  { %s6677_s17 = sld [smem:[%s8297_s0 + %s6584_s14]]   ;;  %s6587_s26 = smov 6  }
   0x5   :  { %s6682_s21 = sld [smem:[%s8297_s0 + %s6585_s18]]   ;;  %s6588_s30 = smov 7  }
   0x6   :  { %s6687_s25 = sld [smem:[%s8297_s0 + %s6586_s22]]   ;;  %s6589_s4 = smov 8  }
   0x7   :  { %8364 = sst [smem:[#allocation2_spill]] %s6662_s5  ;;  %s6590_s10 = smov 9  }
   0x8   :  { %8365 = sst [smem:[#allocation3_spill]] %s6667_s9  ;;  %s6591_s15 = smov 10  }
   0x9   :  { %8366 = sst [smem:[#allocation4_spill]] %s6672_s13  ;;  %s6592_s20 = smov 11  }
   0xa   :  { %s6692_s29 = sld [smem:[%s8297_s0 + %s6587_s26]]   ;;  %s6593_s26 = smov 12  }
   0xb   :  { %s6697_s3 = sld [smem:[%s8297_s0 + %s6588_s30]]   ;;  %s6594_s1 = smov 13  }
   0xc   :  { %s6702_s8 = sld [smem:[%s8297_s0 + %s6589_s4]]   ;;  %s6595_s7 = smov 14  }
   0xd   :  { %s6707_s14 = sld [smem:[%s8297_s0 + %s6590_s10]]   ;;  %s6597_s22 = smov 16  }
   0xe   :  { %s6712_s19 = sld [smem:[%s8297_s0 + %s6591_s15]]   ;;  %s6596_s15 = smov 15  }
   0xf   :  { %s6717_s24 = sld [smem:[%s8297_s0 + %s6592_s20]]   ;;  %s6598_s28 = smov 17  }
  0x10   :  { %s6722_s30 = sld [smem:[%s8297_s0 + %s6593_s26]]  }
  0x11   :  { %8367 = sst [smem:[#allocation5_spill]] %s6697_s3 }
  0x12   :  { %8368 = sst [smem:[#allocation6_spill]] %s6702_s8 }
  0x13   :  { %s6727_s6 = sld [smem:[%s8297_s0 + %s6594_s1]]  }
  0x14   :  { %s6732_s12 = sld [smem:[%s8297_s0 + %s6595_s7]]   ;;  %s6599_s7 = smov 18  }
  0x15   :  { %s6737_s20 = sld [smem:[%s8297_s0 + %s6596_s15]]   ;;  %s6600_s15 = smov 19  }
  0x16   :  { %s6742_s27 = sld [smem:[%s8297_s0 + %s6597_s22]]   ;;  %s6601_s22 = smov 20  }
  0x17   :  { %s6747_s4 = sld [smem:[%s8297_s0 + %s6598_s28]]   ;;  %s6602_s28 = smov 21  }
  0x18   :  { %s6752_s13 = sld [smem:[%s8297_s0 + %s6599_s7]]   ;;  %s6603_s7 = smov 22  }
  0x19   :  { %8369 = sst [smem:[#allocation7_spill]] %s6727_s6 }
  0x1a   :  { %8370 = sst [smem:[#allocation8_spill]] %s6732_s12 }
  0x1b   :  { %8371 = sst [smem:[#allocation9_spill]] %s6737_s20 }
  0x1c   :  { %8372 = sst [smem:[#allocation10_spill]] %s6742_s27 }
  0x1d   :  { %8373 = sst [smem:[#allocation11_spill]] %s6747_s4 }
  0x1e   :  { %8374 = sst [smem:[#allocation12_spill]] %s6752_s13 }
  0x1f   :  { %s6757_s20 = sld [smem:[%s8297_s0 + %s6600_s15]]   ;;  %s6604_s15 = smov 23  }
  0x20   :  { %s6762_s27 = sld [smem:[%s8297_s0 + %s6601_s22]]   ;;  %s6605_s22 = smov 24  }
  0x21   :  { %s6767_s4 = sld [smem:[%s8297_s0 + %s6602_s28]]   ;;  %s6606_s28 = smov 25  }
  0x22   :  { %s6772_s13 = sld [smem:[%s8297_s0 + %s6603_s7]]   ;;  %s6607_s7 = smov 26  }
  0x25   :  { %8375 = sst [smem:[#allocation13_spill]] %s6757_s20 }
  0x26   :  { %8376 = sst [smem:[#allocation14_spill]] %s6762_s27 }
  0x27   :  { %8377 = sst [smem:[#allocation15_spill]] %s6767_s4 }
  0x28   :  { %8378 = sst [smem:[#allocation16_spill]] %s6772_s13 }
  0x29   :  { %s6777_s20 = sld [smem:[%s8297_s0 + %s6604_s15]]   ;;  %s6608_s15 = smov 27  }
  0x2a   :  { %s6782_s27 = sld [smem:[%s8297_s0 + %s6605_s22]]   ;;  %s6609_s22 = smov 28  }
  0x2b   :  { %s6787_s4 = sld [smem:[%s8297_s0 + %s6606_s28]]   ;;  %s6610_s28 = smov 29  }
  0x2c   :  { %s6792_s13 = sld [smem:[%s8297_s0 + %s6607_s7]]   ;;  %s6611_s7 = smov 30  }
  0x2f   :  { %8379 = sst [smem:[#allocation17_spill]] %s6777_s20 }
  0x30   :  { %8380 = sst [smem:[#allocation18_spill]] %s6782_s27 }
  0x31   :  { %8381 = sst [smem:[#allocation19_spill]] %s6787_s4 }
  0x32   :  { %8382 = sst [smem:[#allocation20_spill]] %s6792_s13 }
  0x33   :  { %s6797_s20 = sld [smem:[%s8297_s0 + %s6608_s15]]   ;;  %s6612_s15 = smov 31  }
  0x34   :  { %s6802_s27 = sld [smem:[%s8297_s0 + %s6609_s22]]   ;;  %s6613_s22 = smov 32  }
  0x35   :  { %s6807_s4 = sld [smem:[%s8297_s0 + %s6610_s28]]   ;;  %s6614_s28 = smov 33  }
  0x36   :  { %s6812_s13 = sld [smem:[%s8297_s0 + %s6611_s7]]   ;;  %s6615_s7 = smov 34  }
  0x39   :  { %8383 = sst [smem:[#allocation21_spill]] %s6797_s20 }
  0x3a   :  { %8384 = sst [smem:[#allocation22_spill]] %s6802_s27 }
  0x3b   :  { %8385 = sst [smem:[#allocation23_spill]] %s6807_s4 }
  0x3c   :  { %8386 = sst [smem:[#allocation24_spill]] %s6812_s13 }
  0x3d   :  { %s6817_s20 = sld [smem:[%s8297_s0 + %s6612_s15]]   ;;  %s6616_s15 = smov 35  }
  0x3e   :  { %s6822_s27 = sld [smem:[%s8297_s0 + %s6613_s22]]   ;;  %s6617_s22 = smov 36  }
  0x3f   :  { %s6827_s4 = sld [smem:[%s8297_s0 + %s6614_s28]]   ;;  %s6618_s28 = smov 37  }
  0x40   :  { %s6832_s13 = sld [smem:[%s8297_s0 + %s6615_s7]]   ;;  %s6619_s7 = smov 38  }
  0x43   :  { %8387 = sst [smem:[#allocation25_spill]] %s6817_s20 }
  0x44   :  { %8388 = sst [smem:[#allocation26_spill]] %s6822_s27 }
  0x45   :  { %8389 = sst [smem:[#allocation27_spill]] %s6827_s4 }
  0x46   :  { %8390 = sst [smem:[#allocation28_spill]] %s6832_s13 }
  0x47   :  { %s6837_s20 = sld [smem:[%s8297_s0 + %s6616_s15]]   ;;  %s6620_s15 = smov 39  }
  0x48   :  { %s6842_s27 = sld [smem:[%s8297_s0 + %s6617_s22]]   ;;  %s6621_s22 = smov 40  }
  0x49   :  { %s6847_s4 = sld [smem:[%s8297_s0 + %s6618_s28]]   ;;  %s6622_s28 = smov 41  }
  0x4a   :  { %s6852_s13 = sld [smem:[%s8297_s0 + %s6619_s7]]   ;;  %s6623_s7 = smov 42  }
  0x4d   :  { %8391 = sst [smem:[#allocation29_spill]] %s6837_s20 }
  0x4e   :  { %8392 = sst [smem:[#allocation30_spill]] %s6842_s27 }
  0x4f   :  { %8393 = sst [smem:[#allocation31_spill]] %s6847_s4 }
  0x50   :  { %8394 = sst [smem:[#allocation32_spill]] %s6852_s13 }
  0x51   :  { %s6857_s20 = sld [smem:[%s8297_s0 + %s6620_s15]]   ;;  %s6874_s15 = smov 0  }
  0x52   :  { %s6862_s27 = sld [smem:[%s8297_s0 + %s6621_s22]]  }
  0x53   :  { %s6867_s4 = sld [smem:[%s8297_s0 + %s6622_s28]]  }
  0x54   :  { %s6872_s13 = sld [smem:[%s8297_s0 + %s6623_s7]]  }
  0x55 LB: > { %s8395_s12 = sld [smem:[#allocation8_spill]]  ;;  %s6880_s16 = sadd.s32 4294967295, %s6580_s15   ;;  %s6580_s15 = sphi %s6874_s15, %s95_s15  }
  0x56   : > { %s8396_s9 = sld [smem:[#allocation3_spill]]  ;;  %p5776_p0 = scmp.ge.s32.totalorder %s6580_s15, 1 }
  0x57   : > { %s8397_s8 = sld [smem:[#allocation6_spill]]  ;;  %p1145_p1 = scmp.lt.s32.totalorder %s6580_s15, 3 }
  0x58   : > { %s8398_s6 = sld [smem:[#allocation7_spill]] }
  0x59   : > { %s8399_s5 = sld [smem:[#allocation2_spill]]  ;;  %p1146_p2 = pnand %p5776_p0, %p1145_p1 }
  0x5a   : > { %s8400_s3 = sld [smem:[#allocation5_spill]]  ;;  %p1241_p3 = scmp.lt.s32.totalorder (!%p1146_p2), %s6880_s16, 1 }
  0x5b   : > { %1149 = sbr.rel (%p1146_p2) target bundleno = 10012 (0x271c), region = 188  ;;  %p5778_p4 = scmp.ne.s32.totalorder (!%p1146_p2), %s6880_s16, 0 }
  0x60   : > { %s1242_s0 = scalar_select %p1241_p3, %s6880_s16, 1 }
  0x61   : > { %1248 = sbr.rel (%p5778_p4) target bundleno = 5045 (0x13b5), region = 192  ;;  %s6625_s23 = smov (!%p5778_p4), 96  }
  0x62   : > { %s5777_s18 = sshll.u32 %s1242_s0, 2  ;;  %s6626_s26 = smov (!%p5778_p4), 120  }
  0x63   : > { %s6887_s22 = scalar_lea.vmem %s6872_s13, %s5777_s18  ;;  %s6627_s28 = smov (!%p5778_p4), 88  }
  0x64   : > { %s8316_s1 = smov (!%p5778_p4), 64   ;;  %s6629_s2 = smov (!%p5778_p4), 72  }
  0x65   : > { %s6630_s7 = smov (!%p5778_p4), 80   ;;  %s6631_s10 = smov (!%p5778_p4), 104  }
  0x66   : > { %v1251_v0 = vld [vmem:[%s8399_s5 + $0x10] sm:$0xff]  ;;  %vm1259_vm0 = vcmask 261120   ;;  %v1249_v1 = vld [vmem:[%s8399_s5] sm:$0xff]  ;;  %v1252_v2 = vld [vmem:[%s8399_s5 + $0x18] sm:$0xff]  ;;  %v6624_v8 = vmov 32.0   ;;  %vm1430_vm14 = vcmask 64512  }
  0x67   : > { %v1266_v3 = vsel %vm1259_vm0, %v1251_v0, 0.0  ;;  %v1260_v4 = vsel %vm1259_vm0, %v1249_v1, 0.0  ;;  %v1250_v5 = vld [vmem:[%s8399_s5 + $0x8] sm:$0xff]  ;;  %v1269_v6 = vsel %vm1259_vm0, %v1252_v2, 0.0  ;;  %6240 = vrcp.f32 %v6624_v8  ;;  %v1372_v35 = vld [vmem:[%s6687_s25 + $0x18] sm:$0xff]  ;;  %v1371_v36 = vld [vmem:[%s6687_s25 + $0x10] sm:$0xff] }
  0x68   : > { %1267 = vadd.xlane.f32.xlu1 %v1266_v3  ;;  %1261 = vadd.xlane.f32.xlu0 %v1260_v4  ;;  %v1263_v7 = vsel %vm1259_vm0, %v1250_v5, 0.0  ;;  %v1370_v37 = vld [vmem:[%s6687_s25 + $0x8] sm:$0xff]  ;;  %v1369_v38 = vld [vmem:[%s6687_s25] sm:$0xff]  ;;  %s6632_s11 = smov 112   ;;  %s8322_s0 = smov 56   ;;  %vm2131_vm15 = vcmask 130048  }
  0x69   : > { %1401 = vmatpush.msra.mxu0 %v1372_v35  ;;  %s8318_s18 = smov 48  }
  0x6b   : > { %1402 = vmatpush.msra.mxu0 %v1371_v36 }
  0x6d   : > { %v6241_v9 = vpop.eup %6240  ;;  %1403 = vmatpush.msra.mxu0 %v1370_v37 }
  0x6e   : > { %v1273_v10 = vmul.f32 32.0, %v6241_v9  ;;  %vm1277_vm1 = vweird.f32 %v6241_v9 }
  0x6f   : > { %1404 = vmatpush.msra.mxu0 %v1369_v38 }
  0x70   : > { %1270 = vadd.xlane.f32.xlu1 %v1269_v6  ;;  %1264 = vadd.xlane.f32.xlu0 %v1263_v7  ;;  %v1274_v11 = vsub.f32 1.0, %v1273_v10 }
  0x72   : > { %v1275_v12 = vmul.f32 %v6241_v9, %v1274_v11 }
  0x74   : > { %v1276_v13 = vadd.f32 %v6241_v9, %v1275_v12 }
  0x76   : > { %v6898_v14 = vsel %vm1277_vm1, %v6241_v9, %v1276_v13  ;;  %vm2136_vm1 = vcmask 195584  }
  0xdb   : > { %v1268_v15 = vpop.xlane.xlu1 %1267  ;;  %v1262_v16 = vpop.xlane.xlu0 %1261 }
  0xdc   : > { %v1281_v17 = vmul.f32 %v6898_v14, %v1268_v15  ;;  %v1279_v18 = vmul.f32 %v6898_v14, %v1262_v16 }
  0xde   : > { %v6902_v19 = vsub.f32 %v1251_v0, %v1281_v17  ;;  %v6904_v20 = vsub.f32 %v1249_v1, %v1279_v18  ;;  %v6222_v1 = vld [vmem:[%s6677_s17] ss:$0 sm:$0xff] }
  0xe0   : > { %v1289_v21 = vmul.f32 %v6902_v19, %v6902_v19  ;;  %v1287_v22 = vmul.f32 %v6904_v20, %v6904_v20 }
  0xe2   : > { %v1297_v23 = vsel %vm1259_vm0, %v1289_v21, 0.0  ;;  %v1291_v24 = vsel %vm1259_vm0, %v1287_v22, 0.0 }
  0xe3   : > { %v1271_v25 = vpop.xlane.xlu1 %1270  ;;  %1298 = vadd.xlane.f32.xlu0 %v1297_v23  ;;  %1292 = vadd.xlane.f32.xlu2 %v1291_v24  ;;  %v1265_v26 = vpop.xlane.xlu0 %1264 }
  0xe4   : > { %v1282_v27 = vmul.f32 %v6898_v14, %v1271_v25  ;;  %v1280_v28 = vmul.f32 %v6898_v14, %v1265_v26 }
  0xe6   : > { %v6914_v29 = vsub.f32 %v1252_v2, %v1282_v27  ;;  %v6916_v30 = vsub.f32 %v1250_v5, %v1280_v28  ;;  %v6223_v5 = vld [vmem:[%s6682_s21] ss:$0 sm:$0xff] }
  0xe8   : > { %v1290_v31 = vmul.f32 %v6914_v29, %v6914_v29  ;;  %v1288_v32 = vmul.f32 %v6916_v30, %v6916_v30 }
  0xea   : > { %v1300_v33 = vsel %vm1259_vm0, %v1290_v31, 0.0  ;;  %v1294_v34 = vsel %vm1259_vm0, %v1288_v32, 0.0 }
  0xeb   : > { %1301 = vadd.xlane.f32.xlu1 %v1300_v33  ;;  %1295 = vadd.xlane.f32.xlu2 %v1294_v34  ;;  %v6224_v33 = vld [vmem:[%s6692_s29] ss:$0 sm:$0xff] }
 0x156   : > { %v1293_v39 = vpop.xlane.xlu2 %1292  ;;  %v1299_v40 = vpop.xlane.xlu0 %1298 }
 0x157   : > { %v1303_v41 = vmul.f32 %v1293_v39, %v6898_v14  ;;  %v1305_v42 = vmul.f32 %v1299_v40, %v6898_v14 }
 0x159   : > { %v1307_v43 = vadd.f32 1e-05, %v1303_v41  ;;  %v1309_v44 = vadd.f32 1e-05, %v1305_v42 }
 0x15b   : > { %6242 = vrsqrt.f32 %v1307_v43  ;;  %vm1317_vm3 = vweird.f32 %v1307_v43  ;;  %vm1337_vm5 = vweird.f32 %v1309_v44 }
 0x15c   : > { %6244 = vrsqrt.f32 %v1309_v44 }
 0x15e   : > { %v1302_v45 = vpop.xlane.xlu1 %1301  ;;  %v1296_v46 = vpop.xlane.xlu2 %1295 }
 0x15f   : > { %v1306_v47 = vmul.f32 %v1302_v45, %v6898_v14  ;;  %v1304_v48 = vmul.f32 %v1296_v46, %v6898_v14 }
 0x161   : > { %v6243_v49 = vpop.eup %6242  ;;  %v1310_v50 = vadd.f32 1e-05, %v1306_v47  ;;  %v1308_v51 = vadd.f32 1e-05, %v1304_v48 }
 0x162   : > { %v6245_v52 = vpop.eup %6244  ;;  %v1312_v53 = vmul.f32 %v6243_v49, %v1307_v43  ;;  %vm1318_vm2 = vweird.f32 %v6243_v49 }
 0x163   : > { %v1332_v54 = vmul.f32 %v6245_v52, %v1309_v44  ;;  %6246 = vrsqrt.f32 %v1310_v50  ;;  %vm1319_vm4 = vmor %vm1317_vm3, %vm1318_vm2  ;;  %vm1338_vm6 = vweird.f32 %v6245_v52  ;;  %vm1327_vm9 = vweird.f32 %v1308_v51 }
 0x164   : > { %v1313_v55 = vmul.f32 %v6243_v49, %v1312_v53  ;;  %6248 = vrsqrt.f32 %v1308_v51  ;;  %vm1339_vm8 = vmor %vm1337_vm5, %vm1338_vm6  ;;  %vm1347_vm11 = vweird.f32 %v1310_v50 }
 0x165   : > { %v1333_v57 = vmul.f32 %v6245_v52, %v1332_v54 }
 0x166   : > { %v1314_v56 = vmul.f32 0.5, %v1313_v55 }
 0x167   : > { %v1334_v62 = vmul.f32 0.5, %v1333_v57 }
 0x168   : > { %v1315_v58 = vsub.f32 1.5, %v1314_v56 }
 0x169   : > { %v6247_v59 = vpop.eup %6246  ;;  %v1335_v6 = vsub.f32 1.5, %v1334_v62 }
 0x16a   : > { %v6249_v60 = vpop.eup %6248  ;;  %v1316_v61 = vmul.f32 %v6243_v49, %v1315_v58  ;;  %v1342_v63 = vmul.f32 %v6247_v59, %v1310_v50  ;;  %vm1348_vm12 = vweird.f32 %v6247_v59 }
 0x16b   : > { %v1322_v0 = vmul.f32 %v6249_v60, %v1308_v51  ;;  %vm1328_vm7 = vweird.f32 %v6249_v60  ;;  %v1336_v12 = vmul.f32 %v6245_v52, %v1335_v6  ;;  %vm1349_vm13 = vmor %vm1347_vm11, %vm1348_vm12 }
 0x16c   : > { %v1320_v2 = vsel %vm1319_vm4, %v6243_v49, %v1316_v61  ;;  %v1343_v7 = vmul.f32 %v6247_v59, %v1342_v63  ;;  %vm1329_vm10 = vmor %vm1327_vm9, %vm1328_vm7 }
 0x16d   : > { %v1323_v3 = vmul.f32 %v6249_v60, %v1322_v0  ;;  %v1351_v4 = vmul.f32 %v1320_v2, %v6904_v20  ;;  %v1340_v20 = vsel %vm1339_vm8, %v6245_v52, %v1336_v12  ;;  %v7026_v2 = vld [vmem:[%s8396_s9] sm:$0xff]  ;;  %v7036_v12 = vld [vmem:[%s8396_s9 + $0x10] sm:$0xff] }
 0x16e   : > { %v1344_v13 = vmul.f32 0.5, %v1343_v7  ;;  %v1353_v23 = vmul.f32 %v1340_v20, %v6902_v19  ;;  %v7031_v7 = vld [vmem:[%s8396_s9 + $0x8] sm:$0xff] }
 0x16f   : > { %v1324_v8 = vmul.f32 0.5, %v1323_v3  ;;  %v1358_v9 = vmul.f32 %v6222_v1, %v1351_v4 }
 0x170   : > { %v1345_v18 = vsub.f32 1.5, %v1344_v13  ;;  %v1360_v25 = vmul.f32 %v6222_v1, %v1353_v23 }
 0x171   : > { %v1325_v10 = vsub.f32 1.5, %v1324_v8  ;;  %v1365_v11 = vadd.f32 %v6223_v5, %v1358_v9 }
 0x172   : > { %v1346_v24 = vmul.f32 %v6247_v59, %v1345_v18  ;;  %v1367_v27 = vadd.f32 %v6223_v5, %v1360_v25  ;;  %v7041_v18 = vld [vmem:[%s8396_s9 + $0x18] sm:$0xff] }
 0x173   : > { %v1326_v15 = vmul.f32 %v6249_v60, %v1325_v10  ;;  %5779 = vmatmul.msk.f32.vlgmr.msra.gmra.mxu0 %vm1259_vm0, %v1365_v11 }
 0x174   : > { %v1350_v26 = vsel %vm1349_vm13, %v6247_v59, %v1346_v24 }
 0x175   : > { %v1330_v16 = vsel %vm1329_vm10, %v6249_v60, %v1326_v15  ;;  %v1354_v28 = vmul.f32 %v1350_v26, %v6914_v29 }
 0x176   : > { %v1352_v17 = vmul.f32 %v1330_v16, %v6916_v30 }
 0x177   : > { %v1361_v30 = vmul.f32 %v6222_v1, %v1354_v28 }
 0x178   : > { %v1359_v21 = vmul.f32 %v6222_v1, %v1352_v17 }
 0x179   : > { %v1368_v31 = vadd.f32 %v6223_v5, %v1361_v30 }
 0x17a   : > { %v1366_v22 = vadd.f32 %v6223_v5, %v1359_v21 }
 0x17c   : > { %5780 = vmatmul.msk.f32.gmra.mxu0 %vm1259_vm0, %v1366_v22 }
 0x184   : > { %5781 = vmatmul.msk.f32.gmra.mxu0 %vm1259_vm0, %v1367_v27 }
 0x18c   : > { %5782 = vmatmul.msk.f32.gmra.mxu0 %vm1259_vm0, %v1368_v31 }
 0x1f0   : > { %v1406_v32 = vpop.f32.mrf.mxu0 }
 0x1f1   : > { %v6947_v36 = vadd.f32 %v6224_v33, %v1406_v32 }
 0x1f9   : > { %v1409_v34 = vpop.f32.mrf.mxu0 }
 0x1fa   : > { %v6943_v35 = vadd.f32 %v6224_v33, %v1409_v34 }
 0x1fc   : > { %1424 = vrot.lane.b32.xlu1 %v6943_v35, %s6625_s23  ;;  %v6969_v40 = vpack.i.bf16 %v6947_v36, %v6943_v35 }
 0x201   : > { %v1412_v19 = vpop.f32.mrf.mxu0 }
 0x202   : > { %v6949_v37 = vadd.f32 %v6224_v33, %v1412_v19 }
 0x204   : > { %1581 = vrot.lane.b32.xlu1 %v6947_v36, %s6626_s26  ;;  %1426 = vrot.lane.b32.xlu0 %v6949_v37, %s6625_s23 }
 0x209   : > { %v1415_v29 = vpop.f32.mrf.mxu0 }
 0x20a   : > { %v6955_v38 = vadd.f32 %v6224_v33, %v1415_v29 }
 0x20c   : > { %1583 = vrot.lane.b32.xlu1 %v6943_v35, %s6626_s26  ;;  %1428 = vrot.lane.b32.xlu2 %v6955_v38, %s6625_s23  ;;  %v6965_v39 = vpack.i.bf16 %v6949_v37, %v6955_v38 }
 0x20d   : > { %1593 = vrot.lane.b32.xlu0 %v6949_v37, %s6627_s28 }
 0x214   : > { %1422 = vrot.lane.b32.xlu2 %v6947_v36, %s6625_s23  ;;  %6148 = vrot.lane.b32.xlu1 %v6965_v39, %s8316_s1 }
 0x215   : > { %6143 = vrot.lane.b32.xlu0 %v6969_v40, %s8316_s1  ;;  %s8320_s1 = smov 40  }
 0x21c   : > { %1591 = vrot.lane.b32.xlu2 %v6943_v35, %s6627_s28  ;;  %1927 = vrot.lane.b32.xlu1 %v6955_v38, %s6629_s2 }
 0x21d   : > { %1589 = vrot.lane.b32.xlu0 %v6947_v36, %s6627_s28 }
 0x224   : > { %1755 = vrot.lane.b32.xlu1 %v6947_v36, %s6630_s7  ;;  %1585 = vrot.lane.b32.xlu2 %v6949_v37, %s6626_s26 }
 0x225   : > { %1925 = vrot.lane.b32.xlu0 %v6949_v37, %s6629_s2 }
 0x22c   : > { %1759 = vrot.lane.b32.xlu2 %v6949_v37, %s6630_s7 }
 0x22d   : > { %1757 = vrot.lane.b32.xlu0 %v6943_v35, %s6630_s7 }
 0x234   : > { %1595 = vrot.lane.b32.xlu2 %v6955_v38, %s6627_s28 }
 0x235   : > { %1761 = vrot.lane.b32.xlu0 %v6955_v38, %s6630_s7 }
 0x23c   : > { %1587 = vrot.lane.b32.xlu2 %v6955_v38, %s6626_s26 }
 0x266   : > { %v1429_v41 = vpop.permute.xlu2 %1428 }
 0x267   : > { %5783 = vmatpush.xpose.msk.msra.mxu1 %vm1430_vm14, %v1429_v41 }
 0x26e   : > { %v1425_v42 = vpop.permute.xlu1 %1424  ;;  %v1423_v43 = vpop.permute.xlu2 %1422 }
 0x276   : > { %v1582_v44 = vpop.permute.xlu1 %1581  ;;  %v1592_v45 = vpop.permute.xlu2 %1591 }
 0x277   : > { %v1427_v46 = vpop.permute.xlu0 %1426 }
 0x278   : > { %5784 = vmatpush.xpose.msk.msra.mxu1 %vm1430_vm14, %v1427_v46 }
 0x27c   : > { %5785 = vmatpush.xpose.msk.msra.mxu1 %vm1430_vm14, %v1425_v42 }
 0x27e   : > { %v1584_v47 = vpop.permute.xlu1 %1583  ;;  %v1586_v48 = vpop.permute.xlu2 %1585 }
 0x27f   : > { %v1594_v49 = vpop.permute.xlu0 %1593 }
 0x280   : > { %5786 = vmatpush.xpose.msk.msra.mxu1 %vm1430_vm14, %v1423_v43 }
 0x283   : > { %5787 = vmatmul.msk.f32.vlgmr.msra.gmra.mxu1 %vm1430_vm14, %v6947_v36 }
 0x286   : > { %v6149_v50 = vpop.permute.xlu1 %6148  ;;  %v1760_v51 = vpop.permute.xlu2 %1759 }
 0x287   : > { %v6144_v52 = vpop.permute.xlu0 %6143  ;;  %v6150_v53 = vunpack.i.l.bf16 %v6149_v50  ;;  %v6151_v54 = vunpack.i.h.bf16 %v6149_v50 }
 0x288   : > { %v6145_v55 = vunpack.i.l.bf16 %v6144_v52  ;;  %v6146_v56 = vunpack.i.h.bf16 %v6144_v52 }
 0x289   : > { %1564 = vmatpush.msra.mxu2 %v6150_v53 }
 0x28b   : > { %5788 = vmatmul.msk.f32.gmra.mxu1 %vm1430_vm14, %v6943_v35  ;;  %1565 = vmatpush.msra.mxu2 %v6151_v54 }
 0x28d   : > { %1566 = vmatpush.msra.mxu2 %v6145_v55 }
 0x28e   : > { %v1596_v57 = vpop.permute.xlu2 %1595  ;;  %v1928_v60 = vpop.permute.xlu1 %1927 }
 0x28f   : > { %v1590_v58 = vpop.permute.xlu0 %1589  ;;  %1567 = vmatpush.msra.mxu2 %v6146_v56  ;;  %5795 = vmatpush.xpose.msk.msra.mxu3 %vm1430_vm14, %v1596_v57 }
 0x293   : > { %5789 = vmatmul.msk.f32.gmra.mxu1 %vm1430_vm14, %v6949_v37  ;;  %5796 = vmatpush.xpose.msk.msra.mxu3 %vm1430_vm14, %v1594_v49 }
 0x296   : > { %v1756_v63 = vpop.permute.xlu1 %1755  ;;  %v1588_v0 = vpop.permute.xlu2 %1587 }
 0x297   : > { %v1926_v59 = vpop.permute.xlu0 %1925  ;;  %5797 = vmatpush.xpose.msk.msra.mxu3 %vm1430_vm14, %v1592_v45 }
 0x29b   : > { %5790 = vmatmul.msk.f32.gmra.mxu1 %vm1430_vm14, %v6955_v38  ;;  %5798 = vmatpush.xpose.msk.msra.mxu3 %vm1430_vm14, %v1590_v58 }
 0x29e   : > { %5799 = vmatmul.msk.f32.vlgmr.msra.gmra.mxu3 %vm1430_vm14, %v1582_v44 }
 0x29f   : > { %5819 = vmatpush.xpose.msk.msrb.mxu3 %vm1430_vm14, %v1928_v60  ;;  %v1758_v61 = vpop.permute.xlu0 %1757 }
 0x2a3   : > { %5820 = vmatpush.xpose.msk.msrb.mxu3 %vm1430_vm14, %v1926_v59 }
 0x2a6   : > { %5800 = vmatmul.msk.f32.gmra.mxu3 %vm1430_vm14, %v1584_v47 }
 0x2a7   : > { %v1762_v62 = vpop.permute.xlu0 %1761 }
 0x2a8   : > { %5807 = vmatpush.xpose.msk.msrb.mxu2 %vm1430_vm14, %v1762_v62 }
 0x2ac   : > { %5808 = vmatpush.xpose.msk.msrb.mxu2 %vm1430_vm14, %v1760_v51 }
 0x2ae   : > { %5801 = vmatmul.msk.f32.gmra.mxu3 %vm1430_vm14, %v1586_v48 }
 0x2b0   : > { %5809 = vmatpush.xpose.msk.msrb.mxu2 %vm1430_vm14, %v1758_v61 }
 0x2b4   : > { %5810 = vmatpush.xpose.msk.msrb.mxu2 %vm1430_vm14, %v1756_v63 }
 0x2b6   : > { %5802 = vmatmul.msk.f32.gmra.mxu3 %vm1430_vm14, %v1588_v0 }
 0x300   : > { %v1464_v1 = vpop.f32.mrf.mxu1 }
 0x301   : > { %v1476_v3 = vmul.f32 0.35355338, %v1464_v1 }
 0x303   : > { %v1480_v4 = vadd.f32 %v1476_v3, %v7026_v2 }
 0x305   : > { %v1484_v5 = vsel %vm1259_vm0, %v1480_v4, -inf }
 0x306   : > { %1485 = vmax.xlane.f32.xlu0 %v1484_v5 }
 0x308   : > { %v1467_v6 = vpop.f32.mrf.mxu1 }
 0x309   : > { %v1477_v8 = vmul.f32 0.35355338, %v1467_v6 }
 0x30b   : > { %v1481_v9 = vadd.f32 %v1477_v8, %v7031_v7 }
 0x30d   : > { %v1487_v10 = vsel %vm1259_vm0, %v1481_v9, -inf }
 0x30e   : > { %1488 = vmax.xlane.f32.xlu2 %v1487_v10 }
 0x310   : > { %v1470_v11 = vpop.f32.mrf.mxu1 }
 0x311   : > { %v1478_v13 = vmul.f32 0.35355338, %v1470_v11 }
 0x313   : > { %v1482_v15 = vadd.f32 %v1478_v13, %v7036_v12 }
 0x315   : > { %v1490_v16 = vsel %vm1259_vm0, %v1482_v15, -inf }
 0x316   : > { %1491 = vmax.xlane.f32.xlu1 %v1490_v16 }
 0x318   : > { %v1473_v17 = vpop.f32.mrf.mxu1 }
 0x319   : > { %v1479_v20 = vmul.f32 0.35355338, %v1473_v17 }
 0x31b   : > { %v1483_v21 = vadd.f32 %v1479_v20, %v7041_v18 }
 0x31d   : > { %v1493_v22 = vsel %vm1259_vm0, %v1483_v21, -inf }
 0x31e   : > { %1494 = vmax.xlane.f32.xlu0 %v1493_v22 }
 0x321   : > { %v1630_v47 = vpop.f32.mrf.mxu3 }
 0x322   : > { %v1642_v52 = vmul.f32 0.35355338, %v1630_v47 }
 0x326   : > { %1923 = vrot.lane.b32.xlu2 %v6943_v35, %s6629_s2 }
 0x329   : > { %v1633_v49 = vpop.f32.mrf.mxu3 }
 0x32a   : > { %v1643_v53 = vmul.f32 0.35355338, %v1633_v49 }
 0x32c   : > { %v7069_v55 = vadd.f32 %v1643_v53, %v7031_v7 }
 0x32e   : > { %v1653_v58 = vsel %vm1259_vm0, %v7069_v55, -inf }
 0x331   : > { %v1636_v51 = vpop.f32.mrf.mxu3 }
 0x332   : > { %1921 = vrot.lane.b32.xlu0 %v6947_v36, %s6629_s2 }
 0x339   : > { %v1639_v54 = vpop.f32.mrf.mxu3 }
 0x33a   : > { %v1645_v56 = vmul.f32 0.35355338, %v1639_v54 }
 0x33c   : > { %v7075_v59 = vadd.f32 %v1645_v56, %v7041_v18 }
 0x33e   : > { %v1659_v60 = vsel %vm1259_vm0, %v7075_v59, -inf }
 0x379   : > { %v1486_v23 = vpop.xlane.xlu0 %1485 }
 0x37a   : > { %v1496_v24 = vsub.f32 %v1480_v4, %v1486_v23 }
 0x37c   : > { %v1500_v25 = vmul.f32 1.442695, %v1496_v24 }
 0x37e   : > { %6250 = vpow2.f32 %v1500_v25 }
 0x381   : > { %v1489_v26 = vpop.xlane.xlu2 %1488 }
 0x382   : > { %v1497_v27 = vsub.f32 %v1481_v9, %v1489_v26 }
 0x384   : > { %v6251_v28 = vpop.eup %6250  ;;  %v1502_v30 = vmul.f32 1.442695, %v1497_v27 }
 0x385   : > { %v1508_v31 = vsel %vm1259_vm0, %v6251_v28, 0.0 }
 0x386   : > { %6252 = vpow2.f32 %v1502_v30  ;;  %1509 = vadd.xlane.f32.xlu1 %v1508_v31 }
 0x389   : > { %v1924_v32 = vpop.permute.xlu2 %1923  ;;  %v1492_v33 = vpop.xlane.xlu1 %1491 }
 0x38a   : > { %v1498_v34 = vsub.f32 %v1482_v15, %v1492_v33  ;;  %5821 = vmatpush.xpose.msk.msrb.mxu3 %vm1430_vm14, %v1924_v32 }
 0x38c   : > { %v6253_v19 = vpop.eup %6252  ;;  %v1504_v29 = vmul.f32 1.442695, %v1498_v34 }
 0x38d   : > { %v1511_v41 = vsel %vm1259_vm0, %v6253_v19, 0.0 }
 0x38e   : > { %6254 = vpow2.f32 %v1504_v29  ;;  %1512 = vadd.xlane.f32.xlu2 %v1511_v41 }
 0x391   : > { %v1495_v44 = vpop.xlane.xlu0 %1494 }
 0x392   : > { %v1499_v46 = vsub.f32 %v1483_v21, %v1495_v44 }
 0x394   : > { %v6255_v42 = vpop.eup %6254  ;;  %v1506_v48 = vmul.f32 1.442695, %v1499_v46 }
 0x395   : > { %v1514_v43 = vsel %vm1259_vm0, %v6255_v42, 0.0 }
 0x396   : > { %1515 = vadd.xlane.f32.xlu0 %v1514_v43  ;;  %6256 = vpow2.f32 %v1506_v48 }
 0x39c   : > { %v6257_v50 = vpop.eup %6256 }
 0x39f   : > { %1913 = vrot.lane.b32.xlu1 %v6947_v36, %s6631_s10 }
 0x3a4   : > { %v1922_v45 = vpop.permute.xlu0 %1921 }
 0x3a5   : > { %5822 = vmatpush.xpose.msk.msrb.mxu3 %vm1430_vm14, %v1922_v45 }
 0x3a6   : > { %1747 = vrot.lane.b32.xlu2 %v6947_v36, %s6632_s11  ;;  %v1517_v36 = vsel %vm1259_vm0, %v6257_v50, 0.0 }
 0x3aa   : > { %1749 = vrot.lane.b32.xlu0 %v6943_v35, %s6632_s11 }
 0x3ae   : > { %1915 = vrot.lane.b32.xlu2 %v6943_v35, %s6631_s10  ;;  %v1646_v35 = vadd.f32 %v1642_v52, %v7026_v2 }
 0x3b0   : > { %v1650_v57 = vsel %vm1259_vm0, %v1646_v35, -inf }
 0x3b2   : > { %1917 = vrot.lane.b32.xlu0 %v6949_v37, %s6631_s10 }
 0x3b6   : > { %1753 = vrot.lane.b32.xlu2 %v6955_v38, %s6632_s11 }
 0x3c9   : > { %1518 = vadd.xlane.f32.xlu1 %v1517_v36 }
 0x3dc   : > { %1651 = vmax.xlane.f32.xlu0 %v1650_v57 }
 0x3df   : > { %1654 = vmax.xlane.f32.xlu2 %v1653_v58 }
 0x3e2   : > { %1751 = vrot.lane.b32.xlu1 %v6949_v37, %s6632_s11  ;;  %v1644_v37 = vmul.f32 0.35355338, %v1636_v51 }
 0x3e4   : > { %1660 = vmax.xlane.f32.xlu0 %v1659_v60  ;;  %v7086_v6 = vadd.f32 %v1644_v37, %v7036_v12 }
 0x3e6   : > { %v1656_v10 = vsel %vm1259_vm0, %v7086_v6, -inf }
 0x3ea   : > { %1919 = vrot.lane.b32.xlu1 %v6955_v38, %s6631_s10 }
 0x3f9   : > { %v1510_v61 = vpop.xlane.xlu1 %1509 }
 0x3fa   : > { %6258 = vrcp.f32 %v1510_v61 }
 0x400   : > { %v6259_v62 = vpop.eup %6258 }
 0x401   : > { %v1513_v63 = vpop.xlane.xlu2 %1512  ;;  %v1524_v0 = vmul.f32 %v6259_v62, %v6251_v28 }
 0x402   : > { %6260 = vrcp.f32 %v1513_v63 }
 0x403   : > { %5791 = vmatmul.msk.f32.vlgmr.msra.gmra.mxu2 %vm1259_vm0, %v1524_v0 }
 0x408   : > { %v6261_v1 = vpop.eup %6260 }
 0x409   : > { %v1516_v3 = vpop.xlane.xlu0 %1515  ;;  %v1525_v4 = vmul.f32 %v6261_v1, %v6253_v19  ;;  %v1748_v5 = vpop.permute.xlu2 %1747 }
 0x40a   : > { %6262 = vrcp.f32 %v1516_v3 }
 0x40b   : > { %5792 = vmatmul.msk.f32.gmra.mxu2 %vm1259_vm0, %v1525_v4 }
 0x410   : > { %v6263_v38 = vpop.eup %6262 }
 0x411   : > { %v1914_v8 = vpop.permute.xlu1 %1913  ;;  %v1526_v9 = vmul.f32 %v6263_v38, %v6255_v42  ;;  %v1916_v11 = vpop.permute.xlu2 %1915 }
 0x412   : > { %5823 = vmatmul.msk.f32.vlgmr.msrb.gmra.mxu3 %vm1430_vm14, %v1914_v8 }
 0x413   : > { %5793 = vmatmul.msk.f32.gmra.mxu2 %vm1259_vm0, %v1526_v9 }
 0x414   : > { %1657 = vmax.xlane.f32.xlu1 %v1656_v10 }
 0x419   : > { %v1754_v23 = vpop.permute.xlu2 %1753 }
 0x41a   : > { %5824 = vmatmul.msk.f32.gmra.mxu3 %vm1430_vm14, %v1916_v11 }
 0x41c   : > { %v1750_v13 = vpop.permute.xlu0 %1749 }
 0x424   : > { %v1918_v15 = vpop.permute.xlu0 %1917 }
 0x425   : > { %5825 = vmatmul.msk.f32.gmra.mxu3 %vm1430_vm14, %v1918_v15 }
 0x43c   : > { %v1519_v16 = vpop.xlane.xlu1 %1518 }
 0x43d   : > { %6264 = vrcp.f32 %v1519_v16 }
 0x443   : > { %v6265_v17 = vpop.eup %6264 }
 0x444   : > { %v1527_v20 = vmul.f32 %v6265_v17, %v6257_v50 }
 0x446   : > { %5794 = vmatmul.msk.f32.gmra.mxu2 %vm1259_vm0, %v1527_v20 }
 0x44e   : > { %5811 = vmatmul.msk.f32.vlgmr.msrb.gmra.mxu2 %vm1430_vm14, %v1748_v5 }
 0x44f   : > { %v1652_v25 = vpop.xlane.xlu0 %1651 }
 0x450   : > { %v1662_v28 = vsub.f32 %v1646_v35, %v1652_v25 }
 0x452   : > { %v1666_v31 = vmul.f32 1.442695, %v1662_v28  ;;  %v1655_v53 = vpop.xlane.xlu2 %1654 }
 0x453   : > { %v1663_v56 = vsub.f32 %v7069_v55, %v1655_v53 }
 0x454   : > { %v1752_v21 = vpop.permute.xlu1 %1751  ;;  %6266 = vpow2.f32 %v1666_v31 }
 0x455   : > { %v1668_v60 = vmul.f32 1.442695, %v1663_v56 }
 0x456   : > { %5812 = vmatmul.msk.f32.gmra.mxu2 %vm1430_vm14, %v1750_v13 }
 0x457   : > { %6268 = vpow2.f32 %v1668_v60  ;;  %v1661_v11 = vpop.xlane.xlu0 %1660 }
 0x458   : > { %v1665_v13 = vsub.f32 %v7075_v59, %v1661_v11 }
 0x45a   : > { %v7110_v29 = vpop.eup %6266  ;;  %v1672_v17 = vmul.f32 1.442695, %v1665_v13 }
 0x45b   : > { %v1674_v43 = vsel %vm1259_vm0, %v7110_v29, 0.0 }
 0x45c   : > { %v1920_v22 = vpop.permute.xlu1 %1919 }
 0x45d   : > { %5826 = vmatmul.msk.f32.gmra.mxu3 %vm1430_vm14, %v1920_v22  ;;  %v7143_v5 = vpop.eup %6268 }
 0x45e   : > { %5813 = vmatmul.msk.f32.gmra.mxu2 %vm1430_vm14, %v1752_v21  ;;  %v1677_v38 = vsel %vm1259_vm0, %v7143_v5, 0.0 }
 0x466   : > { %5814 = vmatmul.msk.f32.gmra.mxu2 %vm1430_vm14, %v1754_v23 }
 0x486   : > { %v7117_v45 = vpop.f32.mrf.mxu2 }
 0x487   : > { %v1658_v62 = vpop.xlane.xlu1 %1657 }
 0x488   : > { %v1664_v3 = vsub.f32 %v7086_v6, %v1658_v62 }
 0x48a   : > { %v1670_v37 = vmul.f32 1.442695, %v1664_v3 }
 0x48c   : > { %6270 = vpow2.f32 %v1670_v37 }
 0x48e   : > { %v7121_v47 = vpop.f32.mrf.mxu2 }
 0x492   : > { %v7147_v8 = vpop.eup %6270 }
 0x495   : > { %v1962_v24 = vpop.f32.mrf.mxu3 }
 0x496   : > { %v1974_v26 = vmul.f32 0.35355338, %v1962_v24  ;;  %v7123_v48 = vpop.f32.mrf.mxu2 }
 0x498   : > { %v7101_v27 = vadd.f32 %v1974_v26, %v7026_v2 }
 0x49a   : > { %v1982_v30 = vsel %vm1259_vm0, %v7101_v27, -inf }
 0x49b   : > { %1983 = vmax.xlane.f32.xlu1 %v1982_v30 }
 0x49d   : > { %v1965_v32 = vpop.f32.mrf.mxu3 }
 0x49e   : > { %v1975_v33 = vmul.f32 0.35355338, %v1965_v32 }
 0x4a0   : > { %v7106_v34 = vadd.f32 %v1975_v33, %v7031_v7 }
 0x4a2   : > { %v1985_v19 = vsel %vm1259_vm0, %v7106_v34, -inf }
 0x4a3   : > { %1986 = vmax.xlane.f32.xlu2 %v1985_v19 }
 0x4a8   : > { %v1968_v41 = vpop.f32.mrf.mxu3 }
 0x4a9   : > { %v1976_v42 = vmul.f32 0.35355338, %v1968_v41 }
 0x4ab   : > { %1675 = vadd.xlane.f32.xlu2 %v1674_v43  ;;  %v7115_v44 = vadd.f32 %v1976_v42, %v7036_v12 }
 0x4ad   : > { %v1988_v46 = vsel %vm1259_vm0, %v7115_v44, -inf }
 0x4ae   : > { %1989 = vmax.xlane.f32.xlu0 %v1988_v46 }
 0x4c9   : > { %v7125_v49 = vpop.f32.mrf.mxu2 }
 0x4d1   : > { %v1796_v50 = vpop.f32.mrf.mxu2 }
 0x4d2   : > { %v1808_v36 = vmul.f32 0.35355338, %v1796_v50 }
 0x4d4   : > { %v7128_v51 = vadd.f32 %v1808_v36, %v7026_v2 }
 0x4d6   : > { %v1816_v52 = vsel %vm1259_vm0, %v7128_v51, -inf }
 0x4d7   : > { %1817 = vmax.xlane.f32.xlu2 %v1816_v52 }
 0x4d9   : > { %v1799_v35 = vpop.f32.mrf.mxu2 }
 0x4da   : > { %v1809_v54 = vmul.f32 0.35355338, %v1799_v35 }
 0x4dc   : > { %v1813_v57 = vadd.f32 %v1809_v54, %v7031_v7 }
 0x4de   : > { %v1819_v58 = vsel %vm1259_vm0, %v1813_v57, -inf }
 0x4df   : > { %1820 = vmax.xlane.f32.xlu0 %v1819_v58 }
 0x4e0   : > { %v1971_v61 = vpop.f32.mrf.mxu3 }
 0x4e1   : > { %v1977_v63 = vmul.f32 0.35355338, %v1971_v61  ;;  %v1802_v2 = vpop.f32.mrf.mxu2 }
 0x4e2   : > { %v1810_v0 = vmul.f32 0.35355338, %v1802_v2 }
 0x4e3   : > { %v7136_v1 = vadd.f32 %v1977_v63, %v7041_v18 }
 0x4e4   : > { %v1814_v4 = vadd.f32 %v1810_v0, %v7036_v12  ;;  %v1680_v12 = vsel %vm1259_vm0, %v7147_v8, 0.0 }
 0x4e5   : > { %v1991_v7 = vsel %vm1259_vm0, %v7136_v1, -inf }
 0x4e6   : > { %1992 = vmax.xlane.f32.xlu2 %v1991_v7  ;;  %v1822_v55 = vsel %vm1259_vm0, %v1814_v4, -inf }
 0x4e7   : > { %1823 = vmax.xlane.f32.xlu1 %v1822_v55 }
 0x4e9   : > { %v1805_v16 = vpop.f32.mrf.mxu2 }
 0x4ea   : > { %v1811_v20 = vmul.f32 0.35355338, %v1805_v16 }
 0x4ec   : > { %v7166_v22 = vadd.f32 %v1811_v20, %v7041_v18 }
 0x4ee   : > { %1678 = vadd.xlane.f32.xlu2 %v1677_v38  ;;  %v1825_v23 = vsel %vm1259_vm0, %v7166_v22, -inf }
 0x4f3   : > { %6158 = vrot.lane.b32.xlu0 %v6969_v40, %s8322_s0 }
 0x4f6   : > { %1681 = vadd.xlane.f32.xlu2 %v1680_v12 }
 0x500   : > { %6153 = vrot.lane.b32.xlu1 %v6965_v39, %s8322_s0  ;;  %s6638_s0 = smov 16  }
 0x50e   : > { %v1984_v6 = vpop.xlane.xlu1 %1983  ;;  %6163 = vrot.lane.b32.xlu2 %v6965_v39, %s8318_s18 }
 0x50f   : > { %v1994_v9 = vsub.f32 %v7101_v27, %v1984_v6 }
 0x511   : > { %v1998_v10 = vmul.f32 1.442695, %v1994_v9 }
 0x513   : > { %6272 = vpow2.f32 %v1998_v10 }
 0x514   : > { %6274 = vpow2.f32 %v1672_v17 }
 0x516   : > { %6168 = vrot.lane.b32.xlu2 %v6965_v39, %s8320_s1  ;;  %v7174_v24 = vpop.xlane.xlu2 %1986 }
 0x517   : > { %v1995_v13 = vsub.f32 %v7106_v34, %v7174_v24 }
 0x519   : > { %v7161_v15 = vpop.eup %6272  ;;  %v2000_v17 = vmul.f32 1.442695, %v1995_v13 }
 0x51a   : > { %v2006_v21 = vsel %vm1259_vm0, %v7161_v15, 0.0  ;;  %v7170_v39 = vpop.eup %6274 }
 0x51b   : > { %v1683_v59 = vsel %vm1259_vm0, %v7170_v39, 0.0 }
 0x51d   : > { %2007 = vadd.xlane.f32.xlu0 %v2006_v21 }
 0x51e   : > { %v1676_v25 = vpop.xlane.xlu2 %1675 }
 0x521   : > { %v1990_v26 = vpop.xlane.xlu0 %1989 }
 0x522   : > { %v1996_v50 = vsub.f32 %v7115_v44, %v1990_v26 }
 0x524   : > { %v2002_v52 = vmul.f32 1.442695, %v1996_v50 }
 0x525   : > { %1826 = vmax.xlane.f32.xlu0 %v1825_v23 }
 0x52a   : > { %1684 = vadd.xlane.f32.xlu1 %v1683_v59 }
 0x539   : > { %6178 = vrot.lane.b32.xlu0 %v6969_v40, %s8320_s1  ;;  %s6637_s1 = smov 24  }
 0x54a   : > { %v1818_v27 = vpop.xlane.xlu2 %1817 }
 0x54b   : > { %v1828_v18 = vsub.f32 %v7128_v51, %v1818_v27 }
 0x54d   : > { %v1832_v28 = vmul.f32 1.442695, %v1828_v18 }
 0x54f   : > { %6276 = vpow2.f32 %v1832_v28 }
 0x552   : > { %v1821_v30 = vpop.xlane.xlu0 %1820 }
 0x553   : > { %v1829_v31 = vsub.f32 %v1813_v57, %v1821_v30 }
 0x555   : > { %v7179_v32 = vpop.eup %6276  ;;  %v1834_v33 = vmul.f32 1.442695, %v1829_v31 }
 0x556   : > { %v1840_v19 = vsel %vm1259_vm0, %v7179_v32, 0.0 }
 0x557   : > { %6278 = vpow2.f32 %v1834_v33  ;;  %1841 = vadd.xlane.f32.xlu2 %v1840_v19 }
 0x559   : > { %v1993_v41 = vpop.xlane.xlu2 %1992 }
 0x55a   : > { %v1824_v42 = vpop.xlane.xlu1 %1823  ;;  %v1997_v54 = vsub.f32 %v7136_v1, %v1993_v41 }
 0x55b   : > { %v1830_v43 = vsub.f32 %v1814_v4, %v1824_v42 }
 0x55c   : > { %v2004_v57 = vmul.f32 1.442695, %v1997_v54 }
 0x55d   : > { %v7183_v46 = vpop.eup %6278  ;;  %v1836_v36 = vmul.f32 1.442695, %v1830_v43 }
 0x55e   : > { %v1843_v51 = vsel %vm1259_vm0, %v7183_v46, 0.0 }
 0x55f   : > { %6280 = vpow2.f32 %v1836_v36  ;;  %1844 = vadd.xlane.f32.xlu1 %v1843_v51 }
 0x560   : > { %6282 = vpow2.f32 %v2002_v52 }
 0x561   : > { %v1679_v53 = vpop.xlane.xlu2 %1678  ;;  %6284 = vpow2.f32 %v2004_v57 }
 0x562   : > { %6286 = vrcp.f32 %v1676_v25 }
 0x563   : > { %6288 = vrcp.f32 %v1679_v53 }
 0x565   : > { %v7188_v35 = vpop.eup %6280  ;;  %v6159_v1 = vpop.permute.xlu0 %6158 }
 0x566   : > { %v1846_v56 = vsel %vm1259_vm0, %v7188_v35, 0.0  ;;  %v7193_v44 = vpop.eup %6282  ;;  %v6161_v38 = vunpack.i.h.bf16 %v6159_v1 }
 0x567   : > { %1847 = vadd.xlane.f32.xlu1 %v1846_v56  ;;  %v2012_v60 = vsel %vm1259_vm0, %v7193_v44, 0.0  ;;  %v7199_v2 = vpop.eup %6284 }
 0x568   : > { %v2015_v7 = vsel %vm1259_vm0, %v7199_v2, 0.0  ;;  %v6287_v55 = vpop.eup %6286 }
 0x569   : > { %v1682_v58 = vpop.xlane.xlu2 %1681  ;;  %v1690_v6 = vmul.f32 %v6287_v55, %v7110_v29  ;;  %v6289_v10 = vpop.eup %6288 }
 0x56a   : > { %6290 = vrcp.f32 %v1682_v58  ;;  %v1691_v11 = vmul.f32 %v6289_v10, %v7143_v5 }
 0x56b   : > { %6292 = vpow2.f32 %v2000_v17 }
 0x56f   : > { %6173 = vrot.lane.b32.xlu2 %v6969_v40, %s8318_s18  ;;  %2013 = vadd.xlane.f32.xlu1 %v2012_v60  ;;  %v6160_v40 = vunpack.i.l.bf16 %v6159_v1  ;;  %s6636_s18 = smov 8  }
 0x570   : > { %v6291_v16 = vpop.eup %6290 }
 0x571   : > { %v6164_v61 = vpop.permute.xlu2 %6163  ;;  %v1692_v20 = vmul.f32 %v6291_v16, %v7147_v8  ;;  %v6293_v21 = vpop.eup %6292 }
 0x572   : > { %v6154_v62 = vpop.permute.xlu1 %6153  ;;  %v6165_v63 = vunpack.i.l.bf16 %v6164_v61  ;;  %v6166_v3 = vunpack.i.h.bf16 %v6164_v61  ;;  %v2009_v23 = vsel %vm1259_vm0, %v6293_v21, 0.0 }
 0x573   : > { %v6155_v0 = vunpack.i.l.bf16 %v6154_v62  ;;  %v6156_v4 = vunpack.i.h.bf16 %v6154_v62 }
 0x574   : > { %1896 = vmatpush.msrb.mxu1 %v6165_v63 }
 0x575   : > { %1730 = vmatpush.msrb.mxu0 %v6155_v0 }
 0x576   : > { %1897 = vmatpush.msrb.mxu1 %v6166_v3 }
 0x577   : > { %2016 = vadd.xlane.f32.xlu1 %v2015_v7  ;;  %1731 = vmatpush.msrb.mxu0 %v6156_v4 }
 0x579   : > { %v6169_v37 = vpop.permute.xlu2 %6168  ;;  %1732 = vmatpush.msrb.mxu0 %v6160_v40 }
 0x57a   : > { %v6170_v12 = vunpack.i.l.bf16 %v6169_v37  ;;  %v6171_v9 = vunpack.i.h.bf16 %v6169_v37  ;;  %v2143_v37 = vld [vmem:[%s8400_s3 + $0x10] sm:$0xff] }
 0x57b   : > { %1733 = vmatpush.msrb.mxu0 %v6161_v38  ;;  %v2142_v38 = vld [vmem:[%s8400_s3 + $0x8] sm:$0xff] }
 0x57c   : > { %5803 = vmatmul.msk.f32.vlgmr.msrb.gmra.mxu0 %vm1259_vm0, %v1690_v6  ;;  %v2141_v6 = vld [vmem:[%s8400_s3] sm:$0xff] }
 0x57d   : > { %2062 = vmatpush.msra.mxu0 %v6170_v12 }
 0x57f   : > { %2063 = vmatpush.msra.mxu0 %v6171_v9 }
 0x584   : > { %5804 = vmatmul.msk.f32.gmra.mxu0 %vm1259_vm0, %v1691_v11 }
 0x58c   : > { %5805 = vmatmul.msk.f32.gmra.mxu0 %vm1259_vm0, %v1692_v20 }
 0x590   : > { %v2008_v29 = vpop.xlane.xlu0 %2007 }
 0x598   : > { %2010 = vadd.xlane.f32.xlu2 %v2009_v23  ;;  %v1827_v59 = vpop.xlane.xlu0 %1826 }
 0x599   : > { %v1831_v5 = vsub.f32 %v7166_v22, %v1827_v59 }
 0x59b   : > { %v1838_v25 = vmul.f32 1.442695, %v1831_v5 }
 0x59d   : > { %6294 = vpow2.f32 %v1838_v25  ;;  %v1685_v26 = vpop.xlane.xlu1 %1684 }
 0x59e   : > { %6296 = vrcp.f32 %v1685_v26 }
 0x59f   : > { %6298 = vrcp.f32 %v2008_v29 }
 0x5a3   : > { %v6295_v34 = vpop.eup %6294 }
 0x5a4   : > { %v6297_v24 = vpop.eup %6296  ;;  %v1849_v27 = vsel %vm1259_vm0, %v6295_v34, 0.0 }
 0x5a5   : > { %1850 = vadd.xlane.f32.xlu0 %v1849_v27  ;;  %v1693_v8 = vmul.f32 %v6297_v24, %v7170_v39  ;;  %v6299_v28 = vpop.eup %6298 }
 0x5a6   : > { %v2022_v22 = vmul.f32 %v6299_v28, %v7161_v15 }
 0x5a7   : > { %5806 = vmatmul.msk.f32.gmra.mxu0 %vm1259_vm0, %v1693_v8 }
 0x5ab   : > { %v6179_v18 = vpop.permute.xlu0 %6178 }
 0x5ac   : > { %v6180_v30 = vunpack.i.l.bf16 %v6179_v18  ;;  %v6181_v31 = vunpack.i.h.bf16 %v6179_v18 }
 0x5ae   : > { %2064 = vmatpush.msra.mxu0 %v6180_v30 }
 0x5b0   : > { %2065 = vmatpush.msra.mxu0 %v6181_v31 }
 0x5b1   : > { %5827 = vmatmul.msk.f32.vlgmr.msra.gmra.mxu0 %vm1259_vm0, %v2022_v22 }
 0x5ca   : > { %v1842_v33 = vpop.xlane.xlu2 %1841 }
 0x5cb   : > { %6300 = vrcp.f32 %v1842_v33 }
 0x5d1   : > { %v6301_v42 = vpop.eup %6300 }
 0x5d2   : > { %v6174_v19 = vpop.permute.xlu2 %6173  ;;  %v1845_v41 = vpop.xlane.xlu1 %1844  ;;  %v1856_v50 = vmul.f32 %v6301_v42, %v7179_v32 }
 0x5d3   : > { %v6175_v43 = vunpack.i.l.bf16 %v6174_v19  ;;  %6302 = vrcp.f32 %v1845_v41  ;;  %v6176_v39 = vunpack.i.h.bf16 %v6174_v19 }
 0x5d5   : > { %1898 = vmatpush.msrb.mxu1 %v6175_v43  ;;  %v6442_v43 = vld [vmem:[%s8399_s5] sm:$0xff] }
 0x5d7   : > { %1899 = vmatpush.msrb.mxu1 %v6176_v39 }
 0x5d8   : > { %5815 = vmatmul.msk.f32.vlgmr.msrb.gmra.mxu1 %vm1259_vm0, %v1856_v50 }
 0x5d9   : > { %v6303_v51 = vpop.eup %6302 }
 0x5da   : > { %v1848_v36 = vpop.xlane.xlu1 %1847  ;;  %v1857_v15 = vmul.f32 %v6303_v51, %v7183_v46  ;;  %v6443_v51 = vld [vmem:[%s8399_s5 + $0x8] sm:$0xff] }
 0x5db   : > { %6304 = vrcp.f32 %v1848_v36 }
 0x5e0   : > { %5816 = vmatmul.msk.f32.gmra.mxu1 %vm1259_vm0, %v1857_v15 }
 0x5e1   : > { %v6305_v52 = vpop.eup %6304 }
 0x5e2   : > { %v1858_v53 = vmul.f32 %v6305_v52, %v7188_v35  ;;  %v2014_v56 = vpop.xlane.xlu1 %2013 }
 0x5e8   : > { %5817 = vmatmul.msk.f32.gmra.mxu1 %vm1259_vm0, %v1858_v53 }
 0x5ea   : > { %v2017_v46 = vpop.xlane.xlu1 %2016 }
 0x5f9   : > { %v1735_v54 = vpop.f32.mrf.mxu0 }
 0x5fa   : > { %2083 = vrot.lane.b32.xlu1 %v1735_v54, %s6636_s18 }
 0x601   : > { %v1738_v60 = vpop.f32.mrf.mxu0 }
 0x609   : > { %v1741_v63 = vpop.f32.mrf.mxu0 }
 0x60b   : > { %v2011_v32 = vpop.xlane.xlu2 %2010 }
 0x60c   : > { %6306 = vrcp.f32 %v2011_v32  ;;  %v6444_v32 = vld [vmem:[%s8399_s5 + $0x10] sm:$0xff] }
 0x60d   : > { %6308 = vrcp.f32 %v2014_v56 }
 0x612   : > { %v6307_v57 = vpop.eup %6306 }
 0x613   : > { %v2023_v58 = vmul.f32 %v6307_v57, %v6293_v21  ;;  %v6309_v61 = vpop.eup %6308 }
 0x614   : > { %v2024_v35 = vmul.f32 %v6309_v61, %v7193_v44 }
 0x615   : > { %5828 = vmatmul.msk.f32.gmra.mxu0 %vm1259_vm0, %v2023_v58 }
 0x618   : > { %v1851_v62 = vpop.xlane.xlu0 %1850 }
 0x619   : > { %6310 = vrcp.f32 %v1851_v62 }
 0x61a   : > { %6312 = vrcp.f32 %v2017_v46  ;;  %v6445_v46 = vld [vmem:[%s8399_s5 + $0x18] sm:$0xff] }
 0x61d   : > { %5829 = vmatmul.msk.f32.gmra.mxu0 %vm1259_vm0, %v2024_v35 }
 0x61f   : > { %v6311_v0 = vpop.eup %6310 }
 0x620   : > { %v6313_v1 = vpop.eup %6312  ;;  %v1859_v3 = vmul.f32 %v6311_v0, %v6295_v34 }
 0x621   : > { %v2025_v4 = vmul.f32 %v6313_v1, %v7199_v2  ;;  %v2144_v2 = vld [vmem:[%s8400_s3 + $0x18] sm:$0xff] }
 0x622   : > { %5818 = vmatmul.msk.f32.gmra.mxu1 %vm1259_vm0, %v1859_v3  ;;  %2169 = vmatpush.msra.mxu2 %v2144_v2 }
 0x624   : > { %v1744_v7 = vpop.f32.mrf.mxu0  ;;  %2170 = vmatpush.msra.mxu2 %v2143_v37 }
 0x625   : > { %5830 = vmatmul.msk.f32.gmra.mxu0 %vm1259_vm0, %v2025_v4 }
 0x626   : > { %2171 = vmatpush.msra.mxu2 %v2142_v38 }
 0x628   : > { %2172 = vmatpush.msra.mxu2 %v2141_v6 }
 0x62e   : > { %v2067_v55 = vpop.f32.mrf.mxu0 }
 0x62f   : > { %2115 = vrot.lane.b32.xlu1 %v2067_v55, %s6637_s1 }
 0x637   : > { %2085 = vrot.lane.b32.xlu1 %v1738_v60, %s6636_s18 }
 0x63f   : > { %2087 = vrot.lane.b32.xlu1 %v1741_v63, %s6636_s18 }
 0x655   : > { %v1901_v44 = vpop.f32.mrf.mxu1 }
 0x656   : > { %2099 = vrot.lane.b32.xlu2 %v1901_v44, %s6638_s0 }
 0x65d   : > { %v1904_v40 = vpop.f32.mrf.mxu1 }
 0x65e   : > { %2101 = vrot.lane.b32.xlu0 %v1904_v40, %s6638_s0 }
 0x665   : > { %v1907_v9 = vpop.f32.mrf.mxu1 }
 0x666   : > { %2089 = vrot.lane.b32.xlu0 %v1744_v7, %s6636_s18 }
 0x66c   : > { %v2084_v16 = vpop.permute.xlu1 %2083 }
 0x66d   : > { %v2127_v17 = vsel %vm1430_vm14, %v7117_v45, %v2084_v16 }
 0x692   : > { %v2070_v12 = vpop.f32.mrf.mxu0 }
 0x693   : > { %2117 = vrot.lane.b32.xlu2 %v2070_v12, %s6637_s1 }
 0x69a   : > { %v2073_v10 = vpop.f32.mrf.mxu0 }
 0x69b   : > { %2103 = vrot.lane.b32.xlu2 %v1907_v9, %s6638_s0  ;;  %2119 = vrot.lane.b32.xlu1 %v2073_v10, %s6637_s1 }
 0x69f   : > { %v1910_v11 = vpop.f32.mrf.mxu1 }
 0x6a1   : > { %v2116_v29 = vpop.permute.xlu1 %2115 }
 0x6a2   : > { %v2076_v13 = vpop.f32.mrf.mxu0 }
 0x6a3   : > { %2105 = vrot.lane.b32.xlu2 %v1910_v11, %s6638_s0  ;;  %2121 = vrot.lane.b32.xlu1 %v2076_v13, %s6637_s1 }
 0x6a9   : > { %v2086_v59 = vpop.permute.xlu1 %2085 }
 0x6aa   : > { %v2128_v25 = vsel %vm1430_vm14, %v7121_v47, %v2086_v59 }
 0x6b0   : > { %v2100_v20 = vpop.permute.xlu2 %2099 }
 0x6b1   : > { %v2132_v21 = vsel %vm2131_vm15, %v2127_v17, %v2100_v20  ;;  %v2088_v45 = vpop.permute.xlu1 %2087  ;;  %v2305_v20 = vld [vmem:[%s6717_s24 + $0x18] sm:$0xff] }
 0x6b2   : > { %v2137_v23 = vsel %vm2136_vm1, %v2132_v21, %v2116_v29  ;;  %v2129_v8 = vsel %vm1430_vm14, %v7123_v48, %v2088_v45  ;;  %v6225_v48 = vld [vmem:[%s8397_s8] ss:$0 sm:$0xff]  ;;  %2334 = vmatpush.msra.mxu1 %v2305_v20  ;;  %v2304_v29 = vld [vmem:[%s6717_s24 + $0x10] sm:$0xff]  ;;  %v2303_v21 = vld [vmem:[%s6717_s24 + $0x8] sm:$0xff] }
 0x6b3   : > { %5831 = vmatmul.msk.f32.vlgmr.msra.gmra.mxu2 %vm1259_vm0, %v2137_v23  ;;  %v2302_v23 = vld [vmem:[%s6717_s24] sm:$0xff]  ;;  %v2442_v20 = vld [vmem:[%s8398_s6 + $0x38] sm:$0xff] }
 0x6b4   : > { %2335 = vmatpush.msra.mxu1 %v2304_v29  ;;  %2468 = vmatpush.msra.mxu3 %v2442_v20  ;;  %v2441_v29 = vld [vmem:[%s8398_s6 + $0x30] sm:$0xff] }
 0x6b6   : > { %2336 = vmatpush.msra.mxu1 %v2303_v21  ;;  %2469 = vmatpush.msra.mxu3 %v2441_v29  ;;  %v2440_v21 = vld [vmem:[%s8398_s6 + $0x28] sm:$0xff] }
 0x6b8   : > { %2337 = vmatpush.msra.mxu1 %v2302_v23  ;;  %2470 = vmatpush.msra.mxu3 %v2440_v21  ;;  %v2439_v23 = vld [vmem:[%s8398_s6 + $0x20] sm:$0xff] }
 0x6ba   : > { %2471 = vmatpush.msra.mxu3 %v2439_v23 }
 0x6d0   : > { %v2102_v5 = vpop.permute.xlu0 %2101 }
 0x6d1   : > { %v2133_v26 = vsel %vm2131_vm15, %v2128_v25, %v2102_v5 }
 0x6d8   : > { %v2090_v47 = vpop.permute.xlu0 %2089 }
 0x6d9   : > { %v2130_v22 = vsel %vm1430_vm14, %v7125_v49, %v2090_v47  ;;  %v6227_v47 = vld [vmem:[%s6712_s19] ss:$0 sm:$0xff] }
 0x6ed   : > { %v2118_v34 = vpop.permute.xlu2 %2117 }
 0x6ee   : > { %v2138_v24 = vsel %vm2136_vm1, %v2133_v26, %v2118_v34 }
 0x6ef   : > { %5832 = vmatmul.msk.f32.gmra.mxu2 %vm1259_vm0, %v2138_v24 }
 0x6f5   : > { %v2104_v27 = vpop.permute.xlu2 %2103 }
 0x6f6   : > { %v2134_v18 = vsel %vm2131_vm15, %v2129_v8, %v2104_v27 }
 0x6fd   : > { %v2106_v31 = vpop.permute.xlu2 %2105 }
 0x6fe   : > { %v2135_v33 = vsel %vm2131_vm15, %v2130_v22, %v2106_v31 }
 0x70d   : > { %v2120_v28 = vpop.permute.xlu1 %2119 }
 0x70e   : > { %v2139_v30 = vsel %vm2136_vm1, %v2134_v18, %v2120_v28  ;;  %v6226_v18 = vld [vmem:[%s6707_s14] ss:$0 sm:$0xff] }
 0x70f   : > { %5833 = vmatmul.msk.f32.gmra.mxu2 %vm1259_vm0, %v2139_v30 }
 0x715   : > { %v2122_v19 = vpop.permute.xlu1 %2121 }
 0x716   : > { %v2140_v41 = vsel %vm2136_vm1, %v2135_v33, %v2122_v19 }
 0x717   : > { %5834 = vmatmul.msk.f32.gmra.mxu2 %vm1259_vm0, %v2140_v41 }
 0x736   : > { %v2174_v42 = vpop.f32.mrf.mxu2 }
 0x737   : > { %v2186_v39 = vadd.f32 %v6442_v43, %v2174_v42 }
 0x739   : > { %v7268_v50 = vadd.f32 %v6225_v48, %v2186_v39 }
 0x73b   : > { %v2200_v36 = vsel %vm1259_vm0, %v7268_v50, 0.0 }
 0x73c   : > { %2201 = vadd.xlane.f32.xlu0 %v2200_v36 }
 0x772   : > { %v2177_v49 = vpop.f32.mrf.mxu2 }
 0x773   : > { %v2187_v15 = vadd.f32 %v6443_v51, %v2177_v49 }
 0x775   : > { %v7273_v52 = vadd.f32 %v6225_v48, %v2187_v15 }
 0x777   : > { %v2203_v53 = vsel %vm1259_vm0, %v7273_v52, 0.0 }
 0x778   : > { %2204 = vadd.xlane.f32.xlu2 %v2203_v53 }
 0x792   : > { %v2180_v54 = vpop.f32.mrf.mxu2 }
 0x793   : > { %v2188_v56 = vadd.f32 %v6444_v32, %v2180_v54 }
 0x795   : > { %v7278_v57 = vadd.f32 %v6225_v48, %v2188_v56 }
 0x797   : > { %v2206_v58 = vsel %vm1259_vm0, %v7278_v57, 0.0 }
 0x798   : > { %2207 = vadd.xlane.f32.xlu1 %v2206_v58 }
 0x79a   : > { %v2183_v60 = vpop.f32.mrf.mxu2 }
 0x79b   : > { %v2189_v61 = vadd.f32 %v6445_v46, %v2183_v60 }
 0x79d   : > { %v7283_v62 = vadd.f32 %v6225_v48, %v2189_v61 }
 0x79f   : > { %v2209_v35 = vsel %vm1259_vm0, %v7283_v62, 0.0 }
 0x7a0   : > { %2210 = vadd.xlane.f32.xlu0 %v2209_v35 }
 0x7af   : > { %v2202_v63 = vpop.xlane.xlu0 %2201 }
 0x7b0   : > { %v2212_v0 = vmul.f32 %v2202_v63, %v6898_v14 }
 0x7b2   : > { %v2216_v1 = vsub.f32 %v7268_v50, %v2212_v0 }
 0x7b4   : > { %v2220_v3 = vmul.f32 %v2216_v1, %v2216_v1 }
 0x7b6   : > { %v2224_v4 = vsel %vm1259_vm0, %v2220_v3, 0.0 }
 0x7b7   : > { %2225 = vadd.xlane.f32.xlu2 %v2224_v4 }
 0x7eb   : > { %v2205_v7 = vpop.xlane.xlu2 %2204 }
 0x7ec   : > { %v2213_v55 = vmul.f32 %v2205_v7, %v6898_v14 }
 0x7ee   : > { %v2217_v44 = vsub.f32 %v7273_v52, %v2213_v55 }
 0x7f0   : > { %v2221_v40 = vmul.f32 %v2217_v44, %v2217_v44 }
 0x7f2   : > { %v2227_v2 = vsel %vm1259_vm0, %v2221_v40, 0.0 }
 0x7f3   : > { %2228 = vadd.xlane.f32.xlu1 %v2227_v2 }
 0x80b   : > { %v2208_v37 = vpop.xlane.xlu1 %2207 }
 0x80c   : > { %v2214_v38 = vmul.f32 %v2208_v37, %v6898_v14 }
 0x80e   : > { %v7295_v12 = vsub.f32 %v7278_v57, %v2214_v38 }
 0x810   : > { %v2222_v6 = vmul.f32 %v7295_v12, %v7295_v12 }
 0x812   : > { %v2230_v9 = vsel %vm1259_vm0, %v2222_v6, 0.0 }
 0x813   : > { %v2211_v10 = vpop.xlane.xlu0 %2210  ;;  %2231 = vadd.xlane.f32.xlu0 %v2230_v9 }
 0x814   : > { %v2215_v11 = vmul.f32 %v2211_v10, %v6898_v14 }
 0x816   : > { %v7302_v13 = vsub.f32 %v7283_v62, %v2215_v11 }
 0x818   : > { %v2223_v16 = vmul.f32 %v7302_v13, %v7302_v13 }
 0x81a   : > { %v2233_v17 = vsel %vm1259_vm0, %v2223_v16, 0.0 }
 0x81b   : > { %2234 = vadd.xlane.f32.xlu2 %v2233_v17 }
 0x82a   : > { %v2226_v59 = vpop.xlane.xlu2 %2225 }
 0x82b   : > { %v2236_v5 = vmul.f32 %v2226_v59, %v6898_v14  ;;  %v2438_v59 = vld [vmem:[%s8398_s6 + $0x18] sm:$0xff] }
 0x82c   : > { %2472 = vmatpush.msra.mxu3 %v2438_v59 }
 0x82d   : > { %v2240_v25 = vadd.f32 1e-05, %v2236_v5  ;;  %v7329_v5 = vld [vmem:[%s6722_s30] ss:$0 sm:$0xff] }
 0x82f   : > { %6314 = vrsqrt.f32 %v2240_v25  ;;  %vm2250_vm3 = vweird.f32 %v2240_v25 }
 0x835   : > { %v6315_v26 = vpop.eup %6314 }
 0x836   : > { %v2245_v34 = vmul.f32 %v6315_v26, %v2240_v25  ;;  %vm2251_vm2 = vweird.f32 %v6315_v26  ;;  %v2437_v25 = vld [vmem:[%s8398_s6 + $0x10] sm:$0xff] }
 0x837   : > { %vm2252_vm4 = vmor %vm2250_vm3, %vm2251_vm2  ;;  %2473 = vmatpush.msra.mxu3 %v2437_v25 }
 0x838   : > { %v2246_v24 = vmul.f32 %v6315_v26, %v2245_v34 }
 0x83a   : > { %v2247_v45 = vmul.f32 0.5, %v2246_v24  ;;  %v2435_v24 = vld [vmem:[%s8398_s6] sm:$0xff] }
 0x83c   : > { %v2248_v27 = vsub.f32 1.5, %v2247_v45 }
 0x83e   : > { %v2249_v8 = vmul.f32 %v6315_v26, %v2248_v27 }
 0x840   : > { %v2253_v28 = vsel %vm2252_vm4, %v6315_v26, %v2249_v8  ;;  %v2436_v26 = vld [vmem:[%s8398_s6 + $0x8] sm:$0xff] }
 0x841   : > { %v2284_v30 = vmul.f32 %v2253_v28, %v2216_v1  ;;  %2474 = vmatpush.msra.mxu3 %v2436_v26 }
 0x843   : > { %v2291_v31 = vmul.f32 %v6226_v18, %v2284_v30  ;;  %2475 = vmatpush.msra.mxu3 %v2435_v24 }
 0x845   : > { %v2298_v22 = vadd.f32 %v6227_v47, %v2291_v31 }
 0x847   : > { %5835 = vmatmul.msk.f32.vlgmr.msra.gmra.mxu1 %vm1259_vm0, %v2298_v22 }
 0x866   : > { %v2229_v33 = vpop.xlane.xlu1 %2228 }
 0x867   : > { %v2237_v19 = vmul.f32 %v2229_v33, %v6898_v14 }
 0x869   : > { %v2241_v41 = vadd.f32 1e-05, %v2237_v19 }
 0x86b   : > { %6316 = vrsqrt.f32 %v2241_v41  ;;  %vm2260_vm6 = vweird.f32 %v2241_v41 }
 0x871   : > { %v6317_v48 = vpop.eup %6316 }
 0x872   : > { %v2255_v42 = vmul.f32 %v6317_v48, %v2241_v41  ;;  %vm2261_vm5 = vweird.f32 %v6317_v48 }
 0x873   : > { %vm2262_vm7 = vmor %vm2260_vm6, %vm2261_vm5  ;;  %vm2447_vm6 = vcmask 523264  }
 0x874   : > { %v2256_v43 = vmul.f32 %v6317_v48, %v2255_v42 }
 0x876   : > { %v2257_v39 = vmul.f32 0.5, %v2256_v43 }
 0x878   : > { %v2258_v36 = vsub.f32 1.5, %v2257_v39 }
 0x87a   : > { %v2259_v49 = vmul.f32 %v6317_v48, %v2258_v36 }
 0x87c   : > { %v2263_v51 = vsel %vm2262_vm7, %v6317_v48, %v2259_v49 }
 0x87d   : > { %v2285_v15 = vmul.f32 %v2263_v51, %v2217_v44 }
 0x87f   : > { %v2292_v53 = vmul.f32 %v6226_v18, %v2285_v15 }
 0x881   : > { %v2299_v54 = vadd.f32 %v6227_v47, %v2292_v53 }
 0x883   : > { %5836 = vmatmul.msk.f32.gmra.mxu1 %vm1259_vm0, %v2299_v54 }
 0x886   : > { %v2232_v32 = vpop.xlane.xlu0 %2231 }
 0x887   : > { %v2238_v56 = vmul.f32 %v2232_v32, %v6898_v14 }
 0x889   : > { %v2242_v58 = vadd.f32 1e-05, %v2238_v56 }
 0x88b   : > { %6318 = vrsqrt.f32 %v2242_v58  ;;  %vm2270_vm9 = vweird.f32 %v2242_v58 }
 0x88e   : > { %v2235_v60 = vpop.xlane.xlu2 %2234 }
 0x88f   : > { %v2239_v46 = vmul.f32 %v2235_v60, %v6898_v14 }
 0x891   : > { %v6319_v61 = vpop.eup %6318  ;;  %v2243_v35 = vadd.f32 1e-05, %v2239_v46 }
 0x892   : > { %v2265_v63 = vmul.f32 %v6319_v61, %v2242_v58  ;;  %vm2271_vm8 = vweird.f32 %v6319_v61 }
 0x893   : > { %6320 = vrsqrt.f32 %v2243_v35  ;;  %vm2272_vm10 = vmor %vm2270_vm9, %vm2271_vm8  ;;  %vm2280_vm12 = vweird.f32 %v2243_v35 }
 0x894   : > { %v2266_v0 = vmul.f32 %v6319_v61, %v2265_v63 }
 0x896   : > { %v2267_v1 = vmul.f32 0.5, %v2266_v0 }
 0x898   : > { %v2268_v3 = vsub.f32 1.5, %v2267_v1 }
 0x899   : > { %v6321_v4 = vpop.eup %6320 }
 0x89a   : > { %v2269_v7 = vmul.f32 %v6319_v61, %v2268_v3  ;;  %v2275_v55 = vmul.f32 %v6321_v4, %v2243_v35  ;;  %vm2281_vm11 = vweird.f32 %v6321_v4 }
 0x89b   : > { %vm2282_vm13 = vmor %vm2280_vm12, %vm2281_vm11 }
 0x89c   : > { %v2273_v44 = vsel %vm2272_vm10, %v6319_v61, %v2269_v7  ;;  %v2276_v40 = vmul.f32 %v6321_v4, %v2275_v55 }
 0x89d   : > { %v2286_v2 = vmul.f32 %v2273_v44, %v7295_v12 }
 0x89e   : > { %v2277_v37 = vmul.f32 0.5, %v2276_v40 }
 0x89f   : > { %v2293_v38 = vmul.f32 %v6226_v18, %v2286_v2 }
 0x8a0   : > { %v2278_v6 = vsub.f32 1.5, %v2277_v37 }
 0x8a1   : > { %v2300_v9 = vadd.f32 %v6227_v47, %v2293_v38 }
 0x8a2   : > { %v2279_v10 = vmul.f32 %v6321_v4, %v2278_v6 }
 0x8a3   : > { %5837 = vmatmul.msk.f32.gmra.mxu1 %vm1259_vm0, %v2300_v9 }
 0x8a4   : > { %v2283_v11 = vsel %vm2282_vm13, %v6321_v4, %v2279_v10 }
 0x8a5   : > { %v2287_v16 = vmul.f32 %v2283_v11, %v7302_v13 }
 0x8a7   : > { %v2294_v12 = vmul.f32 %v6226_v18, %v2287_v16 }
 0x8a9   : > { %v2301_v17 = vadd.f32 %v6227_v47, %v2294_v12 }
 0x8ab   : > { %5838 = vmatmul.msk.f32.gmra.mxu1 %vm1259_vm0, %v2301_v17 }
 0x8c4   : > { %v2339_v13 = vpop.f32.mrf.mxu1 }
 0x8c5   : > { %v2340_v34 = vadd.f32 %v7329_v5, %v2339_v13 }
 0x8c7   : > { %v5839_v45 = vmul.f32 -1.702, %v2340_v34 }
 0x8c9   : > { %v2359_v27 = vmul.f32 1.442695, %v5839_v45 }
 0x8cb   : > { %6322 = vpow2.f32 %v2359_v27 }
 0x8d1   : > { %v6323_v8 = vpop.eup %6322 }
 0x8d2   : > { %v2367_v18 = vadd.f32 1.0, %v6323_v8 }
 0x8d4   : > { %6324 = vrcp.f32 %v2367_v18  ;;  %v2382_v31 = vand.u32 2147483648, %v2367_v18  ;;  %v2380_v33 = vand.u32 2147483647, %v2367_v18  ;;  %vm2376_vm3 = vweird.f32 %v2367_v18 }
 0x8d6   : > { %v2383_v41 = vor.u32 1.1754944e-38, %v2382_v31  ;;  %vm2381_vm5 = vcmp.eq.f32.partialorder %v2380_v33, 8.507059e+37  ;;  %v6229_v31 = vld [vmem:[%s8395_s12] ss:$0 sm:$0xff] }
 0x8da   : > { %v6325_v28 = vpop.eup %6324 }
 0x8db   : > { %v2372_v30 = vmul.f32 %v6325_v28, %v2367_v18  ;;  %vm2377_vm2 = vweird.f32 %v6325_v28 }
 0x8dc   : > { %vm2378_vm4 = vmor %vm2376_vm3, %vm2377_vm2 }
 0x8dd   : > { %v2373_v47 = vsub.f32 1.0, %v2372_v30 }
 0x8df   : > { %v2374_v22 = vmul.f32 %v6325_v28, %v2373_v47 }
 0x8e1   : > { %v2375_v19 = vadd.f32 %v6325_v28, %v2374_v22 }
 0x8e3   : > { %v2379_v48 = vsel %vm2378_vm4, %v6325_v28, %v2375_v19 }
 0x8e4   : > { %v2384_v42 = vsel %vm2381_vm5, %v2383_v41, %v2379_v48 }
 0x8e5   : > { %v2431_v43 = vmul.f32 %v2384_v42, %v2340_v34 }
 0x8e7   : > { %5843 = vmatmul.msk.f32.vlgmr.msra.gmra.mxu3 %vm2447_vm6, %v2431_v43 }
 0x900   : > { %v2342_v39 = vpop.f32.mrf.mxu1 }
 0x901   : > { %v2343_v36 = vadd.f32 %v7329_v5, %v2342_v39 }
 0x903   : > { %v5840_v49 = vmul.f32 -1.702, %v2343_v36 }
 0x905   : > { %v2361_v51 = vmul.f32 1.442695, %v5840_v49 }
 0x907   : > { %6326 = vpow2.f32 %v2361_v51 }
 0x90d   : > { %v6327_v15 = vpop.eup %6326 }
 0x90e   : > { %v2368_v53 = vadd.f32 1.0, %v6327_v15 }
 0x910   : > { %6328 = vrcp.f32 %v2368_v53  ;;  %v2397_v58 = vand.u32 2147483648, %v2368_v53  ;;  %v2395_v46 = vand.u32 2147483647, %v2368_v53  ;;  %vm2391_vm8 = vweird.f32 %v2368_v53 }
 0x912   : > { %v2398_v35 = vor.u32 1.1754944e-38, %v2397_v58  ;;  %vm2396_vm10 = vcmp.eq.f32.partialorder %v2395_v46, 8.507059e+37 }
 0x916   : > { %v6329_v54 = vpop.eup %6328 }
 0x917   : > { %v2387_v32 = vmul.f32 %v6329_v54, %v2368_v53  ;;  %vm2392_vm7 = vweird.f32 %v6329_v54 }
 0x918   : > { %vm2393_vm9 = vmor %vm2391_vm8, %vm2392_vm7 }
 0x919   : > { %v2388_v56 = vsub.f32 1.0, %v2387_v32 }
 0x91b   : > { %v2389_v60 = vmul.f32 %v6329_v54, %v2388_v56 }
 0x91d   : > { %v2390_v61 = vadd.f32 %v6329_v54, %v2389_v60 }
 0x91f   : > { %v2394_v63 = vsel %vm2393_vm9, %v6329_v54, %v2390_v61 }
 0x920   : > { %v2399_v0 = vsel %vm2396_vm10, %v2398_v35, %v2394_v63  ;;  %v2345_v1 = vpop.f32.mrf.mxu1 }
 0x921   : > { %v2432_v3 = vmul.f32 %v2399_v0, %v2343_v36  ;;  %v2346_v4 = vadd.f32 %v7329_v5, %v2345_v1 }
 0x923   : > { %v5841_v7 = vmul.f32 -1.702, %v2346_v4  ;;  %5844 = vmatmul.msk.f32.gmra.mxu3 %vm2447_vm6, %v2432_v3 }
 0x925   : > { %v2363_v55 = vmul.f32 1.442695, %v5841_v7 }
 0x927   : > { %6330 = vpow2.f32 %v2363_v55 }
 0x928   : > { %v2348_v44 = vpop.f32.mrf.mxu1 }
 0x929   : > { %v2349_v40 = vadd.f32 %v7329_v5, %v2348_v44 }
 0x92b   : > { %v5842_v2 = vmul.f32 -1.702, %v2349_v40 }
 0x92d   : > { %v6331_v37 = vpop.eup %6330  ;;  %v2365_v38 = vmul.f32 1.442695, %v5842_v2 }
 0x92e   : > { %v2369_v6 = vadd.f32 1.0, %v6331_v37 }
 0x92f   : > { %6332 = vpow2.f32 %v2365_v38  ;;  %v5852_v38 = vld [vmem:[%s6687_s25 + $0x38] sm:$0xff] }
 0x930   : > { %6334 = vrcp.f32 %v2369_v6  ;;  %v2412_v17 = vand.u32 2147483648, %v2369_v6  ;;  %v2410_v29 = vand.u32 2147483647, %v2369_v6  ;;  %vm2406_vm12 = vweird.f32 %v2369_v6  ;;  %2633 = vmatpush.msrb.mxu0 %v5852_v38 }
 0x932   : > { %v2413_v59 = vor.u32 1.1754944e-38, %v2412_v17  ;;  %vm2411_vm2 = vcmp.eq.f32.partialorder %v2410_v29, 8.507059e+37 }
 0x935   : > { %v6333_v9 = vpop.eup %6332 }
 0x936   : > { %v6335_v10 = vpop.eup %6334  ;;  %v2370_v11 = vadd.f32 1.0, %v6333_v9  ;;  %v5850_v9 = vld [vmem:[%s6687_s25 + $0x28] sm:$0xff] }
 0x937   : > { %v2402_v16 = vmul.f32 %v6335_v10, %v2369_v6  ;;  %vm2407_vm11 = vweird.f32 %v6335_v10  ;;  %v5851_v6 = vld [vmem:[%s6687_s25 + $0x30] sm:$0xff] }
 0x938   : > { %6336 = vrcp.f32 %v2370_v11  ;;  %vm2408_vm13 = vmor %vm2406_vm12, %vm2407_vm11  ;;  %v2427_v24 = vand.u32 2147483648, %v2370_v11  ;;  %v2425_v27 = vand.u32 2147483647, %v2370_v11  ;;  %vm2421_vm4 = vweird.f32 %v2370_v11  ;;  %2634 = vmatpush.msrb.mxu0 %v5851_v6 }
 0x939   : > { %v2403_v12 = vsub.f32 1.0, %v2402_v16 }
 0x93a   : > { %v2428_v18 = vor.u32 1.1754944e-38, %v2427_v24  ;;  %vm2426_vm7 = vcmp.eq.f32.partialorder %v2425_v27, 8.507059e+37  ;;  %2635 = vmatpush.msrb.mxu0 %v5850_v9  ;;  %v6232_v9 = vld [vmem:[%s6692_s29 + $0x1] ss:$0 sm:$0xff] }
 0x93b   : > { %v2404_v20 = vmul.f32 %v6335_v10, %v2403_v12 }
 0x93d   : > { %v2405_v21 = vadd.f32 %v6335_v10, %v2404_v20 }
 0x93e   : > { %v6337_v23 = vpop.eup %6336 }
 0x93f   : > { %v2409_v5 = vsel %vm2408_vm13, %v6335_v10, %v2405_v21  ;;  %v2417_v25 = vmul.f32 %v6337_v23, %v2370_v11  ;;  %vm2422_vm3 = vweird.f32 %v6337_v23  ;;  %v5849_v10 = vld [vmem:[%s6687_s25 + $0x20] sm:$0xff] }
 0x940   : > { %v2414_v13 = vsel %vm2411_vm2, %v2413_v59, %v2409_v5  ;;  %vm2423_vm5 = vmor %vm2421_vm4, %vm2422_vm3  ;;  %2636 = vmatpush.msrb.mxu0 %v5849_v10  ;;  %v6230_v5 = vld [vmem:[%s6677_s17 + $0x1] ss:$0 sm:$0xff] }
 0x941   : > { %v2433_v26 = vmul.f32 %v2414_v13, %v2346_v4  ;;  %v2418_v34 = vsub.f32 1.0, %v2417_v25 }
 0x943   : > { %v2419_v45 = vmul.f32 %v6337_v23, %v2418_v34  ;;  %5845 = vmatmul.msk.f32.gmra.mxu3 %vm2447_vm6, %v2433_v26  ;;  %v6231_v26 = vld [vmem:[%s6682_s21 + $0x1] ss:$0 sm:$0xff] }
 0x945   : > { %v2420_v8 = vadd.f32 %v6337_v23, %v2419_v45 }
 0x947   : > { %v2424_v28 = vsel %vm2423_vm5, %v6337_v23, %v2420_v8 }
 0x948   : > { %v2429_v30 = vsel %vm2426_vm7, %v2428_v18, %v2424_v28 }
 0x949   : > { %v2434_v47 = vmul.f32 %v2429_v30, %v2349_v40 }
 0x94b   : > { %5846 = vmatmul.msk.f32.gmra.mxu3 %vm2447_vm6, %v2434_v47 }
 0x96a   : > { %v2477_v22 = vpop.f32.mrf.mxu3 }
 0x96b   : > { %v2478_v33 = vadd.f32 %v6229_v31, %v2477_v22 }
 0x96d   : > { %v7344_v19 = vadd.f32 %v2478_v33, %v7268_v50 }
 0x96f   : > { %v2497_v41 = vsel %vm1259_vm0, %v7344_v19, 0.0 }
 0x970   : > { %2498 = vadd.xlane.f32.xlu1 %v2497_v41 }
 0x9a6   : > { %v2480_v48 = vpop.f32.mrf.mxu3 }
 0x9a7   : > { %v2481_v42 = vadd.f32 %v6229_v31, %v2480_v48 }
 0x9a9   : > { %v7349_v43 = vadd.f32 %v2481_v42, %v7273_v52 }
 0x9ab   : > { %v2500_v39 = vsel %vm1259_vm0, %v7349_v43, 0.0 }
 0x9ac   : > { %2501 = vadd.xlane.f32.xlu0 %v2500_v39 }
 0x9c6   : > { %v2483_v36 = vpop.f32.mrf.mxu3 }
 0x9c7   : > { %v2484_v49 = vadd.f32 %v6229_v31, %v2483_v36 }
 0x9c9   : > { %v7354_v51 = vadd.f32 %v2484_v49, %v7278_v57 }
 0x9cb   : > { %v2503_v50 = vsel %vm1259_vm0, %v7354_v51, 0.0 }
 0x9cc   : > { %2504 = vadd.xlane.f32.xlu2 %v2503_v50 }
 0x9ce   : > { %v2486_v15 = vpop.f32.mrf.mxu3 }
 0x9cf   : > { %v2487_v53 = vadd.f32 %v6229_v31, %v2486_v15 }
 0x9d1   : > { %v7359_v54 = vadd.f32 %v2487_v53, %v7283_v62 }
 0x9d3   : > { %v2506_v52 = vsel %vm1259_vm0, %v7359_v54, 0.0 }
 0x9d4   : > { %2507 = vadd.xlane.f32.xlu1 %v2506_v52 }
 0x9e3   : > { %v2499_v32 = vpop.xlane.xlu1 %2498 }
 0x9e4   : > { %v2509_v56 = vmul.f32 %v2499_v32, %v6898_v14 }
 0x9e6   : > { %v2513_v58 = vsub.f32 %v7344_v19, %v2509_v56 }
 0x9e8   : > { %v2517_v57 = vmul.f32 %v2513_v58, %v2513_v58 }
 0x9ea   : > { %v2521_v60 = vsel %vm1259_vm0, %v2517_v57, 0.0 }
 0x9eb   : > { %2522 = vadd.xlane.f32.xlu0 %v2521_v60 }
 0xa1f   : > { %v2502_v46 = vpop.xlane.xlu0 %2501 }
 0xa20   : > { %v2510_v61 = vmul.f32 %v2502_v46, %v6898_v14 }
 0xa22   : > { %v2514_v35 = vsub.f32 %v7349_v43, %v2510_v61 }
 0xa24   : > { %v2518_v62 = vmul.f32 %v2514_v35, %v2514_v35 }
 0xa26   : > { %v2524_v63 = vsel %vm1259_vm0, %v2518_v62, 0.0 }
 0xa27   : > { %2525 = vadd.xlane.f32.xlu2 %v2524_v63 }
 0xa3f   : > { %v2505_v0 = vpop.xlane.xlu2 %2504 }
 0xa40   : > { %v2511_v1 = vmul.f32 %v2505_v0, %v6898_v14 }
 0xa42   : > { %v7371_v3 = vsub.f32 %v7354_v51, %v2511_v1 }
 0xa44   : > { %v2519_v4 = vmul.f32 %v7371_v3, %v7371_v3 }
 0xa46   : > { %v2527_v7 = vsel %vm1259_vm0, %v2519_v4, 0.0 }
 0xa47   : > { %2528 = vadd.xlane.f32.xlu1 %v2527_v7  ;;  %v2508_v55 = vpop.xlane.xlu1 %2507 }
 0xa48   : > { %v2512_v44 = vmul.f32 %v2508_v55, %v6898_v14 }
 0xa4a   : > { %v7378_v40 = vsub.f32 %v7359_v54, %v2512_v44 }
 0xa4c   : > { %v2520_v2 = vmul.f32 %v7378_v40, %v7378_v40 }
 0xa4e   : > { %v2530_v37 = vsel %vm1259_vm0, %v2520_v2, 0.0 }
 0xa4f   : > { %2531 = vadd.xlane.f32.xlu0 %v2530_v37 }
 0xa5e   : > { %v2523_v11 = vpop.xlane.xlu0 %2522 }
 0xa5f   : > { %v2533_v16 = vmul.f32 %v2523_v11, %v6898_v14 }
 0xa61   : > { %v2537_v12 = vadd.f32 1e-05, %v2533_v16 }
 0xa63   : > { %6338 = vrsqrt.f32 %v2537_v12  ;;  %vm2547_vm9 = vweird.f32 %v2537_v12 }
 0xa69   : > { %v6339_v17 = vpop.eup %6338 }
 0xa6a   : > { %v2542_v20 = vmul.f32 %v6339_v17, %v2537_v12  ;;  %vm2548_vm8 = vweird.f32 %v6339_v17 }
 0xa6b   : > { %vm2549_vm10 = vmor %vm2547_vm9, %vm2548_vm8 }
 0xa6c   : > { %v2543_v29 = vmul.f32 %v6339_v17, %v2542_v20 }
 0xa6e   : > { %v2544_v21 = vmul.f32 0.5, %v2543_v29 }
 0xa70   : > { %v2545_v23 = vsub.f32 1.5, %v2544_v21 }
 0xa72   : > { %v2546_v59 = vmul.f32 %v6339_v17, %v2545_v23 }
 0xa74   : > { %v2550_v25 = vsel %vm2549_vm10, %v6339_v17, %v2546_v59 }
 0xa75   : > { %v2581_v13 = vmul.f32 %v2550_v25, %v2513_v58 }
 0xa77   : > { %v2588_v34 = vmul.f32 %v6230_v5, %v2581_v13 }
 0xa79   : > { %v2595_v24 = vadd.f32 %v6231_v26, %v2588_v34 }
 0xa7b   : > { %5854 = vmatmul.msk.f32.vlgmr.msrb.gmra.mxu0 %vm1259_vm0, %v2595_v24 }
 0xa9a   : > { %v2526_v45 = vpop.xlane.xlu2 %2525 }
 0xa9b   : > { %v2534_v27 = vmul.f32 %v2526_v45, %v6898_v14 }
 0xa9d   : > { %v2538_v8 = vadd.f32 1e-05, %v2534_v27 }
 0xa9f   : > { %6340 = vrsqrt.f32 %v2538_v8  ;;  %vm2557_vm12 = vweird.f32 %v2538_v8 }
 0xaa5   : > { %v6341_v18 = vpop.eup %6340 }
 0xaa6   : > { %v2552_v28 = vmul.f32 %v6341_v18, %v2538_v8  ;;  %vm2558_vm11 = vweird.f32 %v6341_v18 }
 0xaa7   : > { %vm2559_vm13 = vmor %vm2557_vm12, %vm2558_vm11 }
 0xaa8   : > { %v2553_v30 = vmul.f32 %v6341_v18, %v2552_v28 }
 0xaaa   : > { %v2554_v47 = vmul.f32 0.5, %v2553_v30 }
 0xaac   : > { %v2555_v31 = vsub.f32 1.5, %v2554_v47 }
 0xaae   : > { %v2556_v22 = vmul.f32 %v6341_v18, %v2555_v31 }
 0xab0   : > { %v2560_v33 = vsel %vm2559_vm13, %v6341_v18, %v2556_v22 }
 0xab1   : > { %v2582_v41 = vmul.f32 %v2560_v33, %v2514_v35 }
 0xab3   : > { %v2589_v48 = vmul.f32 %v6230_v5, %v2582_v41 }
 0xab5   : > { %v2596_v42 = vadd.f32 %v6231_v26, %v2589_v48 }
 0xab7   : > { %5855 = vmatmul.msk.f32.gmra.mxu0 %vm1259_vm0, %v2596_v42 }
 0xaba   : > { %v2529_v39 = vpop.xlane.xlu1 %2528 }
 0xabb   : > { %v2535_v36 = vmul.f32 %v2529_v39, %v6898_v14 }
 0xabd   : > { %v2539_v49 = vadd.f32 1e-05, %v2535_v36 }
 0xabf   : > { %6342 = vrsqrt.f32 %v2539_v49  ;;  %vm2567_vm3 = vweird.f32 %v2539_v49 }
 0xac2   : > { %v2532_v50 = vpop.xlane.xlu0 %2531 }
 0xac3   : > { %v2536_v15 = vmul.f32 %v2532_v50, %v6898_v14 }
 0xac5   : > { %v6343_v53 = vpop.eup %6342  ;;  %v2540_v52 = vadd.f32 1e-05, %v2536_v15 }
 0xac6   : > { %v2562_v32 = vmul.f32 %v6343_v53, %v2539_v49  ;;  %vm2568_vm2 = vweird.f32 %v6343_v53 }
 0xac7   : > { %6344 = vrsqrt.f32 %v2540_v52  ;;  %vm2569_vm4 = vmor %vm2567_vm3, %vm2568_vm2  ;;  %vm2577_vm7 = vweird.f32 %v2540_v52 }
 0xac8   : > { %v2563_v56 = vmul.f32 %v6343_v53, %v2562_v32 }
 0xaca   : > { %v2564_v58 = vmul.f32 0.5, %v2563_v56 }
 0xacc   : > { %v2565_v57 = vsub.f32 1.5, %v2564_v58 }
 0xacd   : > { %v6345_v60 = vpop.eup %6344 }
 0xace   : > { %v2566_v46 = vmul.f32 %v6343_v53, %v2565_v57  ;;  %v2572_v61 = vmul.f32 %v6345_v60, %v2540_v52  ;;  %vm2578_vm5 = vweird.f32 %v6345_v60 }
 0xacf   : > { %vm2579_vm8 = vmor %vm2577_vm7, %vm2578_vm5 }
 0xad0   : > { %v2570_v35 = vsel %vm2569_vm4, %v6343_v53, %v2566_v46  ;;  %v2573_v62 = vmul.f32 %v6345_v60, %v2572_v61 }
 0xad1   : > { %v2583_v63 = vmul.f32 %v2570_v35, %v7371_v3 }
 0xad2   : > { %v2574_v0 = vmul.f32 0.5, %v2573_v62 }
 0xad3   : > { %v2590_v1 = vmul.f32 %v6230_v5, %v2583_v63 }
 0xad4   : > { %v2575_v4 = vsub.f32 1.5, %v2574_v0 }
 0xad5   : > { %v2597_v7 = vadd.f32 %v6231_v26, %v2590_v1 }
 0xad6   : > { %v2576_v55 = vmul.f32 %v6345_v60, %v2575_v4 }
 0xad7   : > { %5856 = vmatmul.msk.f32.gmra.mxu0 %vm1259_vm0, %v2597_v7  ;;  %v6446_v7 = vld [vmem:[%s8396_s9] sm:$0xff] }
 0xad8   : > { %v2580_v44 = vsel %vm2579_vm8, %v6345_v60, %v2576_v55 }
 0xad9   : > { %v2584_v2 = vmul.f32 %v2580_v44, %v7378_v40 }
 0xadb   : > { %v2591_v37 = vmul.f32 %v6230_v5, %v2584_v2 }
 0xadd   : > { %v2598_v38 = vadd.f32 %v6231_v26, %v2591_v37 }
 0xadf   : > { %5857 = vmatmul.msk.f32.gmra.mxu0 %vm1259_vm0, %v2598_v38 }
 0xaf8   : > { %v2638_v6 = vpop.f32.mrf.mxu0 }
 0xaf9   : > { %v2639_v17 = vadd.f32 %v6232_v9, %v2638_v6 }
 0xb34   : > { %v2641_v3 = vpop.f32.mrf.mxu0 }
 0xb35   : > { %v2642_v40 = vadd.f32 %v6232_v9, %v2641_v3  ;;  %v6447_v3 = vld [vmem:[%s8396_s9 + $0x8] sm:$0xff] }
 0xb37   : > { %v7442_v20 = vpack.i.bf16 %v2639_v17, %v2642_v40 }
 0xb54   : > { %v2644_v10 = vpop.f32.mrf.mxu0 }
 0xb55   : > { %v7400_v11 = vadd.f32 %v6232_v9, %v2644_v10 }
 0xb57   : > { %2824 = vrot.lane.b32.xlu2 %v7400_v11, %s6627_s28  ;;  %2658 = vrot.lane.b32.xlu0 %v7400_v11, %s6625_s23 }
 0xb5c   : > { %v2647_v16 = vpop.f32.mrf.mxu0 }
 0xb5d   : > { %v7406_v12 = vadd.f32 %v6232_v9, %v2647_v16 }
 0xb5f   : > { %2826 = vrot.lane.b32.xlu1 %v7406_v12, %s6627_s28  ;;  %2660 = vrot.lane.b32.xlu2 %v7406_v12, %s6625_s23  ;;  %v7452_v29 = vpack.i.bf16 %v7400_v11, %v7406_v12 }
 0xb60   : > { %2656 = vrot.lane.b32.xlu0 %v2642_v40, %s6625_s23 }
 0xb67   : > { %2822 = vrot.lane.b32.xlu1 %v2642_v40, %s6627_s28  ;;  %2654 = vrot.lane.b32.xlu2 %v2639_v17, %s6625_s23  ;;  %s8401_s23 = smov 64  }
 0xb68   : > { %2820 = vrot.lane.b32.xlu0 %v2639_v17, %s6627_s28  ;;  %s8403_s28 = smov 40  }
 0xb6f   : > { %2812 = vrot.lane.b32.xlu1 %v2639_v17, %s6626_s26  ;;  %2814 = vrot.lane.b32.xlu2 %v2642_v40, %s6626_s26 }
 0xb70   : > { %2816 = vrot.lane.b32.xlu0 %v7400_v11, %s6626_s26 }
 0xb77   : > { %3156 = vrot.lane.b32.xlu1 %v7400_v11, %s6629_s2  ;;  %2986 = vrot.lane.b32.xlu2 %v2639_v17, %s6630_s7 }
 0xb78   : > { %2990 = vrot.lane.b32.xlu0 %v7400_v11, %s6630_s7 }
 0xb7f   : > { %2992 = vrot.lane.b32.xlu1 %v7406_v12, %s6630_s7  ;;  %3158 = vrot.lane.b32.xlu2 %v7406_v12, %s6629_s2 }
 0xb80   : > { %2988 = vrot.lane.b32.xlu0 %v2642_v40, %s6630_s7  ;;  %s8406_s7 = sld [smem:[#allocation9_spill]] }
 0xb87   : > { %3154 = vrot.lane.b32.xlu1 %v2642_v40, %s6629_s2  ;;  %2818 = vrot.lane.b32.xlu2 %v7406_v12, %s6626_s26  ;;  %s8402_s26 = smov 56  }
 0xb88   : > { %3152 = vrot.lane.b32.xlu0 %v2639_v17, %s6629_s2  ;;  %s8404_s2 = smov 48  }
 0xb8f   : > { %2978 = vrot.lane.b32.xlu1 %v2639_v17, %s6632_s11  ;;  %3144 = vrot.lane.b32.xlu2 %v2639_v17, %s6631_s10 }
 0xb90   : > { %2980 = vrot.lane.b32.xlu0 %v2642_v40, %s6632_s11 }
 0xb97   : > { %3146 = vrot.lane.b32.xlu1 %v2642_v40, %s6631_s10  ;;  %2982 = vrot.lane.b32.xlu2 %v7400_v11, %s6632_s11 }
 0xb98   : > { %3148 = vrot.lane.b32.xlu0 %v7400_v11, %s6631_s10 }
 0xb9f   : > { %2984 = vrot.lane.b32.xlu1 %v7406_v12, %s6632_s11  ;;  %3150 = vrot.lane.b32.xlu2 %v7406_v12, %s6631_s10  ;;  %s8407_s10 = sld [smem:[#allocation10_spill]] }
 0xba0   : > { %6183 = vrot.lane.b32.xlu0 %v7442_v20, %s8401_s23  ;;  %s8408_s11 = sld [smem:[#allocation4_spill]] }
 0xba7   : > { %6193 = vrot.lane.b32.xlu1 %v7452_v29, %s8401_s23  ;;  %6188 = vrot.lane.b32.xlu2 %v7442_v20, %s8402_s26 }
 0xbaf   : > { %6198 = vrot.lane.b32.xlu2 %v7452_v29, %s8402_s26 }
 0xbb1   : > { %v2825_v21 = vpop.permute.xlu2 %2824 }
 0xbb9   : > { %v2661_v23 = vpop.permute.xlu2 %2660 }
 0xbba   : > { %5858 = vmatpush.xpose.msk.msrb.mxu2 %vm1430_vm14, %v2661_v23  ;;  %v6448_v23 = vld [vmem:[%s8396_s9 + $0x10] sm:$0xff] }
 0xbc1   : > { %v2655_v59 = vpop.permute.xlu2 %2654 }
 0xbc9   : > { %v2815_v5 = vpop.permute.xlu2 %2814  ;;  %v2659_v25 = vpop.permute.xlu0 %2658 }
 0xbca   : > { %5859 = vmatpush.xpose.msk.msrb.mxu2 %vm1430_vm14, %v2659_v25 }
 0xbd1   : > { %v2827_v13 = vpop.permute.xlu1 %2826  ;;  %v2987_v26 = vpop.permute.xlu2 %2986 }
 0xbd2   : > { %v2657_v34 = vpop.permute.xlu0 %2656  ;;  %5870 = vmatpush.xpose.msk.msrb.mxu3 %vm1430_vm14, %v2827_v13 }
 0xbd3   : > { %5860 = vmatpush.xpose.msk.msrb.mxu2 %vm1430_vm14, %v2657_v34 }
 0xbd6   : > { %5871 = vmatpush.xpose.msk.msrb.mxu3 %vm1430_vm14, %v2825_v21 }
 0xbd7   : > { %5861 = vmatpush.xpose.msk.msrb.mxu2 %vm1430_vm14, %v2655_v59 }
 0xbd9   : > { %v2823_v24 = vpop.permute.xlu1 %2822  ;;  %v3159_v45 = vpop.permute.xlu2 %3158 }
 0xbda   : > { %5862 = vmatmul.msk.f32.vlgmr.msrb.gmra.mxu2 %vm1430_vm14, %v2639_v17  ;;  %v2821_v27 = vpop.permute.xlu0 %2820  ;;  %5872 = vmatpush.xpose.msk.msrb.mxu3 %vm1430_vm14, %v2823_v24 }
 0xbde   : > { %5873 = vmatpush.xpose.msk.msrb.mxu3 %vm1430_vm14, %v2821_v27 }
 0xbe1   : > { %v2813_v8 = vpop.permute.xlu1 %2812  ;;  %v2819_v18 = vpop.permute.xlu2 %2818 }
 0xbe2   : > { %5894 = vmatpush.xpose.msk.msra.mxu3 %vm1430_vm14, %v3159_v45  ;;  %5863 = vmatmul.msk.f32.gmra.mxu2 %vm1430_vm14, %v2642_v40  ;;  %v2817_v28 = vpop.permute.xlu0 %2816 }
 0xbe3   : > { %5874 = vmatmul.msk.f32.vlgmr.msrb.gmra.mxu3 %vm1430_vm14, %v2813_v8  ;;  %v6449_v8 = vld [vmem:[%s8396_s9 + $0x18] sm:$0xff] }
 0xbe9   : > { %v3157_v30 = vpop.permute.xlu1 %3156  ;;  %v3145_v47 = vpop.permute.xlu2 %3144 }
 0xbea   : > { %5864 = vmatmul.msk.f32.gmra.mxu2 %vm1430_vm14, %v7400_v11  ;;  %v2991_v31 = vpop.permute.xlu0 %2990  ;;  %5895 = vmatpush.xpose.msk.msra.mxu3 %vm1430_vm14, %v3157_v30 }
 0xbeb   : > { %5875 = vmatmul.msk.f32.gmra.mxu3 %vm1430_vm14, %v2815_v5 }
 0xbf1   : > { %v2993_v22 = vpop.permute.xlu1 %2992  ;;  %v2983_v33 = vpop.permute.xlu2 %2982 }
 0xbf2   : > { %5865 = vmatmul.msk.f32.gmra.mxu2 %vm1430_vm14, %v7406_v12  ;;  %v2989_v41 = vpop.permute.xlu0 %2988 }
 0xbf3   : > { %5876 = vmatmul.msk.f32.gmra.mxu3 %vm1430_vm14, %v2817_v28  ;;  %5882 = vmatpush.xpose.msk.msra.mxu2 %vm1430_vm14, %v2993_v22 }
 0xbf7   : > { %5883 = vmatpush.xpose.msk.msra.mxu2 %vm1430_vm14, %v2991_v31 }
 0xbf9   : > { %v3155_v48 = vpop.permute.xlu1 %3154  ;;  %v3151_v42 = vpop.permute.xlu2 %3150 }
 0xbfa   : > { %5896 = vmatpush.xpose.msk.msra.mxu3 %vm1430_vm14, %v3155_v48  ;;  %v3153_v39 = vpop.permute.xlu0 %3152 }
 0xbfb   : > { %5877 = vmatmul.msk.f32.gmra.mxu3 %vm1430_vm14, %v2819_v18  ;;  %5884 = vmatpush.xpose.msk.msra.mxu2 %vm1430_vm14, %v2989_v41 }
 0xbfe   : > { %5897 = vmatpush.xpose.msk.msra.mxu3 %vm1430_vm14, %v3153_v39 }
 0xbff   : > { %5885 = vmatpush.xpose.msk.msra.mxu2 %vm1430_vm14, %v2987_v26 }
 0xc01   : > { %v2979_v36 = vpop.permute.xlu1 %2978  ;;  %v6189_v49 = vpop.permute.xlu2 %6188 }
 0xc02   : > { %5886 = vmatmul.msk.f32.vlgmr.msra.gmra.mxu2 %vm1430_vm14, %v2979_v36  ;;  %v2981_v50 = vpop.permute.xlu0 %2980  ;;  %v6190_v56 = vunpack.i.l.bf16 %v6189_v49  ;;  %v6191_v58 = vunpack.i.h.bf16 %v6189_v49 }
 0xc03   : > { %5898 = vmatmul.msk.f32.vlgmr.msra.gmra.mxu3 %vm1430_vm14, %v3145_v47 }
 0xc09   : > { %v3147_v15 = vpop.permute.xlu1 %3146  ;;  %v6199_v53 = vpop.permute.xlu2 %6198 }
 0xc0a   : > { %v6200_v52 = vunpack.i.l.bf16 %v6199_v53  ;;  %5887 = vmatmul.msk.f32.gmra.mxu2 %vm1430_vm14, %v2981_v50  ;;  %v6201_v32 = vunpack.i.h.bf16 %v6199_v53  ;;  %v3149_v57 = vpop.permute.xlu0 %3148 }
 0xc0b   : > { %5899 = vmatmul.msk.f32.gmra.mxu3 %vm1430_vm14, %v3147_v15 }
 0xc0c   : > { %2961 = vmatpush.msra.mxu0 %v6200_v52 }
 0xc0e   : > { %2962 = vmatpush.msra.mxu0 %v6201_v32 }
 0xc10   : > { %2963 = vmatpush.msra.mxu0 %v6190_v56 }
 0xc11   : > { %v2985_v60 = vpop.permute.xlu1 %2984 }
 0xc12   : > { %2964 = vmatpush.msra.mxu0 %v6191_v58  ;;  %5888 = vmatmul.msk.f32.gmra.mxu2 %vm1430_vm14, %v2983_v33  ;;  %v6184_v35 = vpop.permute.xlu0 %6183 }
 0xc13   : > { %5900 = vmatmul.msk.f32.gmra.mxu3 %vm1430_vm14, %v3149_v57  ;;  %v6185_v63 = vunpack.i.l.bf16 %v6184_v35  ;;  %v6186_v0 = vunpack.i.h.bf16 %v6184_v35 }
 0xc19   : > { %v6194_v46 = vpop.permute.xlu1 %6193 }
 0xc1a   : > { %v6195_v61 = vunpack.i.l.bf16 %v6194_v46  ;;  %5889 = vmatmul.msk.f32.gmra.mxu2 %vm1430_vm14, %v2985_v60  ;;  %v6196_v62 = vunpack.i.h.bf16 %v6194_v46 }
 0xc1b   : > { %5901 = vmatmul.msk.f32.gmra.mxu3 %vm1430_vm14, %v3151_v42 }
 0xc1c   : > { %2795 = vmatpush.msrb.mxu1 %v6195_v61 }
 0xc1e   : > { %2796 = vmatpush.msrb.mxu1 %v6196_v62 }
 0xc20   : > { %2797 = vmatpush.msrb.mxu1 %v6185_v63 }
 0xc22   : > { %2798 = vmatpush.msrb.mxu1 %v6186_v0 }
 0xc5d   : > { %v2695_v1 = vpop.f32.mrf.mxu2 }
 0xc5e   : > { %v2707_v4 = vmul.f32 0.35355338, %v2695_v1 }
 0xc60   : > { %v7495_v55 = vadd.f32 %v6446_v7, %v2707_v4 }
 0xc62   : > { %v2715_v44 = vsel %vm1259_vm0, %v7495_v55, -inf }
 0xc63   : > { %2716 = vmax.xlane.f32.xlu0 %v2715_v44 }
 0xc65   : > { %v2698_v2 = vpop.f32.mrf.mxu2 }
 0xc66   : > { %v2861_v37 = vpop.f32.mrf.mxu3  ;;  %v2708_v38 = vmul.f32 0.35355338, %v2698_v2 }
 0xc67   : > { %v2873_v6 = vmul.f32 0.35355338, %v2861_v37 }
 0xc68   : > { %v7500_v9 = vadd.f32 %v6447_v3, %v2708_v38 }
 0xc69   : > { %v7502_v10 = vadd.f32 %v6446_v7, %v2873_v6 }
 0xc6a   : > { %v2718_v11 = vsel %vm1259_vm0, %v7500_v9, -inf }
 0xc6b   : > { %v2881_v16 = vsel %vm1259_vm0, %v7502_v10, -inf  ;;  %2719 = vmax.xlane.f32.xlu2 %v2718_v11 }
 0xc6c   : > { %2882 = vmax.xlane.f32.xlu1 %v2881_v16 }
 0xc6d   : > { %v2701_v12 = vpop.f32.mrf.mxu2 }
 0xc6e   : > { %v2864_v40 = vpop.f32.mrf.mxu3  ;;  %v2709_v17 = vmul.f32 0.35355338, %v2701_v12 }
 0xc6f   : > { %v2874_v21 = vmul.f32 0.35355338, %v2864_v40 }
 0xc70   : > { %v7509_v59 = vadd.f32 %v6448_v23, %v2709_v17 }
 0xc71   : > { %v7511_v5 = vadd.f32 %v6447_v3, %v2874_v21 }
 0xc72   : > { %v2721_v25 = vsel %vm1259_vm0, %v7509_v59, -inf }
 0xc73   : > { %v2884_v13 = vsel %vm1259_vm0, %v7511_v5, -inf }
 0xc74   : > { %2722 = vmax.xlane.f32.xlu1 %v2721_v25  ;;  %2885 = vmax.xlane.f32.xlu0 %v2884_v13 }
 0xc75   : > { %v2704_v26 = vpop.f32.mrf.mxu2 }
 0xc76   : > { %v2867_v34 = vpop.f32.mrf.mxu3  ;;  %v2710_v24 = vmul.f32 0.35355338, %v2704_v26 }
 0xc77   : > { %v2875_v45 = vmul.f32 0.35355338, %v2867_v34 }
 0xc78   : > { %v7520_v18 = vadd.f32 %v6449_v8, %v2710_v24 }
 0xc79   : > { %v7517_v27 = vadd.f32 %v6448_v23, %v2875_v45 }
 0xc7a   : > { %v2724_v28 = vsel %vm1259_vm0, %v7520_v18, -inf }
 0xc7b   : > { %v2887_v30 = vsel %vm1259_vm0, %v7517_v27, -inf }
 0xc7c   : > { %2725 = vmax.xlane.f32.xlu0 %v2724_v28  ;;  %2888 = vmax.xlane.f32.xlu2 %v2887_v30 }
 0xc7e   : > { %v2870_v47 = vpop.f32.mrf.mxu3 }
 0xc7f   : > { %v2876_v31 = vmul.f32 0.35355338, %v2870_v47 }
 0xc81   : > { %v7526_v22 = vadd.f32 %v6449_v8, %v2876_v31 }
 0xc83   : > { %v2890_v33 = vsel %vm1259_vm0, %v7526_v22, -inf }
 0xc84   : > { %2891 = vmax.xlane.f32.xlu1 %v2890_v33 }
 0xc85   : > { %v3027_v41 = vpop.f32.mrf.mxu2 }
 0xc86   : > { %v3193_v48 = vpop.f32.mrf.mxu3  ;;  %v3039_v42 = vmul.f32 0.35355338, %v3027_v41 }
 0xc87   : > { %v3205_v39 = vmul.f32 0.35355338, %v3193_v48 }
 0xc88   : > { %v7530_v36 = vadd.f32 %v6446_v7, %v3039_v42 }
 0xc89   : > { %v7532_v49 = vadd.f32 %v6446_v7, %v3205_v39 }
 0xc8a   : > { %v3047_v50 = vsel %vm1259_vm0, %v7530_v36, -inf }
 0xc8b   : > { %v3213_v15 = vsel %vm1259_vm0, %v7532_v49, -inf  ;;  %3048 = vmax.xlane.f32.xlu2 %v3047_v50 }
 0xc8c   : > { %3214 = vmax.xlane.f32.xlu0 %v3213_v15 }
 0xc8d   : > { %v3030_v53 = vpop.f32.mrf.mxu2 }
 0xc8e   : > { %v3196_v52 = vpop.f32.mrf.mxu3  ;;  %v3040_v32 = vmul.f32 0.35355338, %v3030_v53 }
 0xc8f   : > { %v3206_v56 = vmul.f32 0.35355338, %v3196_v52 }
 0xc90   : > { %v7540_v57 = vadd.f32 %v6447_v3, %v3040_v32 }
 0xc91   : > { %v7538_v58 = vadd.f32 %v6447_v3, %v3206_v56 }
 0xc92   : > { %v3050_v46 = vsel %vm1259_vm0, %v7540_v57, -inf }
 0xc93   : > { %v3216_v60 = vsel %vm1259_vm0, %v7538_v58, -inf  ;;  %3051 = vmax.xlane.f32.xlu1 %v3050_v46 }
 0xc94   : > { %3217 = vmax.xlane.f32.xlu2 %v3216_v60 }
 0xc95   : > { %v3033_v61 = vpop.f32.mrf.mxu2 }
 0xc96   : > { %v3041_v35 = vmul.f32 0.35355338, %v3033_v61  ;;  %v3199_v62 = vpop.f32.mrf.mxu3 }
 0xc97   : > { %v3207_v63 = vmul.f32 0.35355338, %v3199_v62 }
 0xc98   : > { %v7546_v0 = vadd.f32 %v6448_v23, %v3041_v35 }
 0xc99   : > { %v7548_v1 = vadd.f32 %v6448_v23, %v3207_v63 }
 0xc9a   : > { %v3053_v4 = vsel %vm1259_vm0, %v7546_v0, -inf }
 0xc9b   : > { %3054 = vmax.xlane.f32.xlu0 %v3053_v4  ;;  %v3219_v7 = vsel %vm1259_vm0, %v7548_v1, -inf }
 0xc9c   : > { %3220 = vmax.xlane.f32.xlu1 %v3219_v7 }
 0xc9d   : > { %v3036_v44 = vpop.f32.mrf.mxu2 }
 0xc9e   : > { %v3042_v2 = vmul.f32 0.35355338, %v3036_v44  ;;  %v3202_v37 = vpop.f32.mrf.mxu3 }
 0xc9f   : > { %v3208_v6 = vmul.f32 0.35355338, %v3202_v37 }
 0xca0   : > { %v7554_v38 = vadd.f32 %v6449_v8, %v3042_v2 }
 0xca1   : > { %v7558_v11 = vadd.f32 %v6449_v8, %v3208_v6 }
 0xca2   : > { %v3056_v3 = vsel %vm1259_vm0, %v7554_v38, -inf }
 0xca3   : > { %3057 = vmax.xlane.f32.xlu0 %v3056_v3  ;;  %v3222_v16 = vsel %vm1259_vm0, %v7558_v11, -inf }
 0xcab   : > { %3223 = vmax.xlane.f32.xlu0 %v3222_v16 }
 0xcd6   : > { %v2717_v12 = vpop.xlane.xlu0 %2716 }
 0xcd7   : > { %v2727_v40 = vsub.f32 %v7495_v55, %v2717_v12 }
 0xcd9   : > { %v2731_v17 = vmul.f32 1.442695, %v2727_v40 }
 0xcdb   : > { %6346 = vpow2.f32 %v2731_v17 }
 0xcde   : > { %v2720_v21 = vpop.xlane.xlu2 %2719 }
 0xcdf   : > { %v2883_v23 = vpop.xlane.xlu1 %2882  ;;  %v2728_v25 = vsub.f32 %v7500_v9, %v2720_v21 }
 0xce0   : > { %v2893_v13 = vsub.f32 %v7502_v10, %v2883_v23 }
 0xce1   : > { %v7565_v26 = vpop.eup %6346  ;;  %v2733_v34 = vmul.f32 1.442695, %v2728_v25 }
 0xce2   : > { %v2897_v24 = vmul.f32 1.442695, %v2893_v13  ;;  %v2739_v45 = vsel %vm1259_vm0, %v7565_v26, 0.0 }
 0xce3   : > { %6348 = vpow2.f32 %v2733_v34  ;;  %2740 = vadd.xlane.f32.xlu2 %v2739_v45 }
 0xce4   : > { %6350 = vpow2.f32 %v2897_v24 }
 0xce7   : > { %v2723_v8 = vpop.xlane.xlu1 %2722  ;;  %v2886_v55 = vpop.xlane.xlu0 %2885 }
 0xce8   : > { %v2729_v28 = vsub.f32 %v7509_v59, %v2723_v8  ;;  %v2894_v30 = vsub.f32 %v7511_v5, %v2886_v55 }
 0xce9   : > { %v7571_v47 = vpop.eup %6348 }
 0xcea   : > { %v2735_v9 = vmul.f32 1.442695, %v2729_v28  ;;  %v2899_v10 = vmul.f32 1.442695, %v2894_v30  ;;  %v7573_v31 = vpop.eup %6350  ;;  %v2742_v33 = vsel %vm1259_vm0, %v7571_v47, 0.0 }
 0xceb   : > { %2743 = vadd.xlane.f32.xlu1 %v2742_v33  ;;  %v2905_v41 = vsel %vm1259_vm0, %v7573_v31, 0.0 }
 0xcec   : > { %6352 = vpow2.f32 %v2735_v9  ;;  %2906 = vadd.xlane.f32.xlu0 %v2905_v41 }
 0xced   : > { %6354 = vpow2.f32 %v2899_v10 }
 0xcef   : > { %v2726_v39 = vpop.xlane.xlu0 %2725  ;;  %v2889_v15 = vpop.xlane.xlu2 %2888 }
 0xcf0   : > { %v2895_v32 = vsub.f32 %v7517_v27, %v2889_v15 }
 0xcf2   : > { %v7579_v48 = vpop.eup %6352  ;;  %v2901_v56 = vmul.f32 1.442695, %v2895_v32 }
 0xcf3   : > { %v7581_v59 = vpop.eup %6354  ;;  %v2745_v5 = vsel %vm1259_vm0, %v7579_v48, 0.0 }
 0xcf4   : > { %v2908_v42 = vsel %vm1259_vm0, %v7581_v59, 0.0  ;;  %2746 = vadd.xlane.f32.xlu0 %v2745_v5  ;;  %6356 = vpow2.f32 %v2901_v56 }
 0xcf5   : > { %2909 = vadd.xlane.f32.xlu2 %v2908_v42 }
 0xcf7   : > { %v2892_v50 = vpop.xlane.xlu1 %2891 }
 0xcf8   : > { %v2896_v46 = vsub.f32 %v7526_v22, %v2892_v50 }
 0xcfa   : > { %v2903_v4 = vmul.f32 1.442695, %v2896_v46  ;;  %v7600_v2 = vpop.eup %6356 }
 0xcfe   : > { %v3049_v63 = vpop.xlane.xlu2 %3048 }
 0xcff   : > { %v3215_v53 = vpop.xlane.xlu0 %3214  ;;  %v3059_v22 = vsub.f32 %v7530_v36, %v3049_v63 }
 0xd00   : > { %v3225_v27 = vsub.f32 %v7532_v49, %v3215_v53 }
 0xd01   : > { %v3063_v16 = vmul.f32 1.442695, %v3059_v22 }
 0xd02   : > { %v3229_v3 = vmul.f32 1.442695, %v3225_v27 }
 0xd04   : > { %6208 = vrot.lane.b32.xlu1 %v7452_v29, %s8403_s28 }
 0xd06   : > { %v3052_v52 = vpop.xlane.xlu1 %3051 }
 0xd07   : > { %v3060_v60 = vsub.f32 %v7540_v57, %v3052_v52  ;;  %v3218_v12 = vpop.xlane.xlu2 %3217 }
 0xd08   : > { %6203 = vrot.lane.b32.xlu0 %v7452_v29, %s8404_s2  ;;  %v2730_v29 = vsub.f32 %v7520_v18, %v2726_v39  ;;  %v2911_v18 = vsel %vm1259_vm0, %v7600_v2, 0.0  ;;  %v3226_v17 = vsub.f32 %v7538_v58, %v3218_v12 }
 0xd09   : > { %v3065_v35 = vmul.f32 1.442695, %v3060_v60 }
 0xd0a   : > { %v2737_v7 = vmul.f32 1.442695, %v2730_v29  ;;  %v3231_v13 = vmul.f32 1.442695, %v3226_v17 }
 0xd0b   : > { %6358 = vpow2.f32 %v3065_v35 }
 0xd0c   : > { %6360 = vpow2.f32 %v2903_v4 }
 0xd0d   : > { %6213 = vrot.lane.b32.xlu2 %v7442_v20, %s8404_s2  ;;  %6362 = vpow2.f32 %v2737_v7 }
 0xd0e   : > { %v7596_v61 = vpop.xlane.xlu0 %3054 }
 0xd0f   : > { %v3221_v62 = vpop.xlane.xlu1 %3220  ;;  %v3061_v35 = vsub.f32 %v7546_v0, %v7596_v61 }
 0xd10   : > { %v3227_v44 = vsub.f32 %v7548_v1, %v3221_v62 }
 0xd11   : > { %v7606_v6 = vpop.eup %6358 }
 0xd12   : > { %v3233_v57 = vmul.f32 1.442695, %v3227_v44  ;;  %v7609_v40 = vpop.eup %6360  ;;  %v3074_v49 = vsel %vm1259_vm0, %v7606_v6, 0.0 }
 0xd13   : > { %v7613_v36 = vpop.eup %6362  ;;  %v2914_v23 = vsel %vm1259_vm0, %v7609_v40, 0.0 }
 0xd14   : > { %6364 = vpow2.f32 %v3233_v57 }
 0xd15   : > { %6366 = vpow2.f32 %v3229_v3 }
 0xd16   : > { %v3058_v37 = vpop.xlane.xlu0 %3057  ;;  %6368 = vpow2.f32 %v3063_v16 }
 0xd17   : > { %v3062_v1 = vsub.f32 %v7554_v38, %v3058_v37  ;;  %v2748_v38 = vsel %vm1259_vm0, %v7613_v36, 0.0 }
 0xd19   : > { %v3069_v21 = vmul.f32 1.442695, %v3062_v1 }
 0xd1a   : > { %v7620_v25 = vpop.eup %6364 }
 0xd1b   : > { %6370 = vpow2.f32 %v3069_v21  ;;  %v7622_v24 = vpop.eup %6366  ;;  %v3243_v58 = vsel %vm1259_vm0, %v7620_v25, 0.0 }
 0xd1c   : > { %v7626_v45 = vpop.eup %6368  ;;  %6372 = vpow2.f32 %v3231_v13  ;;  %v3237_v55 = vsel %vm1259_vm0, %v7622_v24, 0.0 }
 0xd1d   : > { %v3071_v28 = vsel %vm1259_vm0, %v7626_v45, 0.0 }
 0xd1e   : > { %v3224_v34 = vpop.xlane.xlu0 %3223 }
 0xd1f   : > { %v3228_v8 = vsub.f32 %v7558_v11, %v3224_v34 }
 0xd21   : > { %v7633_v30 = vpop.eup %6370  ;;  %v3235_v9 = vmul.f32 1.442695, %v3228_v8 }
 0xd22   : > { %v7635_v10 = vpop.eup %6372  ;;  %v3080_v33 = vsel %vm1259_vm0, %v7633_v30, 0.0 }
 0xd23   : > { %6374 = vpow2.f32 %v3235_v9  ;;  %v3240_v11 = vsel %vm1259_vm0, %v7635_v10, 0.0 }
 0xd29   : > { %v7641_v41 = vpop.eup %6374 }
 0xd2a   : > { %v3246_v5 = vsel %vm1259_vm0, %v7641_v41, 0.0 }
 0xd2e   : > { %2912 = vadd.xlane.f32.xlu1 %v2911_v18 }
 0xd32   : > { %3075 = vadd.xlane.f32.xlu0 %v3074_v49 }
 0xd36   : > { %2915 = vadd.xlane.f32.xlu2 %v2914_v23  ;;  %2749 = vadd.xlane.f32.xlu1 %v2748_v38 }
 0xd3a   : > { %3244 = vadd.xlane.f32.xlu0 %v3243_v58 }
 0xd3e   : > { %3238 = vadd.xlane.f32.xlu2 %v3237_v55  ;;  %3072 = vadd.xlane.f32.xlu1 %v3071_v28 }
 0xd42   : > { %3081 = vadd.xlane.f32.xlu0 %v3080_v33 }
 0xd46   : > { %3241 = vadd.xlane.f32.xlu2 %v3240_v11 }
 0xd4e   : > { %3247 = vadd.xlane.f32.xlu2 %v3246_v5 }
 0xd56   : > { %v2741_v42 = vpop.xlane.xlu2 %2740 }
 0xd57   : > { %6376 = vrcp.f32 %v2741_v42  ;;  %6218 = vrot.lane.b32.xlu1 %v7442_v20, %s8403_s28 }
 0xd5d   : > { %v6377_v39 = vpop.eup %6376 }
 0xd5e   : > { %v2755_v50 = vmul.f32 %v6377_v39, %v7565_v26  ;;  %v2744_v15 = vpop.xlane.xlu1 %2743 }
 0xd5f   : > { %6378 = vrcp.f32 %v2744_v15  ;;  %v2907_v53 = vpop.xlane.xlu0 %2906 }
 0xd60   : > { %6380 = vrcp.f32 %v2907_v53  ;;  %5866 = vmatmul.msk.f32.vlgmr.msrb.gmra.mxu1 %vm1259_vm0, %v2755_v50 }
 0xd65   : > { %v6379_v52 = vpop.eup %6378 }
 0xd66   : > { %v6381_v32 = vpop.eup %6380  ;;  %v2756_v56 = vmul.f32 %v6379_v52, %v7571_v47  ;;  %v3067_v47 = vmul.f32 1.442695, %v3061_v35 }
 0xd67   : > { %v2921_v60 = vmul.f32 %v6381_v32, %v7573_v31  ;;  %v2747_v29 = vpop.xlane.xlu0 %2746 }
 0xd68   : > { %v2910_v46 = vpop.xlane.xlu2 %2909  ;;  %5867 = vmatmul.msk.f32.gmra.mxu1 %vm1259_vm0, %v2756_v56 }
 0xd69   : > { %6382 = vrcp.f32 %v2910_v46  ;;  %5878 = vmatmul.msk.f32.vlgmr.msra.gmra.mxu0 %vm1259_vm0, %v2921_v60 }
 0xd6a   : > { %6384 = vrcp.f32 %v2747_v29 }
 0xd6b   : > { %6386 = vpow2.f32 %v3067_v47 }
 0xd6f   : > { %v6383_v20 = vpop.eup %6382 }
 0xd70   : > { %v6385_v26 = vpop.eup %6384  ;;  %v2922_v62 = vmul.f32 %v6383_v20, %v7581_v59  ;;  %v6214_v22 = vpop.permute.xlu2 %6213 }
 0xd71   : > { %v2757_v63 = vmul.f32 %v6385_v26, %v7579_v48  ;;  %v7659_v57 = vpop.eup %6386  ;;  %v6215_v59 = vunpack.i.l.bf16 %v6214_v22  ;;  %v6216_v61 = vunpack.i.h.bf16 %v6214_v22  ;;  %v5908_v22 = vld [vmem:[%s8400_s3 + $0x30] sm:$0xff] }
 0xd72   : > { %5879 = vmatmul.msk.f32.gmra.mxu0 %vm1259_vm0, %v2922_v62  ;;  %v3077_v48 = vsel %vm1259_vm0, %v7659_v57, 0.0 }
 0xd73   : > { %5868 = vmatmul.msk.f32.gmra.mxu1 %vm1259_vm0, %v2757_v63 }
 0xd76   : > { %v6209_v31 = vpop.permute.xlu1 %6208 }
 0xd77   : > { %v6210_v4 = vunpack.i.l.bf16 %v6209_v31  ;;  %v6211_v7 = vunpack.i.h.bf16 %v6209_v31 }
 0xd79   : > { %3293 = vmatpush.msrb.mxu0 %v6210_v4 }
 0xd7a   : > { %v6204_v44 = vpop.permute.xlu0 %6203 }
 0xd7b   : > { %v6205_v27 = vunpack.i.l.bf16 %v6204_v44  ;;  %3294 = vmatpush.msrb.mxu0 %v6211_v7  ;;  %v6206_v0 = vunpack.i.h.bf16 %v6204_v44 }
 0xd7d   : > { %3127 = vmatpush.msra.mxu1 %v6205_v27  ;;  %v5909_v27 = vld [vmem:[%s8400_s3 + $0x38] sm:$0xff] }
 0xd7e   : > { %3399 = vmatpush.msrb.mxu2 %v5909_v27 }
 0xd7f   : > { %3128 = vmatpush.msra.mxu1 %v6206_v0  ;;  %v5906_v0 = vld [vmem:[%s8400_s3 + $0x20] sm:$0xff] }
 0xd80   : > { %3400 = vmatpush.msrb.mxu2 %v5908_v22 }
 0xd81   : > { %3078 = vadd.xlane.f32.xlu1 %v3077_v48  ;;  %3129 = vmatpush.msra.mxu1 %v6215_v59 }
 0xd83   : > { %3130 = vmatpush.msra.mxu1 %v6216_v61 }
 0xda1   : > { %v2913_v37 = vpop.xlane.xlu1 %2912 }
 0xda2   : > { %6388 = vrcp.f32 %v2913_v37 }
 0xda5   : > { %v3076_v38 = vpop.xlane.xlu0 %3075 }
 0xda8   : > { %v6389_v18 = vpop.eup %6388 }
 0xda9   : > { %v2916_v3 = vpop.xlane.xlu2 %2915  ;;  %v2750_v16 = vpop.xlane.xlu1 %2749  ;;  %v2923_v12 = vmul.f32 %v6389_v18, %v7600_v2 }
 0xdaa   : > { %6390 = vrcp.f32 %v2916_v3 }
 0xdab   : > { %6392 = vrcp.f32 %v2750_v16  ;;  %5880 = vmatmul.msk.f32.gmra.mxu0 %vm1259_vm0, %v2923_v12 }
 0xdb0   : > { %v6391_v1 = vpop.eup %6390 }
 0xdb1   : > { %v6393_v49 = vpop.eup %6392  ;;  %v2924_v17 = vmul.f32 %v6391_v1, %v7609_v40  ;;  %v3073_v21 = vpop.xlane.xlu1 %3072 }
 0xdb2   : > { %v2758_v23 = vmul.f32 %v6393_v49, %v7613_v36  ;;  %6394 = vrcp.f32 %v3073_v21  ;;  %v3239_v58 = vpop.xlane.xlu2 %3238 }
 0xdb3   : > { %5881 = vmatmul.msk.f32.gmra.mxu0 %vm1259_vm0, %v2924_v17  ;;  %6396 = vrcp.f32 %v3076_v38 }
 0xdb4   : > { %5869 = vmatmul.msk.f32.gmra.mxu1 %vm1259_vm0, %v2758_v23  ;;  %6398 = vrcp.f32 %v3239_v58 }
 0xdb8   : > { %v6395_v13 = vpop.eup %6394 }
 0xdb9   : > { %v3087_v2 = vmul.f32 %v6395_v13, %v7626_v45  ;;  %v6397_v34 = vpop.eup %6396  ;;  %v3245_v45 = vpop.xlane.xlu0 %3244 }
 0xdba   : > { %v3088_v8 = vmul.f32 %v6397_v34, %v7606_v6  ;;  %v3242_v40 = vpop.xlane.xlu2 %3241  ;;  %v6399_v55 = vpop.eup %6398 }
 0xdbb   : > { %6400 = vrcp.f32 %v3242_v40  ;;  %v3253_v33 = vmul.f32 %v6399_v55, %v7622_v24 }
 0xdbc   : > { %5890 = vmatmul.msk.f32.vlgmr.msra.gmra.mxu1 %vm1259_vm0, %v3087_v2  ;;  %6402 = vrcp.f32 %v3245_v45 }
 0xdc1   : > { %v6401_v11 = vpop.eup %6400  ;;  %v3082_v52 = vpop.xlane.xlu0 %3081 }
 0xdc2   : > { %v3254_v6 = vmul.f32 %v6401_v11, %v7635_v10  ;;  %v3248_v5 = vpop.xlane.xlu2 %3247  ;;  %v6403_v42 = vpop.eup %6402 }
 0xdc3   : > { %6404 = vrcp.f32 %v3248_v5  ;;  %v3255_v39 = vmul.f32 %v6403_v42, %v7620_v25 }
 0xdc4   : > { %5891 = vmatmul.msk.f32.gmra.mxu1 %vm1259_vm0, %v3088_v8 }
 0xdc9   : > { %v6219_v36 = vpop.permute.xlu1 %6218  ;;  %v6405_v50 = vpop.eup %6404 }
 0xdca   : > { %v6220_v28 = vunpack.i.l.bf16 %v6219_v36  ;;  %v6221_v9 = vunpack.i.h.bf16 %v6219_v36  ;;  %v3256_v24 = vmul.f32 %v6405_v50, %v7641_v41 }
 0xdcc   : > { %3295 = vmatpush.msrb.mxu0 %v6220_v28 }
 0xdce   : > { %3296 = vmatpush.msrb.mxu0 %v6221_v9 }
 0xdcf   : > { %5902 = vmatmul.msk.f32.vlgmr.msrb.gmra.mxu0 %vm1259_vm0, %v3253_v33  ;;  %v6233_v33 = vld [vmem:[%s8397_s8 + $0x1] ss:$0 sm:$0xff] }
 0xdd7   : > { %5903 = vmatmul.msk.f32.gmra.mxu0 %vm1259_vm0, %v3254_v6 }
 0xddd   : > { %v2800_v60 = vpop.f32.mrf.mxu1 }
 0xddf   : > { %5904 = vmatmul.msk.f32.gmra.mxu0 %vm1259_vm0, %v3255_v39 }
 0xde5   : > { %v2803_v46 = vpop.f32.mrf.mxu1 }
 0xde6   : > { %v2966_v15 = vpop.f32.mrf.mxu0 }
 0xde7   : > { %3314 = vrot.lane.b32.xlu0 %v2966_v15, %s6636_s18  ;;  %5905 = vmatmul.msk.f32.gmra.mxu0 %vm1259_vm0, %v3256_v24 }
 0xdef   : > { %v2969_v53 = vpop.f32.mrf.mxu0 }
 0xdf0   : > { %3316 = vrot.lane.b32.xlu0 %v2969_v53, %s6636_s18  ;;  %v2806_v29 = vpop.f32.mrf.mxu1 }
 0xdf4   : > { %v3079_v10 = vpop.xlane.xlu1 %3078 }
 0xdf5   : > { %6406 = vrcp.f32 %v3079_v10 }
 0xdf6   : > { %6408 = vrcp.f32 %v3082_v52 }
 0xdfb   : > { %v6407_v32 = vpop.eup %6406 }
 0xdfc   : > { %v3089_v25 = vmul.f32 %v6407_v32, %v7659_v57  ;;  %v6409_v56 = vpop.eup %6408  ;;  %v5907_v57 = vld [vmem:[%s8400_s3 + $0x28] sm:$0xff] }
 0xdfd   : > { %v3090_v41 = vmul.f32 %v6409_v56, %v7633_v30  ;;  %3401 = vmatpush.msrb.mxu2 %v5907_v57  ;;  %v5920_v57 = vld [vmem:[%s6717_s24 + $0x38] sm:$0xff] }
 0xdfe   : > { %5892 = vmatmul.msk.f32.gmra.mxu1 %vm1259_vm0, %v3089_v25 }
 0xdff   : > { %3402 = vmatpush.msrb.mxu2 %v5906_v0  ;;  %3569 = vmatpush.msrb.mxu1 %v5920_v57  ;;  %v5919_v0 = vld [vmem:[%s6717_s24 + $0x30] sm:$0xff]  ;;  %v5937_v57 = vld [vmem:[%s8398_s6 + $0x78] sm:$0xff] }
 0xe00   : > { %3704 = vmatpush.msrb.mxu3 %v5937_v57 }
 0xe01   : > { %3570 = vmatpush.msrb.mxu1 %v5919_v0  ;;  %v5936_v0 = vld [vmem:[%s8398_s6 + $0x70] sm:$0xff] }
 0xe02   : > { %3705 = vmatpush.msrb.mxu3 %v5936_v0 }
 0xe06   : > { %5893 = vmatmul.msk.f32.gmra.mxu1 %vm1259_vm0, %v3090_v41 }
 0xe28   : > { %v2972_v20 = vpop.f32.mrf.mxu0 }
 0xe29   : > { %3318 = vrot.lane.b32.xlu0 %v2972_v20, %s6636_s18 }
 0xe30   : > { %v2975_v35 = vpop.f32.mrf.mxu0 }
 0xe31   : > { %v2809_v26 = vpop.f32.mrf.mxu1  ;;  %3320 = vrot.lane.b32.xlu0 %v2975_v35, %s6636_s18 }
 0xe39   : > { %v3132_v62 = vpop.f32.mrf.mxu1 }
 0xe3a   : > { %3330 = vrot.lane.b32.xlu1 %v3132_v62, %s6638_s0 }
 0xe41   : > { %v3135_v30 = vpop.f32.mrf.mxu1 }
 0xe4c   : > { %v3298_v63 = vpop.f32.mrf.mxu0 }
 0xe4d   : > { %3346 = vrot.lane.b32.xlu2 %v3298_v63, %s6637_s1 }
 0xe54   : > { %v3301_v47 = vpop.f32.mrf.mxu0 }
 0xe55   : > { %3348 = vrot.lane.b32.xlu1 %v3301_v47, %s6637_s1  ;;  %3332 = vrot.lane.b32.xlu2 %v3135_v30, %s6638_s0 }
 0xe59   : > { %v3315_v59 = vpop.permute.xlu0 %3314 }
 0xe5a   : > { %v3358_v48 = vsel %vm1430_vm14, %v2800_v60, %v3315_v59  ;;  %v5918_v59 = vld [vmem:[%s6717_s24 + $0x28] sm:$0xff] }
 0xe5b   : > { %3571 = vmatpush.msrb.mxu1 %v5918_v59  ;;  %v5935_v59 = vld [vmem:[%s8398_s6 + $0x68] sm:$0xff] }
 0xe5c   : > { %v3304_v31 = vpop.f32.mrf.mxu0  ;;  %3706 = vmatpush.msrb.mxu3 %v5935_v59 }
 0xe5d   : > { %3350 = vrot.lane.b32.xlu1 %v3304_v31, %s6637_s1 }
 0xe62   : > { %v3317_v16 = vpop.permute.xlu0 %3316 }
 0xe63   : > { %v3359_v1 = vsel %vm1430_vm14, %v2803_v46, %v3317_v16 }
 0xe64   : > { %v3307_v4 = vpop.f32.mrf.mxu0 }
 0xe65   : > { %3352 = vrot.lane.b32.xlu1 %v3307_v4, %s6637_s1  ;;  %s8405_s1 = sld [smem:[#allocation11_spill]] }
 0xe7b   : > { %v3138_v7 = vpop.f32.mrf.mxu1 }
 0xe7c   : > { %3334 = vrot.lane.b32.xlu2 %v3138_v7, %s6638_s0 }
 0xe83   : > { %v3141_v44 = vpop.f32.mrf.mxu1 }
 0xe84   : > { %3336 = vrot.lane.b32.xlu2 %v3141_v44, %s6638_s0 }
 0xe9b   : > { %v3319_v23 = vpop.permute.xlu0 %3318 }
 0xe9c   : > { %v3360_v13 = vsel %vm1430_vm14, %v2806_v29, %v3319_v23 }
 0xea3   : > { %v3321_v8 = vpop.permute.xlu0 %3320 }
 0xea4   : > { %v3361_v40 = vsel %vm1430_vm14, %v2809_v26, %v3321_v8 }
 0xea7   : > { %v3347_v37 = vpop.permute.xlu2 %3346 }
 0xeac   : > { %v3331_v61 = vpop.permute.xlu1 %3330 }
 0xead   : > { %v3362_v18 = vsel %vm2131_vm15, %v3358_v48, %v3331_v61  ;;  %v5917_v48 = vld [vmem:[%s6717_s24 + $0x20] sm:$0xff] }
 0xeae   : > { %v3366_v3 = vsel %vm2136_vm1, %v3362_v18, %v3347_v37  ;;  %3572 = vmatpush.msrb.mxu1 %v5917_v48  ;;  %v5934_v48 = vld [vmem:[%s8398_s6 + $0x60] sm:$0xff] }
 0xeaf   : > { %5910 = vmatmul.msk.f32.vlgmr.msrb.gmra.mxu2 %vm1259_vm0, %v3366_v3  ;;  %v3333_v12 = vpop.permute.xlu2 %3332  ;;  %3707 = vmatpush.msrb.mxu3 %v5934_v48 }
 0xeb0   : > { %v3363_v49 = vsel %vm2131_vm15, %v3359_v1, %v3333_v12 }
 0xec7   : > { %v3349_v17 = vpop.permute.xlu1 %3348 }
 0xec8   : > { %v3367_v21 = vsel %vm2136_vm1, %v3363_v49, %v3349_v17 }
 0xec9   : > { %5911 = vmatmul.msk.f32.gmra.mxu2 %vm1259_vm0, %v3367_v21  ;;  %v6234_v21 = vld [vmem:[%s6707_s14 + $0x1] ss:$0 sm:$0xff] }
 0xecf   : > { %v3351_v38 = vpop.permute.xlu1 %3350 }
 0xed6   : > { %v3335_v2 = vpop.permute.xlu2 %3334 }
 0xed7   : > { %v3364_v34 = vsel %vm2131_vm15, %v3360_v13, %v3335_v2  ;;  %v3353_v55 = vpop.permute.xlu1 %3352  ;;  %v6235_v13 = vld [vmem:[%s6712_s19 + $0x1] ss:$0 sm:$0xff] }
 0xed8   : > { %v3368_v58 = vsel %vm2136_vm1, %v3364_v34, %v3351_v38 }
 0xed9   : > { %5912 = vmatmul.msk.f32.gmra.mxu2 %vm1259_vm0, %v3368_v58 }
 0xede   : > { %v3337_v36 = vpop.permute.xlu2 %3336 }
 0xedf   : > { %v3365_v28 = vsel %vm2131_vm15, %v3361_v40, %v3337_v36 }
 0xee0   : > { %v3369_v9 = vsel %vm2136_vm1, %v3365_v28, %v3353_v55 }
 0xee1   : > { %5913 = vmatmul.msk.f32.gmra.mxu2 %vm1259_vm0, %v3369_v9 }
 0xf32   : > { %v3404_v45 = vpop.f32.mrf.mxu2 }
 0xf33   : > { %v3416_v11 = vadd.f32 %v3404_v45, %v7344_v19 }
 0xf35   : > { %v7719_v6 = vadd.f32 %v6233_v33, %v3416_v11 }
 0xf37   : > { %v3433_v5 = vsel %vm1259_vm0, %v7719_v6, 0.0 }
 0xf38   : > { %3434 = vadd.xlane.f32.xlu0 %v3433_v5 }
 0xf4c   : > { %v3407_v42 = vpop.f32.mrf.mxu2 }
 0xf4d   : > { %v3417_v39 = vadd.f32 %v3407_v42, %v7349_v43 }
 0xf4f   : > { %v7724_v50 = vadd.f32 %v6233_v33, %v3417_v39 }
 0xf51   : > { %v3436_v24 = vsel %vm1259_vm0, %v7724_v50, 0.0 }
 0xf52   : > { %3437 = vadd.xlane.f32.xlu2 %v3436_v24 }
 0xf5c   : > { %v3410_v15 = vpop.f32.mrf.mxu2 }
 0xf5d   : > { %v3418_v53 = vadd.f32 %v3410_v15, %v7354_v51 }
 0xf5f   : > { %v7729_v10 = vadd.f32 %v6233_v33, %v3418_v53 }
 0xf61   : > { %v3439_v19 = vsel %vm1259_vm0, %v7729_v10, 0.0 }
 0xf62   : > { %3440 = vadd.xlane.f32.xlu1 %v3439_v19 }
 0xf64   : > { %v3413_v52 = vpop.f32.mrf.mxu2 }
 0xf65   : > { %v3419_v32 = vadd.f32 %v3413_v52, %v7359_v54 }
 0xf67   : > { %v7734_v25 = vadd.f32 %v6233_v33, %v3419_v32 }
 0xf69   : > { %v3442_v43 = vsel %vm1259_vm0, %v7734_v25, 0.0 }
 0xf6a   : > { %3443 = vadd.xlane.f32.xlu0 %v3442_v43 }
 0xfab   : > { %v3435_v56 = vpop.xlane.xlu0 %3434 }
 0xfac   : > { %v3445_v41 = vmul.f32 %v3435_v56, %v6898_v14 }
 0xfae   : > { %v3449_v51 = vsub.f32 %v7719_v6, %v3445_v41 }
 0xfb0   : > { %v3453_v60 = vmul.f32 %v3449_v51, %v3449_v51 }
 0xfb2   : > { %v3457_v46 = vsel %vm1259_vm0, %v3453_v60, 0.0 }
 0xfb3   : > { %3458 = vadd.xlane.f32.xlu2 %v3457_v46 }
 0xfc5   : > { %v3438_v29 = vpop.xlane.xlu2 %3437 }
 0xfc6   : > { %v3446_v20 = vmul.f32 %v3438_v29, %v6898_v14 }
 0xfc8   : > { %v7743_v54 = vsub.f32 %v7724_v50, %v3446_v20 }
 0xfca   : > { %v3454_v26 = vmul.f32 %v7743_v54, %v7743_v54 }
 0xfcc   : > { %v3460_v35 = vsel %vm1259_vm0, %v3454_v26, 0.0 }
 0xfcd   : > { %3461 = vadd.xlane.f32.xlu1 %v3460_v35 }
 0xfd5   : > { %v3441_v62 = vpop.xlane.xlu1 %3440 }
 0xfd6   : > { %v3447_v63 = vmul.f32 %v3441_v62, %v6898_v14 }
 0xfd8   : > { %v7750_v30 = vsub.f32 %v7729_v10, %v3447_v63 }
 0xfda   : > { %v3455_v47 = vmul.f32 %v7750_v30, %v7750_v30 }
 0xfdc   : > { %v3463_v31 = vsel %vm1259_vm0, %v3455_v47, 0.0 }
 0xfdd   : > { %3464 = vadd.xlane.f32.xlu0 %v3463_v31  ;;  %v3444_v4 = vpop.xlane.xlu0 %3443 }
 0xfde   : > { %v3448_v7 = vmul.f32 %v3444_v4, %v6898_v14 }
 0xfe0   : > { %v7757_v44 = vsub.f32 %v7734_v25, %v3448_v7 }
 0xfe2   : > { %v3456_v27 = vmul.f32 %v7757_v44, %v7757_v44 }
 0xfe4   : > { %v3466_v22 = vsel %vm1259_vm0, %v3456_v27, 0.0 }
 0xfe5   : > { %3467 = vadd.xlane.f32.xlu2 %v3466_v22 }
0x1026   : > { %v3459_v61 = vpop.xlane.xlu2 %3458 }
0x1027   : > { %v3469_v37 = vmul.f32 %v3459_v61, %v6898_v14  ;;  %v5933_v61 = vld [vmem:[%s8398_s6 + $0x58] sm:$0xff] }
0x1028   : > { %3708 = vmatpush.msrb.mxu3 %v5933_v61 }
0x1029   : > { %v3473_v18 = vadd.f32 1e-05, %v3469_v37  ;;  %v6236_v37 = vld [vmem:[%s6722_s30 + $0x1] ss:$0 sm:$0xff] }
0x102b   : > { %6410 = vrsqrt.f32 %v3473_v18  ;;  %vm3483_vm15 = vweird.f32 %v3473_v18 }
0x1031   : > { %v6411_v3 = vpop.eup %6410 }
0x1032   : > { %v3478_v16 = vmul.f32 %v6411_v3, %v3473_v18  ;;  %vm3484_vm14 = vweird.f32 %v6411_v3  ;;  %v5932_v18 = vld [vmem:[%s8398_s6 + $0x50] sm:$0xff] }
0x1033   : > { %vm3485_vm1 = vmor %vm3483_vm15, %vm3484_vm14  ;;  %3709 = vmatpush.msrb.mxu3 %v5932_v18 }
0x1034   : > { %v3479_v12 = vmul.f32 %v6411_v3, %v3478_v16 }
0x1036   : > { %v3480_v1 = vmul.f32 0.5, %v3479_v12  ;;  %v5930_v12 = vld [vmem:[%s8398_s6 + $0x40] sm:$0xff] }
0x1038   : > { %v3481_v49 = vsub.f32 1.5, %v3480_v1 }
0x103a   : > { %v3482_v17 = vmul.f32 %v6411_v3, %v3481_v49 }
0x103c   : > { %v3486_v23 = vsel %vm3485_vm1, %v6411_v3, %v3482_v17  ;;  %v5931_v3 = vld [vmem:[%s8398_s6 + $0x48] sm:$0xff] }
0x103d   : > { %v3517_v38 = vmul.f32 %v3486_v23, %v3449_v51  ;;  %3710 = vmatpush.msrb.mxu3 %v5931_v3 }
0x103f   : > { %v3524_v2 = vmul.f32 %v6234_v21, %v3517_v38  ;;  %3711 = vmatpush.msrb.mxu3 %v5930_v12 }
0x1040   : > { %v3462_v34 = vpop.xlane.xlu1 %3461 }
0x1041   : > { %v3531_v58 = vadd.f32 %v6235_v13, %v3524_v2  ;;  %v3470_v8 = vmul.f32 %v3462_v34, %v6898_v14 }
0x1043   : > { %5922 = vmatmul.msk.f32.vlgmr.msrb.gmra.mxu1 %vm1259_vm0, %v3531_v58  ;;  %v3474_v40 = vadd.f32 1e-05, %v3470_v8 }
0x1045   : > { %6412 = vrsqrt.f32 %v3474_v40  ;;  %vm3493_vm10 = vweird.f32 %v3474_v40 }
0x104b   : > { %v6413_v36 = vpop.eup %6412 }
0x104c   : > { %v3488_v55 = vmul.f32 %v6413_v36, %v3474_v40  ;;  %vm3494_vm9 = vweird.f32 %v6413_v36 }
0x104d   : > { %vm3495_vm11 = vmor %vm3493_vm10, %vm3494_vm9 }
0x104e   : > { %v3489_v28 = vmul.f32 %v6413_v36, %v3488_v55 }
0x1050   : > { %v3490_v9 = vmul.f32 0.5, %v3489_v28  ;;  %v3465_v33 = vpop.xlane.xlu0 %3464 }
0x1051   : > { %v3471_v45 = vmul.f32 %v3465_v33, %v6898_v14 }
0x1052   : > { %v3491_v11 = vsub.f32 1.5, %v3490_v9 }
0x1053   : > { %v3475_v5 = vadd.f32 1e-05, %v3471_v45 }
0x1054   : > { %v3492_v42 = vmul.f32 %v6413_v36, %v3491_v11 }
0x1055   : > { %6414 = vrsqrt.f32 %v3475_v5  ;;  %vm3503_vm13 = vweird.f32 %v3475_v5 }
0x1056   : > { %v3496_v39 = vsel %vm3495_vm11, %v6413_v36, %v3492_v42 }
0x1057   : > { %v3518_v24 = vmul.f32 %v3496_v39, %v7743_v54 }
0x1058   : > { %v3468_v15 = vpop.xlane.xlu2 %3467 }
0x1059   : > { %v3472_v53 = vmul.f32 %v3468_v15, %v6898_v14  ;;  %v3525_v19 = vmul.f32 %v6234_v21, %v3518_v24 }
0x105b   : > { %v6415_v52 = vpop.eup %6414  ;;  %v3476_v32 = vadd.f32 1e-05, %v3472_v53  ;;  %v3532_v43 = vadd.f32 %v6235_v13, %v3525_v19 }
0x105c   : > { %v3498_v56 = vmul.f32 %v6415_v52, %v3475_v5  ;;  %vm3504_vm12 = vweird.f32 %v6415_v52 }
0x105d   : > { %6416 = vrsqrt.f32 %v3476_v32  ;;  %5923 = vmatmul.msk.f32.gmra.mxu1 %vm1259_vm0, %v3532_v43  ;;  %vm3505_vm2 = vmor %vm3503_vm13, %vm3504_vm12  ;;  %vm3513_vm4 = vweird.f32 %v3476_v32 }
0x105e   : > { %v3499_v41 = vmul.f32 %v6415_v52, %v3498_v56 }
0x1060   : > { %v3500_v51 = vmul.f32 0.5, %v3499_v41 }
0x1062   : > { %v3501_v60 = vsub.f32 1.5, %v3500_v51 }
0x1063   : > { %v6417_v46 = vpop.eup %6416 }
0x1064   : > { %v3502_v29 = vmul.f32 %v6415_v52, %v3501_v60  ;;  %v3508_v20 = vmul.f32 %v6417_v46, %v3476_v32  ;;  %vm3514_vm3 = vweird.f32 %v6417_v46 }
0x1065   : > { %vm3515_vm5 = vmor %vm3513_vm4, %vm3514_vm3 }
0x1066   : > { %v3506_v54 = vsel %vm3505_vm2, %v6415_v52, %v3502_v29  ;;  %v3509_v26 = vmul.f32 %v6417_v46, %v3508_v20 }
0x1067   : > { %v3519_v35 = vmul.f32 %v3506_v54, %v7750_v30 }
0x1068   : > { %v3510_v62 = vmul.f32 0.5, %v3509_v26 }
0x1069   : > { %v3526_v63 = vmul.f32 %v6234_v21, %v3519_v35 }
0x106a   : > { %v3511_v47 = vsub.f32 1.5, %v3510_v62 }
0x106b   : > { %v3533_v31 = vadd.f32 %v6235_v13, %v3526_v63 }
0x106c   : > { %v3512_v4 = vmul.f32 %v6417_v46, %v3511_v47 }
0x106d   : > { %5924 = vmatmul.msk.f32.gmra.mxu1 %vm1259_vm0, %v3533_v31 }
0x106e   : > { %v3516_v7 = vsel %vm3515_vm5, %v6417_v46, %v3512_v4 }
0x106f   : > { %v3520_v27 = vmul.f32 %v3516_v7, %v7757_v44 }
0x1071   : > { %v3527_v30 = vmul.f32 %v6234_v21, %v3520_v27 }
0x1073   : > { %v3534_v22 = vadd.f32 %v6235_v13, %v3527_v30 }
0x1075   : > { %5925 = vmatmul.msk.f32.gmra.mxu1 %vm1259_vm0, %v3534_v22 }
0x10c0   : > { %v3574_v44 = vpop.f32.mrf.mxu1 }
0x10c1   : > { %v3575_v16 = vadd.f32 %v6236_v37, %v3574_v44 }
0x10c3   : > { %v5926_v1 = vmul.f32 -1.702, %v3575_v16 }
0x10c5   : > { %v3594_v49 = vmul.f32 1.442695, %v5926_v1 }
0x10c7   : > { %6418 = vpow2.f32 %v3594_v49 }
0x10cd   : > { %v6419_v17 = vpop.eup %6418 }
0x10ce   : > { %v3602_v21 = vadd.f32 1.0, %v6419_v17 }
0x10d0   : > { %6420 = vrcp.f32 %v3602_v21  ;;  %v3617_v2 = vand.u32 2147483648, %v3602_v21  ;;  %v3615_v58 = vand.u32 2147483647, %v3602_v21  ;;  %vm3611_vm8 = vweird.f32 %v3602_v21 }
0x10d2   : > { %v3618_v55 = vor.u32 1.1754944e-38, %v3617_v2  ;;  %vm3616_vm15 = vcmp.eq.f32.partialorder %v3615_v58, 8.507059e+37 }
0x10d6   : > { %v6421_v23 = vpop.eup %6420 }
0x10d7   : > { %v3607_v38 = vmul.f32 %v6421_v23, %v3602_v21  ;;  %vm3612_vm7 = vweird.f32 %v6421_v23 }
0x10d8   : > { %vm3613_vm14 = vmor %vm3611_vm8, %vm3612_vm7 }
0x10d9   : > { %v3608_v13 = vsub.f32 1.0, %v3607_v38 }
0x10da   : > { %v3577_v8 = vpop.f32.mrf.mxu1 }
0x10db   : > { %v3609_v34 = vmul.f32 %v6421_v23, %v3608_v13  ;;  %v3578_v40 = vadd.f32 %v6236_v37, %v3577_v8 }
0x10dd   : > { %v3610_v36 = vadd.f32 %v6421_v23, %v3609_v34  ;;  %v5927_v28 = vmul.f32 -1.702, %v3578_v40  ;;  %v6237_v34 = vld [vmem:[%s8395_s12 + $0x1] ss:$0 sm:$0xff] }
0x10df   : > { %v3614_v9 = vsel %vm3613_vm14, %v6421_v23, %v3610_v36  ;;  %v3596_v45 = vmul.f32 1.442695, %v5927_v28 }
0x10e0   : > { %v3619_v33 = vsel %vm3616_vm15, %v3618_v55, %v3614_v9 }
0x10e1   : > { %v3666_v11 = vmul.f32 %v3619_v33, %v3575_v16  ;;  %6422 = vpow2.f32 %v3596_v45 }
0x10e3   : > { %5939 = vmatmul.msk.f32.vlgmr.msrb.gmra.mxu3 %vm2447_vm6, %v3666_v11 }
0x10e7   : > { %v6423_v5 = vpop.eup %6422 }
0x10e8   : > { %v3603_v42 = vadd.f32 1.0, %v6423_v5 }
0x10ea   : > { %6424 = vrcp.f32 %v3603_v42  ;;  %v3580_v39 = vpop.f32.mrf.mxu1  ;;  %v3632_v41 = vand.u32 2147483648, %v3603_v42  ;;  %v3630_v60 = vand.u32 2147483647, %v3603_v42  ;;  %vm3626_vm9 = vweird.f32 %v3603_v42 }
0x10eb   : > { %v3581_v24 = vadd.f32 %v6236_v37, %v3580_v39 }
0x10ec   : > { %v3633_v26 = vor.u32 1.1754944e-38, %v3632_v41  ;;  %vm3631_vm11 = vcmp.eq.f32.partialorder %v3630_v60, 8.507059e+37 }
0x10ed   : > { %v5928_v15 = vmul.f32 -1.702, %v3581_v24 }
0x10ef   : > { %v3598_v53 = vmul.f32 1.442695, %v5928_v15 }
0x10f0   : > { %v6425_v19 = vpop.eup %6424 }
0x10f1   : > { %v3622_v52 = vmul.f32 %v6425_v19, %v3603_v42  ;;  %6426 = vpow2.f32 %v3598_v53  ;;  %vm3627_vm1 = vweird.f32 %v6425_v19 }
0x10f2   : > { %v3583_v32 = vpop.f32.mrf.mxu1  ;;  %vm3628_vm10 = vmor %vm3626_vm9, %vm3627_vm1 }
0x10f3   : > { %v3623_v43 = vsub.f32 1.0, %v3622_v52  ;;  %v3584_v56 = vadd.f32 %v6236_v37, %v3583_v32 }
0x10f5   : > { %v3624_v51 = vmul.f32 %v6425_v19, %v3623_v43  ;;  %v5929_v46 = vmul.f32 -1.702, %v3584_v56 }
0x10f7   : > { %v6427_v29 = vpop.eup %6426  ;;  %v3625_v20 = vadd.f32 %v6425_v19, %v3624_v51  ;;  %v3600_v54 = vmul.f32 1.442695, %v5929_v46 }
0x10f8   : > { %v3604_v35 = vadd.f32 1.0, %v6427_v29 }
0x10f9   : > { %v3629_v62 = vsel %vm3628_vm10, %v6425_v19, %v3625_v20  ;;  %6428 = vpow2.f32 %v3600_v54 }
0x10fa   : > { %v3634_v63 = vsel %vm3631_vm11, %v3633_v26, %v3629_v62  ;;  %6430 = vrcp.f32 %v3604_v35  ;;  %v3647_v22 = vand.u32 2147483648, %v3604_v35  ;;  %v3645_v0 = vand.u32 2147483647, %v3604_v35 }
0x10fb   : > { %v3667_v47 = vmul.f32 %v3634_v63, %v3578_v40  ;;  %vm3641_vm13 = vweird.f32 %v3604_v35 }
0x10fc   : > { %v3648_v61 = vor.u32 1.1754944e-38, %v3647_v22  ;;  %vm3646_vm3 = vcmp.eq.f32.partialorder %v3645_v0, 8.507059e+37 }
0x10fd   : > { %5940 = vmatmul.msk.f32.gmra.mxu3 %vm2447_vm6, %v3667_v47 }
0x10ff   : > { %v6429_v31 = vpop.eup %6428 }
0x1100   : > { %v6431_v4 = vpop.eup %6430  ;;  %v3605_v7 = vadd.f32 1.0, %v6429_v31 }
0x1101   : > { %v3637_v27 = vmul.f32 %v6431_v4, %v3604_v35  ;;  %vm3642_vm12 = vweird.f32 %v6431_v4 }
0x1102   : > { %6432 = vrcp.f32 %v3605_v7  ;;  %vm3643_vm2 = vmor %vm3641_vm13, %vm3642_vm12  ;;  %v3662_v12 = vand.u32 2147483648, %v3605_v7  ;;  %v3660_v49 = vand.u32 2147483647, %v3605_v7  ;;  %vm3656_vm5 = vweird.f32 %v3605_v7 }
0x1103   : > { %v3638_v30 = vsub.f32 1.0, %v3637_v27 }
0x1104   : > { %v3663_v21 = vor.u32 1.1754944e-38, %v3662_v12  ;;  %vm3661_vm8 = vcmp.eq.f32.partialorder %v3660_v49, 8.507059e+37  ;;  %v3858_v49 = vld [vmem:[%s8405_s1 + $0x8] sm:$0xff] }
0x1105   : > { %v3639_v57 = vmul.f32 %v6431_v4, %v3638_v30 }
0x1107   : > { %v3640_v59 = vadd.f32 %v6431_v4, %v3639_v57 }
0x1108   : > { %v6433_v48 = vpop.eup %6432 }
0x1109   : > { %v3644_v37 = vsel %vm3643_vm2, %v6431_v4, %v3640_v59  ;;  %v3652_v18 = vmul.f32 %v6433_v48, %v3605_v7  ;;  %vm3657_vm4 = vweird.f32 %v6433_v48 }
0x110a   : > { %v3649_v44 = vsel %vm3646_vm3, %v3648_v61, %v3644_v37  ;;  %vm3658_vm7 = vmor %vm3656_vm5, %vm3657_vm4  ;;  %vm3884_vm5 = vcmask 125952  }
0x110b   : > { %v3668_v3 = vmul.f32 %v3649_v44, %v3581_v24  ;;  %v3653_v16 = vsub.f32 1.0, %v3652_v18  ;;  %v3860_v44 = vld [vmem:[%s8405_s1 + $0x18] sm:$0xff] }
0x110c   : > { %3876 = vmatpush.msra.mxu2 %v3860_v44 }
0x110d   : > { %v3654_v1 = vmul.f32 %v6433_v48, %v3653_v16  ;;  %5941 = vmatmul.msk.f32.gmra.mxu3 %vm2447_vm6, %v3668_v3  ;;  %v3859_v3 = vld [vmem:[%s8405_s1 + $0x10] sm:$0xff] }
0x110e   : > { %3877 = vmatpush.msra.mxu2 %v3859_v3 }
0x110f   : > { %v3655_v17 = vadd.f32 %v6433_v48, %v3654_v1 }
0x1110   : > { %3878 = vmatpush.msra.mxu2 %v3858_v49 }
0x1111   : > { %v3659_v23 = vsel %vm3658_vm7, %v6433_v48, %v3655_v17 }
0x1112   : > { %v3664_v38 = vsel %vm3661_vm8, %v3663_v21, %v3659_v23  ;;  %v3857_v23 = vld [vmem:[%s8405_s1] sm:$0xff] }
0x1113   : > { %v3669_v13 = vmul.f32 %v3664_v38, %v3584_v56  ;;  %3879 = vmatpush.msra.mxu2 %v3857_v23 }
0x1115   : > { %5942 = vmatmul.msk.f32.gmra.mxu3 %vm2447_vm6, %v3669_v13 }
0x1166   : > { %v3713_v2 = vpop.f32.mrf.mxu3 }
0x1167   : > { %v3714_v42 = vadd.f32 %v6237_v34, %v3713_v2 }
0x1180   : > { %v3716_v58 = vpop.f32.mrf.mxu3 }
0x1181   : > { %v3717_v8 = vadd.f32 %v6237_v34, %v3716_v58 }
0x1183   : > { %v3726_v40 = vadd.f32 %v3717_v8, %v7724_v50  ;;  %v3725_v50 = vadd.f32 %v3714_v42, %v7719_v6 }
0x1185   : > { %v3734_v36 = vsel %vm1259_vm0, %v3726_v40, 0.0  ;;  %v3731_v24 = vsel %vm1259_vm0, %v3725_v50, 0.0 }
0x1186   : > { %3735 = vadd.xlane.f32.xlu2 %v3734_v36 }
0x1190   : > { %v3719_v55 = vpop.f32.mrf.mxu3 }
0x1191   : > { %v3720_v28 = vadd.f32 %v6237_v34, %v3719_v55 }
0x1193   : > { %v3727_v9 = vadd.f32 %v3720_v28, %v7729_v10 }
0x1195   : > { %v3737_v33 = vsel %vm1259_vm0, %v3727_v9, 0.0 }
0x1196   : > { %3738 = vadd.xlane.f32.xlu0 %v3737_v33 }
0x1198   : > { %v3722_v45 = vpop.f32.mrf.mxu3 }
0x1199   : > { %v3723_v11 = vadd.f32 %v6237_v34, %v3722_v45 }
0x119b   : > { %v3728_v5 = vadd.f32 %v3723_v11, %v7734_v25 }
0x119d   : > { %v3740_v39 = vsel %vm1259_vm0, %v3728_v5, 0.0 }
0x119e   : > { %3741 = vadd.xlane.f32.xlu1 %v3740_v39 }
0x11a6   : > { %3732 = vadd.xlane.f32.xlu1 %v3731_v24 }
0x11f9   : > { %v3736_v15 = vpop.xlane.xlu2 %3735 }
0x11fa   : > { %v3744_v53 = vmul.f32 %v3736_v15, %v6898_v14 }
0x11fc   : > { %v7802_v10 = vsub.f32 %v3726_v40, %v3744_v53 }
0x11fe   : > { %v3752_v19 = vmul.f32 %v7802_v10, %v7802_v10 }
0x1200   : > { %v3758_v52 = vsel %vm1259_vm0, %v3752_v19, 0.0  ;;  %v6239_v19 = vld [vmem:[%s8407_s10] ss:$0 sm:$0xff] }
0x1201   : > { %3759 = vadd.xlane.f32.xlu1 %v3758_v52 }
0x1209   : > { %v3739_v25 = vpop.xlane.xlu0 %3738 }
0x120a   : > { %v3745_v32 = vmul.f32 %v3739_v25, %v6898_v14 }
0x120c   : > { %v7808_v43 = vsub.f32 %v3727_v9, %v3745_v32 }
0x120e   : > { %v3753_v6 = vmul.f32 %v7808_v43, %v7808_v43 }
0x1210   : > { %v3761_v56 = vsel %vm1259_vm0, %v3753_v6, 0.0 }
0x1211   : > { %3762 = vadd.xlane.f32.xlu2 %v3761_v56  ;;  %v3742_v41 = vpop.xlane.xlu1 %3741 }
0x1212   : > { %v3746_v51 = vmul.f32 %v3742_v41, %v6898_v14 }
0x1214   : > { %v7814_v60 = vsub.f32 %v3728_v5, %v3746_v51 }
0x1216   : > { %v3754_v46 = vmul.f32 %v7814_v60, %v7814_v60 }
0x1218   : > { %v3764_v29 = vsel %vm1259_vm0, %v3754_v46, 0.0 }
0x1219   : > { %3765 = vadd.xlane.f32.xlu0 %v3764_v29  ;;  %v3733_v20 = vpop.xlane.xlu1 %3732  ;;  %v3833_v29 = vld [vmem:[%s8408_s11] sm:$0xf] }
0x121a   : > { %v3743_v54 = vmul.f32 %v3733_v20, %v6898_v14 }
0x121c   : > { %v7820_v26 = vsub.f32 %v3725_v50, %v3743_v54  ;;  %v6238_v50 = vld [vmem:[%s8406_s7] ss:$0 sm:$0xff] }
0x121e   : > { %v3751_v35 = vmul.f32 %v7820_v26, %v7820_v26 }
0x1220   : > { %v3755_v62 = vsel %vm1259_vm0, %v3751_v35, 0.0 }
0x1221   : > { %3756 = vadd.xlane.f32.xlu0 %v3755_v62 }
0x1274   : > { %v3760_v63 = vpop.xlane.xlu1 %3759 }
0x1275   : > { %v3768_v47 = vmul.f32 %v3760_v63, %v6898_v14 }
0x1277   : > { %v3772_v31 = vadd.f32 1e-05, %v3768_v47 }
0x1279   : > { %6434 = vrsqrt.f32 %v3772_v31  ;;  %vm3791_vm9 = vweird.f32 %v3772_v31 }
0x127f   : > { %v6435_v30 = vpop.eup %6434 }
0x1280   : > { %v3786_v22 = vmul.f32 %v6435_v30, %v3772_v31  ;;  %vm3792_vm14 = vweird.f32 %v6435_v30 }
0x1281   : > { %vm3793_vm11 = vmor %vm3791_vm9, %vm3792_vm14 }
0x1282   : > { %v3787_v61 = vmul.f32 %v6435_v30, %v3786_v22 }
0x1284   : > { %v3763_v4 = vpop.xlane.xlu2 %3762  ;;  %v3788_v16 = vmul.f32 0.5, %v3787_v61 }
0x1285   : > { %v3769_v7 = vmul.f32 %v3763_v4, %v6898_v14 }
0x1286   : > { %v3789_v2 = vsub.f32 1.5, %v3788_v16 }
0x1287   : > { %v3773_v27 = vadd.f32 1e-05, %v3769_v7 }
0x1288   : > { %v3790_v40 = vmul.f32 %v6435_v30, %v3789_v2 }
0x1289   : > { %6436 = vrsqrt.f32 %v3773_v27  ;;  %vm3801_vm15 = vweird.f32 %v3773_v27 }
0x128a   : > { %v3794_v9 = vsel %vm3793_vm11, %v6435_v30, %v3790_v40 }
0x128b   : > { %v3816_v24 = vmul.f32 %v3794_v9, %v7802_v10 }
0x128c   : > { %v3766_v57 = vpop.xlane.xlu0 %3765 }
0x128d   : > { %v3770_v0 = vmul.f32 %v3766_v57, %v6898_v14  ;;  %v3823_v6 = vmul.f32 %v6238_v50, %v3816_v24 }
0x128f   : > { %v6437_v59 = vpop.eup %6436  ;;  %v3774_v48 = vadd.f32 1e-05, %v3770_v0  ;;  %v3830_v51 = vadd.f32 %v6239_v19, %v3823_v6 }
0x1290   : > { %v3796_v37 = vmul.f32 %v6437_v59, %v3773_v27  ;;  %vm3802_vm6 = vweird.f32 %v6437_v59 }
0x1291   : > { %6438 = vrsqrt.f32 %v3774_v48  ;;  %vm3803_vm1 = vmor %vm3801_vm15, %vm3802_vm6  ;;  %vm3811_vm12 = vweird.f32 %v3774_v48 }
0x1292   : > { %v3797_v18 = vmul.f32 %v6437_v59, %v3796_v37 }
0x1294   : > { %v3798_v12 = vmul.f32 0.5, %v3797_v18  ;;  %v3757_v1 = vpop.xlane.xlu0 %3756 }
0x1295   : > { %v3767_v17 = vmul.f32 %v3757_v1, %v6898_v14 }
0x1296   : > { %v3799_v21 = vsub.f32 1.5, %v3798_v12 }
0x1297   : > { %v6439_v38 = vpop.eup %6438  ;;  %v3771_v13 = vadd.f32 1e-05, %v3767_v17 }
0x1298   : > { %v3806_v34 = vmul.f32 %v6439_v38, %v3774_v48  ;;  %v3800_v58 = vmul.f32 %v6437_v59, %v3799_v21  ;;  %vm3812_vm10 = vweird.f32 %v6439_v38 }
0x1299   : > { %6440 = vrsqrt.f32 %v3771_v13  ;;  %vm3813_vm13 = vmor %vm3811_vm12, %vm3812_vm10  ;;  %vm3781_vm3 = vweird.f32 %v3771_v13 }
0x129a   : > { %v3807_v8 = vmul.f32 %v6439_v38, %v3806_v34  ;;  %v3804_v14 = vsel %vm3803_vm1, %v6437_v59, %v3800_v58 }
0x129b   : > { %v3817_v11 = vmul.f32 %v3804_v14, %v7808_v43 }
0x129c   : > { %v3808_v36 = vmul.f32 0.5, %v3807_v8 }
0x129d   : > { %v3824_v52 = vmul.f32 %v6238_v50, %v3817_v11 }
0x129e   : > { %v3809_v55 = vsub.f32 1.5, %v3808_v36 }
0x129f   : > { %v6441_v28 = vpop.eup %6440  ;;  %v3831_v43 = vadd.f32 %v6239_v19, %v3824_v52 }
0x12a0   : > { %v3810_v33 = vmul.f32 %v6439_v38, %v3809_v55  ;;  %v3776_v45 = vmul.f32 %v6441_v28, %v3771_v13  ;;  %vm3782_vm2 = vweird.f32 %v6441_v28 }
0x12a1   : > { %vm3783_vm4 = vmor %vm3781_vm3, %vm3782_vm2 }
0x12a2   : > { %v3814_v5 = vsel %vm3813_vm13, %v6439_v38, %v3810_v33  ;;  %v3777_v42 = vmul.f32 %v6441_v28, %v3776_v45 }
0x12a3   : > { %v3818_v39 = vmul.f32 %v3814_v5, %v7814_v60 }
0x12a4   : > { %v3778_v15 = vmul.f32 0.5, %v3777_v42 }
0x12a5   : > { %v3825_v53 = vmul.f32 %v6238_v50, %v3818_v39 }
0x12a6   : > { %v3779_v25 = vsub.f32 1.5, %v3778_v15 }
0x12a7   : > { %v3832_v32 = vadd.f32 %v6239_v19, %v3825_v53 }
0x12a8   : > { %v3780_v56 = vmul.f32 %v6441_v28, %v3779_v25 }
0x12a9   : > { %3849 = vmatpush.msra.mxu0 %v3832_v32 }
0x12aa   : > { %v3784_v41 = vsel %vm3783_vm4, %v6441_v28, %v3780_v56 }
0x12ab   : > { %3850 = vmatpush.msra.mxu0 %v3831_v43  ;;  %v3815_v10 = vmul.f32 %v3784_v41, %v7820_v26 }
0x12ad   : > { %3851 = vmatpush.msra.mxu0 %v3830_v51  ;;  %v3822_v60 = vmul.f32 %v6238_v50, %v3815_v10 }
0x12af   : > { %v3829_v46 = vadd.f32 %v6239_v19, %v3822_v60 }
0x12b1   : > { %3852 = vmatpush.msra.mxu0 %v3829_v46 }
0x12b2   : > { %5943 = vmatmul.msk.f32.vlgmr.msra.gmra.mxu0 %vm1259_vm0, %v3833_v29 }
0x132f   : > { %v3854_v20 = vpop.f32.mrf.mxu0 }
0x1330   : > { %5944 = vmatmul.msk.f32.vlgmr.msra.gmra.mxu2 %vm1259_vm0, %v3854_v20 }
0x13b3   : > { %v3881_v54 = vpop.f32.mrf.mxu2 }
0x13b4   : > { %3885 = vst.msk [vmem:[%s6887_s22] sm:$0xf] %vm3884_vm5, %v3881_v54 }
0x13b5 PF: > { %p5945_p5 = scmp.ne.s32.totalorder %s6880_s16, 1 }
0x13b6   : > { %s8409_s0 = sld [smem:[#allocation18_spill]] (!%p5945_p5)  ;;  %s8333_s1 = smov (!%p5945_p5), 120  }
0x13b7   : > { %3889 = sbr.rel (%p5945_p5) target bundleno = 10012 (0x271c), region = 196  ;;  %s8410_s16 = sld [smem:[#allocation13_spill]] (!%p5945_p5) }
0x13b8   : > { %s8411_s18 = sld [smem:[#allocation14_spill]] (!%p5945_p5)  ;;  %s8345_s3 = smov (!%p5945_p5), 80  }
0x13b9   : > { %s8412_s23 = sld [smem:[#allocation12_spill]] (!%p5945_p5)  ;;  %s8430_s9 = smov (!%p5945_p5), 88  }
0x13ba   : > { %s8413_s26 = sld [smem:[#allocation15_spill]] (!%p5945_p5)  ;;  %s8433_s12 = smov (!%p5945_p5), 72  }
0x13bb   : > { %s8414_s28 = sld [smem:[#allocation19_spill]] (!%p5945_p5) }
0x13bc   : > { %v3907_v26 = vld [vmem:[%s8409_s0 + $0x78] sm:$0xff]  ;;  %v3906_v35 = vld [vmem:[%s8409_s0 + $0x70] sm:$0xff]  ;;  %v3905_v62 = vld [vmem:[%s8409_s0 + $0x68] sm:$0xff]  ;;  %vm4002_vm0 = vcmask 1044480   ;;  %vm3995_vm7 = vcmask 39936   ;;  %vm3916_vm8 = vcmask 523264  }
0x13bd   : > { %3920 = vmatpush.msra.mxu0 %v3907_v26  ;;  %v3915_v63 = vld [vmem:[%s8409_s0 + $0xb8] sm:$0xff]  ;;  %v3914_v47 = vld [vmem:[%s8409_s0 + $0xb0] sm:$0xff]  ;;  %v3904_v31 = vld [vmem:[%s8409_s0 + $0x60] sm:$0xff]  ;;  %vm3965_vm6 = vcmask 64512   ;;  %vm4031_vm14 = vcmask 261120   ;;  %vm4035_vm15 = vcmask 254976  }
0x13be   : > { %3948 = vmatpush.msra.mxu1 %v3915_v63  ;;  %v3913_v4 = vld [vmem:[%s8409_s0 + $0xa8] sm:$0xff]  ;;  %v3903_v7 = vld [vmem:[%s8409_s0 + $0x58] sm:$0xff]  ;;  %v3902_v27 = vld [vmem:[%s8409_s0 + $0x50] sm:$0xff]  ;;  %v6639_v5 = vmov 32.0   ;;  %s8415_s2 = sld [smem:[#allocation20_spill]] }
0x13bf   : > { %3921 = vmatpush.msra.mxu0 %v3906_v35  ;;  %v3912_v30 = vld [vmem:[%s8409_s0 + $0xa0] sm:$0xff]  ;;  %v3901_v22 = vld [vmem:[%s8409_s0 + $0x48] sm:$0xff]  ;;  %v3911_v57 = vld [vmem:[%s8409_s0 + $0x98] sm:$0xff]  ;;  %6470 = vrcp.f32 %v6639_v5  ;;  %s8416_s7 = sld [smem:[#allocation23_spill]] }
0x13c0   : > { %3949 = vmatpush.msra.mxu1 %v3914_v47  ;;  %v3962_v0 = vld [vmem:[%s8410_s16] sm:$0x1f]  ;;  %v3910_v59 = vld [vmem:[%s8409_s0 + $0x90] sm:$0xff]  ;;  %v3909_v37 = vld [vmem:[%s8409_s0 + $0x88] sm:$0xff]  ;;  %s8417_s10 = sld [smem:[#allocation21_spill]] }
0x13c1   : > { %3922 = vmatpush.msra.mxu0 %v3905_v62  ;;  %5949 = vmatpush.msk.msra.mxu3 %vm4002_vm0, %v3962_v0  ;;  %v3960_v48 = vld [vmem:[%s8411_s18] sm:$0xff]  ;;  %v3899_v18 = vld [vmem:[%s8409_s0 + $0x38] sm:$0xff]  ;;  %v3898_v3 = vld [vmem:[%s8409_s0 + $0x30] sm:$0xff]  ;;  %s8418_s11 = sld [smem:[#allocation22_spill]] }
0x13c2   : > { %3950 = vmatpush.msra.mxu1 %v3913_v4  ;;  %v3900_v61 = vld [vmem:[%s8409_s0 + $0x40] sm:$0xff]  ;;  %5950 = vmatmul.msk.f32.vlgmr.msra.gmra.mxu3 %vm3995_vm7, %v3960_v48  ;;  %v3891_v16 = vld [vmem:[%s8412_s23 + $0x8] sm:$0xff]  ;;  %v3895_v49 = vld [vmem:[%s8409_s0 + $0x18] sm:$0xff]  ;;  %s8419_s16 = sld [smem:[#allocation24_spill]] }
0x13c3   : > { %3923 = vmatpush.msra.mxu0 %v3904_v31  ;;  %v3908_v44 = vld [vmem:[%s8409_s0 + $0x80] sm:$0xff]  ;;  %v3897_v12 = vld [vmem:[%s8409_s0 + $0x28] sm:$0xff]  ;;  %v3894_v17 = vld [vmem:[%s8409_s0 + $0x10] sm:$0xff]  ;;  %s8426_s5 = sld [smem:[#allocation31_spill]] }
0x13c4   : > { %3951 = vmatpush.msra.mxu1 %v3912_v30  ;;  %v3896_v1 = vld [vmem:[%s8409_s0 + $0x20] sm:$0xff]  ;;  %v3893_v21 = vld [vmem:[%s8409_s0 + $0x8] sm:$0xff]  ;;  %s8427_s6 = sld [smem:[#allocation30_spill]] }
0x13c5   : > { %3924 = vmatpush.msra.mxu0 %v3903_v7  ;;  %v3892_v23 = vld [vmem:[%s8409_s0] sm:$0xff]  ;;  %v3961_v13 = vld [vmem:[%s8411_s18 + $0x8] sm:$0x3]  ;;  %v6471_v42 = vpop.eup %6470  ;;  %s8331_s0 = smov 72   ;;  %s8428_s8 = sld [smem:[#allocation32_spill]] }
0x13c6   : > { %3952 = vmatpush.msra.mxu1 %v3911_v57  ;;  %v3890_v38 = vld [vmem:[%s8412_s23] sm:$0xff]  ;;  %v3964_v40 = vld [vmem:[%s8413_s26 + $0x8] sm:$0x3]  ;;  %v4040_v39 = vmul.f32 32.0, %v6471_v42  ;;  %vm4044_vm1 = vweird.f32 %v6471_v42 }
0x13c7   : > { %3925 = vmatpush.msra.mxu0 %v3902_v27  ;;  %v3963_v8 = vld [vmem:[%s8413_s26] sm:$0xff] }
0x13c8   : > { %3953 = vmatpush.msra.mxu1 %v3910_v59  ;;  %v4041_v50 = vsub.f32 1.0, %v4040_v39  ;;  %v6450_v30 = vld [vmem:[%s8414_s28] ss:$0 sm:$0xff]  ;;  %s8329_s28 = smov 88  }
0x13c9   : > { %3926 = vmatpush.msra.mxu0 %v3901_v22  ;;  %v6451_v59 = vld [vmem:[%s8415_s2] ss:$0 sm:$0xff]  ;;  %s8327_s2 = smov 96  }
0x13ca   : > { %3954 = vmatpush.msra.mxu1 %v3909_v37  ;;  %5951 = vmatmul.msk.f32.gmra.mxu3 %vm3995_vm7, %v3961_v13  ;;  %v4042_v24 = vmul.f32 %v6471_v42, %v4041_v50 }
0x13cb   : > { %3927 = vmatpush.msra.mxu0 %v3900_v61 }
0x13cc   : > { %3955 = vmatpush.msra.mxu1 %v3908_v44  ;;  %v4043_v15 = vadd.f32 %v6471_v42, %v4042_v24 }
0x13cd   : > { %3928 = vmatpush.msra.mxu0 %v3899_v18  ;;  %5946 = vmatmul.msk.f32.vlgmr.msra.gmra.mxu1 %vm3916_vm8, %v3891_v16 }
0x13ce   : > { %v7882_v53 = vsel %vm4044_vm1, %v6471_v42, %v4043_v15 }
0x13cf   : > { %3929 = vmatpush.msra.mxu0 %v3898_v3 }
0x13d1   : > { %3930 = vmatpush.msra.mxu0 %v3897_v12 }
0x13d3   : > { %3931 = vmatpush.msra.mxu0 %v3896_v1 }
0x13d5   : > { %3932 = vmatpush.msra.mxu0 %v3895_v49 }
0x13d7   : > { %3933 = vmatpush.msra.mxu0 %v3894_v17 }
0x13d9   : > { %3934 = vmatpush.msra.mxu0 %v3893_v21 }
0x13db   : > { %3935 = vmatpush.msra.mxu0 %v3892_v23 }
0x13dc   : > { %3936 = vmatmul.f32.vlgmr.msra.gmra.mxu0 %v3890_v38 }
0x1445   : > { %v4023_v36 = vpop.f32.mrf.mxu3 }
0x144a   : > { %v3957_v2 = vpop.f32.mrf.mxu1 }
0x144d   : > { %v4026_v9 = vpop.f32.mrf.mxu3 }
0x1459   : > { %v3937_v34 = vpop.f32.mrf.mxu0 }
0x145a   : > { %v3958_v58 = vadd.f32 %v3957_v2, %v3937_v34 }
0x145c   : > { %3987 = vmatpush.msrb.mxu1 %v3958_v58  ;;  %6061 = vmatpush.msra.mxu2 %v3958_v58 }
0x145d   : > { %5947 = vmatmul.msk.f32.vlgmr.msrb.gmra.mxu1 %vm3965_vm6, %v3963_v8  ;;  %5948 = vmatmul.msk.f32.vlgmr.msra.gmra.mxu2 %vm3965_vm6, %v3964_v40 }
0x14da   : > { %v3989_v14 = vpop.f32.mrf.mxu1 }
0x14db   : > { %v4024_v55 = vadd.f32 %v4023_v36, %v3989_v14  ;;  %v4155_v14 = vld [vmem:[%s8416_s7 + $0x18] sm:$0xff] }
0x14dc   : > { %4178 = vmatpush.msrb.mxu2 %v4155_v14 }
0x14dd   : > { %v4032_v28 = vsel %vm4031_vm14, %v4024_v55, 0.0 }
0x14de   : > { %4033 = vadd.xlane.f32.xlu0 %v4032_v28  ;;  %v4153_v28 = vld [vmem:[%s8416_s7 + $0x8] sm:$0xff] }
0x14e0   : > { %v3992_v33 = vpop.f32.mrf.mxu2 }
0x14e1   : > { %v4027_v45 = vadd.f32 %v4026_v9, %v3992_v33  ;;  %v4152_v9 = vld [vmem:[%s8416_s7] sm:$0xff] }
0x14e3   : > { %v4036_v11 = vsel %vm4035_vm15, %v4027_v45, 0.0 }
0x14e6   : > { %4037 = vadd.xlane.f32.xlu0 %v4036_v11 }
0x1551   : > { %v4034_v19 = vpop.xlane.xlu0 %4033 }
0x1552   : > { %v4046_v52 = vmul.f32 %v7882_v53, %v4034_v19 }
0x1554   : > { %v4048_v25 = vsub.f32 %v4024_v55, %v4046_v52  ;;  %v4154_v55 = vld [vmem:[%s8416_s7 + $0x10] sm:$0xff] }
0x1555   : > { %4179 = vmatpush.msrb.mxu2 %v4154_v55 }
0x1556   : > { %v4050_v32 = vmul.f32 %v4048_v25, %v4048_v25 }
0x1557   : > { %4180 = vmatpush.msrb.mxu2 %v4153_v28 }
0x1558   : > { %v4052_v6 = vsel %vm4031_vm14, %v4050_v32, 0.0 }
0x1559   : > { %4053 = vadd.xlane.f32.xlu1 %v4052_v6  ;;  %v4038_v56 = vpop.xlane.xlu0 %4037  ;;  %4181 = vmatpush.msrb.mxu2 %v4152_v9 }
0x155a   : > { %v4047_v43 = vmul.f32 %v7882_v53, %v4038_v56  ;;  %v6452_v56 = vld [vmem:[%s8417_s10] ss:$0 sm:$0xff] }
0x155c   : > { %v4049_v41 = vsub.f32 %v4027_v45, %v4047_v43 }
0x155e   : > { %v4051_v51 = vmul.f32 %v4049_v41, %v4049_v41 }
0x1560   : > { %v4055_v10 = vsel %vm4035_vm15, %v4051_v51, 0.0 }
0x1561   : > { %4056 = vadd.xlane.f32.xlu1 %v4055_v10  ;;  %v6453_v10 = vld [vmem:[%s8418_s11] ss:$0 sm:$0xff] }
0x15cc   : > { %v4054_v60 = vpop.xlane.xlu1 %4053 }
0x15cd   : > { %v4058_v46 = vmul.f32 %v4054_v60, %v7882_v53 }
0x15cf   : > { %v4060_v29 = vadd.f32 1e-05, %v4058_v46 }
0x15d1   : > { %6472 = vrsqrt.f32 %v4060_v29  ;;  %vm4068_vm10 = vweird.f32 %v4060_v29 }
0x15d4   : > { %v4057_v20 = vpop.xlane.xlu1 %4056 }
0x15d5   : > { %v4059_v54 = vmul.f32 %v4057_v20, %v7882_v53 }
0x15d7   : > { %v6473_v26 = vpop.eup %6472  ;;  %v4061_v35 = vadd.f32 1e-05, %v4059_v54 }
0x15d8   : > { %v4063_v62 = vmul.f32 %v6473_v26, %v4060_v29  ;;  %vm4069_vm9 = vweird.f32 %v6473_v26 }
0x15d9   : > { %6474 = vrsqrt.f32 %v4061_v35  ;;  %vm4070_vm11 = vmor %vm4068_vm10, %vm4069_vm9  ;;  %vm4078_vm13 = vweird.f32 %v4061_v35  ;;  %vm4265_vm9 = vcmask 1041408   ;;  %vm4230_vm10 = vcmask 80896  }
0x15da   : > { %v4064_v63 = vmul.f32 %v6473_v26, %v4063_v62 }
0x15dc   : > { %v4065_v47 = vmul.f32 0.5, %v4064_v63 }
0x15de   : > { %v4066_v31 = vsub.f32 1.5, %v4065_v47  ;;  %v6454_v47 = vld [vmem:[%s8419_s16] ss:$0 sm:$0xff] }
0x15df   : > { %v6475_v4 = vpop.eup %6474 }
0x15e0   : > { %v4067_v7 = vmul.f32 %v6473_v26, %v4066_v31  ;;  %v4073_v27 = vmul.f32 %v6475_v4, %v4061_v35  ;;  %vm4079_vm12 = vweird.f32 %v6475_v4 }
0x15e1   : > { %vm4080_vm2 = vmor %vm4078_vm13, %vm4079_vm12  ;;  %vm4620_vm12 = vcmask 130048   ;;  %vm4623_vm13 = vcmask 195584  }
0x15e2   : > { %v4071_v22 = vsel %vm4070_vm11, %v6473_v26, %v4067_v7  ;;  %v4074_v57 = vmul.f32 %v6475_v4, %v4073_v27  ;;  %vm4234_vm11 = vcmask 74752  }
0x15e3   : > { %v4082_v0 = vmul.f32 %v4071_v22, %v4048_v25 }
0x15e4   : > { %v4075_v48 = vmul.f32 0.5, %v4074_v57 }
0x15e5   : > { %v4087_v61 = vmul.f32 %v6450_v30, %v4082_v0 }
0x15e6   : > { %v4076_v37 = vsub.f32 1.5, %v4075_v48 }
0x15e7   : > { %v7892_v18 = vadd.f32 %v6451_v59, %v4087_v61 }
0x15e8   : > { %v4077_v44 = vmul.f32 %v6475_v4, %v4076_v37 }
0x15e9   : > { %v4098_v3 = vsel %vm4031_vm14, %v7892_v18, 0.0 }
0x15ea   : > { %v4081_v16 = vsel %vm4080_vm2, %v6475_v4, %v4077_v44  ;;  %4099 = vadd.xlane.f32.xlu2 %v4098_v3 }
0x15eb   : > { %v4083_v12 = vmul.f32 %v4081_v16, %v4049_v41 }
0x15ed   : > { %v4088_v1 = vmul.f32 %v6450_v30, %v4083_v12 }
0x15ef   : > { %v7896_v49 = vadd.f32 %v6451_v59, %v4088_v1 }
0x15f1   : > { %v4101_v17 = vsel %vm4035_vm15, %v7896_v49, 0.0 }
0x15f2   : > { %4102 = vadd.xlane.f32.xlu2 %v4101_v17 }
0x165d   : > { %v4100_v21 = vpop.xlane.xlu2 %4099 }
0x165e   : > { %v4104_v23 = vmul.f32 %v4100_v21, %v7882_v53 }
0x1660   : > { %v4106_v38 = vsub.f32 %v7892_v18, %v4104_v23 }
0x1662   : > { %v4108_v13 = vmul.f32 %v4106_v38, %v4106_v38 }
0x1664   : > { %v4110_v2 = vsel %vm4031_vm14, %v4108_v13, 0.0 }
0x1665   : > { %4111 = vadd.xlane.f32.xlu0 %v4110_v2  ;;  %v4103_v34 = vpop.xlane.xlu2 %4102 }
0x1666   : > { %v4105_v58 = vmul.f32 %v4103_v34, %v7882_v53 }
0x1668   : > { %v4107_v8 = vsub.f32 %v7896_v49, %v4105_v58 }
0x166a   : > { %v4109_v40 = vmul.f32 %v4107_v8, %v4107_v8 }
0x166c   : > { %v4113_v36 = vsel %vm4035_vm15, %v4109_v40, 0.0 }
0x166d   : > { %4114 = vadd.xlane.f32.xlu1 %v4113_v36 }
0x16d8   : > { %v4112_v33 = vpop.xlane.xlu0 %4111 }
0x16d9   : > { %v4116_v45 = vmul.f32 %v4112_v33, %v7882_v53 }
0x16db   : > { %v4118_v11 = vadd.f32 1e-05, %v4116_v45 }
0x16dd   : > { %6476 = vrsqrt.f32 %v4118_v11  ;;  %vm4126_vm4 = vweird.f32 %v4118_v11 }
0x16e0   : > { %v4115_v5 = vpop.xlane.xlu1 %4114 }
0x16e1   : > { %v4117_v42 = vmul.f32 %v4115_v5, %v7882_v53 }
0x16e3   : > { %v6477_v39 = vpop.eup %6476  ;;  %v4119_v50 = vadd.f32 1e-05, %v4117_v42 }
0x16e4   : > { %v4121_v24 = vmul.f32 %v6477_v39, %v4118_v11  ;;  %vm4127_vm3 = vweird.f32 %v6477_v39 }
0x16e5   : > { %6478 = vrsqrt.f32 %v4119_v50  ;;  %vm4128_vm5 = vmor %vm4126_vm4, %vm4127_vm3  ;;  %vm4136_vm7 = vweird.f32 %v4119_v50 }
0x16e6   : > { %v4122_v15 = vmul.f32 %v6477_v39, %v4121_v24 }
0x16e8   : > { %v4123_v19 = vmul.f32 0.5, %v4122_v15 }
0x16ea   : > { %v4124_v52 = vsub.f32 1.5, %v4123_v19 }
0x16eb   : > { %v6479_v25 = vpop.eup %6478 }
0x16ec   : > { %v4125_v32 = vmul.f32 %v6477_v39, %v4124_v52  ;;  %v4131_v6 = vmul.f32 %v6479_v25, %v4119_v50  ;;  %vm4137_vm0 = vweird.f32 %v6479_v25 }
0x16ed   : > { %vm4138_vm1 = vmor %vm4136_vm7, %vm4137_vm0 }
0x16ee   : > { %v4129_v43 = vsel %vm4128_vm5, %v6477_v39, %v4125_v32  ;;  %v4132_v41 = vmul.f32 %v6479_v25, %v4131_v6 }
0x16ef   : > { %v4140_v51 = vmul.f32 %v4129_v43, %v4106_v38 }
0x16f0   : > { %v4133_v60 = vmul.f32 0.5, %v4132_v41 }
0x16f1   : > { %v4145_v46 = vmul.f32 %v6452_v56, %v4140_v51 }
0x16f2   : > { %v4134_v29 = vsub.f32 1.5, %v4133_v60 }
0x16f3   : > { %v4150_v20 = vadd.f32 %v6453_v10, %v4145_v46 }
0x16f4   : > { %v4135_v54 = vmul.f32 %v6479_v25, %v4134_v29 }
0x16f5   : > { %5952 = vmatmul.msk.f32.vlgmr.msrb.gmra.mxu2 %vm4031_vm14, %v4150_v20 }
0x16f6   : > { %v4139_v26 = vsel %vm4138_vm1, %v6479_v25, %v4135_v54 }
0x16f7   : > { %v4141_v35 = vmul.f32 %v4139_v26, %v4107_v8 }
0x16f9   : > { %v4146_v62 = vmul.f32 %v6452_v56, %v4141_v35 }
0x16fb   : > { %v4151_v63 = vadd.f32 %v6453_v10, %v4146_v62 }
0x16fd   : > { %5953 = vmatmul.msk.f32.gmra.mxu2 %vm4031_vm14, %v4151_v63 }
0x1778   : > { %v4183_v31 = vpop.f32.mrf.mxu2 }
0x1779   : > { %v7917_v4 = vadd.f32 %v6454_v47, %v4183_v31 }
0x177b   : > { %4295 = vrot.lane.b32.xlu0 %v7917_v4, %s8329_s28 }
0x1780   : > { %v4186_v7 = vpop.f32.mrf.mxu2 }
0x1781   : > { %v7921_v27 = vadd.f32 %v6454_v47, %v4186_v7 }
0x1783   : > { %4193 = vrot.lane.b32.xlu1 %v7921_v27, %s8327_s2  ;;  %4297 = vrot.lane.b32.xlu2 %v7921_v27, %s8329_s28  ;;  %s8347_s28 = smov 104  }
0x1784   : > { %4191 = vrot.lane.b32.xlu0 %v7917_v4, %s8327_s2  ;;  %s8335_s2 = smov 112  }
0x178b   : > { %4499 = vrot.lane.b32.xlu1 %v7921_v27, %s8331_s0  ;;  %4291 = vrot.lane.b32.xlu2 %v7917_v4, %s8333_s1 }
0x178c   : > { %4497 = vrot.lane.b32.xlu0 %v7917_v4, %s8331_s0  ;;  %s8339_s0 = smov 56  }
0x1793   : > { %4398 = vrot.lane.b32.xlu1 %v7921_v27, %s8345_s3  ;;  %4293 = vrot.lane.b32.xlu2 %v7921_v27, %s8333_s1  ;;  %s8337_s1 = smov 64  }
0x1794   : > { %4396 = vrot.lane.b32.xlu0 %v7917_v4, %s8345_s3  ;;  %s8350_s3 = smov 24  }
0x179b   : > { %4392 = vrot.lane.b32.xlu1 %v7917_v4, %s8335_s2  ;;  %4493 = vrot.lane.b32.xlu2 %v7917_v4, %s8347_s28 }
0x179c   : > { %4394 = vrot.lane.b32.xlu0 %v7921_v27, %s8335_s2  ;;  %s8420_s2 = sld [smem:[#allocation16_spill]] }
0x17a2   : > { %v7976_v2 = vld [vmem:[%s8420_s2] sm:$0xff]  ;;  %v7985_v42 = vld [vmem:[%s8420_s2 + $0x8] sm:$0x3]  ;;  %s8422_s2 = sld [smem:[#allocation26_spill]] }
0x17a3   : > { %4358 = vrot.lane.b32.xlu1 %v7921_v27, %s8339_s0  ;;  %4495 = vrot.lane.b32.xlu2 %v7921_v27, %s8347_s28  ;;  %s8352_s28 = smov 16  }
0x17a4   : > { %4256 = vrot.lane.b32.xlu0 %v7921_v27, %s8337_s1 }
0x17ab   : > { %4356 = vrot.lane.b32.xlu2 %v7917_v4, %s8339_s0  ;;  %s8343_s0 = smov 40  }
0x17dd   : > { %v4298_v30 = vpop.permute.xlu2 %4297 }
0x17de   : > { %5961 = vmatpush.xpose.msk.msra.mxu2 %vm3965_vm6, %v4298_v30 }
0x17e5   : > { %v4292_v57 = vpop.permute.xlu2 %4291 }
0x17ed   : > { %v4296_v22 = vpop.permute.xlu0 %4295  ;;  %v4294_v48 = vpop.permute.xlu2 %4293 }
0x17ee   : > { %5962 = vmatpush.xpose.msk.msra.mxu2 %vm3965_vm6, %v4296_v22 }
0x17f1   : > { %5963 = vmatmul.msk.f32.vlgmr.msra.gmra.mxu2 %vm3965_vm6, %v4292_v57 }
0x17f5   : > { %v4194_v0 = vpop.permute.xlu1 %4193  ;;  %v4494_v44 = vpop.permute.xlu2 %4493 }
0x17f6   : > { %v4192_v59 = vpop.permute.xlu0 %4191  ;;  %5954 = vmatpush.xpose.msk.msrb.mxu3 %vm3965_vm6, %v4194_v0 }
0x17f9   : > { %5964 = vmatmul.msk.f32.gmra.mxu2 %vm3965_vm6, %v4294_v48 }
0x17fa   : > { %5955 = vmatpush.xpose.msk.msrb.mxu3 %vm3965_vm6, %v4192_v59 }
0x17fd   : > { %v4500_v61 = vpop.permute.xlu1 %4499  ;;  %5956 = vmatmul.msk.f32.vlgmr.msrb.gmra.mxu3 %vm3965_vm6, %v7917_v4  ;;  %v4496_v12 = vpop.permute.xlu2 %4495 }
0x17fe   : > { %v4498_v37 = vpop.permute.xlu0 %4497  ;;  %5975 = vmatpush.xpose.msk.msrb.mxu2 %vm3965_vm6, %v4500_v61 }
0x1802   : > { %5976 = vmatpush.xpose.msk.msrb.mxu2 %vm3965_vm6, %v4498_v37 }
0x1805   : > { %v4399_v3 = vpop.permute.xlu1 %4398  ;;  %5957 = vmatmul.msk.f32.gmra.mxu3 %vm3965_vm6, %v7921_v27  ;;  %5977 = vmatmul.msk.f32.vlgmr.msrb.gmra.mxu2 %vm3965_vm6, %v4494_v44  ;;  %v4357_v38 = vpop.permute.xlu2 %4356 }
0x1806   : > { %v4397_v16 = vpop.permute.xlu0 %4396  ;;  %5968 = vmatpush.xpose.msk.msrb.mxu0 %vm3965_vm6, %v4399_v3 }
0x180a   : > { %5969 = vmatpush.xpose.msk.msrb.mxu0 %vm3965_vm6, %v4397_v16 }
0x180d   : > { %v4393_v1 = vpop.permute.xlu1 %4392  ;;  %5978 = vmatmul.msk.f32.gmra.mxu2 %vm3965_vm6, %v4496_v12 }
0x180e   : > { %v4395_v17 = vpop.permute.xlu0 %4394  ;;  %5970 = vmatmul.msk.f32.vlgmr.msrb.gmra.mxu0 %vm3965_vm6, %v4393_v1 }
0x1815   : > { %v4359_v21 = vpop.permute.xlu1 %4358 }
0x1816   : > { %v4257_v23 = vpop.permute.xlu0 %4256  ;;  %5965 = vmatpush.msk.msra.mxu3 %vm4265_vm9, %v4359_v21  ;;  %5971 = vmatmul.msk.f32.gmra.mxu0 %vm3965_vm6, %v4395_v17 }
0x1817   : > { %5958 = vmatpush.msk.msra.mxu1 %vm4265_vm9, %v4257_v23 }
0x1818   : > { %4384 = vmatpush.msra.mxu3 %v4357_v38 }
0x1874   : > { %v4324_v13 = vpop.f32.mrf.mxu2 }
0x1875   : > { %v4330_v34 = vmul.f32 0.35355338, %v4324_v13 }
0x1877   : > { %v4332_v58 = vadd.f32 %v4330_v34, %v7976_v2 }
0x1879   : > { %v4334_v8 = vsel %vm4230_vm10, %v4332_v58, -inf }
0x187a   : > { %4335 = vmax.xlane.f32.xlu2 %v4334_v8 }
0x187c   : > { %v4327_v33 = vpop.f32.mrf.mxu2 }
0x187d   : > { %v4331_v11 = vmul.f32 0.35355338, %v4327_v33 }
0x187f   : > { %v4333_v24 = vadd.f32 %v4331_v11, %v7985_v42 }
0x1880   : > { %v4220_v40 = vpop.f32.mrf.mxu3 }
0x1881   : > { %v4226_v36 = vmul.f32 0.35355338, %v4220_v40  ;;  %v4337_v25 = vsel %vm4234_vm11, %v4333_v24, -inf }
0x1883   : > { %v4228_v14 = vadd.f32 %v4226_v36, %v7976_v2 }
0x1885   : > { %v4231_v55 = vsel %vm4230_vm10, %v4228_v14, -inf }
0x1886   : > { %4232 = vmax.xlane.f32.xlu1 %v4231_v55 }
0x1888   : > { %v4526_v15 = vpop.f32.mrf.mxu2  ;;  %v4223_v43 = vpop.f32.mrf.mxu3 }
0x1889   : > { %v4532_v52 = vmul.f32 0.35355338, %v4526_v15  ;;  %v4227_v41 = vmul.f32 0.35355338, %v4223_v43 }
0x188b   : > { %v4425_v28 = vpop.f32.mrf.mxu0  ;;  %v4534_v6 = vadd.f32 %v4532_v52, %v7976_v2  ;;  %v4229_v51 = vadd.f32 %v4227_v41, %v7985_v42 }
0x188c   : > { %v4431_v9 = vmul.f32 0.35355338, %v4425_v28 }
0x188d   : > { %v4536_v56 = vsel %vm4230_vm10, %v4534_v6, -inf  ;;  %v4235_v46 = vsel %vm4234_vm11, %v4229_v51, -inf }
0x188e   : > { %v4433_v45 = vadd.f32 %v4431_v9, %v7976_v2 }
0x1890   : > { %v4435_v5 = vsel %vm4230_vm10, %v4433_v45, -inf  ;;  %v4529_v10 = vpop.f32.mrf.mxu2 }
0x1891   : > { %4436 = vmax.xlane.f32.xlu0 %v4435_v5  ;;  %v4533_v60 = vmul.f32 0.35355338, %v4529_v10 }
0x1892   : > { %4254 = vrot.lane.b32.xlu2 %v7917_v4, %s8337_s1  ;;  %s8341_s1 = smov 48  }
0x1893   : > { %v4428_v39 = vpop.f32.mrf.mxu0  ;;  %v4535_v29 = vadd.f32 %v4533_v60, %v7985_v42 }
0x1894   : > { %v4432_v50 = vmul.f32 0.35355338, %v4428_v39 }
0x1895   : > { %v4539_v20 = vsel %vm4234_vm11, %v4535_v29, -inf }
0x1896   : > { %v7991_v19 = vadd.f32 %v4432_v50, %v7985_v42 }
0x1898   : > { %v4438_v32 = vsel %vm4234_vm11, %v7991_v19, -inf }
0x1899   : > { %4338 = vmax.xlane.f32.xlu0 %v4337_v25  ;;  %4439 = vmax.xlane.f32.xlu1 %v4438_v32 }
0x18a1   : > { %4537 = vmax.xlane.f32.xlu1 %v4536_v56 }
0x18bb   : > { %4236 = vmax.xlane.f32.xlu2 %v4235_v46 }
0x18c3   : > { %4540 = vmax.xlane.f32.xlu2 %v4539_v20 }
0x18ed   : > { %v4336_v54 = vpop.xlane.xlu2 %4335 }
0x18ee   : > { %v4340_v26 = vsub.f32 %v4332_v58, %v4336_v54 }
0x18f0   : > { %v4342_v35 = vmul.f32 1.442695, %v4340_v26 }
0x18f2   : > { %6480 = vpow2.f32 %v4342_v35 }
0x18f5   : > { %v4255_v62 = vpop.permute.xlu2 %4254 }
0x18f6   : > { %4283 = vmatpush.msra.mxu1 %v4255_v62 }
0x18f8   : > { %v6481_v63 = vpop.eup %6480 }
0x18f9   : > { %v4346_v47 = vsel %vm4230_vm10, %v6481_v63, 0.0  ;;  %v4233_v31 = vpop.xlane.xlu1 %4232 }
0x18fa   : > { %4347 = vadd.xlane.f32.xlu0 %v4346_v47  ;;  %v4238_v22 = vsub.f32 %v4228_v14, %v4233_v31 }
0x18fc   : > { %v4240_v0 = vmul.f32 1.442695, %v4238_v22 }
0x1904   : > { %v4437_v7 = vpop.xlane.xlu0 %4436 }
0x1905   : > { %v4441_v30 = vsub.f32 %v4433_v45, %v4437_v7 }
0x1907   : > { %v4443_v57 = vmul.f32 1.442695, %v4441_v30 }
0x1909   : > { %6482 = vpow2.f32 %v4443_v57 }
0x190a   : > { %6484 = vpow2.f32 %v4240_v0 }
0x190c   : > { %v4339_v59 = vpop.xlane.xlu0 %4338  ;;  %v4440_v13 = vpop.xlane.xlu1 %4439 }
0x190d   : > { %v4341_v48 = vsub.f32 %v4333_v24, %v4339_v59  ;;  %v4442_v11 = vsub.f32 %v7991_v19, %v4440_v13 }
0x190f   : > { %v8003_v61 = vpop.eup %6482  ;;  %v4344_v37 = vmul.f32 1.442695, %v4341_v48  ;;  %v4445_v39 = vmul.f32 1.442695, %v4442_v11 }
0x1910   : > { %v4447_v44 = vsel %vm4230_vm10, %v8003_v61, 0.0  ;;  %v6485_v3 = vpop.eup %6484 }
0x1911   : > { %4448 = vadd.xlane.f32.xlu2 %v4447_v44  ;;  %6486 = vpow2.f32 %v4344_v37  ;;  %v4244_v12 = vsel %vm4230_vm10, %v6485_v3, 0.0 }
0x1914   : > { %v4538_v58 = vpop.xlane.xlu1 %4537 }
0x1915   : > { %v4542_v8 = vsub.f32 %v4534_v6, %v4538_v58 }
0x1917   : > { %v6487_v16 = vpop.eup %6486  ;;  %v4544_v40 = vmul.f32 1.442695, %v4542_v8 }
0x1918   : > { %v4349_v1 = vsel %vm4234_vm11, %v6487_v16, 0.0 }
0x1919   : > { %4245 = vadd.xlane.f32.xlu2 %v4244_v12  ;;  %4350 = vadd.xlane.f32.xlu0 %v4349_v1 }
0x192d   : > { %4459 = vrot.lane.b32.xlu0 %v7921_v27, %s8341_s1 }
0x192e   : > { %v4237_v17 = vpop.xlane.xlu2 %4236 }
0x192f   : > { %v4239_v21 = vsub.f32 %v4229_v51, %v4237_v17 }
0x1931   : > { %v4242_v23 = vmul.f32 1.442695, %v4239_v21  ;;  %4558 = vrot.lane.b32.xlu2 %v7917_v4, %s8343_s0 }
0x1933   : > { %6488 = vpow2.f32 %v4242_v23 }
0x1934   : > { %6490 = vpow2.f32 %v4544_v40 }
0x1936   : > { %v4541_v36 = vpop.xlane.xlu2 %4540 }
0x1937   : > { %v4543_v14 = vsub.f32 %v4535_v29, %v4541_v36 }
0x1939   : > { %v6489_v38 = vpop.eup %6488  ;;  %v4546_v55 = vmul.f32 1.442695, %v4543_v14 }
0x193a   : > { %v4247_v34 = vsel %vm4234_vm11, %v6489_v38, 0.0  ;;  %v6491_v28 = vpop.eup %6490 }
0x193b   : > { %4248 = vadd.xlane.f32.xlu1 %v4247_v34  ;;  %6492 = vpow2.f32 %v4546_v55  ;;  %v4548_v9 = vsel %vm4230_vm10, %v6491_v28, 0.0 }
0x1941   : > { %v6493_v33 = vpop.eup %6492 }
0x1942   : > { %v4551_v45 = vsel %vm4234_vm11, %v6493_v33, 0.0 }
0x1954   : > { %4560 = vrot.lane.b32.xlu1 %v7921_v27, %s8343_s0  ;;  %s8421_s0 = sld [smem:[#allocation25_spill]] }
0x1957   : > { %4549 = vadd.xlane.f32.xlu0 %v4548_v9  ;;  %v6455_v9 = vld [vmem:[%s8422_s2] ss:$0 sm:$0xff] }
0x195a   : > { %v4628_v12 = vld [vmem:[%s8421_s0 + $0x10] sm:$0xff]  ;;  %v4627_v1 = vld [vmem:[%s8421_s0 + $0x8] sm:$0xff]  ;;  %v4626_v17 = vld [vmem:[%s8421_s0] sm:$0xff] }
0x195f   : > { %4552 = vadd.xlane.f32.xlu0 %v4551_v45 }
0x196d   : > { %v4348_v5 = vpop.xlane.xlu0 %4347 }
0x196e   : > { %6494 = vrcp.f32 %v4348_v5 }
0x196f   : > { %6496 = vpow2.f32 %v4445_v39 }
0x1973   : > { %4457 = vrot.lane.b32.xlu0 %v7917_v4, %s8341_s1  ;;  %s8354_s1 = smov 8  }
0x1974   : > { %v6495_v50 = vpop.eup %6494 }
0x1975   : > { %v4354_v24 = vmul.f32 %v6495_v50, %v6481_v63  ;;  %v6497_v27 = vpop.eup %6496 }
0x1976   : > { %v4450_v15 = vsel %vm4234_vm11, %v6497_v27, 0.0 }
0x1977   : > { %5966 = vmatmul.msk.f32.vlgmr.msra.gmra.mxu3 %vm4230_vm10, %v4354_v24 }
0x197e   : > { %4451 = vadd.xlane.f32.xlu1 %v4450_v15 }
0x1984   : > { %v4449_v52 = vpop.xlane.xlu2 %4448 }
0x198c   : > { %v4246_v25 = vpop.xlane.xlu2 %4245  ;;  %v4351_v32 = vpop.xlane.xlu0 %4350 }
0x198d   : > { %6498 = vrcp.f32 %v4246_v25 }
0x198e   : > { %6500 = vrcp.f32 %v4351_v32 }
0x1993   : > { %v6499_v19 = vpop.eup %6498 }
0x1994   : > { %v6501_v6 = vpop.eup %6500  ;;  %v4252_v56 = vmul.f32 %v6499_v19, %v6485_v3  ;;  %v4559_v46 = vpop.permute.xlu2 %4558 }
0x1995   : > { %v4355_v43 = vmul.f32 %v6501_v6, %v6487_v16  ;;  %v4629_v16 = vld [vmem:[%s8421_s0 + $0x18] sm:$0xff] }
0x1996   : > { %5959 = vmatmul.msk.f32.vlgmr.msra.gmra.mxu1 %vm4230_vm10, %v4252_v56  ;;  %4648 = vmatpush.msra.mxu0 %v4629_v16 }
0x1997   : > { %5967 = vmatmul.msk.f32.gmra.mxu3 %vm4230_vm10, %v4355_v43 }
0x1998   : > { %4649 = vmatpush.msra.mxu0 %v4628_v12 }
0x199a   : > { %4650 = vmatpush.msra.mxu0 %v4627_v1 }
0x199c   : > { %4651 = vmatpush.msra.mxu0 %v4626_v17 }
0x199f   : > { %v4460_v4 = vpop.permute.xlu0 %4459 }
0x19a0   : > { %5972 = vmatpush.msk.msrb.mxu1 %vm4265_vm9, %v4460_v4 }
0x19ae   : > { %v4249_v41 = vpop.xlane.xlu1 %4248 }
0x19af   : > { %6502 = vrcp.f32 %v4249_v41 }
0x19b5   : > { %v6503_v51 = vpop.eup %6502 }
0x19b6   : > { %v4253_v10 = vmul.f32 %v6503_v51, %v6489_v38 }
0x19b8   : > { %5960 = vmatmul.msk.f32.gmra.mxu1 %vm4230_vm10, %v4253_v10 }
0x19c6   : > { %v4561_v60 = vpop.permute.xlu1 %4560 }
0x19c7   : > { %5979 = vmatpush.msk.msrb.mxu3 %vm4265_vm9, %v4561_v60 }
0x19c9   : > { %4586 = vmatpush.msrb.mxu3 %v4559_v46 }
0x19ca   : > { %v4550_v29 = vpop.xlane.xlu0 %4549 }
0x19cb   : > { %6504 = vrcp.f32 %v4550_v29 }
0x19d1   : > { %v6505_v20 = vpop.eup %6504 }
0x19d2   : > { %v4556_v54 = vmul.f32 %v6505_v20, %v6491_v28  ;;  %v4553_v26 = vpop.xlane.xlu0 %4552 }
0x19d3   : > { %6506 = vrcp.f32 %v4553_v26 }
0x19d4   : > { %5980 = vmatmul.msk.f32.vlgmr.msrb.gmra.mxu3 %vm4230_vm10, %v4556_v54  ;;  %6508 = vrcp.f32 %v4449_v52 }
0x19d9   : > { %v6507_v35 = vpop.eup %6506 }
0x19da   : > { %v4557_v62 = vmul.f32 %v6507_v35, %v6493_v33  ;;  %v6509_v63 = vpop.eup %6508 }
0x19db   : > { %v4455_v47 = vmul.f32 %v6509_v63, %v8003_v61 }
0x19dc   : > { %5981 = vmatmul.msk.f32.gmra.mxu3 %vm4230_vm10, %v4557_v62 }
0x19e5   : > { %v4458_v31 = vpop.permute.xlu0 %4457 }
0x19e6   : > { %4485 = vmatpush.msrb.mxu1 %v4458_v31 }
0x19e7   : > { %5973 = vmatmul.msk.f32.vlgmr.msrb.gmra.mxu1 %vm4230_vm10, %v4455_v47 }
0x19f1   : > { %v4452_v7 = vpop.xlane.xlu1 %4451 }
0x19f2   : > { %6510 = vrcp.f32 %v4452_v7 }
0x19f8   : > { %v6511_v30 = vpop.eup %6510 }
0x19f9   : > { %v4456_v22 = vmul.f32 %v6511_v30, %v6497_v27 }
0x19fa   : > { %v4386_v57 = vpop.f32.mrf.mxu3 }
0x19fb   : > { %4596 = vrot.lane.b32.xlu2 %v4386_v57, %s8354_s1  ;;  %5974 = vmatmul.msk.f32.gmra.mxu1 %vm4230_vm10, %v4456_v22 }
0x1a13   : > { %v4285_v59 = vpop.f32.mrf.mxu1 }
0x1a1a   : > { %v4389_v0 = vpop.f32.mrf.mxu3 }
0x1a35   : > { %v4288_v61 = vpop.f32.mrf.mxu1 }
0x1a55   : > { %v4597_v21 = vpop.permute.xlu2 %4596 }
0x1a56   : > { %v4618_v23 = vsel %vm3965_vm6, %v4285_v59, %v4597_v21 }
0x1a57   : > { %v4588_v48 = vpop.f32.mrf.mxu3 }
0x1a58   : > { %4612 = vrot.lane.b32.xlu2 %v4588_v48, %s8350_s3 }
0x1a5f   : > { %v4591_v44 = vpop.f32.mrf.mxu3 }
0x1a64   : > { %v4487_v37 = vpop.f32.mrf.mxu1 }
0x1a65   : > { %4604 = vrot.lane.b32.xlu0 %v4487_v37, %s8352_s28 }
0x1a6d   : > { %4598 = vrot.lane.b32.xlu0 %v4389_v0, %s8354_s1  ;;  %s8425_s1 = sld [smem:[#allocation28_spill]] }
0x1a73   : > { %v6457_v0 = vld [vmem:[%s8425_s1] ss:$0 sm:$0xff] }
0x1a75   : > { %4614 = vrot.lane.b32.xlu0 %v4591_v44, %s8350_s3  ;;  %s8423_s3 = sld [smem:[#allocation29_spill]] }
0x1a78   : > { %v4490_v3 = vpop.f32.mrf.mxu1 }
0x1a79   : > { %4606 = vrot.lane.b32.xlu2 %v4490_v3, %s8352_s28  ;;  %s8424_s28 = sld [smem:[#allocation27_spill]] }
0x1a7b   : > { %v4726_v4 = vld [vmem:[%s8423_s3 + $0x18] sm:$0xff]  ;;  %v4725_v41 = vld [vmem:[%s8423_s3 + $0x10] sm:$0xff]  ;;  %v4724_v51 = vld [vmem:[%s8423_s3 + $0x8] sm:$0xff] }
0x1a7c   : > { %4749 = vmatpush.msra.mxu1 %v4726_v4  ;;  %v4723_v10 = vld [vmem:[%s8423_s3] sm:$0xff] }
0x1a7e   : > { %4750 = vmatpush.msra.mxu1 %v4725_v41 }
0x1a7f   : > { %v6456_v30 = vld [vmem:[%s8424_s28] ss:$0 sm:$0xff] }
0x1a80   : > { %4751 = vmatpush.msra.mxu1 %v4724_v51 }
0x1a82   : > { %4752 = vmatpush.msra.mxu1 %v4723_v10 }
0x1ab2   : > { %v4613_v13 = vpop.permute.xlu2 %4612 }
0x1ad3   : > { %v4607_v36 = vpop.permute.xlu2 %4606 }
0x1ad7   : > { %v4605_v38 = vpop.permute.xlu0 %4604 }
0x1ad8   : > { %v4621_v34 = vsel %vm4620_vm12, %v4618_v23, %v4605_v38  ;;  %v4809_v38 = vld [vmem:[%s8426_s5 + $0x38] sm:$0xff] }
0x1ad9   : > { %v4624_v58 = vsel %vm4623_vm13, %v4621_v34, %v4613_v13  ;;  %4828 = vmatpush.msra.mxu2 %v4809_v38  ;;  %v4808_v13 = vld [vmem:[%s8426_s5 + $0x30] sm:$0xff]  ;;  %v4807_v34 = vld [vmem:[%s8426_s5 + $0x28] sm:$0xff] }
0x1ada   : > { %5982 = vmatmul.msk.f32.vlgmr.msra.gmra.mxu0 %vm4031_vm14, %v4624_v58  ;;  %v4806_v58 = vld [vmem:[%s8426_s5 + $0x20] sm:$0xff] }
0x1adb   : > { %4829 = vmatpush.msra.mxu2 %v4808_v13  ;;  %v5995_v13 = vld [vmem:[%s8416_s7 + $0x38] sm:$0xff] }
0x1adc   : > { %4931 = vmatpush.msra.mxu3 %v5995_v13 }
0x1add   : > { %4830 = vmatpush.msra.mxu2 %v4807_v34  ;;  %v5994_v34 = vld [vmem:[%s8416_s7 + $0x30] sm:$0xff] }
0x1ade   : > { %4932 = vmatpush.msra.mxu3 %v5994_v34 }
0x1adf   : > { %v4599_v8 = vpop.permute.xlu0 %4598  ;;  %4831 = vmatpush.msra.mxu2 %v4806_v58  ;;  %v5993_v58 = vld [vmem:[%s8416_s7 + $0x28] sm:$0xff] }
0x1ae0   : > { %v4619_v40 = vsel %vm3965_vm6, %v4288_v61, %v4599_v8  ;;  %v6458_v8 = vld [vmem:[%s8427_s6] ss:$0 sm:$0xff]  ;;  %4933 = vmatpush.msra.mxu3 %v5993_v58 }
0x1ae1   : > { %v4622_v55 = vsel %vm4620_vm12, %v4619_v40, %v4607_v36  ;;  %v4805_v40 = vld [vmem:[%s8426_s5 + $0x18] sm:$0xff]  ;;  %v4804_v36 = vld [vmem:[%s8426_s5 + $0x10] sm:$0xff] }
0x1ae2   : > { %4832 = vmatpush.msra.mxu2 %v4805_v40 }
0x1ae4   : > { %4833 = vmatpush.msra.mxu2 %v4804_v36 }
0x1ae7   : > { %v4615_v14 = vpop.permute.xlu0 %4614 }
0x1ae8   : > { %v4625_v28 = vsel %vm4623_vm13, %v4622_v55, %v4615_v14 }
0x1ae9   : > { %5983 = vmatmul.msk.f32.gmra.mxu0 %vm4031_vm14, %v4625_v28  ;;  %v4803_v28 = vld [vmem:[%s8426_s5 + $0x8] sm:$0xff] }
0x1aea   : > { %4834 = vmatpush.msra.mxu2 %v4803_v28 }
0x1b57   : > { %v4653_v33 = vpop.f32.mrf.mxu0 }
0x1b58   : > { %v4659_v45 = vadd.f32 %v4653_v33, %v7892_v18  ;;  %v4802_v33 = vld [vmem:[%s8426_s5] sm:$0xff] }
0x1b59   : > { %4835 = vmatpush.msra.mxu2 %v4802_v33 }
0x1b5a   : > { %v8053_v11 = vadd.f32 %v6455_v9, %v4659_v45 }
0x1b5c   : > { %v4669_v5 = vsel %vm4031_vm14, %v8053_v11, 0.0 }
0x1b5d   : > { %4670 = vadd.xlane.f32.xlu2 %v4669_v5 }
0x1b66   : > { %v4656_v39 = vpop.f32.mrf.mxu0 }
0x1b67   : > { %v4660_v50 = vadd.f32 %v4656_v39, %v7896_v49 }
0x1b69   : > { %v8058_v24 = vadd.f32 %v6455_v9, %v4660_v50 }
0x1b6b   : > { %v4672_v27 = vsel %vm4035_vm15, %v8058_v24, 0.0 }
0x1b6c   : > { %4673 = vadd.xlane.f32.xlu0 %v4672_v27 }
0x1bd0   : > { %v4671_v15 = vpop.xlane.xlu2 %4670 }
0x1bd1   : > { %v4675_v18 = vmul.f32 %v4671_v15, %v7882_v53 }
0x1bd3   : > { %v4677_v52 = vsub.f32 %v8053_v11, %v4675_v18 }
0x1bd5   : > { %v4679_v25 = vmul.f32 %v4677_v52, %v4677_v52 }
0x1bd7   : > { %v4681_v32 = vsel %vm4031_vm14, %v4679_v25, 0.0 }
0x1bd8   : > { %4682 = vadd.xlane.f32.xlu1 %v4681_v32 }
0x1bdf   : > { %v4674_v49 = vpop.xlane.xlu0 %4673 }
0x1be0   : > { %v4676_v19 = vmul.f32 %v4674_v49, %v7882_v53 }
0x1be2   : > { %v4678_v6 = vsub.f32 %v8058_v24, %v4676_v19 }
0x1be4   : > { %v4680_v56 = vmul.f32 %v4678_v6, %v4678_v6 }
0x1be6   : > { %v4684_v43 = vsel %vm4035_vm15, %v4680_v56, 0.0 }
0x1be7   : > { %4685 = vadd.xlane.f32.xlu1 %v4684_v43 }
0x1c4b   : > { %v4683_v60 = vpop.xlane.xlu1 %4682 }
0x1c4c   : > { %v4687_v46 = vmul.f32 %v4683_v60, %v7882_v53 }
0x1c4e   : > { %v4689_v29 = vadd.f32 1e-05, %v4687_v46 }
0x1c50   : > { %6512 = vrsqrt.f32 %v4689_v29  ;;  %vm4697_vm3 = vweird.f32 %v4689_v29 }
0x1c56   : > { %v6513_v20 = vpop.eup %6512 }
0x1c57   : > { %v4692_v54 = vmul.f32 %v6513_v20, %v4689_v29  ;;  %vm4698_vm2 = vweird.f32 %v6513_v20 }
0x1c58   : > { %vm4699_vm4 = vmor %vm4697_vm3, %vm4698_vm2 }
0x1c59   : > { %v4693_v26 = vmul.f32 %v6513_v20, %v4692_v54 }
0x1c5a   : > { %v4686_v35 = vpop.xlane.xlu1 %4685 }
0x1c5b   : > { %v4694_v62 = vmul.f32 0.5, %v4693_v26  ;;  %v4688_v63 = vmul.f32 %v4686_v35, %v7882_v53 }
0x1c5d   : > { %v4695_v47 = vsub.f32 1.5, %v4694_v62  ;;  %v4690_v31 = vadd.f32 1e-05, %v4688_v63 }
0x1c5f   : > { %v4696_v7 = vmul.f32 %v6513_v20, %v4695_v47  ;;  %6514 = vrsqrt.f32 %v4690_v31  ;;  %vm4707_vm0 = vweird.f32 %v4690_v31 }
0x1c61   : > { %v4700_v22 = vsel %vm4699_vm4, %v6513_v20, %v4696_v7 }
0x1c62   : > { %v4711_v57 = vmul.f32 %v4700_v22, %v4677_v52 }
0x1c64   : > { %v4716_v59 = vmul.f32 %v6456_v30, %v4711_v57 }
0x1c65   : > { %v6515_v48 = vpop.eup %6514 }
0x1c66   : > { %v4702_v61 = vmul.f32 %v6515_v48, %v4690_v31  ;;  %v4721_v37 = vadd.f32 %v6457_v0, %v4716_v59  ;;  %vm4708_vm5 = vweird.f32 %v6515_v48 }
0x1c67   : > { %vm4709_vm7 = vmor %vm4707_vm0, %vm4708_vm5 }
0x1c68   : > { %v4703_v44 = vmul.f32 %v6515_v48, %v4702_v61  ;;  %5984 = vmatmul.msk.f32.vlgmr.msra.gmra.mxu1 %vm4031_vm14, %v4721_v37 }
0x1c6a   : > { %v4704_v3 = vmul.f32 0.5, %v4703_v44 }
0x1c6c   : > { %v4705_v16 = vsub.f32 1.5, %v4704_v3 }
0x1c6e   : > { %v4706_v12 = vmul.f32 %v6515_v48, %v4705_v16 }
0x1c70   : > { %v4710_v1 = vsel %vm4709_vm7, %v6515_v48, %v4706_v12 }
0x1c71   : > { %v4712_v17 = vmul.f32 %v4710_v1, %v4678_v6 }
0x1c73   : > { %v4717_v21 = vmul.f32 %v6456_v30, %v4712_v17  ;;  %v6459_v30 = vld [vmem:[%s8428_s8] ss:$0 sm:$0xff] }
0x1c75   : > { %v4722_v23 = vadd.f32 %v6457_v0, %v4717_v21 }
0x1c77   : > { %5985 = vmatmul.msk.f32.gmra.mxu1 %vm4031_vm14, %v4722_v23 }
0x1ce5   : > { %v4754_v14 = vpop.f32.mrf.mxu1 }
0x1ce6   : > { %v4755_v55 = vadd.f32 %v6458_v8, %v4754_v14 }
0x1ce8   : > { %v5986_v9 = vmul.f32 -1.702, %v4755_v55 }
0x1cea   : > { %v4764_v45 = vmul.f32 1.442695, %v5986_v9 }
0x1cec   : > { %6516 = vpow2.f32 %v4764_v45 }
0x1cf2   : > { %v6517_v5 = vpop.eup %6516 }
0x1cf3   : > { %v4768_v39 = vadd.f32 1.0, %v6517_v5 }
0x1cf4   : > { %v4757_v50 = vpop.f32.mrf.mxu1 }
0x1cf5   : > { %6518 = vrcp.f32 %v4768_v39  ;;  %v4758_v27 = vadd.f32 %v6458_v8, %v4757_v50  ;;  %v4781_v49 = vand.u32 2147483648, %v4768_v39  ;;  %v4779_v6 = vand.u32 2147483647, %v4768_v39  ;;  %v5992_v8 = vld [vmem:[%s8416_s7 + $0x20] sm:$0xff]  ;;  %s8429_s7 = smov 120  }
0x1cf6   : > { %vm4775_vm2 = vweird.f32 %v4768_v39  ;;  %4934 = vmatpush.msra.mxu3 %v5992_v8 }
0x1cf7   : > { %v5987_v15 = vmul.f32 -1.702, %v4758_v27  ;;  %v4782_v4 = vor.u32 1.1754944e-38, %v4781_v49  ;;  %vm4780_vm4 = vcmp.eq.f32.partialorder %v4779_v6, 8.507059e+37 }
0x1cf9   : > { %v4766_v18 = vmul.f32 1.442695, %v5987_v15  ;;  %v6460_v15 = vld [vmem:[%s8417_s10 + $0x1] ss:$0 sm:$0xff]  ;;  %s8431_s10 = smov 96  }
0x1cfb   : > { %v6519_v52 = vpop.eup %6518  ;;  %6520 = vpow2.f32 %v4766_v18 }
0x1cfc   : > { %v4771_v25 = vmul.f32 %v6519_v52, %v4768_v39  ;;  %vm4776_vm1 = vweird.f32 %v6519_v52 }
0x1cfd   : > { %vm4777_vm3 = vmor %vm4775_vm2, %vm4776_vm1 }
0x1cfe   : > { %v4772_v32 = vsub.f32 1.0, %v4771_v25  ;;  %v6461_v25 = vld [vmem:[%s8418_s11 + $0x1] ss:$0 sm:$0xff]  ;;  %s8432_s11 = smov 104  }
0x1d00   : > { %v4773_v19 = vmul.f32 %v6519_v52, %v4772_v32 }
0x1d01   : > { %v6521_v56 = vpop.eup %6520 }
0x1d02   : > { %v4774_v43 = vadd.f32 %v6519_v52, %v4773_v19  ;;  %v4769_v41 = vadd.f32 1.0, %v6521_v56 }
0x1d04   : > { %v4778_v51 = vsel %vm4777_vm3, %v6519_v52, %v4774_v43  ;;  %6522 = vrcp.f32 %v4769_v41  ;;  %v4796_v54 = vand.u32 2147483648, %v4769_v41  ;;  %v4794_v35 = vand.u32 2147483647, %v4769_v41 }
0x1d05   : > { %v4783_v10 = vsel %vm4780_vm4, %v4782_v4, %v4778_v51  ;;  %vm4790_vm0 = vweird.f32 %v4769_v41 }
0x1d06   : > { %v4800_v60 = vmul.f32 %v4783_v10, %v4755_v55  ;;  %v4797_v63 = vor.u32 1.1754944e-38, %v4796_v54  ;;  %vm4795_vm1 = vcmp.eq.f32.partialorder %v4794_v35, 8.507059e+37 }
0x1d08   : > { %5988 = vmatmul.msk.f32.vlgmr.msra.gmra.mxu2 %vm3916_vm8, %v4800_v60 }
0x1d0a   : > { %v6523_v46 = vpop.eup %6522 }
0x1d0b   : > { %v4786_v29 = vmul.f32 %v6523_v46, %v4769_v41  ;;  %vm4791_vm5 = vweird.f32 %v6523_v46 }
0x1d0c   : > { %vm4792_vm7 = vmor %vm4790_vm0, %vm4791_vm5 }
0x1d0d   : > { %v4787_v20 = vsub.f32 1.0, %v4786_v29  ;;  %v6462_v29 = vld [vmem:[%s8419_s16 + $0x1] ss:$0 sm:$0xff] }
0x1d0f   : > { %v4788_v26 = vmul.f32 %v6523_v46, %v4787_v20 }
0x1d11   : > { %v4789_v62 = vadd.f32 %v6523_v46, %v4788_v26 }
0x1d13   : > { %v4793_v47 = vsel %vm4792_vm7, %v6523_v46, %v4789_v62 }
0x1d14   : > { %v4798_v31 = vsel %vm4795_vm1, %v4797_v63, %v4793_v47 }
0x1d15   : > { %v4801_v7 = vmul.f32 %v4798_v31, %v4758_v27 }
0x1d17   : > { %5989 = vmatmul.msk.f32.gmra.mxu2 %vm3916_vm8, %v4801_v7 }
0x1d8b   : > { %v4837_v22 = vpop.f32.mrf.mxu2 }
0x1d8c   : > { %v4838_v57 = vadd.f32 %v6459_v30, %v4837_v22 }
0x1d8e   : > { %v8091_v0 = vadd.f32 %v4838_v57, %v8053_v11 }
0x1d90   : > { %v4849_v59 = vsel %vm4031_vm14, %v8091_v0, 0.0 }
0x1d91   : > { %4850 = vadd.xlane.f32.xlu1 %v4849_v59 }
0x1d9a   : > { %v4840_v48 = vpop.f32.mrf.mxu2 }
0x1d9b   : > { %v4841_v61 = vadd.f32 %v6459_v30, %v4840_v48 }
0x1d9d   : > { %v8096_v37 = vadd.f32 %v4841_v61, %v8058_v24 }
0x1d9f   : > { %v4852_v44 = vsel %vm4035_vm15, %v8096_v37, 0.0 }
0x1da0   : > { %4853 = vadd.xlane.f32.xlu1 %v4852_v44 }
0x1e04   : > { %v4851_v3 = vpop.xlane.xlu1 %4850 }
0x1e05   : > { %v4855_v11 = vmul.f32 %v4851_v3, %v7882_v53 }
0x1e07   : > { %v4857_v16 = vsub.f32 %v8091_v0, %v4855_v11 }
0x1e09   : > { %v4859_v12 = vmul.f32 %v4857_v16, %v4857_v16 }
0x1e0b   : > { %v4861_v1 = vsel %vm4031_vm14, %v4859_v12, 0.0 }
0x1e0c   : > { %4862 = vadd.xlane.f32.xlu1 %v4861_v1 }
0x1e13   : > { %v4854_v17 = vpop.xlane.xlu1 %4853 }
0x1e14   : > { %v4856_v24 = vmul.f32 %v4854_v17, %v7882_v53 }
0x1e16   : > { %v4858_v21 = vsub.f32 %v8096_v37, %v4856_v24 }
0x1e18   : > { %v4860_v23 = vmul.f32 %v4858_v21, %v4858_v21 }
0x1e1a   : > { %v4864_v38 = vsel %vm4035_vm15, %v4860_v23, 0.0 }
0x1e1b   : > { %4865 = vadd.xlane.f32.xlu2 %v4864_v38 }
0x1e7f   : > { %v4863_v40 = vpop.xlane.xlu1 %4862 }
0x1e80   : > { %v4867_v36 = vmul.f32 %v4863_v40, %v7882_v53 }
0x1e82   : > { %v4869_v14 = vadd.f32 1e-05, %v4867_v36 }
0x1e84   : > { %6524 = vrsqrt.f32 %v4869_v14  ;;  %vm4877_vm3 = vweird.f32 %v4869_v14 }
0x1e8a   : > { %v6525_v55 = vpop.eup %6524 }
0x1e8b   : > { %v4872_v28 = vmul.f32 %v6525_v55, %v4869_v14  ;;  %vm4878_vm2 = vweird.f32 %v6525_v55 }
0x1e8c   : > { %vm4879_vm4 = vmor %vm4877_vm3, %vm4878_vm2 }
0x1e8d   : > { %v4873_v9 = vmul.f32 %v6525_v55, %v4872_v28 }
0x1e8e   : > { %v4866_v45 = vpop.xlane.xlu2 %4865 }
0x1e8f   : > { %v4874_v33 = vmul.f32 0.5, %v4873_v9  ;;  %v4868_v5 = vmul.f32 %v4866_v45, %v7882_v53 }
0x1e91   : > { %v4875_v39 = vsub.f32 1.5, %v4874_v33  ;;  %v4870_v50 = vadd.f32 1e-05, %v4868_v5 }
0x1e93   : > { %v4876_v27 = vmul.f32 %v6525_v55, %v4875_v39  ;;  %6526 = vrsqrt.f32 %v4870_v50  ;;  %vm4887_vm0 = vweird.f32 %v4870_v50 }
0x1e95   : > { %v4880_v18 = vsel %vm4879_vm4, %v6525_v55, %v4876_v27 }
0x1e96   : > { %v4891_v52 = vmul.f32 %v4880_v18, %v4857_v16 }
0x1e98   : > { %v4896_v32 = vmul.f32 %v6460_v15, %v4891_v52 }
0x1e99   : > { %v6527_v49 = vpop.eup %6526 }
0x1e9a   : > { %v4901_v19 = vadd.f32 %v6461_v25, %v4896_v32  ;;  %v4882_v6 = vmul.f32 %v6527_v49, %v4870_v50  ;;  %vm4888_vm5 = vweird.f32 %v6527_v49 }
0x1e9b   : > { %vm4889_vm7 = vmor %vm4887_vm0, %vm4888_vm5 }
0x1e9c   : > { %5997 = vmatmul.msk.f32.vlgmr.msra.gmra.mxu3 %vm4031_vm14, %v4901_v19  ;;  %v4883_v56 = vmul.f32 %v6527_v49, %v4882_v6 }
0x1e9e   : > { %v4884_v43 = vmul.f32 0.5, %v4883_v56 }
0x1ea0   : > { %v4885_v4 = vsub.f32 1.5, %v4884_v43 }
0x1ea2   : > { %v4886_v41 = vmul.f32 %v6527_v49, %v4885_v4 }
0x1ea4   : > { %v4890_v51 = vsel %vm4889_vm7, %v6527_v49, %v4886_v41 }
0x1ea5   : > { %v4892_v10 = vmul.f32 %v4890_v51, %v4858_v21 }
0x1ea7   : > { %v4897_v60 = vmul.f32 %v6460_v15, %v4892_v10 }
0x1ea9   : > { %v4902_v46 = vadd.f32 %v6461_v25, %v4897_v60 }
0x1eab   : > { %5998 = vmatmul.msk.f32.gmra.mxu3 %vm4031_vm14, %v4902_v46 }
0x1f1f   : > { %v4936_v20 = vpop.f32.mrf.mxu3 }
0x1f20   : > { %v8117_v54 = vadd.f32 %v6462_v29, %v4936_v20 }
0x1f22   : > { %5041 = vrot.lane.b32.xlu2 %v8117_v54, %s8429_s7  ;;  %5045 = vrot.lane.b32.xlu0 %v8117_v54, %s8430_s9 }
0x1f2e   : > { %v4939_v26 = vpop.f32.mrf.mxu3 }
0x1f2f   : > { %v8123_v35 = vadd.f32 %v6462_v29, %v4939_v26 }
0x1f31   : > { %5047 = vrot.lane.b32.xlu1 %v8123_v35, %s8430_s9  ;;  %5043 = vrot.lane.b32.xlu2 %v8123_v35, %s8429_s7  ;;  %s8434_s9 = smov 80   ;;  %s8435_s7 = smov 56  }
0x1f32   : > { %4946 = vrot.lane.b32.xlu0 %v8123_v35, %s8431_s10 }
0x1f39   : > { %4944 = vrot.lane.b32.xlu1 %v8117_v54, %s8431_s10  ;;  %5243 = vrot.lane.b32.xlu2 %v8117_v54, %s8432_s11  ;;  %s8436_s10 = smov 112  }
0x1f3a   : > { %5249 = vrot.lane.b32.xlu0 %v8123_v35, %s8433_s12 }
0x1f41   : > { %5247 = vrot.lane.b32.xlu1 %v8117_v54, %s8433_s12  ;;  %5245 = vrot.lane.b32.xlu2 %v8123_v35, %s8432_s11  ;;  %s8437_s12 = smov 64   ;;  %s8438_s11 = smov 40  }
0x1f42   : > { %5148 = vrot.lane.b32.xlu0 %v8123_v35, %s8434_s9 }
0x1f49   : > { %5146 = vrot.lane.b32.xlu1 %v8117_v54, %s8434_s9  ;;  %5106 = vrot.lane.b32.xlu2 %v8117_v54, %s8435_s7  ;;  %s8439_s9 = smov 48  }
0x1f4a   : > { %5142 = vrot.lane.b32.xlu0 %v8117_v54, %s8436_s10 }
0x1f51   : > { %5144 = vrot.lane.b32.xlu1 %v8123_v35, %s8436_s10  ;;  %s8441_s10 = smov 16  }
0x1f52   : > { %5108 = vrot.lane.b32.xlu0 %v8123_v35, %s8435_s7  ;;  %s8440_s7 = smov 8  }
0x1f59   : > { %5007 = vrot.lane.b32.xlu1 %v8123_v35, %s8437_s12 }
0x1f7c   : > { %v5042_v63 = vpop.permute.xlu2 %5041 }
0x1f8b   : > { %v5044_v7 = vpop.permute.xlu2 %5043 }
0x1f93   : > { %v5244_v57 = vpop.permute.xlu2 %5243 }
0x1f94   : > { %v5046_v62 = vpop.permute.xlu0 %5045 }
0x1f9b   : > { %v5246_v44 = vpop.permute.xlu2 %5245 }
0x1fa3   : > { %v5048_v47 = vpop.permute.xlu1 %5047  ;;  %v5107_v12 = vpop.permute.xlu2 %5106 }
0x1fa4   : > { %v4947_v31 = vpop.permute.xlu0 %4946  ;;  %6006 = vmatpush.xpose.msk.msrb.mxu2 %vm3965_vm6, %v5048_v47 }
0x1fa5   : > { %5999 = vmatpush.xpose.msk.msrb.mxu0 %vm3965_vm6, %v4947_v31 }
0x1fa8   : > { %6007 = vmatpush.xpose.msk.msrb.mxu2 %vm3965_vm6, %v5046_v62 }
0x1fab   : > { %v4945_v30 = vpop.permute.xlu1 %4944  ;;  %6008 = vmatmul.msk.f32.vlgmr.msrb.gmra.mxu2 %vm3965_vm6, %v5042_v63 }
0x1fac   : > { %v5250_v22 = vpop.permute.xlu0 %5249  ;;  %6000 = vmatpush.xpose.msk.msrb.mxu0 %vm3965_vm6, %v4945_v30 }
0x1fad   : > { %6020 = vmatpush.xpose.msk.msra.mxu2 %vm3965_vm6, %v5250_v22 }
0x1faf   : > { %6001 = vmatmul.msk.f32.vlgmr.msrb.gmra.mxu0 %vm3965_vm6, %v8117_v54 }
0x1fb3   : > { %v5248_v59 = vpop.permute.xlu1 %5247  ;;  %6009 = vmatmul.msk.f32.gmra.mxu2 %vm3965_vm6, %v5044_v7 }
0x1fb4   : > { %v5149_v48 = vpop.permute.xlu0 %5148  ;;  %6021 = vmatpush.xpose.msk.msra.mxu2 %vm3965_vm6, %v5248_v59 }
0x1fb5   : > { %6013 = vmatpush.xpose.msk.msra.mxu0 %vm3965_vm6, %v5149_v48 }
0x1fb7   : > { %6002 = vmatmul.msk.f32.gmra.mxu0 %vm3965_vm6, %v8123_v35 }
0x1fbb   : > { %v5147_v61 = vpop.permute.xlu1 %5146  ;;  %6022 = vmatmul.msk.f32.vlgmr.msra.gmra.mxu2 %vm3965_vm6, %v5244_v57 }
0x1fbc   : > { %v5143_v3 = vpop.permute.xlu0 %5142  ;;  %6014 = vmatpush.xpose.msk.msra.mxu0 %vm3965_vm6, %v5147_v61 }
0x1fbf   : > { %6015 = vmatmul.msk.f32.vlgmr.msra.gmra.mxu0 %vm3965_vm6, %v5143_v3 }
0x1fc3   : > { %v5145_v11 = vpop.permute.xlu1 %5144  ;;  %6023 = vmatmul.msk.f32.gmra.mxu2 %vm3965_vm6, %v5246_v44 }
0x1fc4   : > { %v5109_v16 = vpop.permute.xlu0 %5108 }
0x1fc5   : > { %6010 = vmatpush.msk.msrb.mxu3 %vm4265_vm9, %v5109_v16 }
0x1fc7   : > { %5134 = vmatpush.msrb.mxu3 %v5107_v12  ;;  %6016 = vmatmul.msk.f32.gmra.mxu0 %vm3965_vm6, %v5145_v11 }
0x1fcb   : > { %v5008_v1 = vpop.permute.xlu1 %5007 }
0x1fcc   : > { %6003 = vmatpush.msk.msrb.mxu1 %vm4265_vm9, %v5008_v1 }
0x202c   : > { %v4973_v17 = vpop.f32.mrf.mxu0 }
0x202d   : > { %v4979_v24 = vmul.f32 0.35355338, %v4973_v17 }
0x202e   : > { %v5074_v21 = vpop.f32.mrf.mxu2 }
0x202f   : > { %v5080_v23 = vmul.f32 0.35355338, %v5074_v21  ;;  %v4981_v38 = vadd.f32 %v4979_v24, %v7976_v2 }
0x2031   : > { %v4983_v13 = vsel %vm4230_vm10, %v4981_v38, -inf  ;;  %v5082_v34 = vadd.f32 %v5080_v23, %v7976_v2 }
0x2032   : > { %4984 = vmax.xlane.f32.xlu0 %v4983_v13 }
0x2033   : > { %v5084_v58 = vsel %vm4230_vm10, %v5082_v34, -inf }
0x2034   : > { %5085 = vmax.xlane.f32.xlu2 %v5084_v58  ;;  %v4976_v8 = vpop.f32.mrf.mxu0 }
0x2035   : > { %v4980_v40 = vmul.f32 0.35355338, %v4976_v8 }
0x2036   : > { %v5077_v36 = vpop.f32.mrf.mxu2 }
0x2037   : > { %v5081_v14 = vmul.f32 0.35355338, %v5077_v36  ;;  %v4982_v55 = vadd.f32 %v4980_v40, %v7985_v42 }
0x2039   : > { %v5083_v28 = vadd.f32 %v5081_v14, %v7985_v42  ;;  %v4986_v33 = vsel %vm4234_vm11, %v4982_v55, -inf }
0x203b   : > { %v5087_v9 = vsel %vm4234_vm11, %v5083_v28, -inf }
0x203c   : > { %5088 = vmax.xlane.f32.xlu1 %v5087_v9  ;;  %4987 = vmax.xlane.f32.xlu2 %v4986_v33  ;;  %v5175_v45 = vpop.f32.mrf.mxu0 }
0x203d   : > { %v5181_v5 = vmul.f32 0.35355338, %v5175_v45 }
0x203e   : > { %v5276_v39 = vpop.f32.mrf.mxu2 }
0x203f   : > { %v5282_v50 = vmul.f32 0.35355338, %v5276_v39  ;;  %v5183_v27 = vadd.f32 %v5181_v5, %v7976_v2 }
0x2041   : > { %v5284_v15 = vadd.f32 %v5282_v50, %v7976_v2  ;;  %v5185_v52 = vsel %vm4230_vm10, %v5183_v27, -inf }
0x2043   : > { %v5286_v18 = vsel %vm4230_vm10, %v5284_v15, -inf }
0x2044   : > { %5287 = vmax.xlane.f32.xlu0 %v5286_v18  ;;  %5186 = vmax.xlane.f32.xlu1 %v5185_v52  ;;  %v5178_v25 = vpop.f32.mrf.mxu0 }
0x2045   : > { %v5182_v32 = vmul.f32 0.35355338, %v5178_v25 }
0x2046   : > { %v5279_v49 = vpop.f32.mrf.mxu2 }
0x2047   : > { %v5283_v19 = vmul.f32 0.35355338, %v5279_v49  ;;  %v5184_v6 = vadd.f32 %v5182_v32, %v7985_v42 }
0x2049   : > { %v5285_v56 = vadd.f32 %v5283_v19, %v7985_v42  ;;  %v5188_v4 = vsel %vm4234_vm11, %v5184_v6, -inf }
0x204b   : > { %v5289_v43 = vsel %vm4234_vm11, %v5285_v56, -inf }
0x204c   : > { %5290 = vmax.xlane.f32.xlu2 %v5289_v43  ;;  %5189 = vmax.xlane.f32.xlu0 %v5188_v4 }
0x2060   : > { %5310 = vrot.lane.b32.xlu0 %v8123_v35, %s8438_s11 }
0x2064   : > { %5005 = vrot.lane.b32.xlu2 %v8117_v54, %s8437_s12  ;;  %s8442_s12 = smov 24  }
0x20a5   : > { %v4985_v2 = vpop.xlane.xlu0 %4984 }
0x20a6   : > { %v4989_v41 = vsub.f32 %v4981_v38, %v4985_v2 }
0x20a7   : > { %v5086_v51 = vpop.xlane.xlu2 %5085 }
0x20a8   : > { %v4991_v10 = vmul.f32 1.442695, %v4989_v41  ;;  %v5090_v60 = vsub.f32 %v5082_v34, %v5086_v51 }
0x20aa   : > { %6528 = vpow2.f32 %v4991_v10  ;;  %v5092_v46 = vmul.f32 1.442695, %v5090_v60 }
0x20ac   : > { %6530 = vpow2.f32 %v5092_v46 }
0x20af   : > { %v5089_v42 = vpop.xlane.xlu1 %5088  ;;  %v4988_v29 = vpop.xlane.xlu2 %4987 }
0x20b0   : > { %v6529_v20 = vpop.eup %6528  ;;  %v5091_v26 = vsub.f32 %v5083_v28, %v5089_v42  ;;  %v4990_v62 = vsub.f32 %v4982_v55, %v4988_v29 }
0x20b1   : > { %v4995_v63 = vsel %vm4230_vm10, %v6529_v20, 0.0 }
0x20b2   : > { %v6531_v47 = vpop.eup %6530  ;;  %v5094_v31 = vmul.f32 1.442695, %v5091_v26  ;;  %v4993_v7 = vmul.f32 1.442695, %v4990_v62  ;;  %4996 = vadd.xlane.f32.xlu2 %v4995_v63 }
0x20b3   : > { %v5096_v30 = vsel %vm4230_vm10, %v6531_v47, 0.0 }
0x20b4   : > { %6532 = vpow2.f32 %v5094_v31  ;;  %5097 = vadd.xlane.f32.xlu1 %v5096_v30 }
0x20b5   : > { %6534 = vpow2.f32 %v4993_v7 }
0x20b7   : > { %v5187_v22 = vpop.xlane.xlu1 %5186  ;;  %v5288_v57 = vpop.xlane.xlu0 %5287 }
0x20b8   : > { %v5191_v59 = vsub.f32 %v5183_v27, %v5187_v22  ;;  %v5292_v48 = vsub.f32 %v5284_v15, %v5288_v57  ;;  %v6030_v22 = vld [vmem:[%s8421_s0 + $0x38] sm:$0xff]  ;;  %v6029_v57 = vld [vmem:[%s8421_s0 + $0x30] sm:$0xff] }
0x20b9   : > { %5397 = vmatpush.msrb.mxu0 %v6030_v22 }
0x20ba   : > { %v6533_v61 = vpop.eup %6532  ;;  %v5193_v44 = vmul.f32 1.442695, %v5191_v59  ;;  %v5294_v3 = vmul.f32 1.442695, %v5292_v48  ;;  %v6028_v59 = vld [vmem:[%s8421_s0 + $0x28] sm:$0xff]  ;;  %v6027_v48 = vld [vmem:[%s8421_s0 + $0x20] sm:$0xff] }
0x20bb   : > { %v6535_v11 = vpop.eup %6534  ;;  %v5099_v16 = vsel %vm4234_vm11, %v6533_v61, 0.0  ;;  %5398 = vmatpush.msrb.mxu0 %v6029_v57 }
0x20bc   : > { %6536 = vpow2.f32 %v5193_v44  ;;  %5100 = vadd.xlane.f32.xlu1 %v5099_v16  ;;  %v4998_v12 = vsel %vm4234_vm11, %v6535_v11, 0.0 }
0x20bd   : > { %6538 = vpow2.f32 %v5294_v3  ;;  %4999 = vadd.xlane.f32.xlu0 %v4998_v12  ;;  %5399 = vmatpush.msrb.mxu0 %v6028_v59 }
0x20bf   : > { %v5291_v1 = vpop.xlane.xlu2 %5290  ;;  %v5190_v24 = vpop.xlane.xlu0 %5189  ;;  %5400 = vmatpush.msrb.mxu0 %v6027_v48 }
0x20c0   : > { %v5293_v17 = vsub.f32 %v5285_v56, %v5291_v1  ;;  %v5192_v13 = vsub.f32 %v5184_v6, %v5190_v24 }
0x20c2   : > { %v6537_v21 = vpop.eup %6536  ;;  %v5296_v23 = vmul.f32 1.442695, %v5293_v17  ;;  %v5195_v8 = vmul.f32 1.442695, %v5192_v13  ;;  %v6463_v13 = vld [vmem:[%s8422_s2 + $0x1] ss:$0 sm:$0xff] }
0x20c3   : > { %v6539_v38 = vpop.eup %6538  ;;  %v5197_v34 = vsel %vm4230_vm10, %v6537_v21, 0.0 }
0x20c4   : > { %6540 = vpow2.f32 %v5296_v23  ;;  %5198 = vadd.xlane.f32.xlu1 %v5197_v34  ;;  %v5298_v58 = vsel %vm4230_vm10, %v6539_v38, 0.0 }
0x20c5   : > { %5299 = vadd.xlane.f32.xlu2 %v5298_v58  ;;  %6542 = vpow2.f32 %v5195_v8 }
0x20c7   : > { %v5006_v40 = vpop.permute.xlu2 %5005 }
0x20c8   : > { %5033 = vmatpush.msrb.mxu1 %v5006_v40 }
0x20ca   : > { %v6541_v36 = vpop.eup %6540 }
0x20cb   : > { %v5301_v14 = vsel %vm4234_vm11, %v6541_v36, 0.0  ;;  %v6543_v55 = vpop.eup %6542 }
0x20cc   : > { %v5200_v9 = vsel %vm4234_vm11, %v6543_v55, 0.0 }
0x20cd   : > { %5302 = vadd.xlane.f32.xlu2 %v5301_v14 }
0x20d1   : > { %5209 = vrot.lane.b32.xlu0 %v8123_v35, %s8439_s9 }
0x20d2   : > { %v5311_v28 = vpop.permute.xlu0 %5310 }
0x20d3   : > { %6024 = vmatpush.msk.msra.mxu3 %vm4265_vm9, %v5311_v28 }
0x20d5   : > { %5201 = vadd.xlane.f32.xlu2 %v5200_v9 }
0x20d9   : > { %5207 = vrot.lane.b32.xlu0 %v8117_v54, %s8439_s9 }
0x20dd   : > { %5308 = vrot.lane.b32.xlu1 %v8117_v54, %s8438_s11  ;;  %s8443_s11 = sld [smem:[#allocation17_spill]] }
0x2125   : > { %v4997_v33 = vpop.xlane.xlu2 %4996 }
0x2126   : > { %6544 = vrcp.f32 %v4997_v33 }
0x2127   : > { %v5098_v45 = vpop.xlane.xlu1 %5097 }
0x2128   : > { %6546 = vrcp.f32 %v5098_v45 }
0x212c   : > { %v6545_v5 = vpop.eup %6544 }
0x212d   : > { %v5003_v39 = vmul.f32 %v6545_v5, %v6529_v20 }
0x212e   : > { %v6547_v50 = vpop.eup %6546 }
0x212f   : > { %v5104_v35 = vmul.f32 %v6547_v50, %v6531_v47  ;;  %v5101_v27 = vpop.xlane.xlu1 %5100  ;;  %6004 = vmatmul.msk.f32.vlgmr.msrb.gmra.mxu1 %vm4230_vm10, %v5003_v39 }
0x2130   : > { %6548 = vrcp.f32 %v5101_v27  ;;  %v5000_v15 = vpop.xlane.xlu0 %4999 }
0x2131   : > { %6550 = vrcp.f32 %v5000_v15  ;;  %6011 = vmatmul.msk.f32.vlgmr.msrb.gmra.mxu3 %vm4230_vm10, %v5104_v35  ;;  %v6039_v15 = vld [vmem:[%s8423_s3 + $0x38] sm:$0xff] }
0x2136   : > { %v6549_v18 = vpop.eup %6548 }
0x2137   : > { %v6551_v52 = vpop.eup %6550  ;;  %v5105_v25 = vmul.f32 %v6549_v18, %v6533_v61  ;;  %v5199_v49 = vpop.xlane.xlu1 %5198  ;;  %v6038_v18 = vld [vmem:[%s8423_s3 + $0x30] sm:$0xff] }
0x2138   : > { %v5300_v54 = vpop.xlane.xlu2 %5299  ;;  %v5004_v32 = vmul.f32 %v6551_v52, %v6535_v11  ;;  %6552 = vrcp.f32 %v5199_v49  ;;  %v6037_v52 = vld [vmem:[%s8423_s3 + $0x28] sm:$0xff] }
0x2139   : > { %6012 = vmatmul.msk.f32.gmra.mxu3 %vm4230_vm10, %v5105_v25  ;;  %6554 = vrcp.f32 %v5300_v54  ;;  %v6036_v25 = vld [vmem:[%s8423_s3 + $0x20] sm:$0xff] }
0x213a   : > { %6005 = vmatmul.msk.f32.gmra.mxu1 %vm4230_vm10, %v5004_v32 }
0x213e   : > { %v6553_v56 = vpop.eup %6552 }
0x213f   : > { %v5205_v4 = vmul.f32 %v6553_v56, %v6537_v21  ;;  %v6555_v41 = vpop.eup %6554 }
0x2140   : > { %v5303_v19 = vpop.xlane.xlu2 %5302  ;;  %v5306_v51 = vmul.f32 %v6555_v41, %v6539_v38 }
0x2143   : > { %v5210_v6 = vpop.permute.xlu0 %5209 }
0x2144   : > { %6017 = vmatpush.msk.msra.mxu1 %vm4265_vm9, %v5210_v6 }
0x2148   : > { %v5202_v43 = vpop.xlane.xlu2 %5201 }
0x2149   : > { %6556 = vrcp.f32 %v5202_v43 }
0x214a   : > { %6558 = vrcp.f32 %v5303_v19 }
0x214b   : > { %v5208_v2 = vpop.permute.xlu0 %5207 }
0x214c   : > { %5235 = vmatpush.msra.mxu1 %v5208_v2 }
0x214d   : > { %6018 = vmatmul.msk.f32.vlgmr.msra.gmra.mxu1 %vm4230_vm10, %v5205_v4 }
0x214e   : > { %5503 = vmatpush.msrb.mxu1 %v6039_v15 }
0x214f   : > { %v5309_v10 = vpop.permute.xlu1 %5308  ;;  %v6557_v60 = vpop.eup %6556 }
0x2150   : > { %5336 = vmatpush.msra.mxu3 %v5309_v10  ;;  %v5206_v46 = vmul.f32 %v6557_v60, %v6543_v55  ;;  %v6559_v42 = vpop.eup %6558  ;;  %5504 = vmatpush.msrb.mxu1 %v6038_v18 }
0x2151   : > { %6025 = vmatmul.msk.f32.vlgmr.msra.gmra.mxu3 %vm4230_vm10, %v5306_v51  ;;  %v5307_v29 = vmul.f32 %v6559_v42, %v6541_v36 }
0x2152   : > { %5505 = vmatpush.msrb.mxu1 %v6037_v52 }
0x2154   : > { %5506 = vmatpush.msrb.mxu1 %v6036_v25 }
0x2155   : > { %6019 = vmatmul.msk.f32.gmra.mxu1 %vm4230_vm10, %v5206_v46  ;;  %v6464_v46 = vld [vmem:[%s8424_s28 + $0x1] ss:$0 sm:$0xff] }
0x2159   : > { %6026 = vmatmul.msk.f32.gmra.mxu3 %vm4230_vm10, %v5307_v29 }
0x21ac   : > { %v5035_v26 = vpop.f32.mrf.mxu1 }
0x21b4   : > { %v5136_v20 = vpop.f32.mrf.mxu3 }
0x21b5   : > { %5346 = vrot.lane.b32.xlu2 %v5136_v20, %s8440_s7 }
0x21b7   : > { %v5038_v62 = vpop.f32.mrf.mxu1 }
0x21bc   : > { %v5139_v47 = vpop.f32.mrf.mxu3 }
0x21ca   : > { %v5237_v63 = vpop.f32.mrf.mxu1 }
0x21cb   : > { %5354 = vrot.lane.b32.xlu0 %v5237_v63, %s8441_s10 }
0x21d2   : > { %v5240_v7 = vpop.f32.mrf.mxu1 }
0x21d3   : > { %5348 = vrot.lane.b32.xlu0 %v5139_v47, %s8440_s7 }
0x21d4   : > { %v5338_v31 = vpop.f32.mrf.mxu3 }
0x21d5   : > { %5362 = vrot.lane.b32.xlu1 %v5338_v31, %s8442_s12 }
0x21dc   : > { %v5341_v30 = vpop.f32.mrf.mxu3 }
0x21dd   : > { %5364 = vrot.lane.b32.xlu0 %v5341_v30, %s8442_s12  ;;  %5356 = vrot.lane.b32.xlu1 %v5240_v7, %s8441_s10 }
0x220f   : > { %v5347_v44 = vpop.permute.xlu2 %5346 }
0x2210   : > { %v5368_v3 = vsel %vm3965_vm6, %v5035_v26, %v5347_v44  ;;  %v6051_v44 = vld [vmem:[%s8426_s5 + $0x70] sm:$0xff] }
0x223d   : > { %v5355_v61 = vpop.permute.xlu0 %5354 }
0x223e   : > { %v5370_v11 = vsel %vm4620_vm12, %v5368_v3, %v5355_v61  ;;  %v6052_v61 = vld [vmem:[%s8426_s5 + $0x78] sm:$0xff]  ;;  %v6050_v3 = vld [vmem:[%s8426_s5 + $0x68] sm:$0xff] }
0x223f   : > { %5584 = vmatpush.msrb.mxu2 %v6052_v61 }
0x2241   : > { %5585 = vmatpush.msrb.mxu2 %v6051_v44 }
0x2243   : > { %5586 = vmatpush.msrb.mxu2 %v6050_v3 }
0x2245   : > { %v5349_v16 = vpop.permute.xlu0 %5348 }
0x2246   : > { %v5369_v17 = vsel %vm3965_vm6, %v5038_v62, %v5349_v16  ;;  %v6465_v62 = vld [vmem:[%s8425_s1 + $0x1] ss:$0 sm:$0xff]  ;;  %v6048_v16 = vld [vmem:[%s8426_s5 + $0x58] sm:$0xff] }
0x2247   : > { %v5363_v12 = vpop.permute.xlu1 %5362 }
0x2248   : > { %v5372_v1 = vsel %vm4623_vm13, %v5370_v11, %v5363_v12  ;;  %v6049_v11 = vld [vmem:[%s8426_s5 + $0x60] sm:$0xff] }
0x2249   : > { %6031 = vmatmul.msk.f32.vlgmr.msrb.gmra.mxu0 %vm4031_vm14, %v5372_v1  ;;  %5587 = vmatpush.msrb.mxu2 %v6049_v11  ;;  %v6466_v12 = vld [vmem:[%s8427_s6 + $0x1] ss:$0 sm:$0xff]  ;;  %v6047_v1 = vld [vmem:[%s8426_s5 + $0x50] sm:$0xff] }
0x224b   : > { %5588 = vmatpush.msrb.mxu2 %v6048_v16 }
0x224d   : > { %5589 = vmatpush.msrb.mxu2 %v6047_v1 }
0x224f   : > { %v5365_v24 = vpop.permute.xlu0 %5364  ;;  %v5357_v21 = vpop.permute.xlu1 %5356 }
0x2250   : > { %v5371_v23 = vsel %vm4620_vm12, %v5369_v17, %v5357_v21 }
0x2251   : > { %v5373_v38 = vsel %vm4623_vm13, %v5371_v23, %v5365_v24  ;;  %v6046_v24 = vld [vmem:[%s8426_s5 + $0x48] sm:$0xff]  ;;  %v6045_v23 = vld [vmem:[%s8426_s5 + $0x40] sm:$0xff] }
0x2252   : > { %6032 = vmatmul.msk.f32.gmra.mxu0 %vm4031_vm14, %v5373_v38  ;;  %5590 = vmatpush.msrb.mxu2 %v6046_v24  ;;  %v6468_v24 = vld [vmem:[%s6857_s20] ss:$0 sm:$0xff] }
0x2254   : > { %5591 = vmatpush.msrb.mxu2 %v6045_v23 }
0x22c6   : > { %v5402_v34 = vpop.f32.mrf.mxu0 }
0x22c7   : > { %v5408_v58 = vadd.f32 %v5402_v34, %v8091_v0 }
0x22c9   : > { %v8239_v8 = vadd.f32 %v6463_v13, %v5408_v58 }
0x22cb   : > { %v5421_v40 = vsel %vm4031_vm14, %v8239_v8, 0.0 }
0x22cc   : > { %5422 = vadd.xlane.f32.xlu2 %v5421_v40 }
0x22cf   : > { %v5405_v36 = vpop.f32.mrf.mxu0 }
0x22d0   : > { %v5409_v14 = vadd.f32 %v5405_v36, %v8096_v37 }
0x22d2   : > { %v8244_v55 = vadd.f32 %v6463_v13, %v5409_v14 }
0x22d4   : > { %v5424_v28 = vsel %vm4035_vm15, %v8244_v55, 0.0 }
0x22d5   : > { %5425 = vadd.xlane.f32.xlu1 %v5424_v28 }
0x233f   : > { %v5423_v9 = vpop.xlane.xlu2 %5422 }
0x2340   : > { %v5427_v0 = vmul.f32 %v5423_v9, %v7882_v53 }
0x2342   : > { %v5429_v33 = vsub.f32 %v8239_v8, %v5427_v0 }
0x2344   : > { %v5431_v45 = vmul.f32 %v5429_v33, %v5429_v33 }
0x2346   : > { %v5433_v5 = vsel %vm4031_vm14, %v5431_v45, 0.0 }
0x2347   : > { %5434 = vadd.xlane.f32.xlu0 %v5433_v5 }
0x2348   : > { %v5426_v37 = vpop.xlane.xlu1 %5425 }
0x2349   : > { %v5428_v39 = vmul.f32 %v5426_v37, %v7882_v53 }
0x234b   : > { %v5430_v50 = vsub.f32 %v8244_v55, %v5428_v39 }
0x234d   : > { %v5432_v35 = vmul.f32 %v5430_v50, %v5430_v50 }
0x234f   : > { %v5436_v27 = vsel %vm4035_vm15, %v5432_v35, 0.0 }
0x2350   : > { %5437 = vadd.xlane.f32.xlu2 %v5436_v27 }
0x23ba   : > { %v5435_v54 = vpop.xlane.xlu0 %5434 }
0x23bb   : > { %v5439_v32 = vmul.f32 %v5435_v54, %v7882_v53 }
0x23bd   : > { %v5441_v49 = vadd.f32 1e-05, %v5439_v32 }
0x23bf   : > { %6560 = vrsqrt.f32 %v5441_v49  ;;  %vm5449_vm11 = vweird.f32 %v5441_v49 }
0x23c3   : > { %v5438_v19 = vpop.xlane.xlu2 %5437 }
0x23c4   : > { %v5440_v6 = vmul.f32 %v5438_v19, %v7882_v53 }
0x23c5   : > { %v6561_v56 = vpop.eup %6560 }
0x23c6   : > { %v5444_v43 = vmul.f32 %v6561_v56, %v5441_v49  ;;  %v5442_v4 = vadd.f32 1e-05, %v5440_v6  ;;  %vm5450_vm6 = vweird.f32 %v6561_v56 }
0x23c7   : > { %vm5451_vm12 = vmor %vm5449_vm11, %vm5450_vm6 }
0x23c8   : > { %v5445_v2 = vmul.f32 %v6561_v56, %v5444_v43  ;;  %6562 = vrsqrt.f32 %v5442_v4  ;;  %vm5459_vm1 = vweird.f32 %v5442_v4 }
0x23ca   : > { %v5446_v41 = vmul.f32 0.5, %v5445_v2 }
0x23cc   : > { %v5447_v51 = vsub.f32 1.5, %v5446_v41 }
0x23ce   : > { %v6563_v10 = vpop.eup %6562  ;;  %v5448_v60 = vmul.f32 %v6561_v56, %v5447_v51 }
0x23cf   : > { %v5454_v42 = vmul.f32 %v6563_v10, %v5442_v4  ;;  %vm5460_vm13 = vweird.f32 %v6563_v10 }
0x23d0   : > { %v5452_v29 = vsel %vm5451_vm12, %v6561_v56, %v5448_v60  ;;  %vm5461_vm2 = vmor %vm5459_vm1, %vm5460_vm13  ;;  %vm5688_vm13 = vcmask 125952  }
0x23d1   : > { %v5463_v20 = vmul.f32 %v5452_v29, %v5429_v33  ;;  %v5455_v26 = vmul.f32 %v6563_v10, %v5454_v42 }
0x23d3   : > { %v5468_v63 = vmul.f32 %v6464_v46, %v5463_v20  ;;  %v5456_v47 = vmul.f32 0.5, %v5455_v26  ;;  %v5601_v26 = vld [vmem:[%s8443_s11] sm:$0x3] }
0x23d5   : > { %v5457_v31 = vsub.f32 1.5, %v5456_v47  ;;  %v5473_v7 = vadd.f32 %v6465_v62, %v5468_v63 }
0x23d7   : > { %v5458_v30 = vmul.f32 %v6563_v10, %v5457_v31  ;;  %6041 = vmatmul.msk.f32.vlgmr.msrb.gmra.mxu1 %vm4031_vm14, %v5473_v7 }
0x23d9   : > { %v5462_v22 = vsel %vm5461_vm2, %v6563_v10, %v5458_v30  ;;  %v6467_v10 = vld [vmem:[%s8428_s8 + $0x1] ss:$0 sm:$0xff]  ;;  %v5663_v30 = vld [vmem:[%s6867_s4 + $0x18] sm:$0xff] }
0x23da   : > { %v5464_v57 = vmul.f32 %v5462_v22, %v5430_v50  ;;  %5679 = vmatpush.msra.mxu0 %v5663_v30  ;;  %v5662_v22 = vld [vmem:[%s6867_s4 + $0x10] sm:$0xff] }
0x23dc   : > { %v5469_v59 = vmul.f32 %v6464_v46, %v5464_v57  ;;  %5680 = vmatpush.msra.mxu0 %v5662_v22  ;;  %v5661_v57 = vld [vmem:[%s6867_s4 + $0x8] sm:$0xff] }
0x23de   : > { %v5474_v48 = vadd.f32 %v6465_v62, %v5469_v59  ;;  %v5660_v59 = vld [vmem:[%s6867_s4] sm:$0xff]  ;;  %5681 = vmatpush.msra.mxu0 %v5661_v57 }
0x23e0   : > { %6042 = vmatmul.msk.f32.gmra.mxu1 %vm4031_vm14, %v5474_v48  ;;  %5682 = vmatpush.msra.mxu0 %v5660_v59 }
0x2454   : > { %v5508_v17 = vpop.f32.mrf.mxu1 }
0x2455   : > { %v5509_v21 = vadd.f32 %v6466_v12, %v5508_v17 }
0x2457   : > { %v6043_v38 = vmul.f32 -1.702, %v5509_v21 }
0x2459   : > { %v5518_v13 = vmul.f32 1.442695, %v6043_v38  ;;  %v6469_v38 = vld [vmem:[%s6862_s27] ss:$0 sm:$0xff] }
0x245b   : > { %6564 = vpow2.f32 %v5518_v13 }
0x245d   : > { %v5511_v34 = vpop.f32.mrf.mxu1 }
0x245e   : > { %v5512_v58 = vadd.f32 %v6466_v12, %v5511_v34 }
0x2460   : > { %v6044_v40 = vmul.f32 -1.702, %v5512_v58 }
0x2461   : > { %v6565_v36 = vpop.eup %6564 }
0x2462   : > { %v5522_v14 = vadd.f32 1.0, %v6565_v36  ;;  %v5520_v28 = vmul.f32 1.442695, %v6044_v40 }
0x2464   : > { %6566 = vrcp.f32 %v5522_v14  ;;  %v5535_v37 = vand.u32 2147483648, %v5522_v14  ;;  %v5533_v50 = vand.u32 2147483647, %v5522_v14  ;;  %vm5529_vm4 = vweird.f32 %v5522_v14 }
0x2465   : > { %6568 = vpow2.f32 %v5520_v28 }
0x2466   : > { %v5536_v27 = vor.u32 1.1754944e-38, %v5535_v37  ;;  %vm5534_vm0 = vcmp.eq.f32.partialorder %v5533_v50, 8.507059e+37 }
0x246a   : > { %v6567_v9 = vpop.eup %6566 }
0x246b   : > { %v6569_v0 = vpop.eup %6568  ;;  %v5525_v33 = vmul.f32 %v6567_v9, %v5522_v14  ;;  %vm5530_vm3 = vweird.f32 %v6567_v9 }
0x246c   : > { %v5523_v45 = vadd.f32 1.0, %v6569_v0  ;;  %vm5531_vm5 = vmor %vm5529_vm4, %vm5530_vm3 }
0x246d   : > { %v5526_v5 = vsub.f32 1.0, %v5525_v33 }
0x246e   : > { %6570 = vrcp.f32 %v5523_v45  ;;  %v5550_v49 = vand.u32 2147483648, %v5523_v45  ;;  %v5548_v6 = vand.u32 2147483647, %v5523_v45  ;;  %vm5544_vm6 = vweird.f32 %v5523_v45 }
0x246f   : > { %v5527_v39 = vmul.f32 %v6567_v9, %v5526_v5 }
0x2470   : > { %v5551_v43 = vor.u32 1.1754944e-38, %v5550_v49  ;;  %vm5549_vm12 = vcmp.eq.f32.partialorder %v5548_v6, 8.507059e+37 }
0x2471   : > { %v5528_v35 = vadd.f32 %v6567_v9, %v5527_v39 }
0x2473   : > { %v5532_v15 = vsel %vm5531_vm5, %v6567_v9, %v5528_v35 }
0x2474   : > { %v6571_v18 = vpop.eup %6570  ;;  %v5537_v52 = vsel %vm5534_vm0, %v5536_v27, %v5532_v15 }
0x2475   : > { %v5554_v25 = vmul.f32 %v5537_v52, %v5509_v21  ;;  %v5540_v54 = vmul.f32 %v6571_v18, %v5523_v45  ;;  %vm5545_vm7 = vweird.f32 %v6571_v18 }
0x2476   : > { %vm5546_vm11 = vmor %vm5544_vm6, %vm5545_vm7 }
0x2477   : > { %v5541_v32 = vsub.f32 1.0, %v5540_v54  ;;  %6054 = vmatmul.msk.f32.vlgmr.msrb.gmra.mxu2 %vm3916_vm8, %v5554_v25 }
0x2479   : > { %v5542_v19 = vmul.f32 %v6571_v18, %v5541_v32 }
0x247b   : > { %v5543_v56 = vadd.f32 %v6571_v18, %v5542_v19 }
0x247d   : > { %v5547_v4 = vsel %vm5546_vm11, %v6571_v18, %v5543_v56 }
0x247e   : > { %v5552_v2 = vsel %vm5549_vm12, %v5551_v43, %v5547_v4 }
0x247f   : > { %v5555_v41 = vmul.f32 %v5552_v2, %v5512_v58 }
0x2481   : > { %6055 = vmatmul.msk.f32.gmra.mxu2 %vm3916_vm8, %v5555_v41 }
0x24fa   : > { %v5593_v51 = vpop.f32.mrf.mxu2 }
0x24fb   : > { %v5594_v46 = vadd.f32 %v6467_v10, %v5593_v51 }
0x24fd   : > { %v5599_v20 = vadd.f32 %v5594_v46, %v8239_v8 }
0x2504   : > { %v5596_v60 = vpop.f32.mrf.mxu2 }
0x2505   : > { %v5597_v42 = vadd.f32 %v6467_v10, %v5596_v60 }
0x2507   : > { %v5600_v29 = vadd.f32 %v5597_v42, %v8244_v55 }
0x2509   : > { %6056 = vmatpush.msk.msrb.mxu3 %vm4265_vm9, %v5600_v29 }
0x250b   : > { %5623 = vmatpush.msrb.mxu3 %v5599_v20 }
0x250c   : > { %6057 = vmatmul.msk.f32.vlgmr.msrb.gmra.mxu3 %vm4230_vm10, %v5601_v26 }
0x258f   : > { %v5625_v62 = vpop.f32.mrf.mxu3 }
0x2590   : > { %v5630_v63 = vsel %vm4035_vm15, %v5625_v62, 0.0 }
0x2591   : > { %5631 = vadd.xlane.f32.xlu1 %v5630_v63 }
0x2604   : > { %v5632_v47 = vpop.xlane.xlu1 %5631 }
0x2605   : > { %v5633_v31 = vmul.f32 %v5632_v47, %v7882_v53 }
0x2607   : > { %v5634_v7 = vsub.f32 %v5625_v62, %v5633_v31 }
0x2609   : > { %v5635_v55 = vmul.f32 %v5634_v7, %v5634_v7 }
0x260b   : > { %v5636_v8 = vsel %vm4035_vm15, %v5635_v55, 0.0 }
0x260c   : > { %5637 = vadd.xlane.f32.xlu0 %v5636_v8 }
0x267f   : > { %v5638_v48 = vpop.xlane.xlu0 %5637 }
0x2680   : > { %v5639_v61 = vmul.f32 %v5638_v48, %v7882_v53 }
0x2682   : > { %v5640_v44 = vadd.f32 1e-05, %v5639_v61 }
0x2684   : > { %6572 = vrsqrt.f32 %v5640_v44  ;;  %vm5647_vm15 = vweird.f32 %v5640_v44 }
0x268a   : > { %v6573_v3 = vpop.eup %6572 }
0x268b   : > { %v5642_v11 = vmul.f32 %v6573_v3, %v5640_v44  ;;  %vm5648_vm8 = vweird.f32 %v6573_v3 }
0x268c   : > { %vm5649_vm10 = vmor %vm5647_vm15, %vm5648_vm8 }
0x268d   : > { %v5643_v16 = vmul.f32 %v6573_v3, %v5642_v11 }
0x268f   : > { %v5644_v12 = vmul.f32 0.5, %v5643_v16 }
0x2691   : > { %v5645_v1 = vsub.f32 1.5, %v5644_v12 }
0x2693   : > { %v5646_v17 = vmul.f32 %v6573_v3, %v5645_v1 }
0x2695   : > { %v5650_v21 = vsel %vm5649_vm10, %v6573_v3, %v5646_v17 }
0x2696   : > { %v5651_v23 = vmul.f32 %v5650_v21, %v5634_v7 }
0x2698   : > { %v5655_v13 = vmul.f32 %v6468_v24, %v5651_v23 }
0x269a   : > { %v5659_v34 = vadd.f32 %v6469_v38, %v5655_v13 }
0x269c   : > { %6058 = vmatmul.msk.f32.vlgmr.msra.gmra.mxu0 %vm4031_vm14, %v5659_v34 }
0x2719   : > { %v5684_v53 = vpop.f32.mrf.mxu0 }
0x271a   : > { %v5687_v58 = vsel %vm4265_vm9, %v5684_v53, 0.0 }
0x271b   : > { %5689 = vst.msk [vmem:[%s6887_s22] sm:$0xf] %vm5688_vm13, %v5687_v58 }
0x271c PF: > { %s95_s15 = sadd.s32 1, %s6580_s15  }
0x271d   : > { %p92_p6 = scmp.ge.s32.totalorder %s95_s15, 4  }
0x271f   :  { %94 = sbr.rel (!%p92_p6) target bundleno = 85 (0x55), region = 289 }

</bundles_post_ra>
